<compile_context>
chip_gen: v5e
topology: v5e:2x2
jax: 0.10.0
libtpu: 0.0.40
codegen_flags: <defaults>
</compile_context>

<pallas_src>
import functools
import math

import jax
import jax.numpy as jnp
from jax import lax
from jax.experimental import pallas as pl
from jax.experimental.pallas import tpu as pltpu

IMG, PATCH, IN_CH = 32, 16, 3
EMBED, DEPTH, HEADS = 384, 2, 6
HEAD_DIM = EMBED // HEADS                    # 64
MLP_DIM = EMBED * 4                          # 1536
NUM_CLASSES = 2
LOGIT_PAD = 128                              # lane-dense head output
NUM_PATCHES = (IMG // PATCH) ** 2            # 4
SEQ = NUM_PATCHES + 1                        # 5 real tokens (cls + patches)
SEQ_PAD = 8                                  # padded to a full sublane group
PATCH_DIM = IN_CH * PATCH * PATCH            # 768
EPS = 1e-6                                   # timm ViT uses LayerNorm(eps=1e-6)

QKV_DIM = 3 * EMBED                          # 1152
WA_DIM = QKV_DIM + EMBED + MLP_DIM           # [qkv | proj | fc1] concat -> 3072 lanes
BIAS_DIM = QKV_DIM + EMBED + MLP_DIM + EMBED # [qkvb | projb | fc1b | fc2b] -> 3456 lanes
MAX_TILE_B = 16                              # 16 images * 8 tokens = 128 rows per tile


# ----------------------------------------------------------------------------
# in-kernel helpers (f32 elementwise; bf16 only feeds the MXU)
# ----------------------------------------------------------------------------
def _layernorm(x, w, b):
    mu = jnp.mean(x, axis=-1, keepdims=True)
    var = jnp.mean((x - mu) ** 2, axis=-1, keepdims=True)
    return (x - mu) * lax.rsqrt(var + EPS) * w + b


def _gelu(x):
    # TODO(synk): timm nn.GELU is the exact erf-GELU; tanh approximation kept for
    # guaranteed Mosaic elementwise lowering (numerics differ at ~1e-3 level).
    c = math.sqrt(2.0 / math.pi)
    return 0.5 * x * (1.0 + jnp.tanh(c * (x + 0.044715 * x * x * x)))


def _mmb(x, w_bf16, b=None):
    # bf16 x bf16 -> f32 accumulate on the MXU.
    y = jnp.dot(x.astype(jnp.bfloat16), w_bf16, preferred_element_type=jnp.float32)
    if b is not None:
        y = y + b
    return y


# ----------------------------------------------------------------------------
# fused kernel: grid = (batch_tiles ["parallel"], DEPTH ["arbitrary"])
# rows inside a tile are token-major: row r = token (r // tile_b) of image (r % tile_b)
# ----------------------------------------------------------------------------
def vit_kernel(patches_ref, base_ref, patch_w_ref, ln_ref, bias_ref,
               wa_ref, wb_ref, norm_ref, head_w_ref, head_b_ref,
               *rest, tile_b, with_feat):
    if with_feat:
        logits_ref, feat_ref, x_scr, attn_scr, mask_scr = rest
    else:
        logits_ref, x_scr, attn_scr, mask_scr = rest
        feat_ref = None

    d = pl.program_id(1)
    rows = tile_b * SEQ_PAD

    # ---- first depth step for this batch tile: patch embed + attention mask ----
    @pl.when(d == 0)
    def _init():
        # patches (bf16, zero on cls/pad rows) @ patch_w + (cls token + pos embed + bias)
        x_scr[...] = base_ref[...] + jnp.dot(
            patches_ref[...], patch_w_ref[...], preferred_element_type=jnp.float32)
        # additive mask: same image (r % tile_b == c % tile_b) and key is a real token
        r = lax.broadcasted_iota(jnp.int32, (rows, rows), 0)
        c = lax.broadcasted_iota(jnp.int32, (rows, rows), 1)
        valid = ((r % tile_b) == (c % tile_b)) & (c < SEQ * tile_b)
        mask_scr[...] = jnp.where(valid, 0.0, -1e30).astype(jnp.float32)

    # ---- one encoder block (parameters for depth step d) ----
    ln1w, ln1b = ln_ref[0:1, :], ln_ref[1:2, :]
    ln2w, ln2b = ln_ref[2:3, :], ln_ref[3:4, :]
    qkvb = bias_ref[:, 0:QKV_DIM]
    projb = bias_ref[:, QKV_DIM:QKV_DIM + EMBED]
    fc1b = bias_ref[:, QKV_DIM + EMBED:QKV_DIM + EMBED + MLP_DIM]
    fc2b = bias_ref[:, QKV_DIM + EMBED + MLP_DIM:]

    x = x_scr[...]
    mask = mask_scr[...]

    # --- attention ---  (1/sqrt(head_dim) already folded into the Q weight/bias)
    h = _layernorm(x, ln1w, ln1b)
    qkv = _mmb(h, wa_ref[:, 0:QKV_DIM], qkvb)            # (rows, 1152) f32

    lane = lax.broadcasted_iota(jnp.int32, (1, 2 * HEAD_DIM), 1)
    left = (lane < HEAD_DIM).astype(jnp.float32)          # head 2p lanes
    right = 1.0 - left                                     # head 2p+1 lanes

    for p in range(HEADS // 2):                            # aligned 128-lane head pairs
        off = p * 2 * HEAD_DIM
        qp = qkv[:, off:off + 2 * HEAD_DIM].astype(jnp.bfloat16)
        kp = qkv[:, EMBED + off:EMBED + off + 2 * HEAD_DIM]
        vp = qkv[:, 2 * EMBED + off:2 * EMBED + off + 2 * HEAD_DIM]
        kl = (kp * left).astype(jnp.bfloat16)
        kr = (kp * right).astype(jnp.bfloat16)
        vl = (vp * left).astype(jnp.bfloat16)
        vr = (vp * right).astype(jnp.bfloat16)

        dims = (((1,), (1,)), ((), ()))
        s0 = lax.dot_general(qp, kl, dims, preferred_element_type=jnp.float32) + mask
        s1 = lax.dot_general(qp, kr, dims, preferred_element_type=jnp.float32) + mask
        p0 = jnp.exp(s0 - jnp.max(s0, axis=-1, keepdims=True))
        p1 = jnp.exp(s1 - jnp.max(s1, axis=-1, keepdims=True))
        a0 = (p0 * pl.reciprocal(jnp.sum(p0, axis=-1, keepdims=True),
                                 approx=True)).astype(jnp.bfloat16)
        a1 = (p1 * pl.reciprocal(jnp.sum(p1, axis=-1, keepdims=True),
                                 approx=True)).astype(jnp.bfloat16)
        # per-pair output: lanes 0..63 from head 2p, lanes 64..127 from head 2p+1
        attn_scr[:, off:off + 2 * HEAD_DIM] = (
            jnp.dot(a0, vl, preferred_element_type=jnp.float32)
            + jnp.dot(a1, vr, preferred_element_type=jnp.float32))

    x = x + _mmb(attn_scr[...], wa_ref[:, QKV_DIM:QKV_DIM + EMBED], projb)

    # --- MLP ---
    h = _layernorm(x, ln2w, ln2b)
    h = _gelu(_mmb(h, wa_ref[:, QKV_DIM + EMBED:], fc1b))
    x = x + _mmb(h, wb_ref[...], fc2b)
    x_scr[...] = x

    # ---- last depth step: final LayerNorm + head on the CLS rows only ----
    @pl.when(d == DEPTH - 1)
    def _final():
        cls = x_scr[0:tile_b, :]                           # token-major: cls rows first
        cls = _layernorm(cls, norm_ref[0:1, :], norm_ref[1:2, :])
        if with_feat:
            feat_ref[...] = cls
        logits_ref[...] = _mmb(cls, head_w_ref[...], head_b_ref[...])


# ----------------------------------------------------------------------------
# parameters (deterministic synthetic init; no checkpoint loading)
# ----------------------------------------------------------------------------
def init_params(key):
    keys = iter(jax.random.split(key, 64))

    def nrm(shape, scale=0.02):
        return (scale * jax.random.normal(next(keys), shape)).astype(jnp.float32)

    params = {
        # conv(3->384, k=16, s=16) weight reshaped from (EMBED, C, P, P) to (C*P*P, EMBED)
        "patch_w": nrm((PATCH_DIM, EMBED)).astype(jnp.bfloat16),
        "patch_b": jnp.zeros((EMBED,), jnp.float32),
        "cls_token": nrm((EMBED,)),
        "pos_embed": nrm((SEQ, EMBED)),
        "norm_wb": jnp.concatenate(
            [jnp.ones((1, EMBED), jnp.float32), jnp.zeros((1, EMBED), jnp.float32)], 0),
    }
    # PyTorch Linear(384, num_classes): weight stored transposed, zero-padded to 128 lanes.
    hw = jnp.zeros((EMBED, LOGIT_PAD), jnp.float32)
    hw = hw.at[:, :NUM_CLASSES].set(nrm((EMBED, NUM_CLASSES)))
    params["head_w"] = hw.astype(jnp.bfloat16)
    params["head_b"] = jnp.zeros((1, LOGIT_PAD), jnp.float32)

    scale = HEAD_DIM ** -0.5
    ln_l, bias_l, wa_l, wb_l = [], [], [], []
    for _ in range(DEPTH):
        qkvw = nrm((EMBED, QKV_DIM))
        qkvb = jnp.zeros((QKV_DIM,), jnp.float32)
        # fold 1/sqrt(head_dim) into the Q columns (kernel skips the per-block scale)
        qkvw = qkvw.at[:, :EMBED].multiply(scale)
        qkvb = qkvb.at[:EMBED].multiply(scale)
        projw, projb = nrm((EMBED, EMBED)), jnp.zeros((EMBED,), jnp.float32)
        fc1w, fc1b = nrm((EMBED, MLP_DIM)), jnp.zeros((MLP_DIM,), jnp.float32)
        fc2w, fc2b = nrm((MLP_DIM, EMBED)), jnp.zeros((EMBED,), jnp.float32)

        ln_l.append(jnp.stack([jnp.ones((EMBED,)), jnp.zeros((EMBED,)),
                               jnp.ones((EMBED,)), jnp.zeros((EMBED,))]).astype(jnp.float32))
        bias_l.append(jnp.concatenate([qkvb, projb, fc1b, fc2b])[None, :])
        wa_l.append(jnp.concatenate([qkvw, projw, fc1w], axis=1).astype(jnp.bfloat16))
        wb_l.append(fc2w.astype(jnp.bfloat16))

    params["ln"] = jnp.stack(ln_l)       # (DEPTH, 4, EMBED)       f32
    params["bias"] = jnp.stack(bias_l)   # (DEPTH, 1, BIAS_DIM)    f32
    params["wa"] = jnp.stack(wa_l)       # (DEPTH, EMBED, WA_DIM)  bf16
    params["wb"] = jnp.stack(wb_l)       # (DEPTH, MLP_DIM, EMBED) bf16
    return params


# ----------------------------------------------------------------------------
# forward (mirrors ViT_S.forward)
# ----------------------------------------------------------------------------
@functools.partial(jax.jit, static_argnames=("return_feature",))
def vit_s_forward(params, x, return_feature=False):
    B = x.shape[0]
    tile_b = B if B <= MAX_TILE_B else MAX_TILE_B
    B_pad = ((B + tile_b - 1) // tile_b) * tile_b
    n_bt = B_pad // tile_b
    tile_rows = tile_b * SEQ_PAD

    if B_pad != B:
        x = jnp.concatenate([x, jnp.zeros((B_pad - B,) + x.shape[1:], x.dtype)], axis=0)

    # glue: im2col for the stride-16 patch conv (NCHW input; (c, ph, pw) flatten order
    # matches the PyTorch conv-weight flatten order), laid out token-major per tile.
    g = IMG // PATCH
    p = x.reshape(B_pad, IN_CH, g, PATCH, g, PATCH)
    p = p.transpose(0, 2, 4, 1, 3, 5).reshape(B_pad, NUM_PATCHES, PATCH_DIM)
    patches = jnp.zeros((B_pad, SEQ_PAD, PATCH_DIM), jnp.float32)
    patches = patches.at[:, 1:1 + NUM_PATCHES, :].set(p)
    patches = patches.reshape(n_bt, tile_b, SEQ_PAD, PATCH_DIM).transpose(0, 2, 1, 3)
    patches = patches.reshape(n_bt * tile_rows, PATCH_DIM).astype(jnp.bfloat16)

    # glue: per-token additive base = cls token + pos embed (+ patch-conv bias on patch
    # rows), token-major repeated tile_b times -> a single slab shared by every tile.
    base = jnp.zeros((SEQ_PAD, EMBED), jnp.float32)
    base = base.at[0].set(params["cls_token"] + params["pos_embed"][0])
    base = base.at[1:SEQ].set(params["pos_embed"][1:] + params["patch_b"][None, :])
    base = jnp.repeat(base, tile_b, axis=0)               # (tile_rows, EMBED)

    kernel = functools.partial(vit_kernel, tile_b=tile_b, with_feat=return_feature)
    if return_feature:
        out_shape = (jax.ShapeDtypeStruct((B_pad, LOGIT_PAD), jnp.float32),
                     jax.ShapeDtypeStruct((B_pad, EMBED), jnp.float32))
        out_specs = (pl.BlockSpec((tile_b, LOGIT_PAD), lambda b, d: (b, 0)),
                     pl.BlockSpec((tile_b, EMBED), lambda b, d: (b, 0)))
    else:
        out_shape = jax.ShapeDtypeStruct((B_pad, LOGIT_PAD), jnp.float32)
        out_specs = pl.BlockSpec((tile_b, LOGIT_PAD), lambda b, d: (b, 0))

    outs = pl.pallas_call(
        kernel,
        out_shape=out_shape,
        grid_spec=pltpu.PrefetchScalarGridSpec(
            num_scalar_prefetch=0,
            grid=(n_bt, DEPTH),
            in_specs=[
                pl.BlockSpec((tile_rows, PATCH_DIM), lambda b, d: (b, 0)),   # patches
                pl.BlockSpec((tile_rows, EMBED), lambda b, d: (0, 0)),       # base
                pl.BlockSpec((PATCH_DIM, EMBED), lambda b, d: (0, 0)),       # patch_w
                pl.BlockSpec((None, 4, EMBED), lambda b, d: (d, 0, 0)),      # ln params
                pl.BlockSpec((None, 1, BIAS_DIM), lambda b, d: (d, 0, 0)),   # biases
                pl.BlockSpec((None, EMBED, WA_DIM), lambda b, d: (d, 0, 0)), # qkv|proj|fc1
                pl.BlockSpec((None, MLP_DIM, EMBED), lambda b, d: (d, 0, 0)),# fc2
                pl.BlockSpec((2, EMBED), lambda b, d: (0, 0)),               # final LN
                pl.BlockSpec((EMBED, LOGIT_PAD), lambda b, d: (0, 0)),       # head_w
                pl.BlockSpec((1, LOGIT_PAD), lambda b, d: (0, 0)),           # head_b
            ],
            out_specs=out_specs,
            scratch_shapes=[
                pltpu.VMEM((tile_rows, EMBED), jnp.float32),       # x (resident over d)
                pltpu.VMEM((tile_rows, EMBED), jnp.float32),       # attention output
                pltpu.VMEM((tile_rows, tile_rows), jnp.float32),   # additive mask
            ]),
        compiler_params=pltpu.CompilerParams(
            dimension_semantics=("parallel", "arbitrary"),
            vmem_limit_bytes=40 * 1024 * 1024),
    )(patches, base, params["patch_w"], params["ln"], params["bias"],
      params["wa"], params["wb"], params["norm_wb"], params["head_w"],
      params["head_b"])

    if return_feature:
        logits_pad, feat_pad = outs
        return logits_pad[:B, :NUM_CLASSES], feat_pad[:B]
    return outs[:B, :NUM_CLASSES]


if __name__ == "__main__":
    key = jax.random.PRNGKey(0)
    pkey, xkey = jax.random.split(key)
    params = init_params(pkey)
    x = jax.random.normal(xkey, (2, IN_CH, IMG, IMG), dtype=jnp.float32)  # NCHW like PyTorch

    logits = vit_s_forward(params, x)
    jax.block_until_ready(logits)
    assert logits.shape == (2, NUM_CLASSES)
    assert logits.dtype == jnp.float32

    logits_f, feat = vit_s_forward(params, x, return_feature=True)
    jax.block_until_ready((logits_f, feat))
    assert feat.shape == (2, EMBED)

    print("KERNEL_OK")
</pallas_src>

<mosaic_0001>
module attributes {stable_mosaic.version = 11 : i64} {
  func.func @vit_kernel(%arg0: i32, %arg1: i32, %arg2: memref<16x768xbf16, #tpu.memory_space<vmem>>, %arg3: memref<16x384xf32, #tpu.memory_space<vmem>>, %arg4: memref<768x384xbf16, #tpu.memory_space<vmem>>, %arg5: memref<1x4x384xf32, #tpu.memory_space<vmem>>, %arg6: memref<1x1x3456xf32, #tpu.memory_space<vmem>>, %arg7: memref<1x384x3072xbf16, #tpu.memory_space<vmem>>, %arg8: memref<1x1536x384xbf16, #tpu.memory_space<vmem>>, %arg9: memref<2x384xf32, #tpu.memory_space<vmem>>, %arg10: memref<384x128xbf16, #tpu.memory_space<vmem>>, %arg11: memref<1x128xf32, #tpu.memory_space<vmem>>, %arg12: memref<2x128xf32, #tpu.memory_space<vmem>>, %arg13: memref<16x384xf32, #tpu.memory_space<vmem>>, %arg14: memref<16x384xf32, #tpu.memory_space<vmem>>, %arg15: memref<16x16xf32, #tpu.memory_space<vmem>>) attributes {dimension_semantics = [#tpu.dimension_semantics<parallel>, #tpu.dimension_semantics<arbitrary>], iteration_bounds = array<i64: 1, 2>, scalar_prefetch = 0 : i64, scratch_operands = 3 : i64, tpu.core_type = #tpu.core_type<tc>, window_params = [{transform_indices = @transform_0, window_bounds = array<i64: 16, 768>}, {pipeline_mode = #tpu.pipeline_mode<synchronous>, transform_indices = @transform_1, window_bounds = array<i64: 16, 384>}, {pipeline_mode = #tpu.pipeline_mode<synchronous>, transform_indices = @transform_2, window_bounds = array<i64: 768, 384>}, {transform_indices = @transform_3, window_bounds = array<i64: 1, 4, 384>}, {transform_indices = @transform_4, window_bounds = array<i64: 1, 1, 3456>}, {transform_indices = @transform_5, window_bounds = array<i64: 1, 384, 3072>}, {transform_indices = @transform_6, window_bounds = array<i64: 1, 1536, 384>}, {pipeline_mode = #tpu.pipeline_mode<synchronous>, transform_indices = @transform_7, window_bounds = array<i64: 2, 384>}, {pipeline_mode = #tpu.pipeline_mode<synchronous>, transform_indices = @transform_8, window_bounds = array<i64: 384, 128>}, {pipeline_mode = #tpu.pipeline_mode<synchronous>, transform_indices = @transform_9, window_bounds = array<i64: 1, 128>}, {transform_indices = @transform_10, window_bounds = array<i64: 2, 128>}]} {
    %c0_i32 = arith.constant 0 : i32
    %0 = arith.cmpi eq, %arg1, %c0_i32 : i32
    %1 = arith.extui %0 : i1 to i32
    %c0_i32_0 = arith.constant 0 : i32
    %2 = arith.cmpi ne, %1, %c0_i32_0 : i32
    scf.if %2 {
      %c0_85 = arith.constant 0 : index
      %c0_86 = arith.constant 0 : index
      %254 = vector.load %arg3[%c0_85, %c0_86] : memref<16x384xf32, #tpu.memory_space<vmem>>, vector<16x384xf32>
      %c0_87 = arith.constant 0 : index
      %c0_88 = arith.constant 0 : index
      %255 = vector.load %arg2[%c0_87, %c0_88] : memref<16x768xbf16, #tpu.memory_space<vmem>>, vector<16x768xbf16>
      %c0_89 = arith.constant 0 : index
      %c0_90 = arith.constant 0 : index
      %256 = vector.load %arg4[%c0_89, %c0_90] : memref<768x384xbf16, #tpu.memory_space<vmem>>, vector<768x384xbf16>
      %cst_91 = arith.constant dense<0.000000e+00> : vector<16x384xf32>
      %257 = tpu.matmul %255, %256, %cst_91 {dimension_numbers = #tpu.dot_dimension_numbers<[1], [0], [0], [1], [0, 0, 1, 1], [], []>} : vector<16x768xbf16>, vector<768x384xbf16>, vector<16x384xf32> -> vector<16x384xf32>
      %258 = arith.addf %254, %257 : vector<16x384xf32>
      %c0_92 = arith.constant 0 : index
      %c0_93 = arith.constant 0 : index
      %259 = vector.load %arg13[%c0_92, %c0_93] : memref<16x384xf32, #tpu.memory_space<vmem>>, vector<16x384xf32>
      tpu.vector_store %arg13[%c0_92, %c0_93], %258 {strides = array<i32>} : memref<16x384xf32, #tpu.memory_space<vmem>>, vector<16x384xf32>,
      %260 = tpu.iota {dimensions = array<i32: 0>} : vector<16x16xi32>
      %261 = tpu.iota {dimensions = array<i32: 1>} : vector<16x16xi32>
      %c2_i32 = arith.constant 2 : i32
      %c0_i32_94 = arith.constant 0 : i32
      %262 = arith.cmpi eq, %c2_i32, %c0_i32_94 : i32
      %c1_i32_95 = arith.constant 1 : i32
      %263 = arith.select %262, %c1_i32_95, %c2_i32 : i32
      %264 = vector.broadcast %263 : i32 to vector<16x16xi32>
      %265 = arith.remsi %260, %264 : vector<16x16xi32>
      %c0_i32_96 = arith.constant 0 : i32
      %266 = vector.broadcast %c0_i32_96 : i32 to vector<16x16xi32>
      %267 = arith.cmpi ne, %265, %266 : vector<16x16xi32>
      %c0_i32_97 = arith.constant 0 : i32
      %268 = vector.broadcast %c0_i32_97 : i32 to vector<16x16xi32>
      %269 = arith.cmpi slt, %265, %268 : vector<16x16xi32>
      %c0_i32_98 = arith.constant 0 : i32
      %270 = arith.cmpi slt, %263, %c0_i32_98 : i32
      %271 = vector.broadcast %270 : i1 to vector<16x16xi1>
      %272 = vector.broadcast %271 : vector<16x16xi1> to vector<16x16xi1>
      %273 = arith.xori %269, %272 : vector<16x16xi1>
      %274 = arith.andi %273, %267 : vector<16x16xi1>
      %275 = vector.broadcast %263 : i32 to vector<16x16xi32>
      %276 = arith.addi %265, %275 : vector<16x16xi32>
      %277 = arith.select %274, %276, %265 : vector<16x16xi1>, vector<16x16xi32>
      %c2_i32_99 = arith.constant 2 : i32
      %c0_i32_100 = arith.constant 0 : i32
      %278 = arith.cmpi eq, %c2_i32_99, %c0_i32_100 : i32
      %c1_i32_101 = arith.constant 1 : i32
      %279 = arith.select %278, %c1_i32_101, %c2_i32_99 : i32
      %280 = vector.broadcast %279 : i32 to vector<16x16xi32>
      %281 = arith.remsi %261, %280 : vector<16x16xi32>
      %c0_i32_102 = arith.constant 0 : i32
      %282 = vector.broadcast %c0_i32_102 : i32 to vector<16x16xi32>
      %283 = arith.cmpi ne, %281, %282 : vector<16x16xi32>
      %c0_i32_103 = arith.constant 0 : i32
      %284 = vector.broadcast %c0_i32_103 : i32 to vector<16x16xi32>
      %285 = arith.cmpi slt, %281, %284 : vector<16x16xi32>
      %c0_i32_104 = arith.constant 0 : i32
      %286 = arith.cmpi slt, %279, %c0_i32_104 : i32
      %287 = vector.broadcast %286 : i1 to vector<16x16xi1>
      %288 = vector.broadcast %287 : vector<16x16xi1> to vector<16x16xi1>
      %289 = arith.xori %285, %288 : vector<16x16xi1>
      %290 = arith.andi %289, %283 : vector<16x16xi1>
      %291 = vector.broadcast %279 : i32 to vector<16x16xi32>
      %292 = arith.addi %281, %291 : vector<16x16xi32>
      %293 = arith.select %290, %292, %281 : vector<16x16xi1>, vector<16x16xi32>
      %294 = arith.cmpi eq, %277, %293 : vector<16x16xi32>
      %c10_i32 = arith.constant 10 : i32
      %295 = vector.broadcast %c10_i32 : i32 to vector<16x16xi32>
      %296 = arith.cmpi slt, %261, %295 : vector<16x16xi32>
      %297 = arith.andi %294, %296 : vector<16x16xi1>
      %cst_105 = arith.constant 0.000000e+00 : f32
      %cst_106 = arith.constant -1.000000e+30 : f32
      %298 = vector.broadcast %cst_105 : f32 to vector<16x16xf32>
      %299 = vector.broadcast %cst_106 : f32 to vector<16x16xf32>
      %300 = arith.select %297, %298, %299 : vector<16x16xi1>, vector<16x16xf32>
      %c0_107 = arith.constant 0 : index
      %c0_108 = arith.constant 0 : index
      %301 = vector.load %arg15[%c0_107, %c0_108] : memref<16x16xf32, #tpu.memory_space<vmem>>, vector<16x16xf32>
      tpu.vector_store %arg15[%c0_107, %c0_108], %300 {strides = array<i32>} : memref<16x16xf32, #tpu.memory_space<vmem>>, vector<16x16xf32>,
    } else {
    }
    %c0 = arith.constant 0 : index
    %c0_1 = arith.constant 0 : index
    %c0_2 = arith.constant 0 : index
    %3 = vector.load %arg5[%c0, %c0_1, %c0_2] : memref<1x4x384xf32, #tpu.memory_space<vmem>>, vector<1x1x384xf32>
    %4 = vector.shape_cast %3 : vector<1x1x384xf32> to vector<1x384xf32>
    %c0_3 = arith.constant 0 : index
    %c1 = arith.constant 1 : index
    %c0_4 = arith.constant 0 : index
    %5 = vector.load %arg5[%c0_3, %c1, %c0_4] : memref<1x4x384xf32, #tpu.memory_space<vmem>>, vector<1x1x384xf32>
    %6 = vector.shape_cast %5 : vector<1x1x384xf32> to vector<1x384xf32>
    %c0_5 = arith.constant 0 : index
    %c2 = arith.constant 2 : index
    %c0_6 = arith.constant 0 : index
    %7 = vector.load %arg5[%c0_5, %c2, %c0_6] : memref<1x4x384xf32, #tpu.memory_space<vmem>>, vector<1x1x384xf32>
    %8 = vector.shape_cast %7 : vector<1x1x384xf32> to vector<1x384xf32>
    %c0_7 = arith.constant 0 : index
    %c3 = arith.constant 3 : index
    %c0_8 = arith.constant 0 : index
    %9 = vector.load %arg5[%c0_7, %c3, %c0_8] : memref<1x4x384xf32, #tpu.memory_space<vmem>>, vector<1x1x384xf32>
    %10 = vector.shape_cast %9 : vector<1x1x384xf32> to vector<1x384xf32>
    %c0_9 = arith.constant 0 : index
    %c0_10 = arith.constant 0 : index
    %c0_11 = arith.constant 0 : index
    %11 = vector.load %arg6[%c0_9, %c0_10, %c0_11] : memref<1x1x3456xf32, #tpu.memory_space<vmem>>, vector<1x1x1152xf32>
    %12 = vector.shape_cast %11 : vector<1x1x1152xf32> to vector<1x1152xf32>
    %c0_12 = arith.constant 0 : index
    %c0_13 = arith.constant 0 : index
    %c1152 = arith.constant 1152 : index
    %13 = vector.load %arg6[%c0_12, %c0_13, %c1152] : memref<1x1x3456xf32, #tpu.memory_space<vmem>>, vector<1x1x384xf32>
    %14 = vector.shape_cast %13 : vector<1x1x384xf32> to vector<1x384xf32>
    %c0_14 = arith.constant 0 : index
    %c0_15 = arith.constant 0 : index
    %c1536 = arith.constant 1536 : index
    %15 = vector.load %arg6[%c0_14, %c0_15, %c1536] : memref<1x1x3456xf32, #tpu.memory_space<vmem>>, vector<1x1x1536xf32>
    %16 = vector.shape_cast %15 : vector<1x1x1536xf32> to vector<1x1536xf32>
    %c0_16 = arith.constant 0 : index
    %c0_17 = arith.constant 0 : index
    %c3072 = arith.constant 3072 : index
    %17 = vector.load %arg6[%c0_16, %c0_17, %c3072] : memref<1x1x3456xf32, #tpu.memory_space<vmem>>, vector<1x1x384xf32>
    %18 = vector.shape_cast %17 : vector<1x1x384xf32> to vector<1x384xf32>
    %c0_18 = arith.constant 0 : index
    %c0_19 = arith.constant 0 : index
    %19 = vector.load %arg13[%c0_18, %c0_19] : memref<16x384xf32, #tpu.memory_space<vmem>>, vector<16x384xf32>
    %c0_20 = arith.constant 0 : index
    %c0_21 = arith.constant 0 : index
    %20 = vector.load %arg15[%c0_20, %c0_21] : memref<16x16xf32, #tpu.memory_space<vmem>>, vector<16x16xf32>
    %cst = arith.constant dense<0.000000e+00> : vector<16xf32>
    %21 = vector.multi_reduction <add>, %19, %cst [1] : vector<16x384xf32> to vector<16xf32>
    %22 = vector.shape_cast %21 : vector<16xf32> to vector<16x1xf32>
    %cst_22 = arith.constant 3.840000e+02 : f32
    %23 = vector.broadcast %cst_22 : f32 to vector<16x1xf32>
    %24 = arith.divf %22, %23 : vector<16x1xf32>
    %25 = vector.broadcast %24 : vector<16x1xf32> to vector<16x384xf32>
    %26 = arith.subf %19, %25 : vector<16x384xf32>
    %27 = arith.mulf %26, %26 : vector<16x384xf32>
    %cst_23 = arith.constant dense<0.000000e+00> : vector<16xf32>
    %28 = vector.multi_reduction <add>, %27, %cst_23 [1] : vector<16x384xf32> to vector<16xf32>
    %29 = vector.shape_cast %28 : vector<16xf32> to vector<16x1xf32>
    %cst_24 = arith.constant 3.840000e+02 : f32
    %30 = vector.broadcast %cst_24 : f32 to vector<16x1xf32>
    %31 = arith.divf %29, %30 : vector<16x1xf32>
    %32 = vector.broadcast %24 : vector<16x1xf32> to vector<16x384xf32>
    %33 = arith.subf %19, %32 : vector<16x384xf32>
    %cst_25 = arith.constant 9.99999997E-7 : f32
    %34 = vector.broadcast %cst_25 : f32 to vector<16x1xf32>
    %35 = arith.addf %31, %34 : vector<16x1xf32>
    %36 = math.rsqrt %35 : vector<16x1xf32>
    %37 = vector.broadcast %36 : vector<16x1xf32> to vector<16x384xf32>
    %38 = arith.mulf %33, %37 : vector<16x384xf32>
    %39 = vector.broadcast %4 : vector<1x384xf32> to vector<16x384xf32>
    %40 = arith.mulf %38, %39 : vector<16x384xf32>
    %41 = vector.broadcast %6 : vector<1x384xf32> to vector<16x384xf32>
    %42 = arith.addf %40, %41 : vector<16x384xf32>
    %c0_26 = arith.constant 0 : index
    %c0_27 = arith.constant 0 : index
    %c0_28 = arith.constant 0 : index
    %43 = vector.load %arg7[%c0_26, %c0_27, %c0_28] : memref<1x384x3072xbf16, #tpu.memory_space<vmem>>, vector<1x384x1152xbf16>
    %44 = vector.shape_cast %43 : vector<1x384x1152xbf16> to vector<384x1152xbf16>
    %45 = arith.truncf %42 : vector<16x384xf32> to vector<16x384xbf16>
    %cst_29 = arith.constant dense<0.000000e+00> : vector<16x1152xf32>
    %46 = tpu.matmul %45, %44, %cst_29 {dimension_numbers = #tpu.dot_dimension_numbers<[1], [0], [0], [1], [0, 0, 1, 1], [], []>} : vector<16x384xbf16>, vector<384x1152xbf16>, vector<16x1152xf32> -> vector<16x1152xf32>
    %47 = vector.broadcast %12 : vector<1x1152xf32> to vector<16x1152xf32>
    %48 = arith.addf %46, %47 : vector<16x1152xf32>
    %49 = tpu.iota {dimensions = array<i32: 1>} : vector<1x128xi32>
    %c64_i32 = arith.constant 64 : i32
    %50 = vector.broadcast %c64_i32 : i32 to vector<1x128xi32>
    %51 = arith.cmpi slt, %49, %50 : vector<1x128xi32>
    %52 = arith.extui %51 : vector<1x128xi1> to vector<1x128xi32>
    %53 = arith.sitofp %52 : vector<1x128xi32> to vector<1x128xf32>
    %cst_30 = arith.constant 1.000000e+00 : f32
    %54 = vector.broadcast %cst_30 : f32 to vector<1x128xf32>
    %55 = arith.subf %54, %53 : vector<1x128xf32>
    %56 = vector.extract_strided_slice %48 {offsets = [0, 0], sizes = [16, 128], strides = [1, 1]} : vector<16x1152xf32> to vector<16x128xf32>
    %57 = arith.truncf %56 : vector<16x128xf32> to vector<16x128xbf16>
    %58 = vector.extract_strided_slice %48 {offsets = [0, 384], sizes = [16, 128], strides = [1, 1]} : vector<16x1152xf32> to vector<16x128xf32>
    %59 = vector.extract_strided_slice %48 {offsets = [0, 768], sizes = [16, 128], strides = [1, 1]} : vector<16x1152xf32> to vector<16x128xf32>
    %60 = vector.broadcast %53 : vector<1x128xf32> to vector<16x128xf32>
    %61 = arith.mulf %58, %60 : vector<16x128xf32>
    %62 = arith.truncf %61 : vector<16x128xf32> to vector<16x128xbf16>
    %63 = vector.broadcast %55 : vector<1x128xf32> to vector<16x128xf32>
    %64 = arith.mulf %58, %63 : vector<16x128xf32>
    %65 = arith.truncf %64 : vector<16x128xf32> to vector<16x128xbf16>
    %66 = vector.broadcast %53 : vector<1x128xf32> to vector<16x128xf32>
    %67 = arith.mulf %59, %66 : vector<16x128xf32>
    %68 = arith.truncf %67 : vector<16x128xf32> to vector<16x128xbf16>
    %69 = vector.broadcast %55 : vector<1x128xf32> to vector<16x128xf32>
    %70 = arith.mulf %59, %69 : vector<16x128xf32>
    %71 = arith.truncf %70 : vector<16x128xf32> to vector<16x128xbf16>
    %cst_31 = arith.constant dense<0.000000e+00> : vector<16x16xf32>
    %72 = tpu.matmul %57, %62, %cst_31 {dimension_numbers = #tpu.dot_dimension_numbers<[1], [1], [0], [0], [0, 0, 1, 0], [], []>} : vector<16x128xbf16>, vector<16x128xbf16>, vector<16x16xf32> -> vector<16x16xf32>
    %73 = arith.addf %72, %20 : vector<16x16xf32>
    %cst_32 = arith.constant dense<0.000000e+00> : vector<16x16xf32>
    %74 = tpu.matmul %57, %65, %cst_32 {dimension_numbers = #tpu.dot_dimension_numbers<[1], [1], [0], [0], [0, 0, 1, 0], [], []>} : vector<16x128xbf16>, vector<16x128xbf16>, vector<16x16xf32> -> vector<16x16xf32>
    %75 = arith.addf %74, %20 : vector<16x16xf32>
    %cst_33 = arith.constant dense<0xFF800000> : vector<16xf32>
    %76 = vector.multi_reduction <maximumf>, %73, %cst_33 [1] : vector<16x16xf32> to vector<16xf32>
    %77 = vector.shape_cast %76 : vector<16xf32> to vector<16x1xf32>
    %78 = vector.broadcast %77 : vector<16x1xf32> to vector<16x16xf32>
    %79 = arith.subf %73, %78 : vector<16x16xf32>
    %80 = math.exp %79 : vector<16x16xf32>
    %cst_34 = arith.constant dense<0xFF800000> : vector<16xf32>
    %81 = vector.multi_reduction <maximumf>, %75, %cst_34 [1] : vector<16x16xf32> to vector<16xf32>
    %82 = vector.shape_cast %81 : vector<16xf32> to vector<16x1xf32>
    %83 = vector.broadcast %82 : vector<16x1xf32> to vector<16x16xf32>
    %84 = arith.subf %75, %83 : vector<16x16xf32>
    %85 = math.exp %84 : vector<16x16xf32>
    %cst_35 = arith.constant dense<0.000000e+00> : vector<16xf32>
    %86 = vector.multi_reduction <add>, %80, %cst_35 [1] : vector<16x16xf32> to vector<16xf32>
    %87 = vector.shape_cast %86 : vector<16xf32> to vector<16x1xf32>
    %88 = tpu.reciprocal %87 {approx = true} : vector<16x1xf32> -> vector<16x1xf32>
    %89 = vector.broadcast %88 : vector<16x1xf32> to vector<16x16xf32>
    %90 = arith.mulf %80, %89 : vector<16x16xf32>
    %91 = arith.truncf %90 : vector<16x16xf32> to vector<16x16xbf16>
    %cst_36 = arith.constant dense<0.000000e+00> : vector<16xf32>
    %92 = vector.multi_reduction <add>, %85, %cst_36 [1] : vector<16x16xf32> to vector<16xf32>
    %93 = vector.shape_cast %92 : vector<16xf32> to vector<16x1xf32>
    %94 = tpu.reciprocal %93 {approx = true} : vector<16x1xf32> -> vector<16x1xf32>
    %95 = vector.broadcast %94 : vector<16x1xf32> to vector<16x16xf32>
    %96 = arith.mulf %85, %95 : vector<16x16xf32>
    %97 = arith.truncf %96 : vector<16x16xf32> to vector<16x16xbf16>
    %cst_37 = arith.constant dense<0.000000e+00> : vector<16x128xf32>
    %98 = tpu.matmul %91, %68, %cst_37 {dimension_numbers = #tpu.dot_dimension_numbers<[1], [0], [0], [1], [0, 0, 1, 1], [], []>} : vector<16x16xbf16>, vector<16x128xbf16>, vector<16x128xf32> -> vector<16x128xf32>
    %cst_38 = arith.constant dense<0.000000e+00> : vector<16x128xf32>
    %99 = tpu.matmul %97, %71, %cst_38 {dimension_numbers = #tpu.dot_dimension_numbers<[1], [0], [0], [1], [0, 0, 1, 1], [], []>} : vector<16x16xbf16>, vector<16x128xbf16>, vector<16x128xf32> -> vector<16x128xf32>
    %100 = arith.addf %98, %99 : vector<16x128xf32>
    %c0_39 = arith.constant 0 : index
    %c0_40 = arith.constant 0 : index
    %101 = vector.load %arg14[%c0_39, %c0_40] : memref<16x384xf32, #tpu.memory_space<vmem>>, vector<16x128xf32>
    tpu.vector_store %arg14[%c0_39, %c0_40], %100 {strides = array<i32>} : memref<16x384xf32, #tpu.memory_space<vmem>>, vector<16x128xf32>,
    %102 = vector.extract_strided_slice %48 {offsets = [0, 128], sizes = [16, 128], strides = [1, 1]} : vector<16x1152xf32> to vector<16x128xf32>
    %103 = arith.truncf %102 : vector<16x128xf32> to vector<16x128xbf16>
    %104 = vector.extract_strided_slice %48 {offsets = [0, 512], sizes = [16, 128], strides = [1, 1]} : vector<16x1152xf32> to vector<16x128xf32>
    %105 = vector.extract_strided_slice %48 {offsets = [0, 896], sizes = [16, 128], strides = [1, 1]} : vector<16x1152xf32> to vector<16x128xf32>
    %106 = vector.broadcast %53 : vector<1x128xf32> to vector<16x128xf32>
    %107 = arith.mulf %104, %106 : vector<16x128xf32>
    %108 = arith.truncf %107 : vector<16x128xf32> to vector<16x128xbf16>
    %109 = vector.broadcast %55 : vector<1x128xf32> to vector<16x128xf32>
    %110 = arith.mulf %104, %109 : vector<16x128xf32>
    %111 = arith.truncf %110 : vector<16x128xf32> to vector<16x128xbf16>
    %112 = vector.broadcast %53 : vector<1x128xf32> to vector<16x128xf32>
    %113 = arith.mulf %105, %112 : vector<16x128xf32>
    %114 = arith.truncf %113 : vector<16x128xf32> to vector<16x128xbf16>
    %115 = vector.broadcast %55 : vector<1x128xf32> to vector<16x128xf32>
    %116 = arith.mulf %105, %115 : vector<16x128xf32>
    %117 = arith.truncf %116 : vector<16x128xf32> to vector<16x128xbf16>
    %cst_41 = arith.constant dense<0.000000e+00> : vector<16x16xf32>
    %118 = tpu.matmul %103, %108, %cst_41 {dimension_numbers = #tpu.dot_dimension_numbers<[1], [1], [0], [0], [0, 0, 1, 0], [], []>} : vector<16x128xbf16>, vector<16x128xbf16>, vector<16x16xf32> -> vector<16x16xf32>
    %119 = arith.addf %118, %20 : vector<16x16xf32>
    %cst_42 = arith.constant dense<0.000000e+00> : vector<16x16xf32>
    %120 = tpu.matmul %103, %111, %cst_42 {dimension_numbers = #tpu.dot_dimension_numbers<[1], [1], [0], [0], [0, 0, 1, 0], [], []>} : vector<16x128xbf16>, vector<16x128xbf16>, vector<16x16xf32> -> vector<16x16xf32>
    %121 = arith.addf %120, %20 : vector<16x16xf32>
    %cst_43 = arith.constant dense<0xFF800000> : vector<16xf32>
    %122 = vector.multi_reduction <maximumf>, %119, %cst_43 [1] : vector<16x16xf32> to vector<16xf32>
    %123 = vector.shape_cast %122 : vector<16xf32> to vector<16x1xf32>
    %124 = vector.broadcast %123 : vector<16x1xf32> to vector<16x16xf32>
    %125 = arith.subf %119, %124 : vector<16x16xf32>
    %126 = math.exp %125 : vector<16x16xf32>
    %cst_44 = arith.constant dense<0xFF800000> : vector<16xf32>
    %127 = vector.multi_reduction <maximumf>, %121, %cst_44 [1] : vector<16x16xf32> to vector<16xf32>
    %128 = vector.shape_cast %127 : vector<16xf32> to vector<16x1xf32>
    %129 = vector.broadcast %128 : vector<16x1xf32> to vector<16x16xf32>
    %130 = arith.subf %121, %129 : vector<16x16xf32>
    %131 = math.exp %130 : vector<16x16xf32>
    %cst_45 = arith.constant dense<0.000000e+00> : vector<16xf32>
    %132 = vector.multi_reduction <add>, %126, %cst_45 [1] : vector<16x16xf32> to vector<16xf32>
    %133 = vector.shape_cast %132 : vector<16xf32> to vector<16x1xf32>
    %134 = tpu.reciprocal %133 {approx = true} : vector<16x1xf32> -> vector<16x1xf32>
    %135 = vector.broadcast %134 : vector<16x1xf32> to vector<16x16xf32>
    %136 = arith.mulf %126, %135 : vector<16x16xf32>
    %137 = arith.truncf %136 : vector<16x16xf32> to vector<16x16xbf16>
    %cst_46 = arith.constant dense<0.000000e+00> : vector<16xf32>
    %138 = vector.multi_reduction <add>, %131, %cst_46 [1] : vector<16x16xf32> to vector<16xf32>
    %139 = vector.shape_cast %138 : vector<16xf32> to vector<16x1xf32>
    %140 = tpu.reciprocal %139 {approx = true} : vector<16x1xf32> -> vector<16x1xf32>
    %141 = vector.broadcast %140 : vector<16x1xf32> to vector<16x16xf32>
    %142 = arith.mulf %131, %141 : vector<16x16xf32>
    %143 = arith.truncf %142 : vector<16x16xf32> to vector<16x16xbf16>
    %cst_47 = arith.constant dense<0.000000e+00> : vector<16x128xf32>
    %144 = tpu.matmul %137, %114, %cst_47 {dimension_numbers = #tpu.dot_dimension_numbers<[1], [0], [0], [1], [0, 0, 1, 1], [], []>} : vector<16x16xbf16>, vector<16x128xbf16>, vector<16x128xf32> -> vector<16x128xf32>
    %cst_48 = arith.constant dense<0.000000e+00> : vector<16x128xf32>
    %145 = tpu.matmul %143, %117, %cst_48 {dimension_numbers = #tpu.dot_dimension_numbers<[1], [0], [0], [1], [0, 0, 1, 1], [], []>} : vector<16x16xbf16>, vector<16x128xbf16>, vector<16x128xf32> -> vector<16x128xf32>
    %146 = arith.addf %144, %145 : vector<16x128xf32>
    %c0_49 = arith.constant 0 : index
    %c128 = arith.constant 128 : index
    %147 = vector.load %arg14[%c0_49, %c128] : memref<16x384xf32, #tpu.memory_space<vmem>>, vector<16x128xf32>
    tpu.vector_store %arg14[%c0_49, %c128], %146 {strides = array<i32>} : memref<16x384xf32, #tpu.memory_space<vmem>>, vector<16x128xf32>,
    %148 = vector.extract_strided_slice %48 {offsets = [0, 256], sizes = [16, 128], strides = [1, 1]} : vector<16x1152xf32> to vector<16x128xf32>
    %149 = arith.truncf %148 : vector<16x128xf32> to vector<16x128xbf16>
    %150 = vector.extract_strided_slice %48 {offsets = [0, 640], sizes = [16, 128], strides = [1, 1]} : vector<16x1152xf32> to vector<16x128xf32>
    %151 = vector.extract_strided_slice %48 {offsets = [0, 1024], sizes = [16, 128], strides = [1, 1]} : vector<16x1152xf32> to vector<16x128xf32>
    %152 = vector.broadcast %53 : vector<1x128xf32> to vector<16x128xf32>
    %153 = arith.mulf %150, %152 : vector<16x128xf32>
    %154 = arith.truncf %153 : vector<16x128xf32> to vector<16x128xbf16>
    %155 = vector.broadcast %55 : vector<1x128xf32> to vector<16x128xf32>
    %156 = arith.mulf %150, %155 : vector<16x128xf32>
    %157 = arith.truncf %156 : vector<16x128xf32> to vector<16x128xbf16>
    %158 = vector.broadcast %53 : vector<1x128xf32> to vector<16x128xf32>
    %159 = arith.mulf %151, %158 : vector<16x128xf32>
    %160 = arith.truncf %159 : vector<16x128xf32> to vector<16x128xbf16>
    %161 = vector.broadcast %55 : vector<1x128xf32> to vector<16x128xf32>
    %162 = arith.mulf %151, %161 : vector<16x128xf32>
    %163 = arith.truncf %162 : vector<16x128xf32> to vector<16x128xbf16>
    %cst_50 = arith.constant dense<0.000000e+00> : vector<16x16xf32>
    %164 = tpu.matmul %149, %154, %cst_50 {dimension_numbers = #tpu.dot_dimension_numbers<[1], [1], [0], [0], [0, 0, 1, 0], [], []>} : vector<16x128xbf16>, vector<16x128xbf16>, vector<16x16xf32> -> vector<16x16xf32>
    %165 = arith.addf %164, %20 : vector<16x16xf32>
    %cst_51 = arith.constant dense<0.000000e+00> : vector<16x16xf32>
    %166 = tpu.matmul %149, %157, %cst_51 {dimension_numbers = #tpu.dot_dimension_numbers<[1], [1], [0], [0], [0, 0, 1, 0], [], []>} : vector<16x128xbf16>, vector<16x128xbf16>, vector<16x16xf32> -> vector<16x16xf32>
    %167 = arith.addf %166, %20 : vector<16x16xf32>
    %cst_52 = arith.constant dense<0xFF800000> : vector<16xf32>
    %168 = vector.multi_reduction <maximumf>, %165, %cst_52 [1] : vector<16x16xf32> to vector<16xf32>
    %169 = vector.shape_cast %168 : vector<16xf32> to vector<16x1xf32>
    %170 = vector.broadcast %169 : vector<16x1xf32> to vector<16x16xf32>
    %171 = arith.subf %165, %170 : vector<16x16xf32>
    %172 = math.exp %171 : vector<16x16xf32>
    %cst_53 = arith.constant dense<0xFF800000> : vector<16xf32>
    %173 = vector.multi_reduction <maximumf>, %167, %cst_53 [1] : vector<16x16xf32> to vector<16xf32>
    %174 = vector.shape_cast %173 : vector<16xf32> to vector<16x1xf32>
    %175 = vector.broadcast %174 : vector<16x1xf32> to vector<16x16xf32>
    %176 = arith.subf %167, %175 : vector<16x16xf32>
    %177 = math.exp %176 : vector<16x16xf32>
    %cst_54 = arith.constant dense<0.000000e+00> : vector<16xf32>
    %178 = vector.multi_reduction <add>, %172, %cst_54 [1] : vector<16x16xf32> to vector<16xf32>
    %179 = vector.shape_cast %178 : vector<16xf32> to vector<16x1xf32>
    %180 = tpu.reciprocal %179 {approx = true} : vector<16x1xf32> -> vector<16x1xf32>
    %181 = vector.broadcast %180 : vector<16x1xf32> to vector<16x16xf32>
    %182 = arith.mulf %172, %181 : vector<16x16xf32>
    %183 = arith.truncf %182 : vector<16x16xf32> to vector<16x16xbf16>
    %cst_55 = arith.constant dense<0.000000e+00> : vector<16xf32>
    %184 = vector.multi_reduction <add>, %177, %cst_55 [1] : vector<16x16xf32> to vector<16xf32>
    %185 = vector.shape_cast %184 : vector<16xf32> to vector<16x1xf32>
    %186 = tpu.reciprocal %185 {approx = true} : vector<16x1xf32> -> vector<16x1xf32>
    %187 = vector.broadcast %186 : vector<16x1xf32> to vector<16x16xf32>
    %188 = arith.mulf %177, %187 : vector<16x16xf32>
    %189 = arith.truncf %188 : vector<16x16xf32> to vector<16x16xbf16>
    %cst_56 = arith.constant dense<0.000000e+00> : vector<16x128xf32>
    %190 = tpu.matmul %183, %160, %cst_56 {dimension_numbers = #tpu.dot_dimension_numbers<[1], [0], [0], [1], [0, 0, 1, 1], [], []>} : vector<16x16xbf16>, vector<16x128xbf16>, vector<16x128xf32> -> vector<16x128xf32>
    %cst_57 = arith.constant dense<0.000000e+00> : vector<16x128xf32>
    %191 = tpu.matmul %189, %163, %cst_57 {dimension_numbers = #tpu.dot_dimension_numbers<[1], [0], [0], [1], [0, 0, 1, 1], [], []>} : vector<16x16xbf16>, vector<16x128xbf16>, vector<16x128xf32> -> vector<16x128xf32>
    %192 = arith.addf %190, %191 : vector<16x128xf32>
    %c0_58 = arith.constant 0 : index
    %c256 = arith.constant 256 : index
    %193 = vector.load %arg14[%c0_58, %c256] : memref<16x384xf32, #tpu.memory_space<vmem>>, vector<16x128xf32>
    tpu.vector_store %arg14[%c0_58, %c256], %192 {strides = array<i32>} : memref<16x384xf32, #tpu.memory_space<vmem>>, vector<16x128xf32>,
    %c0_59 = arith.constant 0 : index
    %c0_60 = arith.constant 0 : index
    %194 = vector.load %arg14[%c0_59, %c0_60] : memref<16x384xf32, #tpu.memory_space<vmem>>, vector<16x384xf32>
    %c0_61 = arith.constant 0 : index
    %c0_62 = arith.constant 0 : index
    %c1152_63 = arith.constant 1152 : index
    %195 = vector.load %arg7[%c0_61, %c0_62, %c1152_63] : memref<1x384x3072xbf16, #tpu.memory_space<vmem>>, vector<1x384x384xbf16>
    %196 = vector.shape_cast %195 : vector<1x384x384xbf16> to vector<384x384xbf16>
    %197 = arith.truncf %194 : vector<16x384xf32> to vector<16x384xbf16>
    %cst_64 = arith.constant dense<0.000000e+00> : vector<16x384xf32>
    %198 = tpu.matmul %197, %196, %cst_64 {dimension_numbers = #tpu.dot_dimension_numbers<[1], [0], [0], [1], [0, 0, 1, 1], [], []>} : vector<16x384xbf16>, vector<384x384xbf16>, vector<16x384xf32> -> vector<16x384xf32>
    %199 = vector.broadcast %14 : vector<1x384xf32> to vector<16x384xf32>
    %200 = arith.addf %198, %199 : vector<16x384xf32>
    %201 = arith.addf %19, %200 : vector<16x384xf32>
    %cst_65 = arith.constant dense<0.000000e+00> : vector<16xf32>
    %202 = vector.multi_reduction <add>, %201, %cst_65 [1] : vector<16x384xf32> to vector<16xf32>
    %203 = vector.shape_cast %202 : vector<16xf32> to vector<16x1xf32>
    %cst_66 = arith.constant 3.840000e+02 : f32
    %204 = vector.broadcast %cst_66 : f32 to vector<16x1xf32>
    %205 = arith.divf %203, %204 : vector<16x1xf32>
    %206 = vector.broadcast %205 : vector<16x1xf32> to vector<16x384xf32>
    %207 = arith.subf %201, %206 : vector<16x384xf32>
    %208 = arith.mulf %207, %207 : vector<16x384xf32>
    %cst_67 = arith.constant dense<0.000000e+00> : vector<16xf32>
    %209 = vector.multi_reduction <add>, %208, %cst_67 [1] : vector<16x384xf32> to vector<16xf32>
    %210 = vector.shape_cast %209 : vector<16xf32> to vector<16x1xf32>
    %cst_68 = arith.constant 3.840000e+02 : f32
    %211 = vector.broadcast %cst_68 : f32 to vector<16x1xf32>
    %212 = arith.divf %210, %211 : vector<16x1xf32>
    %213 = vector.broadcast %205 : vector<16x1xf32> to vector<16x384xf32>
    %214 = arith.subf %201, %213 : vector<16x384xf32>
    %cst_69 = arith.constant 9.99999997E-7 : f32
    %215 = vector.broadcast %cst_69 : f32 to vector<16x1xf32>
    %216 = arith.addf %212, %215 : vector<16x1xf32>
    %217 = math.rsqrt %216 : vector<16x1xf32>
    %218 = vector.broadcast %217 : vector<16x1xf32> to vector<16x384xf32>
    %219 = arith.mulf %214, %218 : vector<16x384xf32>
    %220 = vector.broadcast %8 : vector<1x384xf32> to vector<16x384xf32>
    %221 = arith.mulf %219, %220 : vector<16x384xf32>
    %222 = vector.broadcast %10 : vector<1x384xf32> to vector<16x384xf32>
    %223 = arith.addf %221, %222 : vector<16x384xf32>
    %c0_70 = arith.constant 0 : index
    %c0_71 = arith.constant 0 : index
    %c1536_72 = arith.constant 1536 : index
    %224 = vector.load %arg7[%c0_70, %c0_71, %c1536_72] : memref<1x384x3072xbf16, #tpu.memory_space<vmem>>, vector<1x384x1536xbf16>
    %225 = vector.shape_cast %224 : vector<1x384x1536xbf16> to vector<384x1536xbf16>
    %226 = arith.truncf %223 : vector<16x384xf32> to vector<16x384xbf16>
    %cst_73 = arith.constant dense<0.000000e+00> : vector<16x1536xf32>
    %227 = tpu.matmul %226, %225, %cst_73 {dimension_numbers = #tpu.dot_dimension_numbers<[1], [0], [0], [1], [0, 0, 1, 1], [], []>} : vector<16x384xbf16>, vector<384x1536xbf16>, vector<16x1536xf32> -> vector<16x1536xf32>
    %228 = vector.broadcast %16 : vector<1x1536xf32> to vector<16x1536xf32>
    %229 = arith.addf %227, %228 : vector<16x1536xf32>
    %cst_74 = arith.constant 5.000000e-01 : f32
    %230 = vector.broadcast %cst_74 : f32 to vector<16x1536xf32>
    %231 = arith.mulf %230, %229 : vector<16x1536xf32>
    %cst_75 = arith.constant 4.471500e-02 : f32
    %232 = vector.broadcast %cst_75 : f32 to vector<16x1536xf32>
    %233 = arith.mulf %232, %229 : vector<16x1536xf32>
    %234 = arith.mulf %233, %229 : vector<16x1536xf32>
    %235 = arith.mulf %234, %229 : vector<16x1536xf32>
    %236 = arith.addf %229, %235 : vector<16x1536xf32>
    %cst_76 = arith.constant 0.797884583 : f32
    %237 = vector.broadcast %cst_76 : f32 to vector<16x1536xf32>
    %238 = arith.mulf %237, %236 : vector<16x1536xf32>
    %239 = math.tanh %238 : vector<16x1536xf32>
    %cst_77 = arith.constant 1.000000e+00 : f32
    %240 = vector.broadcast %cst_77 : f32 to vector<16x1536xf32>
    %241 = arith.addf %240, %239 : vector<16x1536xf32>
    %242 = arith.mulf %231, %241 : vector<16x1536xf32>
    %c0_78 = arith.constant 0 : index
    %c0_79 = arith.constant 0 : index
    %c0_80 = arith.constant 0 : index
    %243 = vector.load %arg8[%c0_78, %c0_79, %c0_80] : memref<1x1536x384xbf16, #tpu.memory_space<vmem>>, vector<1x1536x384xbf16>
    %244 = vector.shape_cast %243 : vector<1x1536x384xbf16> to vector<1536x384xbf16>
    %245 = arith.truncf %242 : vector<16x1536xf32> to vector<16x1536xbf16>
    %cst_81 = arith.constant dense<0.000000e+00> : vector<16x384xf32>
    %246 = tpu.matmul %245, %244, %cst_81 {dimension_numbers = #tpu.dot_dimension_numbers<[1], [0], [0], [1], [0, 0, 1, 1], [], []>} : vector<16x1536xbf16>, vector<1536x384xbf16>, vector<16x384xf32> -> vector<16x384xf32>
    %247 = vector.broadcast %18 : vector<1x384xf32> to vector<16x384xf32>
    %248 = arith.addf %246, %247 : vector<16x384xf32>
    %249 = arith.addf %201, %248 : vector<16x384xf32>
    %c0_82 = arith.constant 0 : index
    %c0_83 = arith.constant 0 : index
    %250 = vector.load %arg13[%c0_82, %c0_83] : memref<16x384xf32, #tpu.memory_space<vmem>>, vector<16x384xf32>
    tpu.vector_store %arg13[%c0_82, %c0_83], %249 {strides = array<i32>} : memref<16x384xf32, #tpu.memory_space<vmem>>, vector<16x384xf32>,
    %c1_i32 = arith.constant 1 : i32
    %251 = arith.cmpi eq, %arg1, %c1_i32 : i32
    %252 = arith.extui %251 : i1 to i32
    %c0_i32_84 = arith.constant 0 : i32
    %253 = arith.cmpi ne, %252, %c0_i32_84 : i32
    scf.if %253 {
      %c0_85 = arith.constant 0 : index
      %c0_86 = arith.constant 0 : index
      %254 = vector.load %arg13[%c0_85, %c0_86] : memref<16x384xf32, #tpu.memory_space<vmem>>, vector<2x384xf32>
      %c0_87 = arith.constant 0 : index
      %c0_88 = arith.constant 0 : index
      %255 = vector.load %arg9[%c0_87, %c0_88] : memref<2x384xf32, #tpu.memory_space<vmem>>, vector<1x384xf32>
      %c1_89 = arith.constant 1 : index
      %c0_90 = arith.constant 0 : index
      %256 = vector.load %arg9[%c1_89, %c0_90] : memref<2x384xf32, #tpu.memory_space<vmem>>, vector<1x384xf32>
      %cst_91 = arith.constant dense<0.000000e+00> : vector<2xf32>
      %257 = vector.multi_reduction <add>, %254, %cst_91 [1] : vector<2x384xf32> to vector<2xf32>
      %258 = vector.shape_cast %257 : vector<2xf32> to vector<2x1xf32>
      %cst_92 = arith.constant 3.840000e+02 : f32
      %259 = vector.broadcast %cst_92 : f32 to vector<2x1xf32>
      %260 = arith.divf %258, %259 : vector<2x1xf32>
      %261 = vector.broadcast %260 : vector<2x1xf32> to vector<2x384xf32>
      %262 = arith.subf %254, %261 : vector<2x384xf32>
      %263 = arith.mulf %262, %262 : vector<2x384xf32>
      %cst_93 = arith.constant dense<0.000000e+00> : vector<2xf32>
      %264 = vector.multi_reduction <add>, %263, %cst_93 [1] : vector<2x384xf32> to vector<2xf32>
      %265 = vector.shape_cast %264 : vector<2xf32> to vector<2x1xf32>
      %cst_94 = arith.constant 3.840000e+02 : f32
      %266 = vector.broadcast %cst_94 : f32 to vector<2x1xf32>
      %267 = arith.divf %265, %266 : vector<2x1xf32>
      %268 = vector.broadcast %260 : vector<2x1xf32> to vector<2x384xf32>
      %269 = arith.subf %254, %268 : vector<2x384xf32>
      %cst_95 = arith.constant 9.99999997E-7 : f32
      %270 = vector.broadcast %cst_95 : f32 to vector<2x1xf32>
      %271 = arith.addf %267, %270 : vector<2x1xf32>
      %272 = math.rsqrt %271 : vector<2x1xf32>
      %273 = vector.broadcast %272 : vector<2x1xf32> to vector<2x384xf32>
      %274 = arith.mulf %269, %273 : vector<2x384xf32>
      %275 = vector.broadcast %255 : vector<1x384xf32> to vector<2x384xf32>
      %276 = arith.mulf %274, %275 : vector<2x384xf32>
      %277 = vector.broadcast %256 : vector<1x384xf32> to vector<2x384xf32>
      %278 = arith.addf %276, %277 : vector<2x384xf32>
      %c0_96 = arith.constant 0 : index
      %c0_97 = arith.constant 0 : index
      %279 = vector.load %arg10[%c0_96, %c0_97] : memref<384x128xbf16, #tpu.memory_space<vmem>>, vector<384x128xbf16>
      %c0_98 = arith.constant 0 : index
      %c0_99 = arith.constant 0 : index
      %280 = vector.load %arg11[%c0_98, %c0_99] : memref<1x128xf32, #tpu.memory_space<vmem>>, vector<1x128xf32>
      %281 = arith.truncf %278 : vector<2x384xf32> to vector<2x384xbf16>
      %cst_100 = arith.constant dense<0.000000e+00> : vector<2x128xf32>
      %282 = tpu.matmul %281, %279, %cst_100 {dimension_numbers = #tpu.dot_dimension_numbers<[1], [0], [0], [1], [0, 0, 1, 1], [], []>} : vector<2x384xbf16>, vector<384x128xbf16>, vector<2x128xf32> -> vector<2x128xf32>
      %283 = vector.broadcast %280 : vector<1x128xf32> to vector<2x128xf32>
      %284 = arith.addf %282, %283 : vector<2x128xf32>
      %c0_101 = arith.constant 0 : index
      %c0_102 = arith.constant 0 : index
      %285 = vector.load %arg12[%c0_101, %c0_102] : memref<2x128xf32, #tpu.memory_space<vmem>>, vector<2x128xf32>
      tpu.vector_store %arg12[%c0_101, %c0_102], %284 {strides = array<i32>} : memref<2x128xf32, #tpu.memory_space<vmem>>, vector<2x128xf32>,
    } else {
    }
    return
  }
  func.func @transform_0(%arg0: i32, %arg1: i32) -> (i32, i32) {
    %c0_i32 = arith.constant 0 : i32
    %c0_i32_0 = arith.constant 0 : i32
    return %arg0, %c0_i32 : i32, i32
  }
  func.func @transform_1(%arg0: i32, %arg1: i32) -> (i32, i32) {
    %c0_i32 = arith.constant 0 : i32
    %c0_i32_0 = arith.constant 0 : i32
    %c0_i32_1 = arith.constant 0 : i32
    return %c0_i32, %c0_i32_0 : i32, i32
  }
  func.func @transform_2(%arg0: i32, %arg1: i32) -> (i32, i32) {
    %c0_i32 = arith.constant 0 : i32
    %c0_i32_0 = arith.constant 0 : i32
    %c0_i32_1 = arith.constant 0 : i32
    return %c0_i32, %c0_i32_0 : i32, i32
  }
  func.func @transform_3(%arg0: i32, %arg1: i32) -> (i32, i32, i32) {
    %c0_i32 = arith.constant 0 : i32
    %c0_i32_0 = arith.constant 0 : i32
    %c0_i32_1 = arith.constant 0 : i32
    return %arg1, %c0_i32, %c0_i32_0 : i32, i32, i32
  }
  func.func @transform_4(%arg0: i32, %arg1: i32) -> (i32, i32, i32) {
    %c0_i32 = arith.constant 0 : i32
    %c0_i32_0 = arith.constant 0 : i32
    %c0_i32_1 = arith.constant 0 : i32
    return %arg1, %c0_i32, %c0_i32_0 : i32, i32, i32
  }
  func.func @transform_5(%arg0: i32, %arg1: i32) -> (i32, i32, i32) {
    %c0_i32 = arith.constant 0 : i32
    %c0_i32_0 = arith.constant 0 : i32
    %c0_i32_1 = arith.constant 0 : i32
    return %arg1, %c0_i32, %c0_i32_0 : i32, i32, i32
  }
  func.func @transform_6(%arg0: i32, %arg1: i32) -> (i32, i32, i32) {
    %c0_i32 = arith.constant 0 : i32
    %c0_i32_0 = arith.constant 0 : i32
    %c0_i32_1 = arith.constant 0 : i32
    return %arg1, %c0_i32, %c0_i32_0 : i32, i32, i32
  }
  func.func @transform_7(%arg0: i32, %arg1: i32) -> (i32, i32) {
    %c0_i32 = arith.constant 0 : i32
    %c0_i32_0 = arith.constant 0 : i32
    %c0_i32_1 = arith.constant 0 : i32
    return %c0_i32, %c0_i32_0 : i32, i32
  }
  func.func @transform_8(%arg0: i32, %arg1: i32) -> (i32, i32) {
    %c0_i32 = arith.constant 0 : i32
    %c0_i32_0 = arith.constant 0 : i32
    %c0_i32_1 = arith.constant 0 : i32
    return %c0_i32, %c0_i32_0 : i32, i32
  }
  func.func @transform_9(%arg0: i32, %arg1: i32) -> (i32, i32) {
    %c0_i32 = arith.constant 0 : i32
    %c0_i32_0 = arith.constant 0 : i32
    %c0_i32_1 = arith.constant 0 : i32
    return %c0_i32, %c0_i32_0 : i32, i32
  }
  func.func @transform_10(%arg0: i32, %arg1: i32) -> (i32, i32) {
    %c0_i32 = arith.constant 0 : i32
    %c0_i32_0 = arith.constant 0 : i32
    return %arg0, %c0_i32 : i32, i32
  }
}

</mosaic_0001>

<bundles_post_ra>
// kernel: vit_s_forward.1
= control target key start
LH: loop header
LB: loop body
LE: loop exit
PB: predicated region body
PF: predicated region fallthrough
CT: control target
= control target key end

     0   :  { %s19069_s0 = inlined_call_operand.vmem [shape: bf16[16,768], index: 0, kind: input, shape index: {}]   ;;  %s19070_s1 = inlined_call_operand.vmem [shape: f32[16,384], index: 1, kind: input, shape index: {}]   ;;  %s19071_s2 = inlined_call_operand.hbm [shape: bf16[768,384], index: 2, kind: input, shape index: {}]   ;;  %s19072_s3 = inlined_call_operand.hbm [shape: f32[2,4,384], index: 3, kind: input, shape index: {}]   ;;  %s19073_s4 = inlined_call_operand.hbm [shape: f32[2,1,3456], index: 4, kind: input, shape index: {}]   ;;  %s19074_s5 = inlined_call_operand.hbm [shape: bf16[2,384,3072], index: 5, kind: input, shape index: {}]   ;;  %s19075_s6 = inlined_call_operand.hbm [shape: bf16[2,1536,384], index: 6, kind: input, shape index: {}]   ;;  %s19076_s7 = inlined_call_operand.hbm [shape: f32[2,384], index: 7, kind: input, shape index: {}]   ;;  %s19077_s8 = inlined_call_operand.hbm [shape: bf16[384,128], index: 8, kind: input, shape index: {}]   ;;  %s19078_s9 = inlined_call_operand.hbm [shape: f32[1,128], index: 9, kind: input, shape index: {}]   ;;  %s19079_s10 = inlined_call_operand.hbm [shape: f32[2,128], index: 10, kind: output, shape index: {}]  }
   0x1   :  { %19087 = sst [smem:[#allocation31_spill]] %s19069_s0 }
   0x2   :  { %19088 = sst [smem:[#allocation32_spill]] %s19070_s1 }
   0x3   :  { %19089 = sst [smem:[#allocation33_spill]] %s19071_s2 }
   0x4   :  { %19090 = sst [smem:[#allocation34_spill]] %s19072_s3 }
   0x5   :  { %19091 = sst [smem:[#allocation35_spill]] %s19076_s7 }
   0x6   :  { %19092 = sst [smem:[#allocation36_spill]] %s19079_s10 }
   0x7   :  { %15 = vsyncpa [#allocation6], 0 }
   0x8   :  { %16 = vsyncpa [#allocation9], 0 }
   0x9   :  { %18 = vsyncpa [#allocation9 + $0x1], 0 }
   0xa   :  { %19 = vsyncpa [#allocation12], 0 }
   0xb   :  { %21 = vsyncpa [#allocation12 + $0x1], 0 }
   0xc   :  { %22 = vsyncpa [#allocation15], 0 }
   0xd   :  { %23 = vsyncpa [#allocation18], 0 }
   0xe   :  { %24 = vsyncpa [#allocation7], 0  ;;  %s16175_s13 = smov 0   ;;  %s16177_s14 = smov 0  }
   0xf   :  { %s16179_s15 = smov 0   ;;  %s16181_s16 = smov 0  }
  0x10   :  { %s16183_s17 = smov 0   ;;  %s16185_s18 = smov 0  }
  0x11 LB: > { %19093 = sst [smem:[#allocation26_spill]] %s16092_s15  ;;  %s16204_s19 = sadd.s32 4294967295, %s16104_s18   ;;  %s16104_s18 = sphi %s16185_s18, %s30_s18   ;;  %s16100_s17 = sphi %s16183_s17, %s19122_s17   ;;  %s16096_s16 = sphi %s16181_s16, %s19121_s16   ;;  %s16092_s15 = sphi %s16179_s15, %s19117_s15   ;;  %s16088_s14 = sphi %s16177_s14, %s19120_s14   ;;  %s16084_s13 = sphi %s16175_s13, %s19119_s13  }
  0x12   : > { %19094 = sst [smem:[#allocation27_spill]] %s16096_s16  ;;  %p130_p0 = scmp.ne.s32.totalorder %s16088_s14, %s16084_s13 }
  0x13   : > { %19095 = sst [smem:[#allocation28_spill]] %s16104_s18  ;;  %p131_p1 = scmp.eq.s32.totalorder %s16204_s19, 0 }
  0x14   : > { %p10289_p2 = scmp.ge.s32.totalorder %s16104_s18, 1  ;;  %p308_p3 = scmp.lt.s32.totalorder %s16104_s18, 3 }
  0x15   : > { %p16212_p4 = por %p131_p1, %p130_p0  ;;  %s19097_s7 = sld [smem:[#allocation35_spill]] }
  0x16   : > { %p16219_p5 = pnand %p10289_p2, %p308_p3  ;;  %s16106_s25 = smov [#allocation14]  }
  0x17   : > { %s349_s26 = sshll.u32 %s16106_s25, 4  ;;  %s39_s28 = sadd.s32 1, %s16100_s17  ;;  %s350_s26 = int_to_ptr.vmem [resolvable:$true] %s349_s26 }
  0x18   : > { %p15550_p6 = pneg %p16219_p5  ;;  %p40_p8 = scmp.ge.s32.totalorder %s39_s28, 2 }
  0x19   : > { %s117_s29 = sadd.s32 1, %s16092_s15  ;;  %p124_p9 = scmp.ne.s32.totalorder %s16092_s15, %s16088_s14 }
  0x1a   : > { %p16227_p7 = pnand %p15550_p6, %p131_p1  ;;  %p125_p10 = scmp.eq.s32.totalorder %s16104_s18, 0 }
  0x1b   : > { %s347_s23 = sshll.u32 %s19097_s7, 4  ;;  %s19124_s28 = smov (%p40_p8, %s39_s28), 0  ;;  %s348_s23 = int_to_ptr.hbm [resolvable:$true] %s347_s23 }
  0x1c   : > { %15556 = dma.hbm_to_vmem [thread:$0]  (!%p16227_p7), %s348_s23, 96, %s350_s26, [#allocation15]  }
  0x1d   : > { %19100 = sst [smem:[#allocation29_spill]] %s19124_s28  ;;  %p126_p11 = por %p125_p10, %p124_p9 }
  0x1e   : > { %p15580_p12 = scmp.lt.s32.totalorder %s16104_s18, 2  ;;  %s114_s30 = ssub.s32 %s16100_s17, %s19124_s28 }
  0x1f   : > { %s386_s11 = sand.u32 1, %s16104_s18   ;;  %p115_p13 = scmp.eq.s32.totalorder %s114_s30, 0 }
  0x20   : > { %s16245_s12 = sand.u32 1, %s16092_s15   ;;  %s15511_s13 = smul.u32 12, %s16100_s17 }
  0x21   : > { %s16249_s21 = scalar_select %p115_p13, %s16092_s15, %s117_s29  }
  0x22   : > { %s15510_s22 = smul.u32 12, %s16245_s12  ;;  %s19102_s3 = sld [smem:[#allocation34_spill]] }
  0x23   : > { %19101 = sst [smem:[#allocation30_spill]] %s16249_s21  ;;  %p16255_p0 = pnand %p15580_p12, %p126_p11 }
  0x24   : > { %s390_s30 = scalar_lea.vmem [#allocation8], %s15510_s22  ;;  %s16259_s18 = scalar_lea.sflag [#allocation9], %s386_s11 }
  0x25   : > { %s399_s28 = sshll.u32 %s390_s30, 4  ;;  %s15514_s21 = smul.u32 4608, %s16245_s12  ;;  %s400_s28 = int_to_ptr.vmem [resolvable:$true] %s399_s28 }
  0x26   : > { %s15515_s23 = smul.u32 4608, %s16100_s17  ;;  %s19104_s2 = sld [smem:[#allocation33_spill]] }
  0x27   : > { %s16273_s16 = scalar_lea.sflag [#allocation12], %s386_s11  ;;  %s15512_s11 = smul.u32 27, %s16245_s12 }
  0x28   : > { %s395_s26 = scalar_lea.hbm %s19102_s3, %s15511_s13  ;;  %s429_s3 = scalar_lea.vmem [#allocation11], %s15514_s21 }
  0x29   : > { %s397_s7 = sshll.u32 %s395_s26, 4  ;;  %s434_s26 = scalar_lea.hbm %s19074_s5, %s15515_s23  ;;  %s398_s7 = int_to_ptr.hbm [resolvable:$true] %s397_s7 }
  0x2a   : > { %15566 = dma.hbm_to_vmem [thread:$0]  (!%p16255_p0), %s398_s7, 192, %s400_s28, %s16259_s18  }
  0x2b   : > { %s437_s15 = sshll.u32 %s429_s3, 4  ;;  %s435_s1 = sshll.u32 %s434_s26, 4  ;;  %s438_s15 = int_to_ptr.vmem [resolvable:$true] %s437_s15  ;;  %s436_s1 = int_to_ptr.hbm [resolvable:$true] %s435_s1 }
  0x2c   : > { %s332_s0 = sshll.u32 %s19104_s2, 4  ;;  %s16107_s7 = smov 1536   ;;  %s333_s0 = int_to_ptr.hbm [resolvable:$true] %s332_s0 }
  0x2d   : > { %s16108_s28 = smov 96   ;;  %s16109_s23 = smov [#allocation5]  }
  0x2e   : > { %15572 = dma.hbm_to_vmem [thread:$0]  (!%p16255_p0), %s436_s1, 73728, %s438_s15, %s16273_s16, %s16107_s7, %s16107_s7, %s16108_s28  }
  0x2f   : > { %s334_s21 = sshll.u32 %s16109_s23, 4  ;;  %s19085_s3 = smov 192   ;;  %s335_s21 = int_to_ptr.vmem [resolvable:$true] %s334_s21 }
  0x30   : > { %s19086_s13 = smov 12   ;;  %s358_s26 = sshll.u32 %s19077_s8, 4  ;;  %s359_s26 = int_to_ptr.hbm [resolvable:$true] %s358_s26 }
  0x31   : > { %15553 = dma.hbm_to_vmem [thread:$0]  (!%p16227_p7), %s333_s0, 18432, %s335_s21, [#allocation6], %s19085_s3, %s19085_s3, %s19086_s13  }
  0x32   : > { %s16112_s1 = smov [#allocation16]   ;;  %s373_s7 = sshll.u32 %s19078_s9, 4  ;;  %s374_s7 = int_to_ptr.hbm [resolvable:$true] %s373_s7 }
  0x33   : > { %s360_s15 = sshll.u32 %s16112_s1, 4  ;;  %s16113_s28 = smov 64   ;;  %s361_s15 = int_to_ptr.vmem [resolvable:$true] %s360_s15 }
  0x34   : > { %s16114_s23 = smov 4   ;;  %s16115_s0 = smov [#allocation17]  }
  0x35   : > { %15559 = dma.hbm_to_vmem [thread:$0]  (!%p16227_p7), %s359_s26, 3072, %s361_s15, [#allocation15], %s16113_s28, %s16113_s28, %s16114_s23  }
  0x36   : > { %s375_s21 = sshll.u32 %s16115_s0, 4  ;;  %s15513_s25 = smul.u32 27, %s16100_s17  ;;  %s376_s21 = int_to_ptr.vmem [resolvable:$true] %s375_s21 }
  0x37   : > { %15562 = dma.hbm_to_vmem [thread:$0]  (!%p16227_p7), %s374_s7, 16, %s376_s21, [#allocation18]  }
  0x38   : > { %s414_s30 = scalar_lea.hbm %s19073_s4, %s15513_s25  ;;  %s410_s13 = scalar_lea.vmem [#allocation10], %s15512_s11 }
  0x39   : > { %s416_s3 = sshll.u32 %s414_s30, 4  ;;  %s418_s29 = sshll.u32 %s410_s13, 4  ;;  %s417_s3 = int_to_ptr.hbm [resolvable:$true] %s416_s3  ;;  %s419_s29 = int_to_ptr.vmem [resolvable:$true] %s418_s29 }
  0x3a   : > { %15569 = dma.hbm_to_vmem [thread:$0]  (!%p16255_p0), %s417_s3, 432, %s419_s29, %s16259_s18  }
  0x3b   : > { %s15517_s26 = smul.u32 2304, %s16100_s17  ;;  %s19106_s21 = smov 12  }
  0x3c   : > { %s19105_s15 = smul.u32 2304, %s16245_s12  ;;  %s19107_s25 = smov 192  }
  0x3d   : > { %s456_s2 = scalar_lea.hbm %s19075_s6, %s15517_s26  ;;  %471 = sbr.rel (%p16219_p5) target bundleno = 3045 (0xbe5), region = 60 }
  0x3e   : > { %s451_s28 = scalar_lea.vmem [#allocation13], %s19105_s15  ;;  %s457_s7 = sshll.u32 %s456_s2, 4  ;;  %s458_s7 = int_to_ptr.hbm [resolvable:$true] %s457_s7 }
  0x3f   : > { %s459_s23 = sshll.u32 %s451_s28, 4  ;;  %s460_s23 = int_to_ptr.vmem [resolvable:$true] %s459_s23 }
  0x40   : > { %15575 = dma.hbm_to_vmem [thread:$0]  (!%p16255_p0), %s458_s7, 36864, %s460_s23, %s16273_s16, %s19107_s25, %s19107_s25, %s19106_s21  }
  0x42   : > { %16059 = dma.done.wait (%p131_p1), [#allocation6], 18432  }
  0x43   : > { %16061 = vsyncadd (%p131_p1), [#allocation6], 4294948864  ;;  %s478_s18 = sand.u32 1, %s16204_s19   ;;  %s480_s2 = sand.u32 1, %s16088_s14  }
  0x44   : > { %s15518_s12 = smul.u32 12, %s480_s2  ;;  %s479_s10 = scalar_lea.sflag [#allocation9], %s478_s18 }
  0x46   : > { %s16321_s29 = scalar_lea.vmem [#allocation8], %s15518_s12 }
  0x47   : > { %16063 = dma.done.wait (%p16212_p4), %s479_s10, 624  }
  0x48   : > { %16065 = vsyncadd (%p16212_p4), %s479_s10, 4294966672  ;;  %s15519_s16 = smul.u32 27, %s480_s2  ;;  %s499_s13 = scalar_lea.sflag [#allocation12], %s478_s18 }
  0x49   : > { %s15520_s24 = smul.u32 4608, %s480_s2 }
  0x4a   : > { %s16327_s3 = scalar_lea.vmem [#allocation10], %s15519_s16 }
  0x4b   : > { %s16329_s11 = scalar_lea.vmem [#allocation11], %s15520_s24 }
  0x4c   : > { %16067 = dma.done.wait (%p16212_p4), %s499_s13, 110592  }
  0x4d   : > { %16069 = vsyncadd (%p16212_p4), %s499_s13, 4294856704  ;;  %s15521_s1 = smul.u32 2304, %s480_s2 }
  0x4f   : > { %s16335_s22 = scalar_lea.vmem [#allocation13], %s15521_s1 }
  0x50   : > { %16071 = dma.done.wait (%p131_p1), [#allocation15], 3168  }
  0x51   : > { %16073 = vsyncadd (%p131_p1), [#allocation15], 4294964128 }
  0x52   : > { %16075 = dma.done.wait (%p131_p1), [#allocation18], 16  }
  0x53   : > { %16077 = vsyncadd (%p131_p1), [#allocation18], 4294967280  ;;  %s19108_s30 = sld [smem:[#allocation27_spill]] }
  0x59   : > { %p10304_p2 = scmp.ne.s32.totalorder %s19108_s30, 0 }
  0x5a   : > { %s19109_s15 = sld [smem:[#allocation31_spill]] (!%p10304_p2) }
  0x5b   : > { %592 = sbr.rel (%p10304_p2) target bundleno = 399 (0x18f), region = 96  ;;  %s19111_s18 = sld [smem:[#allocation32_spill]] (!%p10304_p2) }
  0x60   : > { %v10415_v0 = vld [vmem:[#allocation5 + $0xa8] sm:$0xf]  ;;  %v14500_v1 = vld [vmem:[#allocation5 + $0xb0] sm:$0xf0]  ;;  %v10403_v11 = vld [vmem:[#allocation5 + $0x90] sm:$0xf]  ;;  %s19110_s28 = smov %s19109_s15 }
  0x61   : > { %v10511_v2 = vld [vmem:[#allocation5 + $0x168] sm:$0xf]  ;;  %v10416_v3 = vor.u32 %v14500_v1, %v10415_v0  ;;  %v14524_v4 = vld [vmem:[#allocation5 + $0x170] sm:$0xf0]  ;;  %v14497_v13 = vld [vmem:[#allocation5 + $0x98] sm:$0xf0]  ;;  %s19112_s2 = smov %s19111_s18 }
  0x62   : > { %v10607_v5 = vld [vmem:[#allocation5 + $0x228] sm:$0xf]  ;;  %v14548_v6 = vld [vmem:[#allocation5 + $0x230] sm:$0xf0]  ;;  %v10512_v7 = vor.u32 %v14524_v4, %v10511_v2  ;;  %v10499_v14 = vld [vmem:[#allocation5 + $0x150] sm:$0xf]  ;;  %v10404_v16 = vor.u32 %v14497_v13, %v10403_v11 }
  0x63   : > { %v10608_v8 = vor.u32 %v14548_v6, %v10607_v5  ;;  %v10703_v9 = vld [vmem:[#allocation5 + $0x2e8] sm:$0xf]  ;;  %v14572_v10 = vld [vmem:[#allocation5 + $0x2f0] sm:$0xf0]  ;;  %1595 = vmatpush.bf16.msra.mxu0 %v10416_v3  ;;  %v14521_v15 = vld [vmem:[#allocation5 + $0x158] sm:$0xf0] }
  0x64   : > { %v10704_v12 = vor.u32 %v14572_v10, %v10703_v9  ;;  %1609 = vmatpush.bf16.msra.mxu1 %v10512_v7  ;;  %v10500_v17 = vor.u32 %v14521_v15, %v10499_v14  ;;  %v10595_v18 = vld [vmem:[#allocation5 + $0x210] sm:$0xf]  ;;  %v14545_v19 = vld [vmem:[#allocation5 + $0x218] sm:$0xf0]  ;;  %v10391_v23 = vld [vmem:[#allocation5 + $0x78] sm:$0xf] }
  0x65   : > { %1623 = vmatpush.bf16.msra.mxu2 %v10608_v8  ;;  %v10691_v20 = vld [vmem:[#allocation5 + $0x2d0] sm:$0xf]  ;;  %v10596_v21 = vor.u32 %v14545_v19, %v10595_v18  ;;  %v14569_v22 = vld [vmem:[#allocation5 + $0x2d8] sm:$0xf0]  ;;  %v14494_v24 = vld [vmem:[#allocation5 + $0x80] sm:$0xf0] }
  0x66   : > { %1637 = vmatpush.bf16.msra.mxu3 %v10704_v12  ;;  %v10692_v25 = vor.u32 %v14569_v22, %v10691_v20  ;;  %v10487_v26 = vld [vmem:[#allocation5 + $0x138] sm:$0xf]  ;;  %v14518_v27 = vld [vmem:[#allocation5 + $0x140] sm:$0xf0]  ;;  %v10392_v29 = vor.u32 %v14494_v24, %v10391_v23  ;;  %v10379_v35 = vld [vmem:[#allocation5 + $0x60] sm:$0xf] }
  0x67   : > { %v10583_v28 = vld [vmem:[#allocation5 + $0x1f8] sm:$0xf]  ;;  %1596 = vmatpush.bf16.msra.mxu0 %v10404_v16  ;;  %v14542_v30 = vld [vmem:[#allocation5 + $0x200] sm:$0xf0]  ;;  %v10488_v33 = vor.u32 %v14518_v27, %v10487_v26  ;;  %v14491_v36 = vld [vmem:[#allocation5 + $0x68] sm:$0xf0] }
  0x68   : > { %v10679_v31 = vld [vmem:[#allocation5 + $0x2b8] sm:$0xf]  ;;  %v14566_v32 = vld [vmem:[#allocation5 + $0x2c0] sm:$0xf0]  ;;  %1610 = vmatpush.bf16.msra.mxu1 %v10500_v17  ;;  %v10584_v34 = vor.u32 %v14542_v30, %v10583_v28  ;;  %v10475_v37 = vld [vmem:[#allocation5 + $0x120] sm:$0xf]  ;;  %v10380_v44 = vor.u32 %v14491_v36, %v10379_v35 }
  0x69   : > { %1624 = vmatpush.bf16.msra.mxu2 %v10596_v21  ;;  %v10680_v38 = vor.u32 %v14566_v32, %v10679_v31  ;;  %v14515_v39 = vld [vmem:[#allocation5 + $0x128] sm:$0xf0]  ;;  %v10571_v40 = vld [vmem:[#allocation5 + $0x1e0] sm:$0xf]  ;;  %v10367_v47 = vld [vmem:[#allocation5 + $0x48] sm:$0xf] }
  0x6a   : > { %1638 = vmatpush.bf16.msra.mxu3 %v10692_v25  ;;  %v14539_v41 = vld [vmem:[#allocation5 + $0x1e8] sm:$0xf0]  ;;  %v10667_v42 = vld [vmem:[#allocation5 + $0x2a0] sm:$0xf]  ;;  %v10476_v45 = vor.u32 %v14515_v39, %v10475_v37  ;;  %v14488_v48 = vld [vmem:[#allocation5 + $0x50] sm:$0xf0] }
  0x6b   : > { %v14563_v43 = vld [vmem:[#allocation5 + $0x2a8] sm:$0xf0]  ;;  %1597 = vmatpush.bf16.msra.mxu0 %v10392_v29  ;;  %v10572_v46 = vor.u32 %v14539_v41, %v10571_v40  ;;  %v10463_v49 = vld [vmem:[#allocation5 + $0x108] sm:$0xf]  ;;  %v14512_v51 = vld [vmem:[#allocation5 + $0x110] sm:$0xf0]  ;;  %v10368_v56 = vor.u32 %v14488_v48, %v10367_v47 }
  0x6c   : > { %1611 = vmatpush.bf16.msra.mxu1 %v10488_v33  ;;  %v10668_v50 = vor.u32 %v14563_v43, %v10667_v42  ;;  %v10559_v52 = vld [vmem:[#allocation5 + $0x1c8] sm:$0xf]  ;;  %v14536_v53 = vld [vmem:[#allocation5 + $0x1d0] sm:$0xf0]  ;;  %v10464_v57 = vor.u32 %v14512_v51, %v10463_v49  ;;  %v10355_v59 = vld [vmem:[#allocation5 + $0x30] sm:$0xf] }
  0x6d   : > { %1625 = vmatpush.bf16.msra.mxu2 %v10584_v34  ;;  %v10655_v54 = vld [vmem:[#allocation5 + $0x288] sm:$0xf]  ;;  %v14560_v55 = vld [vmem:[#allocation5 + $0x290] sm:$0xf0]  ;;  %v10560_v58 = vor.u32 %v14536_v53, %v10559_v52  ;;  %v14485_v60 = vld [vmem:[#allocation5 + $0x38] sm:$0xf0] }
  0x6e   : > { %1639 = vmatpush.bf16.msra.mxu3 %v10680_v38  ;;  %v10451_v61 = vld [vmem:[#allocation5 + $0xf0] sm:$0xf]  ;;  %v10656_v62 = vor.u32 %v14560_v55, %v10655_v54  ;;  %v14509_v63 = vld [vmem:[#allocation5 + $0xf8] sm:$0xf0]  ;;  %v10356_v4 = vor.u32 %v14485_v60, %v10355_v59  ;;  %v10343_v7 = vld [vmem:[#allocation5 + $0x18] sm:$0xf] }
  0x6f   : > { %1598 = vmatpush.bf16.msra.mxu0 %v10380_v44  ;;  %v10547_v0 = vld [vmem:[#allocation5 + $0x1b0] sm:$0xf]  ;;  %v14533_v1 = vld [vmem:[#allocation5 + $0x1b8] sm:$0xf0]  ;;  %v10452_v5 = vor.u32 %v14509_v63, %v10451_v61  ;;  %v14482_v8 = vld [vmem:[#allocation5 + $0x20] sm:$0xf0] }
  0x70   : > { %1612 = vmatpush.bf16.msra.mxu1 %v10476_v45  ;;  %v10643_v2 = vld [vmem:[#allocation5 + $0x270] sm:$0xf]  ;;  %v14557_v3 = vld [vmem:[#allocation5 + $0x278] sm:$0xf0]  ;;  %v10548_v6 = vor.u32 %v14533_v1, %v10547_v0  ;;  %v10439_v9 = vld [vmem:[#allocation5 + $0xd8] sm:$0xf]  ;;  %v10344_v16 = vor.u32 %v14482_v8, %v10343_v7 }
  0x71   : > { %1626 = vmatpush.bf16.msra.mxu2 %v10572_v46  ;;  %v10644_v10 = vor.u32 %v14557_v3, %v10643_v2  ;;  %v14506_v11 = vld [vmem:[#allocation5 + $0xe0] sm:$0xf0]  ;;  %v10535_v12 = vld [vmem:[#allocation5 + $0x198] sm:$0xf]  ;;  %v10331_v17 = vld [vmem:[#allocation5] sm:$0xf] }
  0x72   : > { %1640 = vmatpush.bf16.msra.mxu3 %v10668_v50  ;;  %v14530_v13 = vld [vmem:[#allocation5 + $0x1a0] sm:$0xf0]  ;;  %v10631_v14 = vld [vmem:[#allocation5 + $0x258] sm:$0xf]  ;;  %v14479_v18 = vld [vmem:[#allocation5 + $0x8] sm:$0xf0]  ;;  %v10440_v19 = vor.u32 %v14506_v11, %v10439_v9 }
  0x73   : > { %1599 = vmatpush.bf16.msra.mxu0 %v10368_v56  ;;  %v14554_v15 = vld [vmem:[#allocation5 + $0x260] sm:$0xf0]  ;;  %v10536_v20 = vor.u32 %v14530_v13, %v10535_v12  ;;  %v10427_v21 = vld [vmem:[#allocation5 + $0xc0] sm:$0xf]  ;;  %v14503_v22 = vld [vmem:[#allocation5 + $0xc8] sm:$0xf0]  ;;  %v10332_v31 = vor.u32 %v14479_v18, %v10331_v17 }
  0x74   : > { %1613 = vmatpush.bf16.msra.mxu1 %v10464_v57  ;;  %v10523_v23 = vld [vmem:[#allocation5 + $0x180] sm:$0xf]  ;;  %v10632_v24 = vor.u32 %v14554_v15, %v10631_v14  ;;  %v14527_v25 = vld [vmem:[#allocation5 + $0x188] sm:$0xf0]  ;;  %v10799_v26 = vld [vmem:[#allocation5 + $0x3a8] sm:$0xf]  ;;  %v10428_v35 = vor.u32 %v14503_v22, %v10427_v21 }
  0x75   : > { %1627 = vmatpush.bf16.msra.mxu2 %v10560_v58  ;;  %v14596_v27 = vld [vmem:[#allocation5 + $0x3b0] sm:$0xf0]  ;;  %v10895_v28 = vld [vmem:[#allocation5 + $0x468] sm:$0xf]  ;;  %v14499_v30 = vld [vmem:[#allocation5 + $0xac] sm:$0xf]  ;;  %v10524_v36 = vor.u32 %v14527_v25, %v10523_v23 }
  0x76   : > { %1641 = vmatpush.bf16.msra.mxu3 %v10656_v62  ;;  %v14620_v29 = vld [vmem:[#allocation5 + $0x470] sm:$0xf0]  ;;  %v10417_v32 = vld [vmem:[#allocation5 + $0xb4] sm:$0xf0]  ;;  %v10619_v33 = vld [vmem:[#allocation5 + $0x240] sm:$0xf]  ;;  %v10800_v39 = vor.u32 %v14596_v27, %v10799_v26 }
  0x77   : > { %1600 = vmatpush.bf16.msra.mxu0 %v10356_v4  ;;  %v14551_v34 = vld [vmem:[#allocation5 + $0x248] sm:$0xf0]  ;;  %v10513_v38 = vld [vmem:[#allocation5 + $0x174] sm:$0xf0]  ;;  %v10896_v40 = vor.u32 %v14620_v29, %v10895_v28  ;;  %v10787_v41 = vld [vmem:[#allocation5 + $0x390] sm:$0xf]  ;;  %v10420_v44 = vor.u32 %v14499_v30, %v10417_v32 }
  0x78   : > { %1614 = vmatpush.bf16.msra.mxu1 %v10452_v5  ;;  %v14523_v37 = vld [vmem:[#allocation5 + $0x16c] sm:$0xf]  ;;  %v14593_v42 = vld [vmem:[#allocation5 + $0x398] sm:$0xf0]  ;;  %v10883_v43 = vld [vmem:[#allocation5 + $0x450] sm:$0xf]  ;;  %v10620_v45 = vor.u32 %v14551_v34, %v10619_v33 }
  0x79   : > { %1628 = vmatpush.bf16.msra.mxu2 %v10548_v6  ;;  %v14617_v46 = vld [vmem:[#allocation5 + $0x458] sm:$0xf0]  ;;  %v14496_v47 = vld [vmem:[#allocation5 + $0x94] sm:$0xf]  ;;  %v10405_v48 = vld [vmem:[#allocation5 + $0x9c] sm:$0xf0]  ;;  %v10516_v49 = vor.u32 %v14523_v37, %v10513_v38  ;;  %v10788_v57 = vor.u32 %v14593_v42, %v10787_v41 }
  0x7a   : > { %1642 = vmatpush.bf16.msra.mxu3 %v10644_v10  ;;  %v14520_v50 = vld [vmem:[#allocation5 + $0x154] sm:$0xf]  ;;  %v10307_v51 = vld [vmem:[%s19109_s15] sm:$0xf]  ;;  %v14475_v52 = vld [vmem:[%s19110_s28 + $0x14] sm:$0xf0]  ;;  %v10884_v58 = vor.u32 %v14617_v46, %v10883_v43  ;;  %v10408_v62 = vor.u32 %v14496_v47, %v10405_v48 }
  0x7b   : > { %1601 = vmatpush.bf16.msra.mxu0 %v10344_v16  ;;  %v10501_v53 = vld [vmem:[#allocation5 + $0x15c] sm:$0xf0]  ;;  %v10775_v54 = vld [vmem:[#allocation5 + $0x378] sm:$0xf]  ;;  %v14590_v55 = vld [vmem:[#allocation5 + $0x380] sm:$0xf0]  ;;  %v16352_v56 = vor.u32 %v14475_v52, %v10307_v51 }
  0x7c   : > { %1615 = vmatpush.bf16.msra.mxu1 %v10440_v19  ;;  %v10871_v59 = vld [vmem:[#allocation5 + $0x438] sm:$0xf]  ;;  %v14614_v60 = vld [vmem:[#allocation5 + $0x440] sm:$0xf0]  ;;  %v14493_v61 = vld [vmem:[#allocation5 + $0x7c] sm:$0xf]  ;;  %v10504_v2 = vor.u32 %v14520_v50, %v10501_v53  ;;  %v10776_v11 = vor.u32 %v14590_v55, %v10775_v54 }
  0x7d   : > { %1629 = vmatpush.bf16.msra.mxu2 %v10536_v20  ;;  %v14472_v63 = vld [vmem:[%s19110_s28 + $0x4] sm:$0xf]  ;;  %v10309_v0 = vld [vmem:[%s19110_s28 + $0x18] sm:$0xf0]  ;;  %v10315_v1 = vld [vmem:[%s19110_s28 + $0x8] sm:$0xf]  ;;  %v10872_v12 = vor.u32 %v14614_v60, %v10871_v59 }
  0x7e   : > { %1643 = vmatpush.bf16.msra.mxu3 %v10632_v24  ;;  %v10393_v3 = vld [vmem:[#allocation5 + $0x84] sm:$0xf0]  ;;  %v14517_v4 = vld [vmem:[#allocation5 + $0x13c] sm:$0xf]  ;;  %v16364_v5 = vor.u32 %v14472_v63, %v10309_v0  ;;  %v14476_v6 = vld [vmem:[%s19110_s28 + $0x1c] sm:$0xf0] }
  0x7f   : > { %1602 = vmatpush.bf16.msra.mxu0 %v10332_v31  ;;  %v10489_v7 = vld [vmem:[#allocation5 + $0x144] sm:$0xf0]  ;;  %v16369_v8 = vor.u32 %v14476_v6, %v10315_v1  ;;  %v14473_v9 = vld [vmem:[%s19110_s28 + $0xc] sm:$0xf]  ;;  %v10317_v10 = vld [vmem:[%s19110_s28 + $0x20] sm:$0xf0]  ;;  %v10396_v15 = vor.u32 %v14493_v61, %v10393_v3 }
  0x80   : > { %1616 = vmatpush.bf16.msra.mxu1 %v10428_v35  ;;  %v10763_v13 = vld [vmem:[#allocation5 + $0x360] sm:$0xf]  ;;  %v16377_v14 = vor.u32 %v14473_v9, %v10317_v10  ;;  %v14587_v16 = vld [vmem:[#allocation5 + $0x368] sm:$0xf0]  ;;  %v10492_v19 = vor.u32 %v14517_v4, %v10489_v7  ;;  %v14490_v20 = vld [vmem:[#allocation5 + $0x64] sm:$0xf] }
  0x81   : > { %1630 = vmatpush.bf16.msra.mxu2 %v10524_v36  ;;  %v10859_v17 = vld [vmem:[#allocation5 + $0x420] sm:$0xf]  ;;  %v14611_v18 = vld [vmem:[#allocation5 + $0x428] sm:$0xf0]  ;;  %v10381_v21 = vld [vmem:[#allocation5 + $0x6c] sm:$0xf0]  ;;  %v10764_v24 = vor.u32 %v14587_v16, %v10763_v13 }
  0x82   : > { %1644 = vmatpush.bf16.msra.mxu3 %v10620_v45  ;;  %1603 = vmatmul.bf16.vlgmr.msra.gmra.mxu0 %v16352_v56  ;;  %v14514_v22 = vld [vmem:[#allocation5 + $0x124] sm:$0xf]  ;;  %v10477_v23 = vld [vmem:[#allocation5 + $0x12c] sm:$0xf0]  ;;  %v10860_v25 = vor.u32 %v14611_v18, %v10859_v17  ;;  %v10751_v26 = vld [vmem:[#allocation5 + $0x348] sm:$0xf]  ;;  %v10384_v27 = vor.u32 %v14490_v20, %v10381_v21 }
  0x83   : > { %1651 = vmatpush.bf16.msrb.mxu0 %v10800_v39  ;;  %1617 = vmatmul.bf16.vlgmr.msra.gmra.mxu1 %v16364_v5  ;;  %v14584_v28 = vld [vmem:[#allocation5 + $0x350] sm:$0xf0]  ;;  %v10847_v29 = vld [vmem:[#allocation5 + $0x408] sm:$0xf]  ;;  %v10480_v31 = vor.u32 %v14514_v22, %v10477_v23  ;;  %v14487_v32 = vld [vmem:[#allocation5 + $0x4c] sm:$0xf] }
  0x84   : > { %1665 = vmatpush.bf16.msrb.mxu1 %v10896_v40  ;;  %1631 = vmatmul.bf16.vlgmr.msra.gmra.mxu2 %v16369_v8  ;;  %v14608_v30 = vld [vmem:[#allocation5 + $0x410] sm:$0xf0]  ;;  %v10369_v33 = vld [vmem:[#allocation5 + $0x54] sm:$0xf0]  ;;  %v14511_v34 = vld [vmem:[#allocation5 + $0x10c] sm:$0xf]  ;;  %v10752_v36 = vor.u32 %v14584_v28, %v10751_v26 }
  0x85   : > { %1679 = vmatpush.bf16.msrb.mxu2 %v10420_v44  ;;  %1645 = vmatmul.bf16.vlgmr.msra.gmra.mxu3 %v16377_v14  ;;  %v10465_v35 = vld [vmem:[#allocation5 + $0x114] sm:$0xf0]  ;;  %v10848_v37 = vor.u32 %v14608_v30, %v10847_v29  ;;  %v10739_v38 = vld [vmem:[#allocation5 + $0x330] sm:$0xf]  ;;  %v10372_v39 = vor.u32 %v14487_v32, %v10369_v33  ;;  %v14581_v40 = vld [vmem:[#allocation5 + $0x338] sm:$0xf0] }
  0x86   : > { %1693 = vmatpush.bf16.msrb.mxu3 %v10516_v49  ;;  %v10835_v41 = vld [vmem:[#allocation5 + $0x3f0] sm:$0xf]  ;;  %v14605_v42 = vld [vmem:[#allocation5 + $0x3f8] sm:$0xf0]  ;;  %v10468_v43 = vor.u32 %v14511_v34, %v10465_v35  ;;  %v14484_v44 = vld [vmem:[#allocation5 + $0x34] sm:$0xf]  ;;  %v10740_v48 = vor.u32 %v14581_v40, %v10739_v38 }
  0x87   : > { %1652 = vmatpush.bf16.msrb.mxu0 %v10788_v57  ;;  %v10357_v45 = vld [vmem:[#allocation5 + $0x3c] sm:$0xf0]  ;;  %v14508_v46 = vld [vmem:[#allocation5 + $0xf4] sm:$0xf]  ;;  %v10836_v49 = vor.u32 %v14605_v42, %v10835_v41  ;;  %v10727_v50 = vld [vmem:[#allocation5 + $0x318] sm:$0xf] }
  0x88   : > { %1666 = vmatpush.bf16.msrb.mxu1 %v10884_v58  ;;  %v10453_v47 = vld [vmem:[#allocation5 + $0xfc] sm:$0xf0]  ;;  %v10360_v51 = vor.u32 %v14484_v44, %v10357_v45  ;;  %v14578_v52 = vld [vmem:[#allocation5 + $0x320] sm:$0xf0]  ;;  %v10823_v53 = vld [vmem:[#allocation5 + $0x3d8] sm:$0xf] }
  0x89   : > { %1680 = vmatpush.bf16.msrb.mxu2 %v10408_v62  ;;  %v14602_v54 = vld [vmem:[#allocation5 + $0x3e0] sm:$0xf0]  ;;  %v10456_v55 = vor.u32 %v14508_v46, %v10453_v47  ;;  %v14481_v57 = vld [vmem:[#allocation5 + $0x1c] sm:$0xf]  ;;  %v10345_v58 = vld [vmem:[#allocation5 + $0x24] sm:$0xf0]  ;;  %v10728_v63 = vor.u32 %v14578_v52, %v10727_v50 }
  0x8a   : > { %1694 = vmatpush.bf16.msrb.mxu3 %v10504_v2  ;;  %v14505_v59 = vld [vmem:[#allocation5 + $0xdc] sm:$0xf]  ;;  %v10441_v60 = vld [vmem:[#allocation5 + $0xe4] sm:$0xf0]  ;;  %v10715_v61 = vld [vmem:[#allocation5 + $0x300] sm:$0xf]  ;;  %v10824_v0 = vor.u32 %v14602_v54, %v10823_v53  ;;  %v10348_v4 = vor.u32 %v14481_v57, %v10345_v58 }
  0x8b   : > { %1653 = vmatpush.bf16.msrb.mxu0 %v10776_v11  ;;  %v14575_v62 = vld [vmem:[#allocation5 + $0x308] sm:$0xf0]  ;;  %v10811_v1 = vld [vmem:[#allocation5 + $0x3c0] sm:$0xf]  ;;  %v14478_v3 = vld [vmem:[#allocation5 + $0x4] sm:$0xf]  ;;  %v10444_v10 = vor.u32 %v14505_v59, %v10441_v60 }
  0x8c   : > { %1667 = vmatpush.bf16.msrb.mxu1 %v10872_v12  ;;  %v14599_v2 = vld [vmem:[#allocation5 + $0x3c8] sm:$0xf0]  ;;  %v10333_v6 = vld [vmem:[#allocation5 + $0xc] sm:$0xf0]  ;;  %v10609_v9 = vld [vmem:[#allocation5 + $0x234] sm:$0xf0]  ;;  %v10716_v18 = vor.u32 %v14575_v62, %v10715_v61 }
  0x8d   : > { %1681 = vmatpush.bf16.msrb.mxu2 %v10396_v15  ;;  %v14547_v7 = vld [vmem:[#allocation5 + $0x22c] sm:$0xf]  ;;  %v10705_v12 = vld [vmem:[#allocation5 + $0x2f4] sm:$0xf0]  ;;  %v10323_v16 = vld [vmem:[%s19110_s28 + $0x10] sm:$0xf]  ;;  %v10336_v23 = vor.u32 %v14478_v3, %v10333_v6 }
  0x8e   : > { %1695 = vmatpush.bf16.msrb.mxu3 %v10492_v19  ;;  %v14571_v11 = vld [vmem:[#allocation5 + $0x2ec] sm:$0xf]  ;;  %v10801_v15 = vld [vmem:[#allocation5 + $0x3b4] sm:$0xf0]  ;;  %v14477_v17 = vld [vmem:[%s19110_s28 + $0x24] sm:$0xf0]  ;;  %v10812_v19 = vor.u32 %v14599_v2, %v10811_v1 }
  0x8f   : > { %1654 = vmatpush.bf16.msrb.mxu0 %v10764_v24  ;;  %v14595_v13 = vld [vmem:[#allocation5 + $0x3ac] sm:$0xf]  ;;  %v14502_v20 = vld [vmem:[#allocation5 + $0xc4] sm:$0xf]  ;;  %v10429_v21 = vld [vmem:[#allocation5 + $0xcc] sm:$0xf0]  ;;  %v10612_v24 = vor.u32 %v14547_v7, %v10609_v9  ;;  %v10708_v28 = vor.u32 %v14571_v11, %v10705_v12  ;;  %v16394_v33 = vor.u32 %v14477_v17, %v10323_v16 }
  0x90   : > { %1668 = vmatpush.bf16.msrb.mxu1 %v10860_v25  ;;  %v14619_v22 = vld [vmem:[#allocation5 + $0x46c] sm:$0xf]  ;;  %v10897_v25 = vld [vmem:[#allocation5 + $0x474] sm:$0xf0]  ;;  %v14474_v26 = vld [vmem:[%s19110_s28 + $0x14] sm:$0xf]  ;;  %v10804_v29 = vor.u32 %v14595_v13, %v10801_v15  ;;  %v10432_v34 = vor.u32 %v14502_v20, %v10429_v21 }
  0x91   : > { %1682 = vmatpush.bf16.msrb.mxu2 %v10384_v27  ;;  %v10325_v27 = vld [vmem:[%s19110_s28 + $0x28] sm:$0xf0]  ;;  %v14544_v30 = vld [vmem:[#allocation5 + $0x214] sm:$0xf]  ;;  %v10693_v35 = vld [vmem:[#allocation5 + $0x2dc] sm:$0xf0]  ;;  %v10900_v38 = vor.u32 %v14619_v22, %v10897_v25 }
  0x92   : > { %1696 = vmatpush.bf16.msrb.mxu3 %v10480_v31  ;;  %v10597_v31 = vld [vmem:[#allocation5 + $0x21c] sm:$0xf0]  ;;  %v14568_v32 = vld [vmem:[#allocation5 + $0x2d4] sm:$0xf]  ;;  %v14541_v45 = vld [vmem:[#allocation5 + $0x1fc] sm:$0xf] }
  0x93   : > { %1655 = vmatpush.bf16.msrb.mxu0 %v10752_v36  ;;  %v14592_v36 = vld [vmem:[#allocation5 + $0x394] sm:$0xf]  ;;  %v10600_v40 = vor.u32 %v14544_v30, %v10597_v31  ;;  %v10885_v42 = vld [vmem:[#allocation5 + $0x45c] sm:$0xf0]  ;;  %v10585_v46 = vld [vmem:[#allocation5 + $0x204] sm:$0xf0] }
  0x94   : > { %1669 = vmatpush.bf16.msrb.mxu1 %v10848_v37  ;;  %v10789_v37 = vld [vmem:[#allocation5 + $0x39c] sm:$0xf0]  ;;  %v14616_v41 = vld [vmem:[#allocation5 + $0x454] sm:$0xf]  ;;  %v14565_v47 = vld [vmem:[#allocation5 + $0x2bc] sm:$0xf]  ;;  %v10588_v52 = vor.u32 %v14541_v45, %v10585_v46 }
  0x95   : > { %1683 = vmatpush.bf16.msrb.mxu2 %v10372_v39  ;;  %v16396_v39 = vor.u32 %v14474_v26, %v10325_v27  ;;  %v10792_v44 = vor.u32 %v14592_v36, %v10789_v37  ;;  %v10777_v50 = vld [vmem:[#allocation5 + $0x384] sm:$0xf0]  ;;  %v14613_v53 = vld [vmem:[#allocation5 + $0x43c] sm:$0xf]  ;;  %v14538_v58 = vld [vmem:[#allocation5 + $0x1e4] sm:$0xf] }
  0x96   : > { %1697 = vmatpush.bf16.msrb.mxu3 %v10468_v43  ;;  %v10696_v43 = vor.u32 %v14568_v32, %v10693_v35  ;;  %v10873_v54 = vld [vmem:[#allocation5 + $0x444] sm:$0xf0]  ;;  %v10573_v59 = vld [vmem:[#allocation5 + $0x1ec] sm:$0xf0]  ;;  %v14562_v60 = vld [vmem:[#allocation5 + $0x2a4] sm:$0xf] }
  0x97   : > { %1656 = vmatpush.bf16.msrb.mxu0 %v10740_v48  ;;  %v10681_v48 = vld [vmem:[#allocation5 + $0x2c4] sm:$0xf0]  ;;  %v10669_v61 = vld [vmem:[#allocation5 + $0x2ac] sm:$0xf0]  ;;  %v14586_v62 = vld [vmem:[#allocation5 + $0x364] sm:$0xf]  ;;  %v10576_v1 = vor.u32 %v14538_v58, %v10573_v59 }
  0x98   : > { %1670 = vmatpush.bf16.msrb.mxu1 %v10836_v49  ;;  %v14589_v49 = vld [vmem:[#allocation5 + $0x37c] sm:$0xf]  ;;  %v14610_v2 = vld [vmem:[#allocation5 + $0x424] sm:$0xf]  ;;  %v10861_v3 = vld [vmem:[#allocation5 + $0x42c] sm:$0xf0] }
  0x99   : > { %1684 = vmatpush.bf16.msrb.mxu2 %v10360_v51  ;;  %v10888_v51 = vor.u32 %v14616_v41, %v10885_v42  ;;  %v10780_v57 = vor.u32 %v14589_v49, %v10777_v50  ;;  %v14535_v7 = vld [vmem:[#allocation5 + $0x1cc] sm:$0xf]  ;;  %v10561_v9 = vld [vmem:[#allocation5 + $0x1d4] sm:$0xf0]  ;;  %v10864_v15 = vor.u32 %v14610_v2, %v10861_v3  ;;  %v14532_v21 = vld [vmem:[#allocation5 + $0x1b4] sm:$0xf] }
  0x9a   : > { %1698 = vmatpush.bf16.msrb.mxu3 %v10456_v55  ;;  %v10684_v55 = vor.u32 %v14565_v47, %v10681_v48  ;;  %v10657_v11 = vld [vmem:[#allocation5 + $0x294] sm:$0xf0]  ;;  %v14583_v12 = vld [vmem:[#allocation5 + $0x34c] sm:$0xf]  ;;  %v10564_v16 = vor.u32 %v14535_v7, %v10561_v9  ;;  %v10549_v22 = vld [vmem:[#allocation5 + $0x1bc] sm:$0xf0] }
  0x9b   : > { %1657 = vmatpush.bf16.msrb.mxu0 %v10728_v63  ;;  %v10765_v63 = vld [vmem:[#allocation5 + $0x36c] sm:$0xf0]  ;;  %v10753_v13 = vld [vmem:[#allocation5 + $0x354] sm:$0xf0]  ;;  %v14607_v17 = vld [vmem:[#allocation5 + $0x40c] sm:$0xf] }
  0x9c   : > { %1671 = vmatpush.bf16.msrb.mxu1 %v10824_v0  ;;  %v10876_v0 = vor.u32 %v14613_v53, %v10873_v54  ;;  %v10768_v6 = vor.u32 %v14586_v62, %v10765_v63  ;;  %v10756_v20 = vor.u32 %v14583_v12, %v10753_v13  ;;  %v14580_v25 = vld [vmem:[#allocation5 + $0x334] sm:$0xf]  ;;  %v10741_v26 = vld [vmem:[#allocation5 + $0x33c] sm:$0xf0]  ;;  %v10537_v35 = vld [vmem:[#allocation5 + $0x1a4] sm:$0xf0] }
  0x9d   : > { %1685 = vmatpush.bf16.msrb.mxu2 %v10348_v4  ;;  %v10672_v4 = vor.u32 %v14562_v60, %v10669_v61  ;;  %v10837_v30 = vld [vmem:[#allocation5 + $0x3fc] sm:$0xf0]  ;;  %v10744_v32 = vor.u32 %v14580_v25, %v10741_v26  ;;  %v14553_v36 = vld [vmem:[#allocation5 + $0x25c] sm:$0xf]  ;;  %v10633_v37 = vld [vmem:[#allocation5 + $0x264] sm:$0xf0] }
  0x9e   : > { %1699 = vmatpush.bf16.msrb.mxu3 %v10444_v10  ;;  %v14559_v10 = vld [vmem:[#allocation5 + $0x28c] sm:$0xf]  ;;  %v14601_v42 = vld [vmem:[#allocation5 + $0x3dc] sm:$0xf]  ;;  %v14526_v45 = vld [vmem:[#allocation5 + $0x184] sm:$0xf]  ;;  %v10636_v47 = vor.u32 %v14553_v36, %v10633_v37 }
  0x9f   : > { %1658 = vmatpush.bf16.msrb.mxu0 %v10716_v18  ;;  %v10849_v18 = vld [vmem:[#allocation5 + $0x414] sm:$0xf0]  ;;  %v10525_v46 = vld [vmem:[#allocation5 + $0x18c] sm:$0xf0]  ;;  %v14550_v49 = vld [vmem:[#allocation5 + $0x244] sm:$0xf] }
  0xa0   : > { %1672 = vmatpush.bf16.msrb.mxu1 %v10812_v19  ;;  %v10660_v19 = vor.u32 %v14559_v10, %v10657_v11  ;;  %v10852_v27 = vor.u32 %v14607_v17, %v10849_v18  ;;  %v10621_v50 = vld [vmem:[#allocation5 + $0x24c] sm:$0xf0]  ;;  %v14501_v54 = vld [vmem:[#allocation5 + $0xb8] sm:$0xf0]  ;;  %v10528_v60 = vor.u32 %v14526_v45, %v10525_v46  ;;  %v14598_v62 = vld [vmem:[#allocation5 + $0x3c4] sm:$0xf] }
  0xa1   : > { %1686 = vmatpush.bf16.msrb.mxu2 %v10336_v23  ;;  %v14556_v23 = vld [vmem:[#allocation5 + $0x274] sm:$0xf]  ;;  %v10423_v53 = vld [vmem:[#allocation5 + $0xb0] sm:$0xf]  ;;  %v14525_v58 = vld [vmem:[#allocation5 + $0x178] sm:$0xf0] }
  0xa2   : > { %1659 = vmatmul.bf16.vlgmr.msrb.gmra.mxu0 %v16394_v33  ;;  %1700 = vmatpush.bf16.msrb.mxu3 %v10432_v34  ;;  %v14529_v34 = vld [vmem:[#allocation5 + $0x19c] sm:$0xf]  ;;  %v10615_v59 = vld [vmem:[#allocation5 + $0x230] sm:$0xf]  ;;  %v10411_v7 = vld [vmem:[#allocation5 + $0x98] sm:$0xf] }
  0xa3   : > { %1707 = vmatpush.bf16.msra.mxu0 %v10612_v24  ;;  %1673 = vmatmul.bf16.vlgmr.msrb.gmra.mxu1 %v16396_v39  ;;  %v10645_v24 = vld [vmem:[#allocation5 + $0x27c] sm:$0xf0]  ;;  %v14549_v61 = vld [vmem:[#allocation5 + $0x238] sm:$0xf0]  ;;  %v10813_v63 = vld [vmem:[#allocation5 + $0x3cc] sm:$0xf0] }
  0xa4   : > { %1721 = vmatpush.bf16.msra.mxu1 %v10708_v28  ;;  %1687 = vmatmul.bf16.vlgmr.msrb.gmra.mxu2 %v16352_v56  ;;  %v10552_v28 = vor.u32 %v14532_v21, %v10549_v22  ;;  %v10648_v31 = vor.u32 %v14556_v23, %v10645_v24  ;;  %v10711_v2 = vld [vmem:[#allocation5 + $0x2f0] sm:$0xf]  ;;  %v14573_v3 = vld [vmem:[#allocation5 + $0x2f8] sm:$0xf0]  ;;  %v10616_v9 = vor.u32 %v14549_v61, %v10615_v59  ;;  %v14498_v11 = vld [vmem:[#allocation5 + $0xa0] sm:$0xf0] }
  0xa5   : > { %1735 = vmatpush.bf16.msra.mxu2 %v10804_v29  ;;  %1701 = vmatmul.bf16.vlgmr.msrb.gmra.mxu3 %v16364_v5  ;;  %v14604_v29 = vld [vmem:[#allocation5 + $0x3f4] sm:$0xf]  ;;  %v10816_v10 = vor.u32 %v14598_v62, %v10813_v63  ;;  %v10507_v12 = vld [vmem:[#allocation5 + $0x158] sm:$0xf]  ;;  %v14522_v13 = vld [vmem:[#allocation5 + $0x160] sm:$0xf0] }
  0xa6   : > { %1749 = vmatpush.bf16.msra.mxu3 %v10900_v38  ;;  %v14577_v38 = vld [vmem:[#allocation5 + $0x31c] sm:$0xf]  ;;  %v10840_v41 = vor.u32 %v14604_v29, %v10837_v30  ;;  %v14546_v17 = vld [vmem:[#allocation5 + $0x220] sm:$0xf0]  ;;  %v10699_v18 = vld [vmem:[#allocation5 + $0x2d8] sm:$0xf]  ;;  %v10508_v21 = vor.u32 %v14522_v13, %v10507_v12 }
  0xa7   : > { %1708 = vmatpush.bf16.msra.mxu0 %v10600_v40  ;;  %v10729_v40 = vld [vmem:[#allocation5 + $0x324] sm:$0xf0]  ;;  %v10399_v22 = vld [vmem:[#allocation5 + $0x80] sm:$0xf]  ;;  %v14495_v24 = vld [vmem:[#allocation5 + $0x88] sm:$0xf0] }
  0xa8   : > { %1722 = vmatpush.bf16.msra.mxu1 %v10696_v43  ;;  %v10540_v43 = vor.u32 %v14529_v34, %v10537_v35  ;;  %v10732_v48 = vor.u32 %v14577_v38, %v10729_v40  ;;  %v10495_v25 = vld [vmem:[#allocation5 + $0x140] sm:$0xf]  ;;  %v14519_v26 = vld [vmem:[#allocation5 + $0x148] sm:$0xf0]  ;;  %v10387_v35 = vld [vmem:[#allocation5 + $0x68] sm:$0xf] }
  0xa9   : > { %1736 = vmatpush.bf16.msra.mxu2 %v10792_v44  ;;  %v10825_v44 = vld [vmem:[#allocation5 + $0x3e4] sm:$0xf0]  ;;  %v14543_v29 = vld [vmem:[#allocation5 + $0x208] sm:$0xf0]  ;;  %v10687_v30 = vld [vmem:[#allocation5 + $0x2c0] sm:$0xf]  ;;  %v10496_v34 = vor.u32 %v14519_v26, %v10495_v25 }
  0xaa   : > { %1750 = vmatpush.bf16.msra.mxu3 %v10888_v51  ;;  %v14574_v51 = vld [vmem:[#allocation5 + $0x304] sm:$0xf]  ;;  %v14492_v37 = vld [vmem:[#allocation5 + $0x70] sm:$0xf0]  ;;  %v10483_v38 = vld [vmem:[#allocation5 + $0x128] sm:$0xf] }
  0xab   : > { %1709 = vmatpush.bf16.msra.mxu0 %v10588_v52  ;;  %v10717_v52 = vld [vmem:[#allocation5 + $0x30c] sm:$0xf0]  ;;  %v14516_v40 = vld [vmem:[#allocation5 + $0x130] sm:$0xf0]  ;;  %v10388_v46 = vor.u32 %v14492_v37, %v10387_v35  ;;  %v10363_v61 = vld [vmem:[#allocation5 + $0x38] sm:$0xf] }
  0xac   : > { %1723 = vmatpush.bf16.msra.mxu1 %v10684_v55  ;;  %v10828_v55 = vor.u32 %v14601_v42, %v10825_v44  ;;  %v10579_v42 = vld [vmem:[#allocation5 + $0x1e8] sm:$0xf]  ;;  %v14564_v45 = vld [vmem:[#allocation5 + $0x2b0] sm:$0xf0]  ;;  %v14486_v63 = vld [vmem:[#allocation5 + $0x40] sm:$0xf0] }
  0xad   : > { %1737 = vmatpush.bf16.msra.mxu2 %v10780_v57  ;;  %v10519_v57 = vld [vmem:[#allocation5 + $0x170] sm:$0xf]  ;;  %v10675_v44 = vld [vmem:[#allocation5 + $0x2a8] sm:$0xf]  ;;  %v14483_v13 = vld [vmem:[#allocation5 + $0x28] sm:$0xf0] }
  0xae   : > { %1751 = vmatpush.bf16.msra.mxu3 %v10876_v0  ;;  %v10624_v0 = vor.u32 %v14550_v49, %v10621_v50  ;;  %v14489_v50 = vld [vmem:[#allocation5 + $0x58] sm:$0xf0]  ;;  %v14480_v25 = vld [vmem:[#allocation5 + $0x10] sm:$0xf0]  ;;  %v10435_v26 = vld [vmem:[#allocation5 + $0xc8] sm:$0xf] }
  0xaf   : > { %1710 = vmatpush.bf16.msra.mxu0 %v10576_v1  ;;  %v10720_v1 = vor.u32 %v14574_v51, %v10717_v52  ;;  %v10471_v51 = vld [vmem:[#allocation5 + $0x110] sm:$0xf]  ;;  %v14513_v52 = vld [vmem:[#allocation5 + $0x118] sm:$0xf0]  ;;  %v10627_v37 = vld [vmem:[#allocation5 + $0x248] sm:$0xf] }
  0xb0   : > { %1724 = vmatpush.bf16.msra.mxu1 %v10672_v4  ;;  %v10424_v4 = vor.u32 %v14501_v54, %v10423_v53  ;;  %v10676_v53 = vor.u32 %v14564_v45, %v10675_v44  ;;  %v10567_v54 = vld [vmem:[#allocation5 + $0x1d0] sm:$0xf]  ;;  %vm1907_vm4 = vcmask 130048  }
  0xb1   : > { %1738 = vmatpush.bf16.msra.mxu2 %v10768_v6  ;;  %v10520_v6 = vor.u32 %v14525_v58, %v10519_v57  ;;  %v10663_v57 = vld [vmem:[#allocation5 + $0x290] sm:$0xf]  ;;  %v14561_v58 = vld [vmem:[#allocation5 + $0x298] sm:$0xf0] }
  0xb2   : > { %1752 = vmatpush.bf16.msra.mxu3 %v10864_v15  ;;  %v10712_v15 = vor.u32 %v14573_v3, %v10711_v2  ;;  %v10664_v2 = vor.u32 %v14561_v58, %v10663_v57  ;;  %v10555_v3 = vld [vmem:[#allocation5 + $0x1b8] sm:$0xf]  ;;  %v10903_v35 = vld [vmem:[#allocation5 + $0x470] sm:$0xf] }
  0xb3   : > { %1711 = vmatpush.bf16.msra.mxu0 %v10564_v16  ;;  %v10603_v16 = vld [vmem:[#allocation5 + $0x218] sm:$0xf] }
  0xb4   : > { %1725 = vmatpush.bf16.msra.mxu1 %v10660_v19  ;;  %v14570_v19 = vld [vmem:[#allocation5 + $0x2e0] sm:$0xf0]  ;;  %v10604_v23 = vor.u32 %v14546_v17, %v10603_v16  ;;  %v14507_v16 = vld [vmem:[#allocation5 + $0xe8] sm:$0xf0] }
  0xb5   : > { %1739 = vmatpush.bf16.msra.mxu2 %v10756_v20  ;;  %v10412_v20 = vor.u32 %v14498_v11, %v10411_v7  ;;  %v14558_v7 = vld [vmem:[#allocation5 + $0x280] sm:$0xf0]  ;;  %v10351_v11 = vld [vmem:[#allocation5 + $0x20] sm:$0xf] }
  0xb6   : > { %1753 = vmatpush.bf16.msra.mxu3 %v10852_v27  ;;  %v10700_v27 = vor.u32 %v14570_v19, %v10699_v18  ;;  %v10543_v18 = vld [vmem:[#allocation5 + $0x1a0] sm:$0xf]  ;;  %v14531_v19 = vld [vmem:[#allocation5 + $0x1a8] sm:$0xf0] }
  0xb7   : > { %1712 = vmatpush.bf16.msra.mxu0 %v10552_v28  ;;  %v10591_v28 = vld [vmem:[#allocation5 + $0x200] sm:$0xf] }
  0xb8   : > { %1726 = vmatpush.bf16.msra.mxu1 %v10648_v31  ;;  %v14567_v31 = vld [vmem:[#allocation5 + $0x2c8] sm:$0xf0]  ;;  %v10592_v36 = vor.u32 %v14543_v29, %v10591_v28  ;;  %v14504_v28 = vld [vmem:[#allocation5 + $0xd0] sm:$0xf0]  ;;  %v10531_v29 = vld [vmem:[#allocation5 + $0x188] sm:$0xf] }
  0xb9   : > { %1740 = vmatpush.bf16.msra.mxu2 %v10744_v32  ;;  %v10400_v32 = vor.u32 %v14495_v24, %v10399_v22  ;;  %v10352_v22 = vor.u32 %v14483_v13, %v10351_v11  ;;  %v10339_v24 = vld [vmem:[#allocation5 + $0x8] sm:$0xf]  ;;  %v10735_v11 = vld [vmem:[#allocation5 + $0x320] sm:$0xf] }
  0xba   : > { %1754 = vmatpush.bf16.msra.mxu3 %v10840_v41  ;;  %v10688_v41 = vor.u32 %v14567_v31, %v10687_v30  ;;  %v14528_v30 = vld [vmem:[#allocation5 + $0x190] sm:$0xf0]  ;;  %v10831_v13 = vld [vmem:[#allocation5 + $0x3e0] sm:$0xf] }
  0xbb   : > { %1713 = vmatpush.bf16.msra.mxu0 %v10540_v43  ;;  %v14540_v43 = vld [vmem:[#allocation5 + $0x1f0] sm:$0xf0] }
  0xbc   : > { %1727 = vmatpush.bf16.msra.mxu1 %v10636_v47  ;;  %v10484_v47 = vor.u32 %v14516_v40, %v10483_v38  ;;  %v10580_v49 = vor.u32 %v14540_v43, %v10579_v42  ;;  %v14552_v38 = vld [vmem:[#allocation5 + $0x250] sm:$0xf0]  ;;  %v10340_v40 = vor.u32 %v14480_v25, %v10339_v24  ;;  %v10532_v42 = vor.u32 %v14528_v30, %v10531_v29 }
  0xbd   : > { %1741 = vmatpush.bf16.msra.mxu2 %v10732_v48  ;;  %v10375_v48 = vld [vmem:[#allocation5 + $0x50] sm:$0xf]  ;;  %v10628_v45 = vor.u32 %v14552_v38, %v10627_v37 }
  0xbe   : > { %1755 = vmatpush.bf16.msra.mxu3 %v10828_v55  ;;  %v14537_v55 = vld [vmem:[#allocation5 + $0x1d8] sm:$0xf0]  ;;  %v10376_v59 = vor.u32 %v14489_v50, %v10375_v48  ;;  %v10891_v48 = vld [vmem:[#allocation5 + $0x458] sm:$0xf] }
  0xbf   : > { %1714 = vmatpush.bf16.msra.mxu0 %v10528_v60  ;;  %v10472_v60 = vor.u32 %v14513_v52, %v10471_v51  ;;  %v10568_v62 = vor.u32 %v14537_v55, %v10567_v54  ;;  %v10783_v52 = vld [vmem:[#allocation5 + $0x380] sm:$0xf]  ;;  %v14615_v55 = vld [vmem:[#allocation5 + $0x448] sm:$0xf0] }
  0xc0   : > { %1728 = vmatpush.bf16.msra.mxu1 %v10624_v0  ;;  %v10459_v0 = vld [vmem:[#allocation5 + $0xf8] sm:$0xf]  ;;  %v10879_v54 = vld [vmem:[#allocation5 + $0x440] sm:$0xf] }
  0xc1   : > { %1742 = vmatpush.bf16.msra.mxu2 %v10720_v1  ;;  %v14510_v1 = vld [vmem:[#allocation5 + $0x100] sm:$0xf0]  ;;  %v10880_v58 = vor.u32 %v14615_v55, %v10879_v54 }
  0xc2   : > { %1756 = vmatpush.bf16.msra.mxu3 %v10816_v10  ;;  %1715 = vmatmul.bf16.vlgmr.msra.gmra.mxu0 %v16369_v8  ;;  %v10460_v10 = vor.u32 %v14510_v1, %v10459_v0  ;;  %v10759_v0 = vld [vmem:[#allocation5 + $0x350] sm:$0xf] }
  0xc3   : > { %1763 = vmatpush.bf16.msrb.mxu0 %v10424_v4  ;;  %1729 = vmatmul.bf16.vlgmr.msra.gmra.mxu1 %v16377_v14  ;;  %v14534_v4 = vld [vmem:[#allocation5 + $0x1c0] sm:$0xf0]  ;;  %v10855_v1 = vld [vmem:[#allocation5 + $0x410] sm:$0xf] }
  0xc4   : > { %1777 = vmatpush.bf16.msrb.mxu1 %v10520_v6  ;;  %1743 = vmatmul.bf16.vlgmr.msra.gmra.mxu2 %v16394_v33  ;;  %v10651_v6 = vld [vmem:[#allocation5 + $0x278] sm:$0xf]  ;;  %v10556_v12 = vor.u32 %v14534_v4, %v10555_v3  ;;  %v14582_v4 = vld [vmem:[#allocation5 + $0x340] sm:$0xf0] }
  0xc5   : > { %1791 = vmatpush.bf16.msrb.mxu2 %v10616_v9  ;;  %1757 = vmatmul.bf16.vlgmr.msra.gmra.mxu3 %v16396_v39  ;;  %v10364_v9 = vor.u32 %v14486_v63, %v10363_v61  ;;  %v10652_v17 = vor.u32 %v14558_v7, %v10651_v6  ;;  %v10867_v61 = vld [vmem:[#allocation5 + $0x428] sm:$0xf]  ;;  %v10843_v6 = vld [vmem:[#allocation5 + $0x3f8] sm:$0xf]  ;;  %v14606_v7 = vld [vmem:[#allocation5 + $0x400] sm:$0xf0] }
  0xc6   : > { %1805 = vmatpush.bf16.msrb.mxu3 %v10712_v15  ;;  %v10447_v15 = vld [vmem:[#allocation5 + $0xe0] sm:$0xf] }
  0xc7   : > { %1764 = vmatpush.bf16.msrb.mxu0 %v10412_v20  ;;  %v10639_v20 = vld [vmem:[#allocation5 + $0x260] sm:$0xf] }
  0xc8   : > { %1778 = vmatpush.bf16.msrb.mxu1 %v10508_v21  ;;  %v14555_v21 = vld [vmem:[#allocation5 + $0x268] sm:$0xf0] }
  0xc9   : > { %1792 = vmatpush.bf16.msrb.mxu2 %v10604_v23  ;;  %v10448_v23 = vor.u32 %v14507_v16, %v10447_v15  ;;  %v10640_v31 = vor.u32 %v14555_v21, %v10639_v20  ;;  %v14603_v15 = vld [vmem:[#allocation5 + $0x3e8] sm:$0xf0]  ;;  %v10819_v20 = vld [vmem:[#allocation5 + $0x3c8] sm:$0xf]  ;;  %v14600_v21 = vld [vmem:[#allocation5 + $0x3d0] sm:$0xf0] }
  0xca   : > { %1806 = vmatpush.bf16.msrb.mxu3 %v10700_v27  ;;  %v10544_v27 = vor.u32 %v14531_v19, %v10543_v18  ;;  %v10723_v18 = vld [vmem:[#allocation5 + $0x308] sm:$0xf]  ;;  %v14576_v19 = vld [vmem:[#allocation5 + $0x310] sm:$0xf0] }
  0xcb   : > { %1765 = vmatpush.bf16.msrb.mxu0 %v10400_v32  ;;  %v10807_v32 = vld [vmem:[#allocation5 + $0x3b0] sm:$0xf] }
  0xcc   : > { %1779 = vmatpush.bf16.msrb.mxu1 %v10496_v34  ;;  %v14597_v34 = vld [vmem:[#allocation5 + $0x3b8] sm:$0xf0] }
  0xcd   : > { %1793 = vmatpush.bf16.msrb.mxu2 %v10592_v36  ;;  %v14621_v36 = vld [vmem:[#allocation5 + $0x478] sm:$0xf0]  ;;  %v10808_v43 = vor.u32 %v14597_v34, %v10807_v32 }
  0xce   : > { %1807 = vmatpush.bf16.msrb.mxu3 %v10688_v41  ;;  %v10436_v41 = vor.u32 %v14504_v28, %v10435_v26  ;;  %v10904_v44 = vor.u32 %v14621_v36, %v10903_v35 }
  0xcf   : > { %1766 = vmatpush.bf16.msrb.mxu0 %v10388_v46  ;;  %v10795_v46 = vld [vmem:[#allocation5 + $0x398] sm:$0xf] }
  0xd0   : > { %1780 = vmatpush.bf16.msrb.mxu1 %v10484_v47  ;;  %v14594_v47 = vld [vmem:[#allocation5 + $0x3a0] sm:$0xf0] }
  0xd1   : > { %1794 = vmatpush.bf16.msrb.mxu2 %v10580_v49  ;;  %v14618_v49 = vld [vmem:[#allocation5 + $0x460] sm:$0xf0]  ;;  %v10796_v50 = vor.u32 %v14594_v47, %v10795_v46  ;;  %v596_v47 = vld [vmem:[%s19112_s2 + $0x18] sm:$0xff] }
  0xd2   : > { %1808 = vmatpush.bf16.msrb.mxu3 %v10676_v53  ;;  %v10892_v51 = vor.u32 %v14618_v49, %v10891_v48  ;;  %v14591_v53 = vld [vmem:[#allocation5 + $0x388] sm:$0xf0] }
  0xd3   : > { %1767 = vmatpush.bf16.msrb.mxu0 %v10376_v59  ;;  %v10784_v57 = vor.u32 %v14591_v53, %v10783_v52  ;;  %v10771_v59 = vld [vmem:[#allocation5 + $0x368] sm:$0xf] }
  0xd4   : > { %1781 = vmatpush.bf16.msrb.mxu1 %v10472_v60  ;;  %v14588_v60 = vld [vmem:[#allocation5 + $0x370] sm:$0xf0] }
  0xd5   : > { %1795 = vmatpush.bf16.msrb.mxu2 %v10568_v62  ;;  %v14612_v62 = vld [vmem:[#allocation5 + $0x430] sm:$0xf0]  ;;  %v10772_v63 = vor.u32 %v14588_v60, %v10771_v59 }
  0xd6   : > { %1809 = vmatpush.bf16.msrb.mxu3 %v10664_v2  ;;  %v14609_v2 = vld [vmem:[#allocation5 + $0x418] sm:$0xf0] }
  0xd7   : > { %1768 = vmatpush.bf16.msrb.mxu0 %v10364_v9  ;;  %v10856_v3 = vor.u32 %v14609_v2, %v10855_v1 }
  0xd8   : > { %1782 = vmatpush.bf16.msrb.mxu1 %v10460_v10  ;;  %v10844_v10 = vor.u32 %v14606_v7, %v10843_v6  ;;  %v597_v6 = vld [vmem:[%s19112_s2 + $0x20] sm:$0xff] }
  0xd9   : > { %1796 = vmatpush.bf16.msrb.mxu2 %v10556_v12  ;;  %v14579_v12 = vld [vmem:[#allocation5 + $0x328] sm:$0xf0] }
  0xda   : > { %1810 = vmatpush.bf16.msrb.mxu3 %v10652_v17  ;;  %v10736_v16 = vor.u32 %v14579_v12, %v10735_v11  ;;  %v10832_v17 = vor.u32 %v14603_v15, %v10831_v13  ;;  %v1859_v11 = vlaneseq }
  0xdb   : > { %1769 = vmatpush.bf16.msrb.mxu0 %v10352_v22  ;;  %v10724_v22 = vor.u32 %v14576_v19, %v10723_v18 }
  0xdc   : > { %1783 = vmatpush.bf16.msrb.mxu1 %v10448_v23  ;;  %v10820_v23 = vor.u32 %v14600_v21, %v10819_v20  ;;  %v1860_v12 = vshrl.u32 %v1859_v11, 7  ;;  %v1863_v15 = vand.u32 127, %v1859_v11  ;;  %v16116_v21 = vmov -1e+30  }
  0xdd   : > { %1797 = vmatpush.bf16.msrb.mxu2 %v10544_v27 }
  0xde   : > { %1811 = vmatpush.bf16.msrb.mxu3 %v10640_v31  ;;  %v1861_v13 = vadd.s32 8, %v1860_v12  ;;  %v1892_v18 = vand.u32 1, %v1863_v15  ;;  %vm1902_vm2 = vcmp.lt.s32.totalorder %v1863_v15, 10 }
  0xdf   : > { %1770 = vmatpush.bf16.msrb.mxu0 %v10340_v40 }
  0xe0   : > { %1784 = vmatpush.bf16.msrb.mxu1 %v10436_v41 }
  0xe1   : > { %1798 = vmatpush.bf16.msrb.mxu2 %v10532_v42 }
  0xe2   : > { %1812 = vmatpush.bf16.msrb.mxu3 %v10628_v45  ;;  %1771 = vmatmul.bf16.vlgmr.msrb.gmra.mxu0 %v16352_v56  ;;  %v10868_v56 = vor.u32 %v14612_v62, %v10867_v61 }
  0xe3   : > { %1819 = vmatpush.bf16.msra.mxu0 %v10808_v43  ;;  %1785 = vmatmul.bf16.vlgmr.msrb.gmra.mxu1 %v16364_v5  ;;  %v14585_v5 = vld [vmem:[#allocation5 + $0x358] sm:$0xf0] }
  0xe4   : > { %1833 = vmatpush.bf16.msra.mxu1 %v10904_v44  ;;  %1799 = vmatmul.bf16.vlgmr.msrb.gmra.mxu2 %v16369_v8  ;;  %v10760_v8 = vor.u32 %v14585_v5, %v10759_v0 }
  0xe5   : > { %1813 = vmatmul.bf16.vlgmr.msrb.gmra.mxu3 %v16377_v14  ;;  %v10747_v14 = vld [vmem:[#allocation5 + $0x338] sm:$0xf] }
  0xe6   : > { %v10748_v9 = vor.u32 %v14582_v4, %v10747_v14 }
  0xe7   : > { %1820 = vmatpush.bf16.msra.mxu0 %v10796_v50 }
  0xe8   : > { %1834 = vmatpush.bf16.msra.mxu1 %v10892_v51 }
  0xeb   : > { %1821 = vmatpush.bf16.msra.mxu0 %v10784_v57 }
  0xec   : > { %1835 = vmatpush.bf16.msra.mxu1 %v10880_v58 }
  0xef   : > { %1822 = vmatpush.bf16.msra.mxu0 %v10772_v63  ;;  %v594_v63 = vld [vmem:[%s19112_s2 + $0x8] sm:$0xff] }
  0xf0   : > { %1836 = vmatpush.bf16.msra.mxu1 %v10868_v56 }
  0xf3   : > { %1823 = vmatpush.bf16.msra.mxu0 %v10760_v8 }
  0xf4   : > { %1837 = vmatpush.bf16.msra.mxu1 %v10856_v3 }
  0xf7   : > { %1824 = vmatpush.bf16.msra.mxu0 %v10748_v9 }
  0xf8   : > { %1838 = vmatpush.bf16.msra.mxu1 %v10844_v10 }
  0xfb   : > { %1825 = vmatpush.bf16.msra.mxu0 %v10736_v16  ;;  %v1868_v16 = vand.u32 1, %v1860_v12 }
  0xfc   : > { %1839 = vmatpush.bf16.msra.mxu1 %v10832_v17  ;;  %v1875_v17 = vand.u32 1, %v1861_v13 }
  0xfd   : > { %vm1900_vm0 = vcmp.eq.s32.totalorder %v1868_v16, %v1892_v18 }
  0xfe   : > { %vm1901_vm1 = vcmp.eq.s32.totalorder %v1875_v17, %v1892_v18  ;;  %vm1903_vm3 = vmand %vm1900_vm0, %vm1902_vm2 }
  0xff   : > { %1826 = vmatpush.bf16.msra.mxu0 %v10724_v22  ;;  %v1604_v24 = vpop.f32.mrf.mxu0  ;;  %vm1904_vm5 = vmand %vm1901_vm1, %vm1902_vm2  ;;  %v1905_v22 = vsel %vm1903_vm3, 0.0, %v16116_v21 }
 0x100   : > { %1840 = vmatpush.bf16.msra.mxu1 %v10820_v23  ;;  %v1618_v25 = vpop.f32.mrf.mxu1  ;;  %v1906_v23 = vsel %vm1904_vm5, 0.0, %v16116_v21  ;;  %1908 = vst.msk [vmem:[#allocation4] sm:$0xff] %vm1907_vm4, %v1905_v22 }
 0x101   : > { %v1619_v26 = vadd.f32 %v1618_v25, %v1604_v24  ;;  %1909 = vst.msk [vmem:[#allocation4 + $0x8] sm:$0xff] %vm1907_vm4, %v1906_v23 }
 0x102   : > { %1827 = vmatmul.bf16.vlgmr.msra.gmra.mxu0 %v16394_v33  ;;  %v593_v33 = vld [vmem:[%s19111_s18] sm:$0xff] }
 0x103   : > { %1841 = vmatmul.bf16.vlgmr.msra.gmra.mxu1 %v16396_v39 }
 0x107   : > { %v1606_v27 = vpop.f32.mrf.mxu0  ;;  %v1632_v28 = vpop.f32.mrf.mxu2 }
 0x108   : > { %v1620_v29 = vpop.f32.mrf.mxu1  ;;  %v1633_v30 = vadd.f32 %v1632_v28, %v1619_v26  ;;  %v1646_v31 = vpop.f32.mrf.mxu3 }
 0x109   : > { %v1621_v34 = vadd.f32 %v1620_v29, %v1606_v27 }
 0x10a   : > { %v1647_v32 = vadd.f32 %v1646_v31, %v1633_v30 }
 0x10f   : > { %v1634_v35 = vpop.f32.mrf.mxu2 }
 0x110   : > { %v1635_v40 = vadd.f32 %v1634_v35, %v1621_v34  ;;  %v1648_v41 = vpop.f32.mrf.mxu3 }
 0x112   : > { %v1649_v43 = vadd.f32 %v1648_v41, %v1635_v40 }
 0x11f   : > { %v1660_v36 = vpop.f32.mrf.mxu0 }
 0x120   : > { %v1661_v37 = vadd.f32 %v1660_v36, %v1647_v32  ;;  %v1674_v38 = vpop.f32.mrf.mxu1 }
 0x122   : > { %v1675_v39 = vadd.f32 %v1674_v38, %v1661_v37  ;;  %v595_v37 = vld [vmem:[%s19112_s2 + $0x10] sm:$0xff] }
 0x124   : > { %v1847_v42 = vadd.f32 %v1675_v39, %v593_v33 }
 0x126   : > { %1853 = vst [vmem:[#allocation2 + $0x28] sm:$0xff] %v1847_v42 }
 0x127   : > { %v1662_v44 = vpop.f32.mrf.mxu0  ;;  %v1688_v50 = vpop.f32.mrf.mxu2 }
 0x128   : > { %v1663_v45 = vadd.f32 %v1662_v44, %v1649_v43  ;;  %v1676_v46 = vpop.f32.mrf.mxu1  ;;  %v1702_v51 = vpop.f32.mrf.mxu3  ;;  %v598_v44 = vld [vmem:[%s19112_s2 + $0x28] sm:$0xff] }
 0x129   : > { %v1703_v53 = vadd.f32 %v1702_v51, %v1688_v50 }
 0x12a   : > { %v1677_v48 = vadd.f32 %v1676_v46, %v1663_v45 }
 0x12c   : > { %v1850_v49 = vadd.f32 %v1677_v48, %v596_v47 }
 0x12e   : > { %1856 = vst [vmem:[#allocation2] sm:$0xff] %v1850_v49 }
 0x12f   : > { %v1690_v52 = vpop.f32.mrf.mxu2 }
 0x130   : > { %v1704_v54 = vpop.f32.mrf.mxu3 }
 0x131   : > { %v1705_v60 = vadd.f32 %v1704_v54, %v1690_v52 }
 0x13f   : > { %v1716_v55 = vpop.f32.mrf.mxu0 }
 0x140   : > { %v1730_v57 = vpop.f32.mrf.mxu1  ;;  %v1717_v58 = vadd.f32 %v1716_v55, %v1703_v53 }
 0x142   : > { %v1731_v59 = vadd.f32 %v1730_v57, %v1717_v58 }
 0x147   : > { %v1744_v61 = vpop.f32.mrf.mxu2  ;;  %v1718_v0 = vpop.f32.mrf.mxu0 }
 0x148   : > { %v1745_v62 = vadd.f32 %v1744_v61, %v1731_v59  ;;  %v1758_v56 = vpop.f32.mrf.mxu3  ;;  %v1719_v1 = vadd.f32 %v1718_v0, %v1705_v60  ;;  %v1732_v2 = vpop.f32.mrf.mxu1 }
 0x14a   : > { %v1759_v5 = vadd.f32 %v1758_v56, %v1745_v62  ;;  %v1733_v3 = vadd.f32 %v1732_v2, %v1719_v1 }
 0x14c   : > { %v1848_v8 = vadd.f32 %v1759_v5, %v594_v63 }
 0x14e   : > { %1854 = vst [vmem:[#allocation2 + $0x10] sm:$0xff] %v1848_v8 }
 0x14f   : > { %v1746_v14 = vpop.f32.mrf.mxu2 }
 0x150   : > { %v1747_v4 = vadd.f32 %v1746_v14, %v1733_v3  ;;  %v1760_v7 = vpop.f32.mrf.mxu3 }
 0x152   : > { %v1761_v9 = vadd.f32 %v1760_v7, %v1747_v4 }
 0x154   : > { %v1851_v10 = vadd.f32 %v1761_v9, %v597_v6 }
 0x156   : > { %1857 = vst [vmem:[#allocation2 + $0x18] sm:$0xff] %v1851_v10 }
 0x15f   : > { %v1772_v19 = vpop.f32.mrf.mxu0 }
 0x160   : > { %v1786_v20 = vpop.f32.mrf.mxu1 }
 0x161   : > { %v1787_v25 = vadd.f32 %v1786_v20, %v1772_v19 }
 0x167   : > { %v1800_v24 = vpop.f32.mrf.mxu2  ;;  %v1774_v26 = vpop.f32.mrf.mxu0 }
 0x168   : > { %v1788_v27 = vpop.f32.mrf.mxu1  ;;  %v1814_v28 = vpop.f32.mrf.mxu3  ;;  %v1801_v29 = vadd.f32 %v1800_v24, %v1787_v25 }
 0x169   : > { %v1789_v31 = vadd.f32 %v1788_v27, %v1774_v26 }
 0x16a   : > { %v1815_v30 = vadd.f32 %v1814_v28, %v1801_v29 }
 0x16f   : > { %v1802_v32 = vpop.f32.mrf.mxu2 }
 0x170   : > { %v1803_v38 = vadd.f32 %v1802_v32, %v1789_v31  ;;  %v1816_v40 = vpop.f32.mrf.mxu3 }
 0x172   : > { %v1817_v41 = vadd.f32 %v1816_v40, %v1803_v38 }
 0x17f   : > { %v1828_v34 = vpop.f32.mrf.mxu0 }
 0x180   : > { %v1829_v35 = vadd.f32 %v1828_v34, %v1815_v30  ;;  %v1842_v36 = vpop.f32.mrf.mxu1 }
 0x182   : > { %v1843_v33 = vadd.f32 %v1842_v36, %v1829_v35 }
 0x184   : > { %v1849_v39 = vadd.f32 %v1843_v33, %v595_v37 }
 0x186   : > { %1855 = vst [vmem:[#allocation2 + $0x8] sm:$0xff] %v1849_v39 }
 0x187   : > { %v1830_v42 = vpop.f32.mrf.mxu0 }
 0x188   : > { %v1831_v43 = vadd.f32 %v1830_v42, %v1817_v41  ;;  %v1844_v45 = vpop.f32.mrf.mxu1 }
 0x18a   : > { %v1845_v46 = vadd.f32 %v1844_v45, %v1831_v43 }
 0x18c   : > { %v1852_v47 = vadd.f32 %v1845_v46, %v598_v44 }
 0x18e   : > { %1858 = vst [vmem:[#allocation2 + $0x20] sm:$0xff] %v1852_v47 }
 0x18f PF: > { %v16430_v48 = vld [vmem:[#allocation2 + $0x28] sm:$0xff]  ;;  %v16432_v49 = vld [vmem:[#allocation2 + $0x10] sm:$0xff]  ;;  %v16438_v52 = vld [vmem:[#allocation2] sm:$0xff]  ;;  %v16117_v59 = vmov 384.0   ;;  %vm3816_vm14 = vcmask 130048  }
 0x190   : > { %v16434_v50 = vld [vmem:[#allocation2 + $0x8] sm:$0xff]  ;;  %v1931_v51 = vadd.f32 %v16432_v49, %v16430_v48  ;;  %v16440_v53 = vld [vmem:[#allocation2 + $0x18] sm:$0xff]  ;;  %15650 = vrcp.f32 %v16117_v59  ;;  %v14685_v4 = vld [vmem:[%s16329_s11 + $0x544] sm:$0xf] }
 0x191   : > { %v1935_v55 = vadd.f32 %v16440_v53, %v16438_v52  ;;  %v11162_v63 = vld [vmem:[%s16329_s11 + $0x540] sm:$0xf]  ;;  %v11164_v6 = vld [vmem:[%s16329_s11 + $0x5a0] sm:$0xf0] }
 0x192   : > { %v1932_v54 = vadd.f32 %v1931_v51, %v16434_v50  ;;  %v14689_v56 = vld [vmem:[%s16329_s11 + $0x59c] sm:$0xf0]  ;;  %v11167_v10 = vor.u32 %v14685_v4, %v11164_v6  ;;  %v14676_v19 = vld [vmem:[%s16329_s11 + $0x484] sm:$0xf] }
 0x193   : > { %v11450_v0 = vld [vmem:[%s16329_s11 + $0xb40] sm:$0xf]  ;;  %v11163_v5 = vor.u32 %v14689_v56, %v11162_v63  ;;  %v11128_v21 = vld [vmem:[%s16329_s11 + $0x4e0] sm:$0xf0] }
 0x194   : > { %1933 = vadd.xlane.f32.xlu0 %v1932_v54  ;;  %v14761_v1 = vld [vmem:[%s16329_s11 + $0xb9c] sm:$0xf0]  ;;  %3433 = vmatpush.bf16.msra.mxu3 %v11167_v10  ;;  %v11131_v24 = vor.u32 %v14676_v19, %v11128_v21  ;;  %v14667_v31 = vld [vmem:[%s16329_s11 + $0x3c4] sm:$0xf] }
 0x195   : > { %v16445_v57 = vld [vmem:[#allocation2 + $0x20] sm:$0xff]  ;;  %v11738_v2 = vld [vmem:[%s16329_s11 + $0x1140] sm:$0xf]  ;;  %v11451_v3 = vor.u32 %v14761_v1, %v11450_v0  ;;  %3391 = vmatpush.bf16.msra.mxu0 %v11163_v5  ;;  %v11092_v32 = vld [vmem:[%s16329_s11 + $0x420] sm:$0xf0] }
 0x196   : > { %v1936_v58 = vadd.f32 %v1935_v55, %v16445_v57  ;;  %v15651_v60 = vpop.eup %15650  ;;  %v14833_v8 = vld [vmem:[%s16329_s11 + $0x119c] sm:$0xf0]  ;;  %v11095_v33 = vor.u32 %v14667_v31, %v11092_v32  ;;  %v14658_v42 = vld [vmem:[%s16329_s11 + $0x304] sm:$0xf] }
 0x197   : > { %v1940_v61 = vmul.f32 384.0, %v15651_v60  ;;  %v11739_v14 = vor.u32 %v14833_v8, %v11738_v2  ;;  %v11126_v7 = vld [vmem:[%s16329_s11 + $0x480] sm:$0xf]  ;;  %3405 = vmatpush.bf16.msra.mxu1 %v11451_v3  ;;  %vm1944_vm6 = vweird.f32 %v15651_v60  ;;  %v11056_v43 = vld [vmem:[%s16329_s11 + $0x360] sm:$0xf0] }
 0x198   : > { %v14680_v11 = vld [vmem:[%s16329_s11 + $0x4dc] sm:$0xf0]  ;;  %3434 = vmatpush.bf16.msra.mxu3 %v11131_v24  ;;  %v11059_v63 = vor.u32 %v14658_v42, %v11056_v43  ;;  %v14649_v56 = vld [vmem:[%s16329_s11 + $0x244] sm:$0xf] }
 0x199   : > { %v1941_v62 = vsub.f32 1.0, %v1940_v61  ;;  %v11414_v12 = vld [vmem:[%s16329_s11 + $0xa80] sm:$0xf]  ;;  %3419 = vmatpush.bf16.msra.mxu2 %v11739_v14  ;;  %v11127_v15 = vor.u32 %v14680_v11, %v11126_v7  ;;  %v11020_v0 = vld [vmem:[%s16329_s11 + $0x2a0] sm:$0xf0] }
 0x19a   : > { %v14752_v13 = vld [vmem:[%s16329_s11 + $0xadc] sm:$0xf0]  ;;  %v11023_v4 = vor.u32 %v14649_v56, %v11020_v0  ;;  %v11740_v56 = vld [vmem:[%s16329_s11 + $0x11a0] sm:$0xf0] }
 0x19b   : > { %v1942_v9 = vmul.f32 %v15651_v60, %v1941_v62  ;;  %v11415_v16 = vor.u32 %v14752_v13, %v11414_v12  ;;  %v11702_v17 = vld [vmem:[%s16329_s11 + $0x1080] sm:$0xf]  ;;  %3392 = vmatpush.bf16.msra.mxu0 %v11127_v15 }
 0x19c   : > { %1937 = vadd.xlane.f32.xlu0 %v1936_v58  ;;  %v14824_v18 = vld [vmem:[%s16329_s11 + $0x10dc] sm:$0xf0]  ;;  %3435 = vmatpush.bf16.msra.mxu3 %v11095_v33  ;;  %v14631_v33 = vld [vmem:[%s16329_s11 + $0xc4] sm:$0xf] }
 0x19d   : > { %v11703_v20 = vor.u32 %v14824_v18, %v11702_v17  ;;  %v11090_v22 = vld [vmem:[%s16329_s11 + $0x3c0] sm:$0xf]  ;;  %v1943_v28 = vadd.f32 %v15651_v60, %v1942_v9  ;;  %3406 = vmatpush.bf16.msra.mxu1 %v11415_v16 }
 0x19e   : > { %v14671_v23 = vld [vmem:[%s16329_s11 + $0x41c] sm:$0xf0] }
 0x19f   : > { %v11378_v25 = vld [vmem:[%s16329_s11 + $0x9c0] sm:$0xf]  ;;  %v11091_v29 = vor.u32 %v14671_v23, %v11090_v22  ;;  %3420 = vmatpush.bf16.msra.mxu2 %v11703_v20  ;;  %v16480_v44 = vsel %vm1944_vm6, %v15651_v60, %v1943_v28 }
 0x1a0   : > { %v14743_v26 = vld [vmem:[%s16329_s11 + $0xa1c] sm:$0xf0]  ;;  %3436 = vmatpush.bf16.msra.mxu3 %v11059_v63  ;;  %v11452_v63 = vld [vmem:[%s16329_s11 + $0xba0] sm:$0xf0] }
 0x1a1   : > { %v11666_v27 = vld [vmem:[%s16329_s11 + $0xfc0] sm:$0xf]  ;;  %v11379_v34 = vor.u32 %v14743_v26, %v11378_v25  ;;  %3393 = vmatpush.bf16.msra.mxu0 %v11091_v29  ;;  %v14640_v26 = vld [vmem:[%s16329_s11 + $0x184] sm:$0xf] }
 0x1a2   : > { %v14815_v30 = vld [vmem:[%s16329_s11 + $0x101c] sm:$0xf0] }
 0x1a3   : > { %v11667_v35 = vor.u32 %v14815_v30, %v11666_v27  ;;  %v11054_v36 = vld [vmem:[%s16329_s11 + $0x300] sm:$0xf]  ;;  %3407 = vmatpush.bf16.msra.mxu1 %v11379_v34  ;;  %v10984_v27 = vld [vmem:[%s16329_s11 + $0x1e0] sm:$0xf0] }
 0x1a4   : > { %v14662_v37 = vld [vmem:[%s16329_s11 + $0x35c] sm:$0xf0]  ;;  %3437 = vmatpush.bf16.msra.mxu3 %v11023_v4  ;;  %v10987_v28 = vor.u32 %v14640_v26, %v10984_v27  ;;  %v11458_v4 = vld [vmem:[%s16329_s11 + $0xb48] sm:$0xf] }
 0x1a5   : > { %v11342_v38 = vld [vmem:[%s16329_s11 + $0x900] sm:$0xf]  ;;  %v11055_v45 = vor.u32 %v14662_v37, %v11054_v36  ;;  %3421 = vmatpush.bf16.msra.mxu2 %v11667_v35  ;;  %v14672_v26 = vld [vmem:[%s16329_s11 + $0x424] sm:$0xf0] }
 0x1a6   : > { %v14734_v40 = vld [vmem:[%s16329_s11 + $0x95c] sm:$0xf0] }
 0x1a7   : > { %v11630_v39 = vld [vmem:[%s16329_s11 + $0xf00] sm:$0xf]  ;;  %v11343_v54 = vor.u32 %v14734_v40, %v11342_v38  ;;  %3394 = vmatpush.bf16.msra.mxu0 %v11055_v45  ;;  %v10948_v40 = vld [vmem:[%s16329_s11 + $0x120] sm:$0xf0] }
 0x1a8   : > { %v14806_v41 = vld [vmem:[%s16329_s11 + $0xf5c] sm:$0xf0]  ;;  %3438 = vmatpush.bf16.msra.mxu3 %v10987_v28 }
 0x1a9   : > { %v11018_v46 = vld [vmem:[%s16329_s11 + $0x240] sm:$0xf]  ;;  %v11631_v55 = vor.u32 %v14806_v41, %v11630_v39  ;;  %3408 = vmatpush.bf16.msra.mxu1 %v11343_v54  ;;  %v10951_v39 = vor.u32 %v14631_v33, %v10948_v40  ;;  %v14663_v33 = vld [vmem:[%s16329_s11 + $0x364] sm:$0xf0] }
 0x1aa   : > { %v14653_v47 = vld [vmem:[%s16329_s11 + $0x29c] sm:$0xf0] }
 0x1ab   : > { %v11306_v51 = vld [vmem:[%s16329_s11 + $0x840] sm:$0xf]  ;;  %v11019_v5 = vor.u32 %v14653_v47, %v11018_v46  ;;  %3422 = vmatpush.bf16.msra.mxu2 %v11631_v55 }
 0x1ac   : > { %v14725_v58 = vld [vmem:[%s16329_s11 + $0x89c] sm:$0xf0]  ;;  %3439 = vmatpush.bf16.msra.mxu3 %v10951_v39 }
 0x1ad   : > { %v11594_v59 = vld [vmem:[%s16329_s11 + $0xe40] sm:$0xf]  ;;  %v11307_v1 = vor.u32 %v14725_v58, %v11306_v51  ;;  %3395 = vmatpush.bf16.msra.mxu0 %v11019_v5  ;;  %v14622_v58 = vld [vmem:[%s16329_s11 + $0x4] sm:$0xf] }
 0x1ae   : > { %v14797_v61 = vld [vmem:[%s16329_s11 + $0xe9c] sm:$0xf0] }
 0x1af   : > { %v11595_v2 = vor.u32 %v14797_v61, %v11594_v59  ;;  %3409 = vmatpush.bf16.msra.mxu1 %v11307_v1  ;;  %v11270_v19 = vld [vmem:[%s16329_s11 + $0x780] sm:$0xf]  ;;  %v10912_v59 = vld [vmem:[%s16329_s11 + $0x60] sm:$0xf0]  ;;  %v11170_v1 = vld [vmem:[%s16329_s11 + $0x548] sm:$0xf] }
 0x1b0   : > { %v14716_v21 = vld [vmem:[%s16329_s11 + $0x7dc] sm:$0xf0]  ;;  %v14757_v61 = vld [vmem:[%s16329_s11 + $0xb44] sm:$0xf] }
 0x1b1   : > { %3423 = vmatpush.bf16.msra.mxu2 %v11595_v2  ;;  %v11558_v22 = vld [vmem:[%s16329_s11 + $0xd80] sm:$0xf]  ;;  %v11271_v24 = vor.u32 %v14716_v21, %v11270_v19  ;;  %v11455_v0 = vor.u32 %v14757_v61, %v11452_v63  ;;  %v14690_v2 = vld [vmem:[%s16329_s11 + $0x5a4] sm:$0xf0]  ;;  %v11380_v21 = vld [vmem:[%s16329_s11 + $0xa20] sm:$0xf0] }
 0x1b2   : > { %v14788_v23 = vld [vmem:[%s16329_s11 + $0xddc] sm:$0xf0]  ;;  %v11314_v61 = vld [vmem:[%s16329_s11 + $0x848] sm:$0xf] }
 0x1b3   : > { %v11559_v25 = vor.u32 %v14788_v23, %v11558_v22  ;;  %3410 = vmatpush.bf16.msra.mxu1 %v11271_v24  ;;  %v10946_v29 = vld [vmem:[%s16329_s11 + $0xc0] sm:$0xf]  ;;  %v14811_v22 = vld [vmem:[%s16329_s11 + $0xfc4] sm:$0xf] }
 0x1b4   : > { %v14635_v30 = vld [vmem:[%s16329_s11 + $0x11c] sm:$0xf0]  ;;  %v11668_v24 = vld [vmem:[%s16329_s11 + $0x1020] sm:$0xf0] }
 0x1b5   : > { %3424 = vmatpush.bf16.msra.mxu2 %v11559_v25  ;;  %v11234_v31 = vld [vmem:[%s16329_s11 + $0x6c0] sm:$0xf]  ;;  %v10947_v32 = vor.u32 %v14635_v30, %v10946_v29  ;;  %v11098_v25 = vld [vmem:[%s16329_s11 + $0x3c8] sm:$0xf]  ;;  %v11671_v27 = vor.u32 %v14811_v22, %v11668_v24 }
 0x1b6   : > { %v14707_v34 = vld [vmem:[%s16329_s11 + $0x71c] sm:$0xf0]  ;;  %v11099_v28 = vor.u32 %v14672_v26, %v11098_v25  ;;  %v11386_v29 = vld [vmem:[%s16329_s11 + $0x9c8] sm:$0xf]  ;;  %v14694_v26 = vld [vmem:[%s16329_s11 + $0x604] sm:$0xf] }
 0x1b7   : > { %v11522_v35 = vld [vmem:[%s16329_s11 + $0xcc0] sm:$0xf]  ;;  %v11235_v37 = vor.u32 %v14707_v34, %v11234_v31  ;;  %v14744_v30 = vld [vmem:[%s16329_s11 + $0xa24] sm:$0xf0]  ;;  %v11344_v34 = vld [vmem:[%s16329_s11 + $0x960] sm:$0xf0] }
 0x1b8   : > { %v14779_v36 = vld [vmem:[%s16329_s11 + $0xd1c] sm:$0xf0]  ;;  %v11387_v31 = vor.u32 %v14744_v30, %v11386_v29  ;;  %v11242_v22 = vld [vmem:[%s16329_s11 + $0x6c8] sm:$0xf]  ;;  %v14766_v29 = vld [vmem:[%s16329_s11 + $0xc04] sm:$0xf] }
 0x1b9   : > { %v11523_v38 = vor.u32 %v14779_v36, %v11522_v35  ;;  %3411 = vmatpush.bf16.msra.mxu1 %v11235_v37  ;;  %v10910_v41 = vld [vmem:[%s16329_s11] sm:$0xf]  ;;  %v14802_v35 = vld [vmem:[%s16329_s11 + $0xf04] sm:$0xf] }
 0x1ba   : > { %v14626_v42 = vld [vmem:[%s16329_s11 + $0x5c] sm:$0xf0]  ;;  %v11632_v37 = vld [vmem:[%s16329_s11 + $0xf60] sm:$0xf0] }
 0x1bb   : > { %3425 = vmatpush.bf16.msra.mxu2 %v11523_v38  ;;  %v11198_v43 = vld [vmem:[%s16329_s11 + $0x600] sm:$0xf]  ;;  %v10911_v45 = vor.u32 %v14626_v42, %v10910_v41  ;;  %v11062_v38 = vld [vmem:[%s16329_s11 + $0x308] sm:$0xf]  ;;  %v11635_v40 = vor.u32 %v14802_v35, %v11632_v37  ;;  %v11488_v30 = vld [vmem:[%s16329_s11 + $0xc60] sm:$0xf0] }
 0x1bc   : > { %v14698_v46 = vld [vmem:[%s16329_s11 + $0x65c] sm:$0xf0]  ;;  %v11063_v39 = vor.u32 %v14663_v33, %v11062_v38  ;;  %v11350_v41 = vld [vmem:[%s16329_s11 + $0x908] sm:$0xf] }
 0x1bd   : > { %v11486_v47 = vld [vmem:[%s16329_s11 + $0xc00] sm:$0xf]  ;;  %v11199_v54 = vor.u32 %v14698_v46, %v11198_v43  ;;  %v14735_v42 = vld [vmem:[%s16329_s11 + $0x964] sm:$0xf0]  ;;  %v11308_v46 = vld [vmem:[%s16329_s11 + $0x8a0] sm:$0xf0] }
 0x1be   : > { %v14770_v51 = vld [vmem:[%s16329_s11 + $0xc5c] sm:$0xf0]  ;;  %v11351_v43 = vor.u32 %v14735_v42, %v11350_v41  ;;  %v11206_v35 = vld [vmem:[%s16329_s11 + $0x608] sm:$0xf] }
 0x1bf   : > { %v11487_v55 = vor.u32 %v14770_v51, %v11486_v47  ;;  %3412 = vmatpush.bf16.msra.mxu1 %v11199_v54  ;;  %v14793_v47 = vld [vmem:[%s16329_s11 + $0xe44] sm:$0xf] }
 0x1c0   : > { %v11596_v51 = vld [vmem:[%s16329_s11 + $0xea0] sm:$0xf0] }
 0x1c1   : > { %3426 = vmatpush.bf16.msra.mxu2 %v11487_v55  ;;  %v11026_v55 = vld [vmem:[%s16329_s11 + $0x248] sm:$0xf] }
 0x207   : > { %v1934_v62 = vpop.xlane.xlu0 %1933 }
 0x208   : > { %v1946_v60 = vmul.f32 %v16480_v44, %v1934_v62  ;;  %v10915_v62 = vor.u32 %v14622_v58, %v10912_v59  ;;  %v11599_v58 = vor.u32 %v14793_v47, %v11596_v51  ;;  %v14654_v59 = vld [vmem:[%s16329_s11 + $0x2a4] sm:$0xf0] }
 0x209   : > { %v11027_v63 = vor.u32 %v14654_v59, %v11026_v55  ;;  %v1910_v55 = vld [vmem:[%s16321_s29] ss:$4 sm:$0x7] }
 0x20a   : > { %v16492_v8 = vsub.f32 %v16430_v48, %v1946_v60  ;;  %v16495_v3 = vsub.f32 %v16432_v49, %v1946_v60  ;;  %v16498_v14 = vsub.f32 %v16434_v50, %v1946_v60  ;;  %v14829_v60 = vld [vmem:[%s16329_s11 + $0x1144] sm:$0xf]  ;;  %3440 = vmatpush.bf16.msra.mxu3 %v10915_v62  ;;  %v14726_v62 = vld [vmem:[%s16329_s11 + $0x8a4] sm:$0xf0] }
 0x20b   : > { %v11743_v5 = vor.u32 %v14829_v60, %v11740_v56  ;;  %v11315_v60 = vor.u32 %v14726_v62, %v11314_v61  ;;  %v14712_v56 = vld [vmem:[%s16329_s11 + $0x784] sm:$0xf]  ;;  %v1999_v62 = vperm.slane %v1910_v55, 0 }
 0x20c   : > { %v1954_v6 = vmul.f32 %v16492_v8, %v16492_v8  ;;  %v1955_v7 = vmul.f32 %v16495_v3, %v16495_v3  ;;  %v1956_v48 = vmul.f32 %v16498_v14, %v16498_v14 }
 0x20d   : > { %3461 = vmatpush.bf16.msrb.mxu1 %v11743_v5  ;;  %v14784_v5 = vld [vmem:[%s16329_s11 + $0xd84] sm:$0xf] }
 0x20e   : > { %v1960_v9 = vadd.f32 %v1955_v7, %v1954_v6  ;;  %v11171_v6 = vor.u32 %v14690_v2, %v11170_v1  ;;  %v14762_v7 = vld [vmem:[%s16329_s11 + $0xba4] sm:$0xf0]  ;;  %v11560_v2 = vld [vmem:[%s16329_s11 + $0xde0] sm:$0xf0] }
 0x20f   : > { %v1938_v49 = vpop.xlane.xlu0 %1937 }
 0x210   : > { %v1947_v50 = vmul.f32 %v16480_v44, %v1938_v49  ;;  %v1961_v10 = vadd.f32 %v1960_v9, %v1956_v48  ;;  %v14748_v48 = vld [vmem:[%s16329_s11 + $0xa84] sm:$0xf]  ;;  %v11459_v49 = vor.u32 %v14762_v7, %v11458_v4  ;;  %3475 = vmatpush.bf16.msrb.mxu2 %v11171_v6  ;;  %v10990_v4 = vld [vmem:[%s16329_s11 + $0x188] sm:$0xf]  ;;  %v11563_v7 = vor.u32 %v14784_v5, %v11560_v2 }
 0x211   : > { %v11416_v9 = vld [vmem:[%s16329_s11 + $0xae0] sm:$0xf0]  ;;  %v14645_v6 = vld [vmem:[%s16329_s11 + $0x1e4] sm:$0xf0]  ;;  %v2001_v2 = vperm.slane %v1910_v55, 2 }
 0x212   : > { %v16508_v11 = vsub.f32 %v16438_v52, %v1947_v50  ;;  %v16511_v12 = vsub.f32 %v16440_v53, %v1947_v50  ;;  %v16514_v13 = vsub.f32 %v16445_v57, %v1947_v50  ;;  %1962 = vadd.xlane.f32.xlu1 %v1961_v10  ;;  %v10982_v53 = vld [vmem:[%s16329_s11 + $0x180] sm:$0xf]  ;;  %v11419_v50 = vor.u32 %v14748_v48, %v11416_v9  ;;  %v14820_v10 = vld [vmem:[%s16329_s11 + $0x1084] sm:$0xf]  ;;  %v11278_v9 = vld [vmem:[%s16329_s11 + $0x788] sm:$0xf] }
 0x213   : > { %v14644_v57 = vld [vmem:[%s16329_s11 + $0x1dc] sm:$0xf0]  ;;  %3489 = vmatpush.bf16.msrb.mxu3 %v11459_v49  ;;  %v10991_v48 = vor.u32 %v14645_v6, %v10990_v4  ;;  %v14717_v49 = vld [vmem:[%s16329_s11 + $0x7e4] sm:$0xf0] }
 0x214   : > { %v1957_v15 = vmul.f32 %v16508_v11, %v16508_v11  ;;  %v1958_v16 = vmul.f32 %v16511_v12, %v16511_v12  ;;  %v1959_v52 = vmul.f32 %v16514_v13, %v16514_v13  ;;  %v10983_v20 = vor.u32 %v14644_v57, %v10982_v53  ;;  %v14753_v53 = vld [vmem:[%s16329_s11 + $0xae4] sm:$0xf0] }
 0x216   : > { %v1964_v17 = vadd.f32 %v1958_v16, %v1957_v15  ;;  %3396 = vmatpush.bf16.msra.mxu0 %v10983_v20  ;;  %v11704_v15 = vld [vmem:[%s16329_s11 + $0x10e0] sm:$0xf0]  ;;  %v11134_v16 = vld [vmem:[%s16329_s11 + $0x488] sm:$0xf] }
 0x217   : > { %v14739_v20 = vld [vmem:[%s16329_s11 + $0x9c4] sm:$0xf] }
 0x218   : > { %v1965_v18 = vadd.f32 %v1964_v17, %v1959_v52  ;;  %v11707_v52 = vor.u32 %v14820_v10, %v11704_v15  ;;  %v14681_v17 = vld [vmem:[%s16329_s11 + $0x4e4] sm:$0xf0]  ;;  %v11383_v23 = vor.u32 %v14739_v20, %v11380_v21  ;;  %v14703_v10 = vld [vmem:[%s16329_s11 + $0x6c4] sm:$0xf] }
 0x219   : > { %v11135_v57 = vor.u32 %v14681_v17, %v11134_v16  ;;  %v11236_v15 = vld [vmem:[%s16329_s11 + $0x720] sm:$0xf0] }
 0x21a   : > { %1966 = vadd.xlane.f32.xlu1 %v1965_v18  ;;  %3397 = vmatpush.bf16.msra.mxu0 %v10947_v32  ;;  %v11422_v18 = vld [vmem:[%s16329_s11 + $0xa88] sm:$0xf]  ;;  %v14730_v32 = vld [vmem:[%s16329_s11 + $0x904] sm:$0xf]  ;;  %v11239_v17 = vor.u32 %v14703_v10, %v11236_v15 }
 0x21b   : > { %v11423_v19 = vor.u32 %v14753_v53, %v11422_v18  ;;  %3462 = vmatpush.bf16.msrb.mxu1 %v11707_v52  ;;  %3476 = vmatpush.bf16.msrb.mxu2 %v11135_v57  ;;  %v11347_v36 = vor.u32 %v14730_v32, %v11344_v34  ;;  %v14775_v16 = vld [vmem:[%s16329_s11 + $0xcc4] sm:$0xf]  ;;  %v10954_v53 = vld [vmem:[%s16329_s11 + $0xc8] sm:$0xf]  ;;  %v11491_v32 = vor.u32 %v14766_v29, %v11488_v30 }
 0x21c   : > { %v11524_v18 = vld [vmem:[%s16329_s11 + $0xd20] sm:$0xf0]  ;;  %v14636_v57 = vld [vmem:[%s16329_s11 + $0x124] sm:$0xf0] }
 0x21d   : > { %3490 = vmatpush.bf16.msrb.mxu3 %v11423_v19  ;;  %v11527_v20 = vor.u32 %v14775_v16, %v11524_v18  ;;  %v10955_v21 = vor.u32 %v14636_v57, %v10954_v53  ;;  %v14627_v34 = vld [vmem:[%s16329_s11 + $0x64] sm:$0xf0] }
 0x21e   : > { %3398 = vmatpush.bf16.msra.mxu0 %v10911_v45  ;;  %v14721_v45 = vld [vmem:[%s16329_s11 + $0x844] sm:$0xf]  ;;  %v14834_v18 = vld [vmem:[%s16329_s11 + $0x11a4] sm:$0xf0] }
 0x21f   : > { %3463 = vmatpush.bf16.msrb.mxu1 %v11671_v27  ;;  %3477 = vmatpush.bf16.msrb.mxu2 %v11099_v28  ;;  %v11311_v54 = vor.u32 %v14721_v45, %v11308_v46  ;;  %v11200_v27 = vld [vmem:[%s16329_s11 + $0x660] sm:$0xf0] }
 0x220   : > { %v11203_v28 = vor.u32 %v14694_v26, %v11200_v27 }
 0x221   : > { %3491 = vmatpush.bf16.msrb.mxu3 %v11387_v31  ;;  %v10918_v31 = vld [vmem:[%s16329_s11 + $0x8] sm:$0xf] }
 0x222   : > { %3447 = vmatpush.bf16.msrb.mxu0 %v11455_v0  ;;  %v11272_v0 = vld [vmem:[%s16329_s11 + $0x7e0] sm:$0xf0]  ;;  %v10919_v37 = vor.u32 %v14627_v34, %v10918_v31  ;;  %v11710_v31 = vld [vmem:[%s16329_s11 + $0x1088] sm:$0xf] }
 0x223   : > { %3464 = vmatpush.bf16.msrb.mxu1 %v11635_v40  ;;  %3478 = vmatpush.bf16.msrb.mxu2 %v11063_v39  ;;  %v11275_v1 = vor.u32 %v14712_v56, %v11272_v0 }
 0x225   : > { %3492 = vmatpush.bf16.msrb.mxu3 %v11351_v43 }
 0x226   : > { %3448 = vmatpush.bf16.msrb.mxu0 %v11419_v50  ;;  %v11279_v50 = vor.u32 %v14717_v49, %v11278_v9 }
 0x227   : > { %3465 = vmatpush.bf16.msrb.mxu1 %v11599_v58  ;;  %3479 = vmatpush.bf16.msrb.mxu2 %v11027_v63  ;;  %v2000_v63 = vperm.slane %v1910_v55, 1  ;;  %v14740_v55 = vld [vmem:[%s16329_s11 + $0x9cc] sm:$0xf] }
 0x229   : > { %3493 = vmatpush.bf16.msrb.mxu3 %v11315_v60  ;;  %v10905_v60 = vld [vmem:[%s16321_s29 + $0x1] ss:$4 sm:$0x7] }
 0x22a   : > { %3449 = vmatpush.bf16.msrb.mxu0 %v11383_v23  ;;  %v14708_v23 = vld [vmem:[%s16329_s11 + $0x724] sm:$0xf0]  ;;  %v2012_v6 = vperm.slane %v10905_v60, 0 }
 0x22b   : > { %3466 = vmatpush.bf16.msrb.mxu1 %v11563_v7  ;;  %3480 = vmatpush.bf16.msrb.mxu2 %v10991_v48  ;;  %v11243_v24 = vor.u32 %v14708_v23, %v11242_v22  ;;  %v2013_v7 = vperm.slane %v10905_v60, 1  ;;  %v11460_v23 = vld [vmem:[%s16329_s11 + $0xba8] sm:$0xf0] }
 0x22d   : > { %3494 = vmatpush.bf16.msrb.mxu3 %v11279_v50 }
 0x22e   : > { %3450 = vmatpush.bf16.msrb.mxu0 %v11347_v36  ;;  %v14699_v36 = vld [vmem:[%s16329_s11 + $0x664] sm:$0xf0] }
 0x22f   : > { %3467 = vmatpush.bf16.msrb.mxu1 %v11527_v20  ;;  %3481 = vmatpush.bf16.msrb.mxu2 %v10955_v21  ;;  %v11207_v38 = vor.u32 %v14699_v36, %v11206_v35  ;;  %v11172_v20 = vld [vmem:[%s16329_s11 + $0x5a8] sm:$0xf0] }
 0x230   : > { %v14758_v21 = vld [vmem:[%s16329_s11 + $0xb4c] sm:$0xf] }
 0x231   : > { %3495 = vmatpush.bf16.msrb.mxu3 %v11243_v24  ;;  %v14830_v24 = vld [vmem:[%s16329_s11 + $0x114c] sm:$0xf]  ;;  %v11463_v34 = vor.u32 %v14758_v21, %v11460_v23 }
 0x232   : > { %3451 = vmatpush.bf16.msrb.mxu0 %v11311_v54  ;;  %v14677_v36 = vld [vmem:[%s16329_s11 + $0x48c] sm:$0xf] }
 0x233   : > { %3468 = vmatpush.bf16.msrb.mxu1 %v11491_v32  ;;  %3482 = vmatpush.bf16.msrb.mxu2 %v10919_v37  ;;  %v14825_v32 = vld [vmem:[%s16329_s11 + $0x10e4] sm:$0xf0]  ;;  %v11136_v37 = vld [vmem:[%s16329_s11 + $0x4e8] sm:$0xf0] }
 0x234   : > { %v11280_v23 = vld [vmem:[%s16329_s11 + $0x7e8] sm:$0xf0] }
 0x235   : > { %3496 = vmatpush.bf16.msrb.mxu3 %v11207_v38  ;;  %v14749_v38 = vld [vmem:[%s16329_s11 + $0xa8c] sm:$0xf] }
 0x236   : > { %3452 = vmatpush.bf16.msrb.mxu0 %v11275_v1 }
 0x23a   : > { %3453 = vmatpush.bf16.msrb.mxu0 %v11239_v17  ;;  %v11746_v17 = vld [vmem:[%s16329_s11 + $0x1148] sm:$0xf] }
 0x23b   : > { %v11747_v26 = vor.u32 %v14834_v18, %v11746_v17  ;;  %v14794_v17 = vld [vmem:[%s16329_s11 + $0xe4c] sm:$0xf] }
 0x23c   : > { %v11604_v18 = vld [vmem:[%s16329_s11 + $0xea8] sm:$0xf0] }
 0x23e   : > { %3454 = vmatpush.bf16.msrb.mxu0 %v11203_v28 }
 0x285   : > { %v1963_v52 = vpop.xlane.xlu1 %1962 }
 0x286   : > { %v1968_v19 = vmul.f32 %v1963_v52, %v16480_v44 }
 0x288   : > { %v1970_v25 = vadd.f32 1e-06, %v1968_v19  ;;  %v14686_v19 = vld [vmem:[%s16329_s11 + $0x54c] sm:$0xf] }
 0x289   : > { %v11175_v30 = vor.u32 %v14686_v19, %v11172_v20  ;;  %v11566_v19 = vld [vmem:[%s16329_s11 + $0xd88] sm:$0xf] }
 0x28a   : > { %15652 = vrsqrt.f32 %v1970_v25  ;;  %vm1978_vm8 = vweird.f32 %v1970_v25  ;;  %v14789_v20 = vld [vmem:[%s16329_s11 + $0xde4] sm:$0xf0] }
 0x28d   : > { %v1967_v33 = vpop.xlane.xlu1 %1966 }
 0x28e   : > { %v1969_v40 = vmul.f32 %v1967_v33, %v16480_v44  ;;  %v11424_v33 = vld [vmem:[%s16329_s11 + $0xae8] sm:$0xf0] }
 0x290   : > { %v15653_v39 = vpop.eup %15652  ;;  %v1971_v41 = vadd.f32 1e-06, %v1969_v40  ;;  %v14821_v40 = vld [vmem:[%s16329_s11 + $0x108c] sm:$0xf] }
 0x291   : > { %v1973_v42 = vmul.f32 %v15653_v39, %v1970_v25  ;;  %vm1979_vm7 = vweird.f32 %v15653_v39  ;;  %v11748_v25 = vld [vmem:[%s16329_s11 + $0x11a8] sm:$0xf0] }
 0x292   : > { %15654 = vrsqrt.f32 %v1971_v41  ;;  %vm1980_vm9 = vmor %vm1978_vm8, %vm1979_vm7  ;;  %vm1988_vm11 = vweird.f32 %v1971_v41  ;;  %v11751_v35 = vor.u32 %v14830_v24, %v11748_v25  ;;  %v14785_v24 = vld [vmem:[%s16329_s11 + $0xd8c] sm:$0xf] }
 0x293   : > { %v1974_v43 = vmul.f32 %v15653_v39, %v1973_v42  ;;  %v11139_v42 = vor.u32 %v14677_v36, %v11136_v37  ;;  %v11568_v25 = vld [vmem:[%s16329_s11 + $0xde8] sm:$0xf0] }
 0x294   : > { %v14632_v36 = vld [vmem:[%s16329_s11 + $0xcc] sm:$0xf] }
 0x295   : > { %v1975_v45 = vmul.f32 0.5, %v1974_v43  ;;  %v11674_v43 = vld [vmem:[%s16329_s11 + $0xfc8] sm:$0xf]  ;;  %v10956_v37 = vld [vmem:[%s16329_s11 + $0x128] sm:$0xf0] }
 0x297   : > { %v1976_v46 = vsub.f32 1.5, %v1975_v45  ;;  %v14816_v45 = vld [vmem:[%s16329_s11 + $0x1024] sm:$0xf0] }
 0x298   : > { %v15655_v47 = vpop.eup %15654 }
 0x299   : > { %v1977_v51 = vmul.f32 %v15653_v39, %v1976_v46  ;;  %v1983_v54 = vmul.f32 %v15655_v47, %v1971_v41  ;;  %vm1989_vm10 = vweird.f32 %v15655_v47  ;;  %v11711_v41 = vor.u32 %v14825_v32, %v11710_v31  ;;  %v11530_v31 = vld [vmem:[%s16329_s11 + $0xcc8] sm:$0xf] }
 0x29a   : > { %vm1990_vm12 = vmor %vm1988_vm11, %vm1989_vm10  ;;  %v11427_v46 = vor.u32 %v14749_v38, %v11424_v33  ;;  %v14780_v32 = vld [vmem:[%s16329_s11 + $0xd24] sm:$0xf0]  ;;  %v14704_v38 = vld [vmem:[%s16329_s11 + $0x6cc] sm:$0xf] }
 0x29b   : > { %v1984_v58 = vmul.f32 %v15655_v47, %v1983_v54  ;;  %v1981_v59 = vsel %vm1980_vm9, %v15653_v39, %v1977_v51  ;;  %v11712_v39 = vld [vmem:[%s16329_s11 + $0x10e8] sm:$0xf0] }
 0x29c   : > { %v1992_v56 = vmul.f32 %v1981_v59, %v16492_v8  ;;  %v1993_v0 = vmul.f32 %v1981_v59, %v16495_v3  ;;  %v1994_v1 = vmul.f32 %v1981_v59, %v16498_v14  ;;  %v2014_v8 = vperm.slane %v10905_v60, 2  ;;  %v14668_v51 = vld [vmem:[%s16329_s11 + $0x3cc] sm:$0xf]  ;;  %v11638_v60 = vld [vmem:[%s16329_s11 + $0xf08] sm:$0xf] }
 0x29d   : > { %v1985_v61 = vmul.f32 0.5, %v1984_v58  ;;  %v11100_v54 = vld [vmem:[%s16329_s11 + $0x428] sm:$0xf0] }
 0x29e   : > { %v2005_v48 = vmul.f32 %v1999_v62, %v1992_v56  ;;  %v2006_v9 = vmul.f32 %v2000_v63, %v1993_v0  ;;  %v2007_v3 = vmul.f32 %v2001_v2, %v1994_v1  ;;  %v11388_v58 = vld [vmem:[%s16329_s11 + $0xa28] sm:$0xf0]  ;;  %v14807_v56 = vld [vmem:[%s16329_s11 + $0xf64] sm:$0xf0] }
 0x29f   : > { %v1986_v5 = vsub.f32 1.5, %v1985_v61  ;;  %v14812_v59 = vld [vmem:[%s16329_s11 + $0xfcc] sm:$0xf]  ;;  %v11391_v0 = vor.u32 %v14740_v55, %v11388_v58 }
 0x2a0   : > { %v2018_v53 = vadd.f32 %v2012_v6, %v2005_v48  ;;  %v2019_v57 = vadd.f32 %v2013_v7, %v2006_v9  ;;  %v11676_v61 = vld [vmem:[%s16329_s11 + $0x1028] sm:$0xf0]  ;;  %v11639_v9 = vor.u32 %v14807_v56, %v11638_v60  ;;  %v11466_v60 = vld [vmem:[%s16329_s11 + $0xb50] sm:$0xf] }
 0x2a1   : > { %v1987_v4 = vmul.f32 %v15655_v47, %v1986_v5  ;;  %v11679_v5 = vor.u32 %v14812_v59, %v11676_v61  ;;  %v14659_v1 = vld [vmem:[%s16329_s11 + $0x30c] sm:$0xf]  ;;  %v14763_v56 = vld [vmem:[%s16329_s11 + $0xbac] sm:$0xf0] }
 0x2a2   : > { %v11640_v48 = vld [vmem:[%s16329_s11 + $0xf68] sm:$0xf0] }
 0x2a3   : > { %v1991_v49 = vsel %vm1990_vm12, %v15655_v47, %v1987_v4  ;;  %v11715_v47 = vor.u32 %v14821_v40, %v11712_v39  ;;  %v14731_v4 = vld [vmem:[%s16329_s11 + $0x90c] sm:$0xf] }
 0x2a4   : > { %v1995_v50 = vmul.f32 %v1991_v49, %v16508_v11  ;;  %v1996_v14 = vmul.f32 %v1991_v49, %v16511_v12  ;;  %v1997_v10 = vmul.f32 %v1991_v49, %v16514_v13  ;;  %v2020_v11 = vadd.f32 %v2014_v8, %v2007_v3  ;;  %v11602_v49 = vld [vmem:[%s16329_s11 + $0xe48] sm:$0xf]  ;;  %v11244_v33 = vld [vmem:[%s16329_s11 + $0x728] sm:$0xf0] }
 0x2a5   : > { %v14798_v3 = vld [vmem:[%s16329_s11 + $0xea4] sm:$0xf0]  ;;  %v14776_v40 = vld [vmem:[%s16329_s11 + $0xccc] sm:$0xf] }
 0x2a6   : > { %v2008_v15 = vmul.f32 %v1999_v62, %v1995_v50  ;;  %v2009_v16 = vmul.f32 %v2000_v63, %v1996_v14  ;;  %v2010_v52 = vmul.f32 %v2001_v2, %v1997_v10  ;;  %v11675_v62 = vor.u32 %v14816_v45, %v11674_v43  ;;  %v11064_v2 = vld [vmem:[%s16329_s11 + $0x368] sm:$0xf0]  ;;  %v14771_v45 = vld [vmem:[%s16329_s11 + $0xc64] sm:$0xf0] }
 0x2a7   : > { %v11103_v63 = vor.u32 %v14668_v51, %v11100_v54  ;;  %v14650_v10 = vld [vmem:[%s16329_s11 + $0x24c] sm:$0xf]  ;;  %v10959_v43 = vor.u32 %v14632_v36, %v10956_v37  ;;  %v11247_v51 = vor.u32 %v14704_v38, %v11244_v33  ;;  %v11358_v36 = vld [vmem:[%s16329_s11 + $0x910] sm:$0xf] }
 0x2a8   : > { %v2021_v12 = vadd.f32 %v2012_v6, %v2008_v15  ;;  %v2022_v22 = vadd.f32 %v2013_v7, %v2009_v16  ;;  %v2023_v13 = vadd.f32 %v2014_v8, %v2010_v52  ;;  %v11352_v6 = vld [vmem:[%s16329_s11 + $0x968] sm:$0xf0]  ;;  %v11067_v8 = vor.u32 %v14659_v1, %v11064_v2  ;;  %v14835_v2 = vld [vmem:[%s16329_s11 + $0x11ac] sm:$0xf0] }
 0x2a9   : > { %v14803_v7 = vld [vmem:[%s16329_s11 + $0xf0c] sm:$0xf]  ;;  %v11355_v50 = vor.u32 %v14731_v4, %v11352_v6  ;;  %v14687_v4 = vld [vmem:[%s16329_s11 + $0x554] sm:$0xf]  ;;  %v14736_v37 = vld [vmem:[%s16329_s11 + $0x96c] sm:$0xf0] }
 0x2aa   : > { %v16628_v27 = vpack.c.bf16 %v2021_v12, %v2018_v53  ;;  %v16630_v28 = vpack.c.bf16 %v2022_v22, %v2019_v57  ;;  %v16632_v29 = vpack.c.bf16 %v2023_v13, %v2020_v11  ;;  %v11643_v14 = vor.u32 %v14803_v7, %v11640_v48  ;;  %v11028_v15 = vld [vmem:[%s16329_s11 + $0x2a8] sm:$0xf0]  ;;  %v11180_v6 = vld [vmem:[%s16329_s11 + $0x5b0] sm:$0xf0]  ;;  %v11646_v38 = vld [vmem:[%s16329_s11 + $0xf10] sm:$0xf] }
 0x2ab   : > { %v14722_v16 = vld [vmem:[%s16329_s11 + $0x84c] sm:$0xf]  ;;  %v11603_v53 = vor.u32 %v14798_v3, %v11602_v49  ;;  %v11031_v57 = vor.u32 %v14650_v10, %v11028_v15  ;;  %v11607_v11 = vor.u32 %v14794_v17, %v11604_v18  ;;  %v11142_v49 = vld [vmem:[%s16329_s11 + $0x490] sm:$0xf]  ;;  %v14678_v17 = vld [vmem:[%s16329_s11 + $0x494] sm:$0xf] }
 0x2ac   : > { %3399 = vmatmul.bf16.vlgmr.msra.gmra.mxu0 %v16628_v27  ;;  %3413 = vmatmul.bf16.vlgmr.msra.gmra.mxu1 %v16630_v28  ;;  %v11316_v52 = vld [vmem:[%s16329_s11 + $0x8a8] sm:$0xf0]  ;;  %v14682_v3 = vld [vmem:[%s16329_s11 + $0x4ec] sm:$0xf0]  ;;  %v11144_v18 = vld [vmem:[%s16329_s11 + $0x4f0] sm:$0xf0] }
 0x2ad   : > { %3427 = vmatmul.bf16.vlgmr.msra.gmra.mxu2 %v16632_v29  ;;  %3441 = vmatmul.bf16.vlgmr.msra.gmra.mxu3 %v16628_v27  ;;  %v11319_v21 = vor.u32 %v14722_v16, %v11316_v52  ;;  %v14641_v12 = vld [vmem:[%s16329_s11 + $0x18c] sm:$0xf]  ;;  %v11430_v10 = vld [vmem:[%s16329_s11 + $0xa90] sm:$0xf] }
 0x2ae   : > { %3503 = vmatpush.bf16.msra.mxu0 %v11747_v26  ;;  %3517 = vmatpush.bf16.msra.mxu1 %v11175_v30  ;;  %v10992_v22 = vld [vmem:[%s16329_s11 + $0x1e8] sm:$0xf0]  ;;  %v11567_v26 = vor.u32 %v14789_v20, %v11566_v19  ;;  %v14754_v15 = vld [vmem:[%s16329_s11 + $0xaec] sm:$0xf0] }
 0x2af   : > { %3531 = vmatpush.bf16.msra.mxu2 %v11463_v34  ;;  %3545 = vmatpush.bf16.msra.mxu3 %v11751_v35  ;;  %v14713_v13 = vld [vmem:[%s16329_s11 + $0x78c] sm:$0xf]  ;;  %v10995_v30 = vor.u32 %v14641_v12, %v10992_v22  ;;  %v11571_v35 = vor.u32 %v14785_v24, %v11568_v25  ;;  %v11718_v16 = vld [vmem:[%s16329_s11 + $0x1090] sm:$0xf]  ;;  %v14669_v24 = vld [vmem:[%s16329_s11 + $0x3d4] sm:$0xf] }
 0x2b0   : > { %v11283_v34 = vor.u32 %v14713_v13, %v11280_v23  ;;  %v11532_v39 = vld [vmem:[%s16329_s11 + $0xd28] sm:$0xf0]  ;;  %v14826_v52 = vld [vmem:[%s16329_s11 + $0x10ec] sm:$0xf0]  ;;  %v11108_v25 = vld [vmem:[%s16329_s11 + $0x430] sm:$0xf0] }
 0x2b1   : > { %v11535_v54 = vor.u32 %v14776_v40, %v11532_v39  ;;  %v14695_v55 = vld [vmem:[%s16329_s11 + $0x60c] sm:$0xf]  ;;  %v11106_v19 = vld [vmem:[%s16329_s11 + $0x3d0] sm:$0xf]  ;;  %v14660_v40 = vld [vmem:[%s16329_s11 + $0x314] sm:$0xf] }
 0x2b2   : > { %3504 = vmatpush.bf16.msra.mxu0 %v11711_v41  ;;  %3518 = vmatpush.bf16.msra.mxu1 %v11139_v42  ;;  %v11494_v41 = vld [vmem:[%s16329_s11 + $0xc08] sm:$0xf]  ;;  %v11531_v42 = vor.u32 %v14780_v32, %v11530_v31  ;;  %v11208_v58 = vld [vmem:[%s16329_s11 + $0x668] sm:$0xf0]  ;;  %v14673_v20 = vld [vmem:[%s16329_s11 + $0x42c] sm:$0xf0] }
 0x2b3   : > { %3532 = vmatpush.bf16.msra.mxu2 %v11427_v46  ;;  %3546 = vmatpush.bf16.msra.mxu3 %v11715_v47  ;;  %v14623_v46 = vld [vmem:[%s16329_s11 + $0xc] sm:$0xf]  ;;  %v11211_v7 = vor.u32 %v14695_v55, %v11208_v58  ;;  %v11394_v12 = vld [vmem:[%s16329_s11 + $0x9d0] sm:$0xf]  ;;  %v11072_v39 = vld [vmem:[%s16329_s11 + $0x370] sm:$0xf0] }
 0x2b4   : > { %v10920_v47 = vld [vmem:[%s16329_s11 + $0x68] sm:$0xf0]  ;;  %v14745_v22 = vld [vmem:[%s16329_s11 + $0xa2c] sm:$0xf0] }
 0x2b5   : > { %v14767_v59 = vld [vmem:[%s16329_s11 + $0xc0c] sm:$0xf]  ;;  %v10923_v1 = vor.u32 %v14623_v46, %v10920_v47  ;;  %v11682_v13 = vld [vmem:[%s16329_s11 + $0xfd0] sm:$0xf]  ;;  %v11075_v47 = vor.u32 %v14660_v40, %v11072_v39 }
 0x2b6   : > { %3505 = vmatpush.bf16.msra.mxu0 %v11675_v62  ;;  %3519 = vmatpush.bf16.msra.mxu1 %v11103_v63  ;;  %v11496_v61 = vld [vmem:[%s16329_s11 + $0xc68] sm:$0xf0]  ;;  %v11178_v62 = vld [vmem:[%s16329_s11 + $0x550] sm:$0xf] }
 0x2b7   : > { %3533 = vmatpush.bf16.msra.mxu2 %v11391_v0  ;;  %3547 = vmatpush.bf16.msra.mxu3 %v11679_v5  ;;  %v14691_v63 = vld [vmem:[%s16329_s11 + $0x5ac] sm:$0xf0]  ;;  %v11495_v5 = vor.u32 %v14771_v45, %v11494_v41  ;;  %v11499_v48 = vor.u32 %v14767_v59, %v11496_v61  ;;  %v14651_v59 = vld [vmem:[%s16329_s11 + $0x254] sm:$0xf] }
 0x2b8   : > { %v11754_v0 = vld [vmem:[%s16329_s11 + $0x1150] sm:$0xf]  ;;  %v11036_v61 = vld [vmem:[%s16329_s11 + $0x2b0] sm:$0xf0] }
 0x2b9   : > { %v14817_v23 = vld [vmem:[%s16329_s11 + $0x102c] sm:$0xf0] }
 0x2ba   : > { %3506 = vmatpush.bf16.msra.mxu0 %v11639_v9  ;;  %3520 = vmatpush.bf16.msra.mxu1 %v11067_v8  ;;  %v11179_v9 = vor.u32 %v14691_v63, %v11178_v62  ;;  %v11467_v8 = vor.u32 %v14763_v56, %v11466_v60  ;;  %v11070_v31 = vld [vmem:[%s16329_s11 + $0x310] sm:$0xf] }
 0x2bb   : > { %3534 = vmatpush.bf16.msra.mxu2 %v11355_v50  ;;  %3548 = vmatpush.bf16.msra.mxu3 %v11643_v14  ;;  %v11755_v50 = vor.u32 %v14835_v2, %v11754_v0  ;;  %v11183_v14 = vor.u32 %v14687_v4, %v11180_v6  ;;  %v14664_v32 = vld [vmem:[%s16329_s11 + $0x36c] sm:$0xf0] }
 0x2bc   : > { %3455 = vmatmul.bf16.vlgmr.msrb.gmra.mxu0 %v16630_v28  ;;  %3469 = vmatmul.bf16.vlgmr.msrb.gmra.mxu1 %v16632_v29  ;;  %v14808_v33 = vld [vmem:[%s16329_s11 + $0xf6c] sm:$0xf0]  ;;  %v11071_v41 = vor.u32 %v14664_v32, %v11070_v31  ;;  %v14831_v31 = vld [vmem:[%s16329_s11 + $0x1154] sm:$0xf] }
 0x2bd   : > { %3483 = vmatmul.bf16.vlgmr.msrb.gmra.mxu2 %v16628_v27  ;;  %3497 = vmatmul.bf16.vlgmr.msrb.gmra.mxu3 %v16630_v28  ;;  %v14655_v45 = vld [vmem:[%s16329_s11 + $0x2ac] sm:$0xf0]  ;;  %v11647_v46 = vor.u32 %v14808_v33, %v11646_v38  ;;  %v11756_v32 = vld [vmem:[%s16329_s11 + $0x11b0] sm:$0xf0]  ;;  %v11474_v38 = vld [vmem:[%s16329_s11 + $0xb58] sm:$0xf] }
 0x2be   : > { %3507 = vmatpush.bf16.msra.mxu0 %v11603_v53  ;;  %3521 = vmatpush.bf16.msra.mxu1 %v11031_v57  ;;  %v11143_v53 = vor.u32 %v14682_v3, %v11142_v49  ;;  %v11431_v57 = vor.u32 %v14754_v15, %v11430_v10  ;;  %v11610_v55 = vld [vmem:[%s16329_s11 + $0xe50] sm:$0xf]  ;;  %v14764_v33 = vld [vmem:[%s16329_s11 + $0xbb4] sm:$0xf0] }
 0x2bf   : > { %3535 = vmatpush.bf16.msra.mxu2 %v11319_v21  ;;  %3549 = vmatpush.bf16.msra.mxu3 %v11607_v11  ;;  %v11719_v21 = vor.u32 %v14826_v52, %v11718_v16  ;;  %v11147_v11 = vor.u32 %v14678_v17, %v11144_v18  ;;  %v14799_v58 = vld [vmem:[%s16329_s11 + $0xeac] sm:$0xf0]  ;;  %v14633_v17 = vld [vmem:[%s16329_s11 + $0xd4] sm:$0xf] }
 0x2c0   : > { %v10998_v60 = vld [vmem:[%s16329_s11 + $0x190] sm:$0xf]  ;;  %v11611_v0 = vor.u32 %v14799_v58, %v11610_v55  ;;  %v10964_v18 = vld [vmem:[%s16329_s11 + $0x130] sm:$0xf0]  ;;  %v11150_v55 = vld [vmem:[%s16329_s11 + $0x498] sm:$0xf] }
 0x2c1   : > { %v14646_v56 = vld [vmem:[%s16329_s11 + $0x1ec] sm:$0xf0]  ;;  %v14683_v58 = vld [vmem:[%s16329_s11 + $0x4f4] sm:$0xf0] }
 0x2c2   : > { %3508 = vmatpush.bf16.msra.mxu0 %v11567_v26  ;;  %3522 = vmatpush.bf16.msra.mxu1 %v10995_v30  ;;  %v11107_v26 = vor.u32 %v14673_v20, %v11106_v19  ;;  %v11395_v30 = vor.u32 %v14745_v22, %v11394_v12  ;;  %v14718_v2 = vld [vmem:[%s16329_s11 + $0x7ec] sm:$0xf0]  ;;  %v10967_v22 = vor.u32 %v14633_v17, %v10964_v18  ;;  %v11366_v17 = vld [vmem:[%s16329_s11 + $0x918] sm:$0xf] }
 0x2c3   : > { %3536 = vmatpush.bf16.msra.mxu2 %v11283_v34  ;;  %3550 = vmatpush.bf16.msra.mxu3 %v11571_v35  ;;  %v11683_v34 = vor.u32 %v14817_v23, %v11682_v13  ;;  %v11111_v35 = vor.u32 %v14669_v24, %v11108_v25  ;;  %v11574_v4 = vld [vmem:[%s16329_s11 + $0xd90] sm:$0xf]  ;;  %v14624_v24 = vld [vmem:[%s16329_s11 + $0x14] sm:$0xf]  ;;  %v14737_v18 = vld [vmem:[%s16329_s11 + $0x974] sm:$0xf0] }
 0x2c4   : > { %v14790_v6 = vld [vmem:[%s16329_s11 + $0xdec] sm:$0xf0]  ;;  %v10928_v25 = vld [vmem:[%s16329_s11 + $0x70] sm:$0xf0] }
 0x2c5   : > { %v10962_v49 = vld [vmem:[%s16329_s11 + $0xd0] sm:$0xf]  ;;  %v10931_v39 = vor.u32 %v14624_v24, %v10928_v25  ;;  %v11330_v24 = vld [vmem:[%s16329_s11 + $0x858] sm:$0xf] }
 0x2c6   : > { %3509 = vmatpush.bf16.msra.mxu0 %v11531_v42  ;;  %3523 = vmatpush.bf16.msra.mxu1 %v10959_v43  ;;  %v11359_v42 = vor.u32 %v14736_v37, %v11358_v36  ;;  %v11034_v43 = vld [vmem:[%s16329_s11 + $0x250] sm:$0xf]  ;;  %v14692_v37 = vld [vmem:[%s16329_s11 + $0x5b4] sm:$0xf0] }
 0x2c7   : > { %3537 = vmatpush.bf16.msra.mxu2 %v11247_v51  ;;  %3551 = vmatpush.bf16.msra.mxu3 %v11535_v54  ;;  %v11322_v51 = vld [vmem:[%s16329_s11 + $0x850] sm:$0xf]  ;;  %v11035_v62 = vor.u32 %v14655_v45, %v11034_v43  ;;  %v14750_v43 = vld [vmem:[%s16329_s11 + $0xa94] sm:$0xf]  ;;  %v14728_v25 = vld [vmem:[%s16329_s11 + $0x8b4] sm:$0xf0] }
 0x2c8   : > { %v14727_v54 = vld [vmem:[%s16329_s11 + $0x8ac] sm:$0xf0]  ;;  %v11432_v45 = vld [vmem:[%s16329_s11 + $0xaf0] sm:$0xf0] }
 0x2c9   : > { %v11323_v63 = vor.u32 %v14727_v54, %v11322_v51  ;;  %v14637_v3 = vld [vmem:[%s16329_s11 + $0x12c] sm:$0xf0]  ;;  %v14822_v51 = vld [vmem:[%s16329_s11 + $0x1094] sm:$0xf] }
 0x2ca   : > { %3510 = vmatpush.bf16.msra.mxu0 %v11495_v5  ;;  %3524 = vmatpush.bf16.msra.mxu1 %v10923_v1  ;;  %v11039_v5 = vor.u32 %v14651_v59, %v11036_v61  ;;  %v11286_v1 = vld [vmem:[%s16329_s11 + $0x790] sm:$0xf]  ;;  %v11720_v54 = vld [vmem:[%s16329_s11 + $0x10f0] sm:$0xf0]  ;;  %v11438_v59 = vld [vmem:[%s16329_s11 + $0xa98] sm:$0xf] }
 0x2cb   : > { %3538 = vmatpush.bf16.msra.mxu2 %v11211_v7  ;;  %3552 = vmatpush.bf16.msra.mxu3 %v11499_v48  ;;  %v14642_v7 = vld [vmem:[%s16329_s11 + $0x194] sm:$0xf]  ;;  %v11250_v10 = vld [vmem:[%s16329_s11 + $0x6d0] sm:$0xf]  ;;  %v14755_v61 = vld [vmem:[%s16329_s11 + $0xaf4] sm:$0xf0] }
 0x2cc   : > { %v11000_v48 = vld [vmem:[%s16329_s11 + $0x1f0] sm:$0xf0]  ;;  %v14709_v15 = vld [vmem:[%s16329_s11 + $0x72c] sm:$0xf0] }
 0x2cd   : > { %3511 = vmatmul.bf16.vlgmr.msra.gmra.mxu0 %v16632_v29  ;;  %3525 = vmatmul.bf16.vlgmr.msra.gmra.mxu1 %v16628_v27  ;;  %v11538_v16 = vld [vmem:[%s16329_s11 + $0xcd0] sm:$0xf]  ;;  %v11251_v19 = vor.u32 %v14709_v15, %v11250_v10  ;;  %v14804_v10 = vld [vmem:[%s16329_s11 + $0xf14] sm:$0xf] }
 0x2ce   : > { %3559 = vmatpush.bf16.msrb.mxu0 %v11179_v9  ;;  %3573 = vmatpush.bf16.msrb.mxu1 %v11467_v8  ;;  %v10999_v9 = vor.u32 %v14646_v56, %v10998_v60  ;;  %v11287_v8 = vor.u32 %v14718_v2, %v11286_v1  ;;  %v14781_v52 = vld [vmem:[%s16329_s11 + $0xd2c] sm:$0xf0]  ;;  %v14741_v60 = vld [vmem:[%s16329_s11 + $0x9d4] sm:$0xf] }
 0x2cf   : > { %3587 = vmatpush.bf16.msrb.mxu2 %v11755_v50  ;;  %3601 = vmatpush.bf16.msrb.mxu3 %v11183_v14  ;;  %v11575_v50 = vor.u32 %v14790_v6, %v11574_v4  ;;  %v11003_v14 = vor.u32 %v14642_v7, %v11000_v48  ;;  %v14628_v20 = vld [vmem:[%s16329_s11 + $0x6c] sm:$0xf0]  ;;  %v11539_v12 = vor.u32 %v14781_v52, %v11538_v16  ;;  %v11396_v56 = vld [vmem:[%s16329_s11 + $0xa30] sm:$0xf0]  ;;  %v11114_v4 = vld [vmem:[%s16329_s11 + $0x3d8] sm:$0xf] }
 0x2d0   : > { %3539 = vmatmul.bf16.vlgmr.msra.gmra.mxu2 %v16630_v28  ;;  %3553 = vmatmul.bf16.vlgmr.msra.gmra.mxu3 %v16632_v29  ;;  %v11502_v13 = vld [vmem:[%s16329_s11 + $0xc10] sm:$0xf]  ;;  %v14813_v1 = vld [vmem:[%s16329_s11 + $0xfd4] sm:$0xf]  ;;  %v14674_v6 = vld [vmem:[%s16329_s11 + $0x434] sm:$0xf0] }
 0x2d1   : > { %v14772_v23 = vld [vmem:[%s16329_s11 + $0xc6c] sm:$0xf0]  ;;  %v11684_v2 = vld [vmem:[%s16329_s11 + $0x1030] sm:$0xf0]  ;;  %v11402_v7 = vld [vmem:[%s16329_s11 + $0x9d8] sm:$0xf] }
 0x2d2   : > { %3560 = vmatpush.bf16.msrb.mxu0 %v11143_v53  ;;  %3574 = vmatpush.bf16.msrb.mxu1 %v11431_v57  ;;  %v10926_v53 = vld [vmem:[%s16329_s11 + $0x10] sm:$0xf]  ;;  %v10963_v57 = vor.u32 %v14637_v3, %v10962_v49  ;;  %v11503_v40 = vor.u32 %v14772_v23, %v11502_v13  ;;  %v14746_v48 = vld [vmem:[%s16329_s11 + $0xa34] sm:$0xf0]  ;;  %v14732_v49 = vld [vmem:[%s16329_s11 + $0x914] sm:$0xf] }
 0x2d3   : > { %3588 = vmatpush.bf16.msrb.mxu2 %v11719_v21  ;;  %3602 = vmatpush.bf16.msrb.mxu3 %v11147_v11  ;;  %v11214_v21 = vld [vmem:[%s16329_s11 + $0x610] sm:$0xf]  ;;  %v11360_v3 = vld [vmem:[%s16329_s11 + $0x970] sm:$0xf0]  ;;  %v11078_v16 = vld [vmem:[%s16329_s11 + $0x318] sm:$0xf] }
 0x2d4   : > { %v14700_v11 = vld [vmem:[%s16329_s11 + $0x66c] sm:$0xf0]  ;;  %v11648_v15 = vld [vmem:[%s16329_s11 + $0xf70] sm:$0xf0]  ;;  %v14665_v52 = vld [vmem:[%s16329_s11 + $0x374] sm:$0xf0] }
 0x2d5   : > { %v11215_v36 = vor.u32 %v14700_v11, %v11214_v21  ;;  %v11079_v21 = vor.u32 %v14665_v52, %v11078_v16  ;;  %v11367_v11 = vor.u32 %v14737_v18, %v11366_v17  ;;  %v11042_v13 = vld [vmem:[%s16329_s11 + $0x258] sm:$0xf]  ;;  %v14832_v16 = vld [vmem:[%s16329_s11 + $0x115c] sm:$0xf] }
 0x2d6   : > { %3561 = vmatpush.bf16.msrb.mxu0 %v11107_v26  ;;  %3575 = vmatpush.bf16.msrb.mxu1 %v11395_v30  ;;  %v14759_v26 = vld [vmem:[%s16329_s11 + $0xb54] sm:$0xf]  ;;  %v14656_v23 = vld [vmem:[%s16329_s11 + $0x2b4] sm:$0xf0]  ;;  %v11764_v52 = vld [vmem:[%s16329_s11 + $0x11b8] sm:$0xf0] }
 0x2d7   : > { %3589 = vmatpush.bf16.msrb.mxu2 %v11683_v34  ;;  %3603 = vmatpush.bf16.msrb.mxu3 %v11111_v35  ;;  %v11468_v30 = vld [vmem:[%s16329_s11 + $0xbb0] sm:$0xf0]  ;;  %v11186_v34 = vld [vmem:[%s16329_s11 + $0x558] sm:$0xf]  ;;  %v10927_v35 = vor.u32 %v14628_v20, %v10926_v53  ;;  %v11363_v53 = vor.u32 %v14732_v49, %v11360_v3  ;;  %v14688_v49 = vld [vmem:[%s16329_s11 + $0x55c] sm:$0xf] }
 0x2d8   : > { %v11324_v20 = vld [vmem:[%s16329_s11 + $0x8b0] sm:$0xf0]  ;;  %v11188_v3 = vld [vmem:[%s16329_s11 + $0x5b8] sm:$0xf0] }
 0x2da   : > { %3562 = vmatpush.bf16.msrb.mxu0 %v11071_v41  ;;  %3576 = vmatpush.bf16.msrb.mxu1 %v11359_v42  ;;  %v11471_v41 = vor.u32 %v14759_v26, %v11468_v30  ;;  %v11759_v42 = vor.u32 %v14831_v31, %v11756_v32  ;;  %v14714_v31 = vld [vmem:[%s16329_s11 + $0x794] sm:$0xf] }
 0x2db   : > { %3590 = vmatpush.bf16.msrb.mxu2 %v11647_v46  ;;  %3604 = vmatpush.bf16.msrb.mxu3 %v11075_v47  ;;  %v11187_v46 = vor.u32 %v14692_v37, %v11186_v34  ;;  %v11475_v47 = vor.u32 %v14764_v33, %v11474_v38  ;;  %v11288_v32 = vld [vmem:[%s16329_s11 + $0x7f0] sm:$0xf0]  ;;  %v11043_v34 = vor.u32 %v14656_v23, %v11042_v13  ;;  %v11006_v38 = vld [vmem:[%s16329_s11 + $0x198] sm:$0xf]  ;;  %v14751_v13 = vld [vmem:[%s16329_s11 + $0xa9c] sm:$0xf] }
 0x2dc   : > { %v11576_v37 = vld [vmem:[%s16329_s11 + $0xdf0] sm:$0xf0]  ;;  %v14647_v33 = vld [vmem:[%s16329_s11 + $0x1f4] sm:$0xf0]  ;;  %v11440_v23 = vld [vmem:[%s16329_s11 + $0xaf8] sm:$0xf0] }
 0x2de   : > { %3563 = vmatpush.bf16.msrb.mxu0 %v11035_v62  ;;  %3577 = vmatpush.bf16.msrb.mxu1 %v11323_v63  ;;  %v11435_v62 = vor.u32 %v14750_v43, %v11432_v45  ;;  %v11723_v63 = vor.u32 %v14822_v51, %v11720_v54  ;;  %v14705_v43 = vld [vmem:[%s16329_s11 + $0x6d4] sm:$0xf] }
 0x2df   : > { %3591 = vmatpush.bf16.msrb.mxu2 %v11611_v0  ;;  %3605 = vmatpush.bf16.msrb.mxu3 %v11039_v5  ;;  %v11151_v0 = vor.u32 %v14683_v58, %v11150_v55  ;;  %v11439_v5 = vor.u32 %v14755_v61, %v11438_v59  ;;  %v11252_v45 = vld [vmem:[%s16329_s11 + $0x730] sm:$0xf0]  ;;  %v10970_v55 = vld [vmem:[%s16329_s11 + $0xd8] sm:$0xf] }
 0x2e0   : > { %v14777_v51 = vld [vmem:[%s16329_s11 + $0xcd4] sm:$0xf]  ;;  %v14638_v58 = vld [vmem:[%s16329_s11 + $0x134] sm:$0xf0] }
 0x2e1   : > { %v11540_v54 = vld [vmem:[%s16329_s11 + $0xd30] sm:$0xf0]  ;;  %v11258_v59 = vld [vmem:[%s16329_s11 + $0x6d8] sm:$0xf] }
 0x2e2   : > { %3564 = vmatpush.bf16.msrb.mxu0 %v10999_v9  ;;  %3578 = vmatpush.bf16.msrb.mxu1 %v11287_v8  ;;  %v11399_v9 = vor.u32 %v14741_v60, %v11396_v56  ;;  %v11687_v8 = vor.u32 %v14813_v1, %v11684_v2  ;;  %v14710_v61 = vld [vmem:[%s16329_s11 + $0x734] sm:$0xf0]  ;;  %v11543_v60 = vor.u32 %v14777_v51, %v11540_v54  ;;  %v11216_v56 = vld [vmem:[%s16329_s11 + $0x670] sm:$0xf0]  ;;  %v14661_v51 = vld [vmem:[%s16329_s11 + $0x31c] sm:$0xf] }
 0x2e3   : > { %3592 = vmatpush.bf16.msrb.mxu2 %v11575_v50  ;;  %3606 = vmatpush.bf16.msrb.mxu3 %v11003_v14  ;;  %v11115_v50 = vor.u32 %v14674_v6, %v11114_v4  ;;  %v11403_v14 = vor.u32 %v14746_v48, %v11402_v7  ;;  %v10971_v1 = vor.u32 %v14638_v58, %v10970_v55  ;;  %v10934_v4 = vld [vmem:[%s16329_s11 + $0x18] sm:$0xf]  ;;  %v11080_v54 = vld [vmem:[%s16329_s11 + $0x378] sm:$0xf0] }
 0x2e4   : > { %v11259_v2 = vor.u32 %v14710_v61, %v11258_v59  ;;  %v14629_v6 = vld [vmem:[%s16329_s11 + $0x74] sm:$0xf0]  ;;  %v14733_v55 = vld [vmem:[%s16329_s11 + $0x91c] sm:$0xf] }
 0x2e5   : > { %v11222_v7 = vld [vmem:[%s16329_s11 + $0x618] sm:$0xf]  ;;  %v10935_v17 = vor.u32 %v14629_v6, %v10934_v4  ;;  %v11368_v58 = vld [vmem:[%s16329_s11 + $0x978] sm:$0xf0] }
 0x2e6   : > { %3565 = vmatpush.bf16.msrb.mxu0 %v10963_v57  ;;  %3579 = vmatpush.bf16.msrb.mxu1 %v11251_v19  ;;  %v11651_v57 = vor.u32 %v14804_v10, %v11648_v15  ;;  %v14723_v19 = vld [vmem:[%s16329_s11 + $0x854] sm:$0xf]  ;;  %v14701_v48 = vld [vmem:[%s16329_s11 + $0x674] sm:$0xf0]  ;;  %v11476_v15 = vld [vmem:[%s16329_s11 + $0xbb8] sm:$0xf0] }
 0x2e7   : > { %3593 = vmatpush.bf16.msrb.mxu2 %v11539_v12  ;;  %3607 = vmatpush.bf16.msrb.mxu3 %v10967_v22  ;;  %v14795_v12 = vld [vmem:[%s16329_s11 + $0xe54] sm:$0xf]  ;;  %v11327_v26 = vor.u32 %v14723_v19, %v11324_v20  ;;  %v11223_v18 = vor.u32 %v14701_v48, %v11222_v7  ;;  %v11726_v19 = vld [vmem:[%s16329_s11 + $0x1098] sm:$0xf]  ;;  %v14805_v59 = vld [vmem:[%s16329_s11 + $0xf1c] sm:$0xf] }
 0x2e8   : > { %v11612_v22 = vld [vmem:[%s16329_s11 + $0xeb0] sm:$0xf0]  ;;  %v14827_v20 = vld [vmem:[%s16329_s11 + $0x10f4] sm:$0xf0]  ;;  %v11656_v61 = vld [vmem:[%s16329_s11 + $0xf78] sm:$0xf0] }
 0x2e9   : > { %v11615_v30 = vor.u32 %v14795_v12, %v11612_v22  ;;  %v14679_v12 = vld [vmem:[%s16329_s11 + $0x49c] sm:$0xf] }
 0x2ea   : > { %3566 = vmatpush.bf16.msrb.mxu0 %v10927_v35  ;;  %3580 = vmatpush.bf16.msrb.mxu1 %v11215_v36  ;;  %v11331_v35 = vor.u32 %v14728_v25, %v11330_v24  ;;  %v14786_v36 = vld [vmem:[%s16329_s11 + $0xd94] sm:$0xf]  ;;  %v11152_v22 = vld [vmem:[%s16329_s11 + $0x4f8] sm:$0xf0] }
 0x2eb   : > { %3594 = vmatpush.bf16.msrb.mxu2 %v11503_v40  ;;  %3608 = vmatpush.bf16.msrb.mxu3 %v10931_v39  ;;  %v11294_v40 = vld [vmem:[%s16329_s11 + $0x798] sm:$0xf]  ;;  %v14823_v24 = vld [vmem:[%s16329_s11 + $0x109c] sm:$0xf] }
 0x2ec   : > { %v14719_v39 = vld [vmem:[%s16329_s11 + $0x7f4] sm:$0xf0]  ;;  %v11728_v25 = vld [vmem:[%s16329_s11 + $0x10f8] sm:$0xf0] }
 0x2ed   : > { %3567 = vmatmul.bf16.vlgmr.msrb.gmra.mxu0 %v16628_v27  ;;  %3581 = vmatmul.bf16.vlgmr.msrb.gmra.mxu1 %v16630_v28  ;;  %v14724_v4 = vld [vmem:[%s16329_s11 + $0x85c] sm:$0xf] }
 0x2ee   : > { %3615 = vmatpush.bf16.msra.mxu0 %v11471_v41  ;;  %3629 = vmatpush.bf16.msra.mxu1 %v11759_v42  ;;  %v11291_v41 = vor.u32 %v14714_v31, %v11288_v32  ;;  %v11579_v42 = vor.u32 %v14786_v36, %v11576_v37  ;;  %v11690_v31 = vld [vmem:[%s16329_s11 + $0xfd8] sm:$0xf]  ;;  %v14670_v36 = vld [vmem:[%s16329_s11 + $0x3dc] sm:$0xf] }
 0x2ef   : > { %3643 = vmatpush.bf16.msra.mxu2 %v11187_v46  ;;  %3657 = vmatpush.bf16.msra.mxu3 %v11475_v47  ;;  %v11007_v46 = vor.u32 %v14647_v33, %v11006_v38  ;;  %v11295_v47 = vor.u32 %v14719_v39, %v11294_v40  ;;  %v14818_v32 = vld [vmem:[%s16329_s11 + $0x1034] sm:$0xf0]  ;;  %v11116_v37 = vld [vmem:[%s16329_s11 + $0x438] sm:$0xf0] }
 0x2f0   : > { %3595 = vmatmul.bf16.vlgmr.msrb.gmra.mxu2 %v16632_v29  ;;  %3609 = vmatmul.bf16.vlgmr.msrb.gmra.mxu3 %v16628_v27  ;;  %v14742_v38 = vld [vmem:[%s16329_s11 + $0x9dc] sm:$0xf] }
 0x2f1   : > { %v11404_v33 = vld [vmem:[%s16329_s11 + $0xa38] sm:$0xf0] }
 0x2f2   : > { %3616 = vmatpush.bf16.msra.mxu0 %v11435_v62  ;;  %3630 = vmatpush.bf16.msra.mxu1 %v11723_v63  ;;  %v14696_v62 = vld [vmem:[%s16329_s11 + $0x614] sm:$0xf]  ;;  %v11255_v63 = vor.u32 %v14705_v43, %v11252_v45  ;;  %v14814_v40 = vld [vmem:[%s16329_s11 + $0xfdc] sm:$0xf]  ;;  %v11654_v43 = vld [vmem:[%s16329_s11 + $0xf18] sm:$0xf] }
 0x2f3   : > { %3644 = vmatpush.bf16.msra.mxu2 %v11151_v0  ;;  %3658 = vmatpush.bf16.msra.mxu3 %v11439_v5  ;;  %v14768_v0 = vld [vmem:[%s16329_s11 + $0xc14] sm:$0xf]  ;;  %v11692_v39 = vld [vmem:[%s16329_s11 + $0x1038] sm:$0xf0]  ;;  %v14809_v45 = vld [vmem:[%s16329_s11 + $0xf74] sm:$0xf0] }
 0x2f4   : > { %v11504_v5 = vld [vmem:[%s16329_s11 + $0xc70] sm:$0xf0]  ;;  %v11332_v6 = vld [vmem:[%s16329_s11 + $0x8b8] sm:$0xf0] }
 0x2f5   : > { %v11507_v10 = vor.u32 %v14768_v0, %v11504_v5  ;;  %v11371_v0 = vor.u32 %v14733_v55, %v11368_v58  ;;  %v11659_v5 = vor.u32 %v14805_v59, %v11656_v61  ;;  %v14796_v7 = vld [vmem:[%s16329_s11 + $0xe5c] sm:$0xf] }
 0x2f6   : > { %3617 = vmatpush.bf16.msra.mxu0 %v11399_v9  ;;  %3631 = vmatpush.bf16.msra.mxu1 %v11687_v8  ;;  %v11762_v9 = vld [vmem:[%s16329_s11 + $0x1158] sm:$0xf]  ;;  %v11620_v48 = vld [vmem:[%s16329_s11 + $0xeb8] sm:$0xf0] }
 0x2f7   : > { %3645 = vmatpush.bf16.msra.mxu2 %v11115_v50  ;;  %3659 = vmatpush.bf16.msra.mxu3 %v11403_v14  ;;  %v14836_v8 = vld [vmem:[%s16329_s11 + $0x11b4] sm:$0xf0]  ;;  %v14760_v50 = vld [vmem:[%s16329_s11 + $0xb5c] sm:$0xf]  ;;  %v11219_v14 = vor.u32 %v14696_v62, %v11216_v56  ;;  %v11655_v62 = vor.u32 %v14809_v45, %v11654_v43  ;;  %v11482_v43 = vld [vmem:[%s16329_s11 + $0xb60] sm:$0xf] }
 0x2f8   : > { %v14800_v56 = vld [vmem:[%s16329_s11 + $0xeb4] sm:$0xf0]  ;;  %v14765_v45 = vld [vmem:[%s16329_s11 + $0xbbc] sm:$0xf0] }
 0x2f9   : > { %v11483_v61 = vor.u32 %v14765_v45, %v11482_v43  ;;  %v14792_v43 = vld [vmem:[%s16329_s11 + $0xdfc] sm:$0xf0] }
 0x2fa   : > { %3618 = vmatpush.bf16.msra.mxu0 %v11363_v53  ;;  %3632 = vmatpush.bf16.msra.mxu1 %v11651_v57  ;;  %v11763_v53 = vor.u32 %v14836_v8, %v11762_v9  ;;  %v11191_v57 = vor.u32 %v14688_v49, %v11188_v3  ;;  %v11582_v49 = vld [vmem:[%s16329_s11 + $0xd98] sm:$0xf] }
 0x2fb   : > { %3646 = vmatpush.bf16.msra.mxu2 %v11079_v21  ;;  %3660 = vmatpush.bf16.msra.mxu3 %v11367_v11  ;;  %v11479_v21 = vor.u32 %v14760_v50, %v11476_v15  ;;  %v11767_v11 = vor.u32 %v14832_v16, %v11764_v52  ;;  %v14791_v3 = vld [vmem:[%s16329_s11 + $0xdf4] sm:$0xf0]  ;;  %v11335_v50 = vor.u32 %v14724_v4, %v11332_v6  ;;  %v11008_v15 = vld [vmem:[%s16329_s11 + $0x1f8] sm:$0xf0]  ;;  %v11122_v6 = vld [vmem:[%s16329_s11 + $0x3e0] sm:$0xf] }
 0x2fc   : > { %v14715_v16 = vld [vmem:[%s16329_s11 + $0x79c] sm:$0xf] }
 0x2fd   : > { %v11296_v52 = vld [vmem:[%s16329_s11 + $0x7f8] sm:$0xf0] }
 0x2fe   : > { %3619 = vmatpush.bf16.msra.mxu0 %v11327_v26  ;;  %3633 = vmatpush.bf16.msra.mxu1 %v11615_v30  ;;  %v11727_v26 = vor.u32 %v14827_v20, %v11726_v19  ;;  %v11155_v30 = vor.u32 %v14679_v12, %v11152_v22  ;;  %v11546_v19 = vld [vmem:[%s16329_s11 + $0xcd8] sm:$0xf]  ;;  %v14634_v12 = vld [vmem:[%s16329_s11 + $0xdc] sm:$0xf] }
 0x2ff   : > { %3647 = vmatpush.bf16.msra.mxu2 %v11043_v34  ;;  %3661 = vmatpush.bf16.msra.mxu3 %v11331_v35  ;;  %v11443_v34 = vor.u32 %v14751_v13, %v11440_v23  ;;  %v11731_v35 = vor.u32 %v14823_v24, %v11728_v25  ;;  %v14782_v20 = vld [vmem:[%s16329_s11 + $0xd34] sm:$0xf0]  ;;  %v10972_v22 = vld [vmem:[%s16329_s11 + $0x138] sm:$0xf0] }
 0x300   : > { %v14706_v13 = vld [vmem:[%s16329_s11 + $0x6dc] sm:$0xf] }
 0x301   : > { %v11260_v23 = vld [vmem:[%s16329_s11 + $0x738] sm:$0xf0] }
 0x302   : > { %3620 = vmatpush.bf16.msra.mxu0 %v11291_v41  ;;  %3634 = vmatpush.bf16.msra.mxu1 %v11579_v42  ;;  %v11691_v41 = vor.u32 %v14818_v32, %v11690_v31  ;;  %v11119_v42 = vor.u32 %v14670_v36, %v11116_v37  ;;  %v14778_v24 = vld [vmem:[%s16329_s11 + $0xcdc] sm:$0xf]  ;;  %v11510_v31 = vld [vmem:[%s16329_s11 + $0xc18] sm:$0xf] }
 0x303   : > { %3648 = vmatpush.bf16.msra.mxu2 %v11007_v46  ;;  %3662 = vmatpush.bf16.msra.mxu3 %v11295_v47  ;;  %v11407_v46 = vor.u32 %v14742_v38, %v11404_v33  ;;  %v11695_v47 = vor.u32 %v14814_v40, %v11692_v39  ;;  %v11548_v25 = vld [vmem:[%s16329_s11 + $0xd38] sm:$0xf0]  ;;  %v14773_v32 = vld [vmem:[%s16329_s11 + $0xc74] sm:$0xf0] }
 0x304   : > { %v11551_v36 = vor.u32 %v14778_v24, %v11548_v25  ;;  %v10936_v37 = vld [vmem:[%s16329_s11 + $0x78] sm:$0xf0] }
 0x305   : > { %v14697_v38 = vld [vmem:[%s16329_s11 + $0x61c] sm:$0xf] }
 0x306   : > { %3621 = vmatpush.bf16.msra.mxu0 %v11255_v63  ;;  %3635 = vmatpush.bf16.msra.mxu1 %v11543_v60  ;;  %v11083_v63 = vor.u32 %v14661_v51, %v11080_v54  ;;  %v11618_v60 = vld [vmem:[%s16329_s11 + $0xe58] sm:$0xf]  ;;  %v11224_v33 = vld [vmem:[%s16329_s11 + $0x678] sm:$0xf0]  ;;  %v11770_v51 = vld [vmem:[%s16329_s11 + $0x1160] sm:$0xf] }
 0x307   : > { %3649 = vmatpush.bf16.msra.mxu2 %v10971_v1  ;;  %3663 = vmatpush.bf16.msra.mxu3 %v11259_v2  ;;  %v14652_v1 = vld [vmem:[%s16329_s11 + $0x25c] sm:$0xf]  ;;  %v11619_v9 = vor.u32 %v14800_v56, %v11618_v60  ;;  %v14837_v54 = vld [vmem:[%s16329_s11 + $0x11bc] sm:$0xf0]  ;;  %v11227_v55 = vor.u32 %v14697_v38, %v11224_v33 }
 0x308   : > { %v11044_v2 = vld [vmem:[%s16329_s11 + $0x2b8] sm:$0xf0]  ;;  %v14684_v60 = vld [vmem:[%s16329_s11 + $0x4fc] sm:$0xf0] }
 0x309   : > { %v11047_v8 = vor.u32 %v14652_v1, %v11044_v2  ;;  %v14769_v40 = vld [vmem:[%s16329_s11 + $0xc1c] sm:$0xf]  ;;  %v11446_v56 = vld [vmem:[%s16329_s11 + $0xaa0] sm:$0xf] }
 0x30a   : > { %3622 = vmatpush.bf16.msra.mxu0 %v11219_v14  ;;  %3636 = vmatpush.bf16.msra.mxu1 %v11507_v10  ;;  %v11623_v14 = vor.u32 %v14796_v7, %v11620_v48  ;;  %v14643_v10 = vld [vmem:[%s16329_s11 + $0x19c] sm:$0xf]  ;;  %v14828_v1 = vld [vmem:[%s16329_s11 + $0x10fc] sm:$0xf0] }
 0x30b   : > { %3650 = vmatpush.bf16.msra.mxu2 %v10935_v17  ;;  %3664 = vmatpush.bf16.msra.mxu3 %v11223_v18  ;;  %v14787_v17 = vld [vmem:[%s16329_s11 + $0xd9c] sm:$0xf]  ;;  %v14675_v48 = vld [vmem:[%s16329_s11 + $0x43c] sm:$0xf0] }
 0x30c   : > { %v11584_v18 = vld [vmem:[%s16329_s11 + $0xdf8] sm:$0xf0]  ;;  %v14648_v33 = vld [vmem:[%s16329_s11 + $0x1fc] sm:$0xf0] }
 0x30d   : > { %3623 = vmatmul.bf16.vlgmr.msra.gmra.mxu0 %v16630_v28  ;;  %3637 = vmatmul.bf16.vlgmr.msra.gmra.mxu1 %v16632_v29  ;;  %v11512_v39 = vld [vmem:[%s16329_s11 + $0xc78] sm:$0xf0] }
 0x30e   : > { %3671 = vmatpush.bf16.msrb.mxu0 %v11763_v53  ;;  %3685 = vmatpush.bf16.msrb.mxu1 %v11191_v57  ;;  %v11583_v53 = vor.u32 %v14791_v3, %v11582_v49  ;;  %v11011_v57 = vor.u32 %v14643_v10, %v11008_v15  ;;  %v11515_v58 = vor.u32 %v14769_v40, %v11512_v39  ;;  %v11698_v49 = vld [vmem:[%s16329_s11 + $0xfe0] sm:$0xf] }
 0x30f   : > { %3699 = vmatpush.bf16.msrb.mxu2 %v11479_v21  ;;  %3713 = vmatpush.bf16.msrb.mxu3 %v11767_v11  ;;  %v11299_v21 = vor.u32 %v14715_v16, %v11296_v52  ;;  %v11587_v11 = vor.u32 %v14787_v17, %v11584_v18  ;;  %v14819_v3 = vld [vmem:[%s16329_s11 + $0x103c] sm:$0xf0]  ;;  %v11123_v10 = vor.u32 %v14675_v48, %v11122_v6 }
 0x310   : > { %3651 = vmatmul.bf16.vlgmr.msra.gmra.mxu2 %v16628_v27  ;;  %3665 = vmatmul.bf16.vlgmr.msra.gmra.mxu3 %v16630_v28  ;;  %v11086_v16 = vld [vmem:[%s16329_s11 + $0x320] sm:$0xf]  ;;  %v11699_v52 = vor.u32 %v14819_v3, %v11698_v49 }
 0x311   : > { %v14666_v17 = vld [vmem:[%s16329_s11 + $0x37c] sm:$0xf0] }
 0x312   : > { %3672 = vmatpush.bf16.msrb.mxu0 %v11727_v26  ;;  %3686 = vmatpush.bf16.msrb.mxu1 %v11155_v30  ;;  %v11547_v26 = vor.u32 %v14782_v20, %v11546_v19  ;;  %v10975_v30 = vor.u32 %v14634_v12, %v10972_v22  ;;  %v11374_v18 = vld [vmem:[%s16329_s11 + $0x920] sm:$0xf]  ;;  %v11087_v20 = vor.u32 %v14666_v17, %v11086_v16 }
 0x313   : > { %3700 = vmatpush.bf16.msrb.mxu2 %v11443_v34  ;;  %3714 = vmatpush.bf16.msrb.mxu3 %v11731_v35  ;;  %v14625_v34 = vld [vmem:[%s16329_s11 + $0x1c] sm:$0xf]  ;;  %v11263_v35 = vor.u32 %v14706_v13, %v11260_v23  ;;  %v14810_v19 = vld [vmem:[%s16329_s11 + $0xf7c] sm:$0xf0] }
 0x314   : > { %v14657_v22 = vld [vmem:[%s16329_s11 + $0x2bc] sm:$0xf0] }
 0x315   : > { %v11338_v13 = vld [vmem:[%s16329_s11 + $0x860] sm:$0xf] }
 0x316   : > { %3673 = vmatpush.bf16.msrb.mxu0 %v11691_v41  ;;  %3687 = vmatpush.bf16.msrb.mxu1 %v11119_v42  ;;  %v11194_v41 = vld [vmem:[%s16329_s11 + $0x560] sm:$0xf] }
 0x317   : > { %3701 = vmatpush.bf16.msrb.mxu2 %v11407_v46  ;;  %3715 = vmatpush.bf16.msrb.mxu3 %v11695_v47  ;;  %v14693_v42 = vld [vmem:[%s16329_s11 + $0x5bc] sm:$0xf0]  ;;  %v11511_v46 = vor.u32 %v14773_v32, %v11510_v31  ;;  %v10939_v47 = vor.u32 %v14625_v34, %v10936_v37  ;;  %v16947_v34 = vld [vmem:[%s16327_s3] sm:$0xff] }
 0x318   : > { %v11195_v59 = vor.u32 %v14693_v42, %v11194_v41  ;;  %v14729_v23 = vld [vmem:[%s16329_s11 + $0x8bc] sm:$0xf0]  ;;  %v2270_v41 = vperm.slane %v16947_v34, 1 }
 0x319   : > { %v11014_v37 = vld [vmem:[%s16329_s11 + $0x1a0] sm:$0xf] }
 0x31a   : > { %3674 = vmatpush.bf16.msrb.mxu0 %v11655_v62  ;;  %3688 = vmatpush.bf16.msrb.mxu1 %v11083_v63  ;;  %v11158_v62 = vld [vmem:[%s16329_s11 + $0x4a0] sm:$0xf]  ;;  %v11771_v63 = vor.u32 %v14837_v54, %v11770_v51  ;;  %v11015_v45 = vor.u32 %v14648_v33, %v11014_v37 }
 0x31b   : > { %3702 = vmatpush.bf16.msrb.mxu2 %v11371_v0  ;;  %3716 = vmatpush.bf16.msrb.mxu3 %v11659_v5  ;;  %v14756_v0 = vld [vmem:[%s16329_s11 + $0xafc] sm:$0xf0]  ;;  %v11159_v2 = vor.u32 %v14684_v60, %v11158_v62 }
 0x31c   : > { %v11734_v5 = vld [vmem:[%s16329_s11 + $0x10a0] sm:$0xf]  ;;  %v11447_v4 = vor.u32 %v14756_v0, %v11446_v56 }
 0x31d   : > { %v11735_v7 = vor.u32 %v14828_v1, %v11734_v5  ;;  %v11302_v40 = vld [vmem:[%s16329_s11 + $0x7a0] sm:$0xf] }
 0x31e   : > { %3675 = vmatpush.bf16.msrb.mxu0 %v11619_v9  ;;  %3689 = vmatpush.bf16.msrb.mxu1 %v11047_v8  ;;  %v11410_v9 = vld [vmem:[%s16329_s11 + $0x9e0] sm:$0xf] }
 0x31f   : > { %3703 = vmatpush.bf16.msrb.mxu2 %v11335_v50  ;;  %3717 = vmatpush.bf16.msrb.mxu3 %v11623_v14  ;;  %v14747_v8 = vld [vmem:[%s16329_s11 + $0xa3c] sm:$0xf0] }
 0x320   : > { %v11411_v15 = vor.u32 %v14747_v8, %v11410_v9  ;;  %v14720_v39 = vld [vmem:[%s16329_s11 + $0x7fc] sm:$0xf0] }
 0x321   : > { %v11590_v42 = vld [vmem:[%s16329_s11 + $0xda0] sm:$0xf] }
 0x322   : > { %3676 = vmatpush.bf16.msrb.mxu0 %v11583_v53  ;;  %3690 = vmatpush.bf16.msrb.mxu1 %v11011_v57  ;;  %v14738_v53 = vld [vmem:[%s16329_s11 + $0x97c] sm:$0xf0]  ;;  %v11591_v51 = vor.u32 %v14792_v43, %v11590_v42  ;;  %v2269_v42 = vperm.slane %v16947_v34, 0 }
 0x323   : > { %3704 = vmatpush.bf16.msrb.mxu2 %v11299_v21  ;;  %3718 = vmatpush.bf16.msrb.mxu3 %v11587_v11  ;;  %v11662_v57 = vld [vmem:[%s16329_s11 + $0xf20] sm:$0xf]  ;;  %v11375_v21 = vor.u32 %v14738_v53, %v11374_v18 }
 0x324   : > { %v11050_v11 = vld [vmem:[%s16329_s11 + $0x260] sm:$0xf]  ;;  %v11663_v12 = vor.u32 %v14810_v19, %v11662_v57 }
 0x325   : > { %v14639_v54 = vld [vmem:[%s16329_s11 + $0x13c] sm:$0xf0] }
 0x326   : > { %3677 = vmatpush.bf16.msrb.mxu0 %v11547_v26  ;;  %3691 = vmatpush.bf16.msrb.mxu1 %v10975_v30  ;;  %v11626_v26 = vld [vmem:[%s16329_s11 + $0xe60] sm:$0xf] }
 0x327   : > { %3705 = vmatpush.bf16.msrb.mxu2 %v11263_v35  ;;  %3719 = vmatpush.bf16.msrb.mxu3 %v11551_v36  ;;  %v14801_v30 = vld [vmem:[%s16329_s11 + $0xebc] sm:$0xf0]  ;;  %v11051_v35 = vor.u32 %v14657_v22, %v11050_v11  ;;  %v11339_v36 = vor.u32 %v14729_v23, %v11338_v13  ;;  %v3769_v22 = vlaneseq  ;;  %v2272_v13 = vperm.slane %v16947_v34, 3 }
 0x328   : > { %v11627_v38 = vor.u32 %v14801_v30, %v11626_v26  ;;  %v14783_v60 = vld [vmem:[%s16329_s11 + $0xd3c] sm:$0xf0] }
 0x329   : > { %v16924_v50 = vpop.f32.mrf.mxu0  ;;  %v16926_v14 = vpop.f32.mrf.mxu1  ;;  %v11230_v48 = vld [vmem:[%s16329_s11 + $0x620] sm:$0xf]  ;;  %v3770_v23 = vand.u32 127, %v3769_v22 }
 0x32a   : > { %3678 = vmatpush.bf16.msrb.mxu0 %v11511_v46  ;;  %3692 = vmatpush.bf16.msrb.mxu1 %v10939_v47  ;;  %v11303_v46 = vor.u32 %v14720_v39, %v11302_v40  ;;  %v10978_v47 = vld [vmem:[%s16329_s11 + $0xe0] sm:$0xf] }
 0x32b   : > { %3706 = vmatpush.bf16.msrb.mxu2 %v11227_v55  ;;  %3720 = vmatpush.bf16.msrb.mxu3 %v11515_v58  ;;  %v11266_v55 = vld [vmem:[%s16329_s11 + $0x6e0] sm:$0xf]  ;;  %v10979_v5 = vor.u32 %v14639_v54, %v10978_v47  ;;  %vm3771_vm13 = vcmp.lt.s32.totalorder %v3770_v23, 64 }
 0x32c   : > { %v14711_v58 = vld [vmem:[%s16329_s11 + $0x73c] sm:$0xf0] }
 0x32d   : > { %3679 = vmatmul.bf16.vlgmr.msrb.gmra.mxu0 %v16632_v29  ;;  %3693 = vmatmul.bf16.vlgmr.msrb.gmra.mxu1 %v16628_v27  ;;  %v11267_v1 = vor.u32 %v14711_v58, %v11266_v55  ;;  %v14702_v9 = vld [vmem:[%s16329_s11 + $0x67c] sm:$0xf0]  ;;  %v3401_v58 = vadd.f32 %v16924_v50, %v2269_v42 }
 0x32e   : > { %3727 = vmatpush.bf16.msra.mxu0 %v11195_v59  ;;  %3741 = vmatpush.bf16.msra.mxu1 %v11483_v61  ;;  %v11518_v49 = vld [vmem:[%s16329_s11 + $0xc20] sm:$0xf]  ;;  %v11231_v16 = vor.u32 %v14702_v9, %v11230_v48 }
 0x32f   : > { %3755 = vmatpush.bf16.msra.mxu2 %v11771_v63  ;;  %3721 = vmatmul.bf16.vlgmr.msrb.gmra.mxu3 %v16632_v29  ;;  %v11554_v63 = vld [vmem:[%s16329_s11 + $0xce0] sm:$0xf] }
 0x330   : > { %3707 = vmatmul.bf16.vlgmr.msrb.gmra.mxu2 %v16630_v28  ;;  %v16938_v24 = vpop.f32.mrf.mxu2  ;;  %v3442_v25 = vpop.f32.mrf.mxu3  ;;  %v11555_v6 = vor.u32 %v14783_v60, %v11554_v63  ;;  %v14774_v3 = vld [vmem:[%s16329_s11 + $0xc7c] sm:$0xf0] }
 0x331   : > { %v16942_v31 = vpop.f32.mrf.mxu0  ;;  %v16944_v32 = vpop.f32.mrf.mxu1  ;;  %v3443_v59 = vadd.f32 %v3442_v25, %v2270_v41 }
 0x332   : > { %3728 = vmatpush.bf16.msra.mxu0 %v11159_v2  ;;  %3742 = vmatpush.bf16.msra.mxu1 %v11447_v4  ;;  %v10942_v4 = vld [vmem:[%s16329_s11 + $0x20] sm:$0xf] }
 0x333   : > { %3756 = vmatpush.bf16.msra.mxu2 %v11735_v7  ;;  %v14630_v7 = vld [vmem:[%s16329_s11 + $0x7c] sm:$0xf0] }
 0x336   : > { %3729 = vmatpush.bf16.msra.mxu0 %v11123_v10  ;;  %3743 = vmatpush.bf16.msra.mxu1 %v11411_v15  ;;  %v2271_v10 = vperm.slane %v16947_v34, 2  ;;  %v10943_v15 = vor.u32 %v14630_v7, %v10942_v4 }
 0x337   : > { %3757 = vmatpush.bf16.msra.mxu2 %v11699_v52  ;;  %v11519_v52 = vor.u32 %v14774_v3, %v11518_v49 }
 0x338   : > { %v16962_v61 = vpop.f32.mrf.mxu2  ;;  %v16964_v62 = vpop.f32.mrf.mxu3 }
 0x339   : > { %v3456_v56 = vpop.f32.mrf.mxu0  ;;  %v3470_v0 = vpop.f32.mrf.mxu1 }
 0x33a   : > { %3730 = vmatpush.bf16.msra.mxu0 %v11087_v20  ;;  %3744 = vmatpush.bf16.msra.mxu1 %v11375_v21  ;;  %v3457_v2 = vadd.f32 %v3456_v56, %v3443_v59 }
 0x33b   : > { %3758 = vmatpush.bf16.msra.mxu2 %v11663_v12 }
 0x33c   : > { %v16972_v8 = vadd.f32 %v3470_v0, %v3457_v2  ;;  %v3415_v0 = vadd.f32 %v16926_v14, %v3401_v58 }
 0x33e   : > { %3731 = vmatpush.bf16.msra.mxu0 %v11051_v35  ;;  %3745 = vmatpush.bf16.msra.mxu1 %v11339_v36  ;;  %v16118_v36 = vmov 0.0  }
 0x33f   : > { %3759 = vmatpush.bf16.msra.mxu2 %v11627_v38 }
 0x340   : > { %v3484_v17 = vpop.f32.mrf.mxu2  ;;  %v3498_v18 = vpop.f32.mrf.mxu3 }
 0x341   : > { %v3485_v53 = vadd.f32 %v3484_v17, %v2271_v10  ;;  %v16979_v57 = vpop.f32.mrf.mxu1  ;;  %v3458_v12 = vpop.f32.mrf.mxu0 }
 0x342   : > { %3732 = vmatpush.bf16.msra.mxu0 %v11015_v45  ;;  %3746 = vmatpush.bf16.msra.mxu1 %v11303_v46  ;;  %v3403_v46 = vadd.f32 %v16942_v31, %v2269_v42 }
 0x343   : > { %3760 = vmatpush.bf16.msra.mxu2 %v11591_v51  ;;  %v16981_v19 = vadd.f32 %v3498_v18, %v3485_v53 }
 0x344   : > { %v3417_v56 = vadd.f32 %v16944_v32, %v3403_v46 }
 0x346   : > { %3733 = vmatpush.bf16.msra.mxu0 %v10979_v5  ;;  %3747 = vmatpush.bf16.msra.mxu1 %v11267_v1  ;;  %v3431_v31 = vadd.f32 %v16962_v61, %v3417_v56  ;;  %v3429_v5 = vadd.f32 %v16938_v24, %v3415_v0 }
 0x347   : > { %3761 = vmatpush.bf16.msra.mxu2 %v11555_v6  ;;  %v2273_v6 = vperm.slane %v16947_v34, 4 }
 0x348   : > { %v16986_v20 = vpop.f32.mrf.mxu2  ;;  %v16988_v21 = vpop.f32.mrf.mxu3  ;;  %v3775_v1 = vpack.c.bf16 %v3431_v31, %v3429_v5 }
 0x34a   : > { %3734 = vmatpush.bf16.msra.mxu0 %v10943_v15  ;;  %3748 = vmatpush.bf16.msra.mxu1 %v11231_v16  ;;  %v3526_v11 = vpop.f32.mrf.mxu1 }
 0x34b   : > { %3762 = vmatpush.bf16.msra.mxu2 %v11519_v52  ;;  %v3527_v30 = vadd.f32 %v3526_v11, %v2272_v13  ;;  %v3445_v11 = vadd.f32 %v16964_v62, %v2270_v41 }
 0x34d   : > { %3735 = vmatmul.bf16.vlgmr.msra.gmra.mxu0 %v16628_v27  ;;  %3749 = vmatmul.bf16.vlgmr.msra.gmra.mxu1 %v16630_v28  ;;  %v16991_v27 = vpop.f32.mrf.mxu0  ;;  %v3459_v22 = vadd.f32 %v3458_v12, %v3445_v11 }
 0x34e   : > { %3763 = vmatmul.bf16.vlgmr.msra.gmra.mxu2 %v16632_v29  ;;  %v16993_v29 = vsel %vm3771_vm13, 1.0, %v16118_v36 }
 0x34f   : > { %v16996_v40 = vsub.f32 1.0, %v16993_v29  ;;  %v3473_v23 = vadd.f32 %v16979_v57, %v3459_v22  ;;  %v3487_v57 = vadd.f32 %v16986_v20, %v2271_v10  ;;  %v3513_v10 = vadd.f32 %v16991_v27, %v16981_v19 }
 0x352   : > { %v3528_v35 = vpop.f32.mrf.mxu1 }
 0x353   : > { %v3540_v25 = vpop.f32.mrf.mxu2  ;;  %v3554_v26 = vpop.f32.mrf.mxu3  ;;  %v3529_v37 = vadd.f32 %v3528_v35, %v2272_v13  ;;  %v3899_v35 = vpack.c.bf16 %v3473_v23, %v16972_v8 }
 0x354   : > { %v3541_v28 = vadd.f32 %v3540_v25, %v3527_v30  ;;  %v2274_v25 = vperm.slane %v16947_v34, 5 }
 0x355   : > { %v3514_v59 = vpop.f32.mrf.mxu0 }
 0x356   : > { %v3555_v33 = vadd.f32 %v3554_v26, %v3541_v28 }
 0x358   : > { %v3776_v47 = vmul.f32 %v16993_v29, %v3555_v33  ;;  %v3779_v51 = vmul.f32 %v16996_v40, %v3555_v33 }
 0x35b   : > { %v3542_v38 = vpop.f32.mrf.mxu2  ;;  %v3556_v43 = vpop.f32.mrf.mxu3 }
 0x35c   : > { %v3543_v39 = vadd.f32 %v3542_v38, %v3529_v37 }
 0x35e   : > { %v3557_v45 = vadd.f32 %v3556_v43, %v3543_v39 }
 0x360   : > { %v3777_v54 = vmul.f32 %v16993_v29, %v3557_v45  ;;  %v3780_v55 = vmul.f32 %v16996_v40, %v3557_v45 }
 0x362   : > { %v3778_v63 = vpack.c.bf16 %v3777_v54, %v3776_v47  ;;  %v3781_v60 = vpack.c.bf16 %v3780_v55, %v3779_v51  ;;  %v3501_v51 = vadd.f32 %v16988_v21, %v3487_v57 }
 0x364   : > { %3795 = vmatpush.bf16.xpose.msra.mxu3 %v3778_v63  ;;  %v3515_v54 = vadd.f32 %v3514_v59, %v3501_v51  ;;  %v2275_v63 = vperm.slane %v16947_v34, 6 }
 0x366   : > { %v4022_v20 = vpack.c.bf16 %v3515_v54, %v3513_v10 }
 0x36a   : > { %v3568_v2 = vpop.f32.mrf.mxu0  ;;  %v3582_v4 = vpop.f32.mrf.mxu1 }
 0x36b   : > { %3796 = vmatmul.bf16.vlgmr.msra.gmra.mxu3 %v3775_v1  ;;  %v3569_v7 = vadd.f32 %v3568_v2, %v2273_v6  ;;  %v2276_v2 = vperm.slane %v16947_v34, 7 }
 0x36c   : > { %3809 = vmatpush.bf16.xpose.msrb.mxu3 %v3781_v60 }
 0x36d   : > { %v3583_v49 = vadd.f32 %v3582_v4, %v3569_v7 }
 0x372   : > { %v3570_v48 = vpop.f32.mrf.mxu0  ;;  %v3584_v32 = vpop.f32.mrf.mxu1 }
 0x373   : > { %v3596_v50 = vpop.f32.mrf.mxu2  ;;  %v3571_v9 = vadd.f32 %v3570_v48, %v2273_v6  ;;  %v3610_v13 = vpop.f32.mrf.mxu3 }
 0x374   : > { %v3597_v3 = vadd.f32 %v3596_v50, %v3583_v49  ;;  %v3611_v28 = vadd.f32 %v3610_v13, %v2274_v25 }
 0x375   : > { %v3585_v15 = vadd.f32 %v3584_v32, %v3571_v9 }
 0x376   : > { %v3900_v61 = vmul.f32 %v16993_v29, %v3597_v3  ;;  %v3903_v24 = vmul.f32 %v16996_v40, %v3597_v3 }
 0x37b   : > { %v3598_v14 = vpop.f32.mrf.mxu2  ;;  %3810 = vmatmul.bf16.vlgmr.msrb.gmra.mxu3 %v3775_v1  ;;  %v3612_v36 = vpop.f32.mrf.mxu3 }
 0x37c   : > { %v3599_v16 = vadd.f32 %v3598_v14, %v3585_v15  ;;  %v3613_v38 = vadd.f32 %v3612_v36, %v2274_v25  ;;  %v1930_v36 = vld [vmem:[#allocation4 + $0x8] sm:$0xff] }
 0x37e   : > { %v3901_v52 = vmul.f32 %v16993_v29, %v3599_v16  ;;  %v3904_v17 = vmul.f32 %v16996_v40, %v3599_v16 }
 0x380   : > { %v3902_v18 = vpack.c.bf16 %v3901_v52, %v3900_v61  ;;  %v3905_v53 = vpack.c.bf16 %v3904_v17, %v3903_v24 }
 0x382   : > { %3919 = vmatpush.bf16.xpose.msra.mxu3 %v3902_v18 }
 0x38a   : > { %3933 = vmatpush.bf16.xpose.msrb.mxu3 %v3905_v53  ;;  %v3624_v26 = vpop.f32.mrf.mxu0  ;;  %v3638_v30 = vpop.f32.mrf.mxu1 }
 0x38b   : > { %3920 = vmatmul.bf16.vlgmr.msra.gmra.mxu3 %v3899_v35  ;;  %v3625_v37 = vadd.f32 %v3624_v26, %v3611_v28  ;;  %v1929_v26 = vld [vmem:[#allocation4] sm:$0xff] }
 0x38d   : > { %v3639_v39 = vadd.f32 %v3638_v30, %v3625_v37 }
 0x38f   : > { %v4023_v42 = vmul.f32 %v16993_v29, %v3639_v39  ;;  %v4026_v43 = vmul.f32 %v16996_v40, %v3639_v39 }
 0x392   : > { %v3626_v33 = vpop.f32.mrf.mxu0  ;;  %v3640_v62 = vpop.f32.mrf.mxu1 }
 0x393   : > { %v3627_v41 = vadd.f32 %v3626_v33, %v3613_v38  ;;  %v3652_v55 = vpop.f32.mrf.mxu2  ;;  %v3666_v58 = vpop.f32.mrf.mxu3 }
 0x394   : > { %v3653_v31 = vadd.f32 %v3652_v55, %v2275_v63 }
 0x395   : > { %v3641_v12 = vadd.f32 %v3640_v62, %v3627_v41 }
 0x396   : > { %v3667_v21 = vadd.f32 %v3666_v58, %v3653_v31 }
 0x397   : > { %v4024_v8 = vmul.f32 %v16993_v29, %v3641_v12  ;;  %v4027_v45 = vmul.f32 %v16996_v40, %v3641_v12 }
 0x399   : > { %v4025_v46 = vpack.c.bf16 %v4024_v8, %v4023_v42  ;;  %v4028_v47 = vpack.c.bf16 %v4027_v45, %v4026_v43 }
 0x39b   : > { %4042 = vmatpush.bf16.xpose.msrb.mxu2 %v4025_v46  ;;  %4056 = vmatpush.bf16.xpose.msra.mxu3 %v4028_v47  ;;  %v3654_v60 = vpop.f32.mrf.mxu2  ;;  %v3668_v56 = vpop.f32.mrf.mxu3 }
 0x39c   : > { %3934 = vmatmul.bf16.vlgmr.msrb.gmra.mxu3 %v3899_v35  ;;  %v3655_v1 = vadd.f32 %v3654_v60, %v2275_v63 }
 0x39e   : > { %v3669_v59 = vadd.f32 %v3668_v56, %v3655_v1 }
 0x3a2   : > { %4043 = vmatmul.bf16.vlgmr.msrb.gmra.mxu2 %v4022_v20 }
 0x3aa   : > { %v3680_v0 = vpop.f32.mrf.mxu0  ;;  %v3694_v5 = vpop.f32.mrf.mxu1 }
 0x3ab   : > { %v3681_v4 = vadd.f32 %v3680_v0, %v3667_v21  ;;  %v3695_v27 = vadd.f32 %v3694_v5, %v2276_v2 }
 0x3ac   : > { %4057 = vmatmul.bf16.vlgmr.msra.gmra.mxu3 %v4022_v20 }
 0x3ad   : > { %v3782_v48 = vmul.f32 %v16993_v29, %v3681_v4  ;;  %v3785_v9 = vmul.f32 %v16996_v40, %v3681_v4 }
 0x3b2   : > { %v3722_v50 = vpop.f32.mrf.mxu3  ;;  %v3682_v7 = vpop.f32.mrf.mxu0 }
 0x3b3   : > { %v3708_v6 = vpop.f32.mrf.mxu2  ;;  %v3683_v19 = vadd.f32 %v3682_v7, %v3669_v59  ;;  %v3696_v3 = vpop.f32.mrf.mxu1 }
 0x3b4   : > { %v3709_v15 = vadd.f32 %v3708_v6, %v3695_v27  ;;  %v3697_v16 = vadd.f32 %v3696_v3, %v2276_v2 }
 0x3b5   : > { %v3783_v49 = vmul.f32 %v16993_v29, %v3683_v19  ;;  %v3786_v32 = vmul.f32 %v16996_v40, %v3683_v19 }
 0x3b6   : > { %v3723_v24 = vadd.f32 %v3722_v50, %v3709_v15 }
 0x3b7   : > { %v3784_v14 = vpack.c.bf16 %v3783_v49, %v3782_v48  ;;  %v3787_v34 = vpack.c.bf16 %v3786_v32, %v3785_v9 }
 0x3b8   : > { %v3906_v53 = vmul.f32 %v16993_v29, %v3723_v24  ;;  %v3909_v11 = vmul.f32 %v16996_v40, %v3723_v24 }
 0x3b9   : > { %3873 = vmatpush.bf16.msrb.mxu0 %v3787_v34  ;;  %3890 = vmatpush.bf16.msrb.mxu1 %v3784_v14 }
 0x3ba   : > { %v3724_v17 = vpop.f32.mrf.mxu3 }
 0x3bb   : > { %v3710_v61 = vpop.f32.mrf.mxu2 }
 0x3bc   : > { %v3711_v52 = vadd.f32 %v3710_v61, %v3697_v16 }
 0x3be   : > { %v3725_v18 = vadd.f32 %v3724_v17, %v3711_v52 }
 0x3c0   : > { %v3907_v22 = vmul.f32 %v16993_v29, %v3725_v18  ;;  %v3910_v13 = vmul.f32 %v16996_v40, %v3725_v18 }
 0x3c2   : > { %v3908_v23 = vpack.c.bf16 %v3907_v22, %v3906_v53  ;;  %v3911_v25 = vpack.c.bf16 %v3910_v13, %v3909_v11 }
 0x3c4   : > { %3996 = vmatpush.bf16.msra.mxu0 %v3911_v25  ;;  %4013 = vmatpush.bf16.msra.mxu1 %v3908_v23 }
 0x3d1   : > { %v17044_v45 = vpop.f32.mrf.mxu2 }
 0x3d9   : > { %v17051_v55 = vpop.f32.mrf.mxu2 }
 0x3ee   : > { %v3797_v30 = vpop.f32.mrf.mxu3 }
 0x3ef   : > { %v3798_v35 = vadd.f32 %v3797_v30, %v1929_v26 }
 0x3f1   : > { %v3817_v28 = vsel %vm3816_vm14, %v3798_v35, -inf }
 0x3f2   : > { %3818 = vmax.xlane.f32.xlu2 %v3817_v28 }
 0x3f6   : > { %v3799_v37 = vpop.f32.mrf.mxu3 }
 0x3f7   : > { %v3800_v38 = vadd.f32 %v3799_v37, %v1930_v36 }
 0x3f9   : > { %v3820_v33 = vsel %vm3816_vm14, %v3800_v38, -inf }
 0x3fa   : > { %3821 = vmax.xlane.f32.xlu2 %v3820_v33 }
 0x3fe   : > { %v3811_v39 = vpop.f32.mrf.mxu3 }
 0x3ff   : > { %v3812_v41 = vadd.f32 %v3811_v39, %v1929_v26 }
 0x401   : > { %v3829_v62 = vsel %vm3816_vm14, %v3812_v41, -inf }
 0x402   : > { %3830 = vmax.xlane.f32.xlu0 %v3829_v62 }
 0x406   : > { %v3813_v12 = vpop.f32.mrf.mxu3 }
 0x407   : > { %v3814_v57 = vadd.f32 %v3813_v12, %v1930_v36 }
 0x409   : > { %v3832_v42 = vsel %vm3816_vm14, %v3814_v57, -inf }
 0x40a   : > { %3833 = vmax.xlane.f32.xlu1 %v3832_v42 }
 0x40e   : > { %v3921_v43 = vpop.f32.mrf.mxu3 }
 0x40f   : > { %v3922_v8 = vadd.f32 %v3921_v43, %v1929_v26 }
 0x411   : > { %v3940_v46 = vsel %vm3816_vm14, %v3922_v8, -inf }
 0x412   : > { %3941 = vmax.xlane.f32.xlu2 %v3940_v46 }
 0x416   : > { %v3923_v47 = vpop.f32.mrf.mxu3 }
 0x417   : > { %v17047_v51 = vadd.f32 %v3923_v47, %v1930_v36 }
 0x419   : > { %v3943_v54 = vsel %vm3816_vm14, %v17047_v51, -inf }
 0x41a   : > { %3944 = vmax.xlane.f32.xlu0 %v3943_v54 }
 0x41f   : > { %v3935_v58 = vpop.f32.mrf.mxu3 }
 0x420   : > { %v17053_v10 = vadd.f32 %v3935_v58, %v1929_v26 }
 0x422   : > { %v3952_v20 = vsel %vm3816_vm14, %v17053_v10, -inf }
 0x423   : > { %3953 = vmax.xlane.f32.xlu1 %v3952_v20 }
 0x425   : > { %v4044_v63 = vpop.f32.mrf.mxu2 }
 0x426   : > { %v17057_v60 = vadd.f32 %v4044_v63, %v1929_v26 }
 0x427   : > { %v3937_v0 = vpop.f32.mrf.mxu3 }
 0x428   : > { %v4063_v56 = vsel %vm3816_vm14, %v17057_v60, -inf  ;;  %v17061_v31 = vadd.f32 %v3937_v0, %v1930_v36 }
 0x429   : > { %4064 = vmax.xlane.f32.xlu0 %v4063_v56 }
 0x42a   : > { %v3955_v5 = vsel %vm3816_vm14, %v17061_v31, -inf }
 0x42b   : > { %3956 = vmax.xlane.f32.xlu2 %v3955_v5 }
 0x42d   : > { %v4046_v1 = vpop.f32.mrf.mxu2 }
 0x42e   : > { %v17065_v21 = vadd.f32 %v4046_v1, %v1930_v36 }
 0x42f   : > { %v4058_v59 = vpop.f32.mrf.mxu3 }
 0x430   : > { %v4066_v2 = vsel %vm3816_vm14, %v17065_v21, -inf  ;;  %v17069_v4 = vadd.f32 %v4058_v59, %v1929_v26 }
 0x431   : > { %4067 = vmax.xlane.f32.xlu1 %v4066_v2 }
 0x432   : > { %v4075_v6 = vsel %vm3816_vm14, %v17069_v4, -inf }
 0x433   : > { %4076 = vmax.xlane.f32.xlu2 %v4075_v6 }
 0x437   : > { %v4060_v50 = vpop.f32.mrf.mxu3 }
 0x438   : > { %v17073_v7 = vadd.f32 %v4060_v50, %v1930_v36 }
 0x43a   : > { %v4078_v19 = vsel %vm3816_vm14, %v17073_v7, -inf }
 0x43b   : > { %4079 = vmax.xlane.f32.xlu0 %v4078_v19 }
 0x465   : > { %v3819_v27 = vpop.xlane.xlu2 %3818 }
 0x466   : > { %v3823_v48 = vsub.f32 %v3798_v35, %v3819_v27 }
 0x468   : > { %v3825_v9 = vmul.f32 1.442695, %v3823_v48 }
 0x46a   : > { %15656 = vpow2.f32 %v3825_v9  ;;  %v3736_v9 = vpop.f32.mrf.mxu0 }
 0x46d   : > { %v3822_v49 = vpop.xlane.xlu2 %3821 }
 0x46e   : > { %v3824_v32 = vsub.f32 %v3800_v38, %v3822_v49 }
 0x470   : > { %v17077_v3 = vpop.eup %15656  ;;  %v3827_v15 = vmul.f32 1.442695, %v3824_v32  ;;  %v15649_v32 = vld [vmem:[%s16327_s3 + $0x8] ss:$0 sm:$0xff] }
 0x471   : > { %v3841_v14 = vsel %vm3816_vm14, %v17077_v3, 0.0 }
 0x472   : > { %15658 = vpow2.f32 %v3827_v15  ;;  %3842 = vadd.xlane.f32.xlu1 %v3841_v14  ;;  %v3738_v49 = vpop.f32.mrf.mxu0 }
 0x473   : > { %v3739_v14 = vadd.f32 %v15649_v32, %v3738_v49 }
 0x475   : > { %v3831_v34 = vpop.xlane.xlu0 %3830 }
 0x476   : > { %v3835_v16 = vsub.f32 %v3812_v41, %v3831_v34  ;;  %v3737_v34 = vadd.f32 %v15649_v32, %v3736_v9 }
 0x478   : > { %v17081_v61 = vpop.eup %15658  ;;  %v3837_v24 = vmul.f32 1.442695, %v3835_v16 }
 0x479   : > { %v3844_v52 = vsel %vm3816_vm14, %v17081_v61, 0.0 }
 0x47a   : > { %15660 = vpow2.f32 %v3837_v24  ;;  %3845 = vadd.xlane.f32.xlu2 %v3844_v52 }
 0x47d   : > { %v3834_v17 = vpop.xlane.xlu1 %3833 }
 0x47e   : > { %v3836_v18 = vsub.f32 %v3814_v57, %v3834_v17 }
 0x480   : > { %v17085_v53 = vpop.eup %15660  ;;  %v3839_v11 = vmul.f32 1.442695, %v3836_v18 }
 0x481   : > { %v3852_v22 = vsel %vm3816_vm14, %v17085_v53, 0.0 }
 0x482   : > { %15662 = vpow2.f32 %v3839_v11  ;;  %3853 = vadd.xlane.f32.xlu0 %v3852_v22 }
 0x485   : > { %v3942_v13 = vpop.xlane.xlu2 %3941 }
 0x486   : > { %v3946_v23 = vsub.f32 %v3922_v8, %v3942_v13 }
 0x488   : > { %v17089_v25 = vpop.eup %15662  ;;  %v3948_v26 = vmul.f32 1.442695, %v3946_v23 }
 0x489   : > { %v3855_v30 = vsel %vm3816_vm14, %v17089_v25, 0.0 }
 0x48a   : > { %15664 = vpow2.f32 %v3948_v26  ;;  %3856 = vadd.xlane.f32.xlu1 %v3855_v30 }
 0x48d   : > { %v3945_v35 = vpop.xlane.xlu0 %3944 }
 0x48e   : > { %v3947_v28 = vsub.f32 %v17047_v51, %v3945_v35 }
 0x490   : > { %v17094_v36 = vpop.eup %15664  ;;  %v3950_v37 = vmul.f32 1.442695, %v3947_v28 }
 0x491   : > { %v3964_v38 = vsel %vm3816_vm14, %v17094_v36, 0.0 }
 0x492   : > { %15666 = vpow2.f32 %v3950_v37  ;;  %3965 = vadd.xlane.f32.xlu2 %v3964_v38 }
 0x496   : > { %v3954_v33 = vpop.xlane.xlu1 %3953 }
 0x497   : > { %v3958_v39 = vsub.f32 %v17053_v10, %v3954_v33 }
 0x498   : > { %v17099_v41 = vpop.eup %15666 }
 0x499   : > { %v3960_v62 = vmul.f32 1.442695, %v3958_v39  ;;  %v3967_v12 = vsel %vm3816_vm14, %v17099_v41, 0.0 }
 0x49a   : > { %3968 = vadd.xlane.f32.xlu0 %v3967_v12 }
 0x49b   : > { %15668 = vpow2.f32 %v3960_v62 }
 0x49c   : > { %v4065_v57 = vpop.xlane.xlu0 %4064 }
 0x49d   : > { %v4069_v42 = vsub.f32 %v17057_v60, %v4065_v57 }
 0x49e   : > { %v3957_v8 = vpop.xlane.xlu2 %3956 }
 0x49f   : > { %v4071_v43 = vmul.f32 1.442695, %v4069_v42  ;;  %v3959_v46 = vsub.f32 %v17061_v31, %v3957_v8 }
 0x4a1   : > { %15670 = vpow2.f32 %v4071_v43  ;;  %v17105_v47 = vpop.eup %15668  ;;  %v3962_v51 = vmul.f32 1.442695, %v3959_v46 }
 0x4a2   : > { %v3975_v54 = vsel %vm3816_vm14, %v17105_v47, 0.0 }
 0x4a3   : > { %15672 = vpow2.f32 %v3962_v51  ;;  %3976 = vadd.xlane.f32.xlu1 %v3975_v54  ;;  %v11865_v51 = vld [vmem:[%s16329_s11 + $0x564] sm:$0xf] }
 0x4a4   : > { %v4068_v58 = vpop.xlane.xlu1 %4067  ;;  %v14860_v54 = vld [vmem:[%s16329_s11 + $0x5c0] sm:$0xf0] }
 0x4a5   : > { %v4070_v10 = vsub.f32 %v17065_v21, %v4068_v58  ;;  %v11853_v58 = vld [vmem:[%s16329_s11 + $0x4a4] sm:$0xf] }
 0x4a6   : > { %v4077_v60 = vpop.xlane.xlu2 %4076 }
 0x4a7   : > { %v17110_v20 = vpop.eup %15670  ;;  %v4073_v63 = vmul.f32 1.442695, %v4070_v10  ;;  %v4081_v0 = vsub.f32 %v17069_v4, %v4077_v60  ;;  %v11866_v10 = vor.u32 %v14860_v54, %v11865_v51  ;;  %v14859_v60 = vld [vmem:[%s16329_s11 + $0x568] sm:$0xf] }
 0x4a8   : > { %v4087_v56 = vsel %vm3816_vm14, %v17110_v20, 0.0 }
 0x4a9   : > { %15674 = vpow2.f32 %v4073_v63  ;;  %4088 = vadd.xlane.f32.xlu0 %v4087_v56  ;;  %v17115_v31 = vpop.eup %15672  ;;  %v4083_v5 = vmul.f32 1.442695, %v4081_v0  ;;  %v14857_v63 = vld [vmem:[%s16329_s11 + $0x500] sm:$0xf0]  ;;  %v11867_v56 = vld [vmem:[%s16329_s11 + $0x5c4] sm:$0xf0]  ;;  %4641 = vmatpush.bf16.msra.mxu2 %v11866_v10 }
 0x4aa   : > { %v3978_v1 = vsel %vm3816_vm14, %v17115_v31, 0.0  ;;  %v11854_v0 = vor.u32 %v14857_v63, %v11853_v58  ;;  %v14844_v58 = vld [vmem:[%s16329_s11 + $0x1a8] sm:$0xf]  ;;  %v11949_v63 = vld [vmem:[%s16329_s11 + $0xaa4] sm:$0xf] }
 0x4ab   : > { %15676 = vpow2.f32 %v4083_v5  ;;  %3979 = vadd.xlane.f32.xlu2 %v3978_v1  ;;  %v11870_v5 = vor.u32 %v14859_v60, %v11867_v56  ;;  %v11841_v1 = vld [vmem:[%s16329_s11 + $0x3e4] sm:$0xf]  ;;  %v11807_v10 = vld [vmem:[%s16329_s11 + $0x204] sm:$0xf0] }
 0x4ac   : > { %v11810_v60 = vor.u32 %v14844_v58, %v11807_v10  ;;  %v14881_v56 = vld [vmem:[%s16329_s11 + $0xb00] sm:$0xf0]  ;;  %v11933_v58 = vld [vmem:[%s16329_s11 + $0x92c] sm:$0xf] }
 0x4ad   : > { %4642 = vmatpush.bf16.msra.mxu2 %v11854_v0  ;;  %v14880_v0 = vld [vmem:[%s16329_s11 + $0xaa8] sm:$0xf]  ;;  %v14876_v10 = vld [vmem:[%s16329_s11 + $0x988] sm:$0xf0] }
 0x4ae   : > { %v4080_v2 = vpop.xlane.xlu0 %4079 }
 0x4af   : > { %v17119_v21 = vpop.eup %15674  ;;  %v4082_v59 = vsub.f32 %v17073_v7, %v4080_v2  ;;  %v3750_v7 = vpop.f32.mrf.mxu1 }
 0x4b0   : > { %v4090_v6 = vsel %vm3816_vm14, %v17119_v21, 0.0  ;;  %v3751_v17 = vadd.f32 %v3750_v7, %v3737_v34 }
 0x4b1   : > { %4091 = vadd.xlane.f32.xlu1 %v4090_v6  ;;  %v17124_v4 = vpop.eup %15676  ;;  %v4085_v50 = vmul.f32 1.442695, %v4082_v59 }
 0x4b2   : > { %v4098_v19 = vsel %vm3816_vm14, %v17124_v4, 0.0  ;;  %v3765_v22 = vadd.f32 %v17044_v45, %v3751_v17 }
 0x4b3   : > { %15678 = vpow2.f32 %v4085_v50  ;;  %4099 = vadd.xlane.f32.xlu2 %v4098_v19 }
 0x4b4   : > { %v4029_v35 = vmul.f32 %v16993_v29, %v3765_v22 }
 0x4b7   : > { %v3752_v16 = vpop.f32.mrf.mxu1 }
 0x4b8   : > { %v3753_v52 = vadd.f32 %v3752_v16, %v3739_v14 }
 0x4b9   : > { %v17128_v27 = vpop.eup %15678 }
 0x4ba   : > { %v4101_v48 = vsel %vm3816_vm14, %v17128_v27, 0.0  ;;  %v3767_v18 = vadd.f32 %v17051_v55, %v3753_v52 }
 0x4bb   : > { %4102 = vadd.xlane.f32.xlu0 %v4101_v48 }
 0x4bc   : > { %v4030_v23 = vmul.f32 %v16993_v29, %v3767_v18  ;;  %v4033_v39 = vmul.f32 %v16996_v40, %v3767_v18  ;;  %v14851_v18 = vld [vmem:[%s16329_s11 + $0x380] sm:$0xf0] }
 0x4be   : > { %v4031_v37 = vpack.c.bf16 %v4030_v23, %v4029_v35  ;;  %v11817_v23 = vld [vmem:[%s16329_s11 + $0x264] sm:$0xf] }
 0x4e5   : > { %v3843_v15 = vpop.xlane.xlu1 %3842 }
 0x4e6   : > { %15680 = vrcp.f32 %v3843_v15 }
 0x4ec   : > { %v15681_v11 = vpop.eup %15680 }
 0x4ed   : > { %v3846_v24 = vpop.xlane.xlu2 %3845  ;;  %v3849_v26 = vmul.f32 %v15681_v11, %v17077_v3  ;;  %v14856_v11 = vld [vmem:[%s16329_s11 + $0x4a8] sm:$0xf] }
 0x4ee   : > { %15682 = vrcp.f32 %v3846_v24 }
 0x4f4   : > { %v15683_v13 = vpop.eup %15682 }
 0x4f5   : > { %v3850_v30 = vmul.f32 %v15683_v13, %v17081_v61  ;;  %v3854_v38 = vpop.xlane.xlu0 %3853  ;;  %v4032_v61 = vmul.f32 %v16996_v40, %v3765_v22  ;;  %v11855_v13 = vld [vmem:[%s16329_s11 + $0x504] sm:$0xf0] }
 0x4f6   : > { %15684 = vrcp.f32 %v3854_v38  ;;  %v14845_v38 = vld [vmem:[%s16329_s11 + $0x200] sm:$0xf0] }
 0x4f7   : > { %v3851_v28 = vpack.c.bf16 %v3850_v30, %v3849_v26  ;;  %v4034_v12 = vpack.c.bf16 %v4033_v39, %v4032_v61  ;;  %v14848_v26 = vld [vmem:[%s16329_s11 + $0x2c0] sm:$0xf0]  ;;  %v11858_v30 = vor.u32 %v14856_v11, %v11855_v13  ;;  %v14847_v61 = vld [vmem:[%s16329_s11 + $0x268] sm:$0xf] }
 0x4f8   : > { %v11818_v35 = vor.u32 %v14848_v26, %v11817_v23  ;;  %v11793_v39 = vld [vmem:[%s16329_s11 + $0xe4] sm:$0xf]  ;;  %v14871_v23 = vld [vmem:[%s16329_s11 + $0x868] sm:$0xf] }
 0x4f9   : > { %11774 = vmatmul.msk.bf16.vlgmr.msrb.gmra.mxu1 %vm3816_vm14, %v3851_v28  ;;  %v12057_v11 = vld [vmem:[%s16329_s11 + $0x1164] sm:$0xf]  ;;  %v11915_v26 = vld [vmem:[%s16329_s11 + $0x8c4] sm:$0xf0] }
 0x4fa   : > { %4136 = vmatpush.bf16.msrb.mxu1 %v4031_v37  ;;  %v11805_v37 = vld [vmem:[%s16329_s11 + $0x1a4] sm:$0xf] }
 0x4fb   : > { %v14908_v13 = vld [vmem:[%s16329_s11 + $0x11c0] sm:$0xf0] }
 0x4fc   : > { %v15685_v33 = vpop.eup %15684 }
 0x4fd   : > { %v3857_v55 = vpop.xlane.xlu1 %3856  ;;  %v3860_v62 = vmul.f32 %v15685_v33, %v17085_v53  ;;  %v11806_v33 = vor.u32 %v14845_v38, %v11805_v37  ;;  %v14869_v38 = vld [vmem:[%s16329_s11 + $0x800] sm:$0xf0] }
 0x4fe   : > { %15686 = vrcp.f32 %v3857_v55  ;;  %v14850_v55 = vld [vmem:[%s16329_s11 + $0x328] sm:$0xf] }
 0x504   : > { %v15687_v45 = vpop.eup %15686 }
 0x505   : > { %v3861_v3 = vmul.f32 %v15687_v45, %v17089_v25  ;;  %v3966_v57 = vpop.xlane.xlu2 %3965  ;;  %v11831_v45 = vld [vmem:[%s16329_s11 + $0x384] sm:$0xf0] }
 0x506   : > { %15688 = vrcp.f32 %v3966_v57 }
 0x507   : > { %v3862_v29 = vpack.c.bf16 %v3861_v3, %v3860_v62  ;;  %v14842_v62 = vld [vmem:[%s16329_s11 + $0x140] sm:$0xf0]  ;;  %v11834_v3 = vor.u32 %v14850_v55, %v11831_v45 }
 0x508   : > { %v12045_v55 = vld [vmem:[%s16329_s11 + $0x10a4] sm:$0xf] }
 0x509   : > { %11773 = vmatmul.msk.bf16.vlgmr.msrb.gmra.mxu0 %vm3816_vm14, %v3862_v29  ;;  %v11819_v29 = vld [vmem:[%s16329_s11 + $0x2c4] sm:$0xf0] }
 0x50a   : > { %4119 = vmatpush.bf16.msrb.mxu0 %v4034_v12  ;;  %v11794_v12 = vor.u32 %v14842_v62, %v11793_v39  ;;  %v11822_v57 = vor.u32 %v14847_v61, %v11819_v29  ;;  %v14868_v39 = vld [vmem:[%s16329_s11 + $0x7a8] sm:$0xf]  ;;  %v14879_v29 = vld [vmem:[%s16329_s11 + $0xa48] sm:$0xf0] }
 0x50b   : > { %v11903_v62 = vld [vmem:[%s16329_s11 + $0x804] sm:$0xf0] }
 0x50c   : > { %v15689_v53 = vpop.eup %15688 }
 0x50d   : > { %v3969_v42 = vpop.xlane.xlu0 %3968  ;;  %v3972_v25 = vmul.f32 %v15689_v53, %v17094_v36  ;;  %v14839_v53 = vld [vmem:[%s16329_s11 + $0x80] sm:$0xf0] }
 0x50e   : > { %15690 = vrcp.f32 %v3969_v42  ;;  %v11781_v42 = vld [vmem:[%s16329_s11 + $0x24] sm:$0xf] }
 0x514   : > { %v15691_v43 = vpop.eup %15690 }
 0x515   : > { %v3973_v40 = vmul.f32 %v15691_v43, %v17099_v41  ;;  %v14854_v41 = vld [vmem:[%s16329_s11 + $0x440] sm:$0xf0] }
 0x516   : > { %v3977_v46 = vpop.xlane.xlu1 %3976  ;;  %v11842_v59 = vor.u32 %v14854_v41, %v11841_v1  ;;  %v11961_v43 = vld [vmem:[%s16329_s11 + $0xb64] sm:$0xf]  ;;  %v14841_v41 = vld [vmem:[%s16329_s11 + $0xe8] sm:$0xf] }
 0x517   : > { %v3974_v8 = vpack.c.bf16 %v3973_v40, %v3972_v25  ;;  %15692 = vrcp.f32 %v3977_v46  ;;  %v11782_v25 = vor.u32 %v14839_v53, %v11781_v42  ;;  %v14884_v40 = vld [vmem:[%s16329_s11 + $0xbc0] sm:$0xf0]  ;;  %v11963_v46 = vld [vmem:[%s16329_s11 + $0xbc4] sm:$0xf0] }
 0x518   : > { %4643 = vmatpush.bf16.msra.mxu2 %v11842_v59  ;;  %v11962_v51 = vor.u32 %v14884_v40, %v11961_v43  ;;  %v11889_v42 = vld [vmem:[%s16329_s11 + $0x6e4] sm:$0xf] }
 0x519   : > { %11776 = vmatmul.msk.bf16.vlgmr.msra.gmra.mxu1 %vm3816_vm14, %v3974_v8  ;;  %v14883_v8 = vld [vmem:[%s16329_s11 + $0xb68] sm:$0xf]  ;;  %v14866_v53 = vld [vmem:[%s16329_s11 + $0x740] sm:$0xf0] }
 0x51a   : > { %4683 = vmatpush.bf16.msra.mxu1 %v11870_v5  ;;  %v11966_v54 = vor.u32 %v14883_v8, %v11963_v46  ;;  %v11951_v5 = vld [vmem:[%s16329_s11 + $0xb04] sm:$0xf0]  ;;  %4655 = vmatpush.bf16.msrb.mxu3 %v11962_v51  ;;  %v12033_v43 = vld [vmem:[%s16329_s11 + $0xfe4] sm:$0xf] }
 0x51b   : > { %v11954_v1 = vor.u32 %v14880_v0, %v11951_v5  ;;  %v14902_v40 = vld [vmem:[%s16329_s11 + $0x1040] sm:$0xf0]  ;;  %v14865_v8 = vld [vmem:[%s16329_s11 + $0x6e8] sm:$0xf] }
 0x51c   : > { %v4089_v2 = vpop.xlane.xlu0 %4088  ;;  %v11891_v46 = vld [vmem:[%s16329_s11 + $0x744] sm:$0xf0]  ;;  %v12034_v51 = vor.u32 %v14902_v40, %v12033_v43  ;;  %v12021_v0 = vld [vmem:[%s16329_s11 + $0xf24] sm:$0xf] }
 0x51d   : > { %v15693_v6 = vpop.eup %15692  ;;  %v14899_v5 = vld [vmem:[%s16329_s11 + $0xf80] sm:$0xf0] }
 0x51e   : > { %v3980_v36 = vpop.xlane.xlu2 %3979  ;;  %v3983_v48 = vmul.f32 %v15693_v6, %v17105_v47  ;;  %4684 = vmatpush.bf16.msra.mxu1 %v11858_v30  ;;  %v11937_v6 = vld [vmem:[%s16329_s11 + $0x9e4] sm:$0xf]  ;;  %v12058_v30 = vor.u32 %v14908_v13, %v12057_v11  ;;  %v11897_v13 = vld [vmem:[%s16329_s11 + $0x6ec] sm:$0xf] }
 0x51f   : > { %15694 = vrcp.f32 %v3980_v36  ;;  %v11950_v36 = vor.u32 %v14881_v56, %v11949_v63  ;;  %v11877_v63 = vld [vmem:[%s16329_s11 + $0x624] sm:$0xf] }
 0x520   : > { %15696 = vrcp.f32 %v4089_v2  ;;  %v11795_v2 = vld [vmem:[%s16329_s11 + $0x144] sm:$0xf0]  ;;  %v14863_v56 = vld [vmem:[%s16329_s11 + $0x680] sm:$0xf0] }
 0x521   : > { %v11798_v59 = vor.u32 %v14841_v41, %v11795_v2  ;;  %4656 = vmatpush.bf16.msrb.mxu3 %v11950_v36  ;;  %v12022_v36 = vor.u32 %v14899_v5, %v12021_v0  ;;  %v11879_v41 = vld [vmem:[%s16329_s11 + $0x684] sm:$0xf0]  ;;  %v14887_v40 = vld [vmem:[%s16329_s11 + $0xc80] sm:$0xf0] }
 0x522   : > { %v14907_v2 = vld [vmem:[%s16329_s11 + $0x1168] sm:$0xf] }
 0x523   : > { %v14892_v5 = vld [vmem:[%s16329_s11 + $0xda8] sm:$0xf] }
 0x524   : > { %v4092_v50 = vpop.xlane.xlu1 %4091 }
 0x525   : > { %15698 = vrcp.f32 %v4092_v50  ;;  %v15695_v19 = vpop.eup %15694  ;;  %v14878_v50 = vld [vmem:[%s16329_s11 + $0xa40] sm:$0xf0] }
 0x526   : > { %v3984_v9 = vmul.f32 %v15695_v19, %v17115_v31  ;;  %v15697_v7 = vpop.eup %15696  ;;  %v4100_v15 = vpop.xlane.xlu2 %4099  ;;  %v14877_v19 = vld [vmem:[%s16329_s11 + $0x9e8] sm:$0xf] }
 0x527   : > { %v4095_v14 = vmul.f32 %v15697_v7, %v17110_v20  ;;  %15700 = vrcp.f32 %v4100_v15  ;;  %v14838_v7 = vld [vmem:[%s16329_s11 + $0x28] sm:$0xf] }
 0x528   : > { %v3985_v49 = vpack.c.bf16 %v3984_v9, %v3983_v48  ;;  %v11938_v48 = vor.u32 %v14878_v50, %v11937_v6  ;;  %v11939_v9 = vld [vmem:[%s16329_s11 + $0xa44] sm:$0xf0]  ;;  %v11921_v50 = vld [vmem:[%s16329_s11 + $0x86c] sm:$0xf] }
 0x529   : > { %v12059_v6 = vld [vmem:[%s16329_s11 + $0x11c4] sm:$0xf0] }
 0x52a   : > { %11775 = vmatmul.msk.bf16.vlgmr.msra.gmra.mxu0 %vm3816_vm14, %v3985_v49  ;;  %v11783_v49 = vld [vmem:[%s16329_s11 + $0x84] sm:$0xf0]  ;;  %4657 = vmatpush.bf16.msrb.mxu3 %v11938_v48 }
 0x52b   : > { %v15699_v32 = vpop.eup %15698  ;;  %v11786_v15 = vor.u32 %v14838_v7, %v11783_v49  ;;  %4669 = vmatpush.bf16.msra.mxu0 %v12058_v30  ;;  %v12062_v7 = vor.u32 %v14907_v2, %v12059_v6  ;;  %v14909_v30 = vld [vmem:[%s16329_s11 + $0x11c8] sm:$0xf0] }
 0x52c   : > { %v4096_v34 = vmul.f32 %v15699_v32, %v17119_v21  ;;  %v11829_v21 = vld [vmem:[%s16329_s11 + $0x324] sm:$0xf]  ;;  %v11942_v32 = vor.u32 %v14877_v19, %v11939_v9  ;;  %v14873_v19 = vld [vmem:[%s16329_s11 + $0x8c8] sm:$0xf0] }
 0x52d   : > { %v15701_v31 = vpop.eup %15700  ;;  %v11830_v22 = vor.u32 %v14851_v18, %v11829_v21  ;;  %v11913_v21 = vld [vmem:[%s16329_s11 + $0x864] sm:$0xf]  ;;  %v11922_v49 = vor.u32 %v14873_v19, %v11921_v50  ;;  %v14858_v2 = vld [vmem:[%s16329_s11 + $0x508] sm:$0xf0] }
 0x52e   : > { %v4097_v16 = vpack.c.bf16 %v4096_v34, %v4095_v14  ;;  %v4103_v47 = vpop.xlane.xlu0 %4102  ;;  %v4106_v52 = vmul.f32 %v15701_v31, %v17124_v4  ;;  %v14853_v4 = vld [vmem:[%s16329_s11 + $0x3e8] sm:$0xf]  ;;  %v11925_v14 = vld [vmem:[%s16329_s11 + $0x924] sm:$0xf]  ;;  %v14900_v6 = vld [vmem:[%s16329_s11 + $0xf88] sm:$0xf0] }
 0x52f   : > { %15702 = vrcp.f32 %v4103_v47  ;;  %4644 = vmatpush.bf16.msra.mxu2 %v11830_v22  ;;  %v14875_v34 = vld [vmem:[%s16329_s11 + $0x980] sm:$0xf0]  ;;  %v11927_v31 = vld [vmem:[%s16329_s11 + $0x984] sm:$0xf0] }
 0x530   : > { %11778 = vmatmul.msk.bf16.vlgmr.msrb.gmra.mxu1 %vm3816_vm14, %v4097_v16  ;;  %v14874_v16 = vld [vmem:[%s16329_s11 + $0x928] sm:$0xf]  ;;  %v11926_v47 = vor.u32 %v14875_v34, %v11925_v14  ;;  %v14872_v18 = vld [vmem:[%s16329_s11 + $0x8c0] sm:$0xf0] }
 0x531   : > { %v11914_v22 = vor.u32 %v14872_v18, %v11913_v21  ;;  %v14896_v14 = vld [vmem:[%s16329_s11 + $0xec0] sm:$0xf0]  ;;  %v14904_v34 = vld [vmem:[%s16329_s11 + $0x10a8] sm:$0xf] }
 0x532   : > { %4658 = vmatpush.bf16.msrb.mxu3 %v11926_v47  ;;  %v12047_v47 = vld [vmem:[%s16329_s11 + $0x1104] sm:$0xf0]  ;;  %v14893_v21 = vld [vmem:[%s16329_s11 + $0xe00] sm:$0xf0] }
 0x533   : > { %4645 = vmatpush.bf16.msra.mxu2 %v11818_v35  ;;  %v14882_v35 = vld [vmem:[%s16329_s11 + $0xb08] sm:$0xf0]  ;;  %v14901_v18 = vld [vmem:[%s16329_s11 + $0xfe8] sm:$0xf] }
 0x535   : > { %v15703_v24 = vpop.eup %15702 }
 0x536   : > { %v4107_v17 = vmul.f32 %v15703_v24, %v17128_v27  ;;  %v11843_v27 = vld [vmem:[%s16329_s11 + $0x444] sm:$0xf0]  ;;  %v11969_v24 = vld [vmem:[%s16329_s11 + $0xb6c] sm:$0xf]  ;;  %4659 = vmatpush.bf16.msrb.mxu3 %v11914_v22 }
 0x537   : > { %v11846_v28 = vor.u32 %v14853_v4, %v11843_v27  ;;  %4646 = vmatpush.bf16.msra.mxu2 %v11806_v33  ;;  %v11918_v4 = vor.u32 %v14871_v23, %v11915_v26  ;;  %v11957_v27 = vld [vmem:[%s16329_s11 + $0xaac] sm:$0xf]  ;;  %v14905_v33 = vld [vmem:[%s16329_s11 + $0x1100] sm:$0xf0]  ;;  %v12035_v22 = vld [vmem:[%s16329_s11 + $0x1044] sm:$0xf0] }
 0x538   : > { %v4108_v20 = vpack.c.bf16 %v4107_v17, %v4106_v52  ;;  %v14885_v52 = vld [vmem:[%s16329_s11 + $0xbc8] sm:$0xf0]  ;;  %v11930_v17 = vor.u32 %v14874_v16, %v11927_v31  ;;  %v11958_v37 = vor.u32 %v14882_v35, %v11957_v27  ;;  %v12046_v45 = vor.u32 %v14905_v33, %v12045_v55 }
 0x539   : > { %4685 = vmatpush.bf16.msra.mxu1 %v11846_v28  ;;  %v11901_v28 = vld [vmem:[%s16329_s11 + $0x7a4] sm:$0xf]  ;;  %v11909_v31 = vld [vmem:[%s16329_s11 + $0x7ac] sm:$0xf] }
 0x53a   : > { %11777 = vmatmul.msk.bf16.vlgmr.msrb.gmra.mxu0 %vm3816_vm14, %v4108_v20  ;;  %v11970_v20 = vor.u32 %v14885_v52, %v11969_v24  ;;  %v11902_v61 = vor.u32 %v14869_v38, %v11901_v28  ;;  %v14870_v24 = vld [vmem:[%s16329_s11 + $0x808] sm:$0xf0]  ;;  %v12050_v52 = vor.u32 %v14904_v34, %v12047_v47 }
 0x53b   : > { %4647 = vmatpush.bf16.msra.mxu2 %v11794_v12  ;;  %v11906_v12 = vor.u32 %v14868_v39, %v11903_v62  ;;  %4670 = vmatpush.bf16.msra.mxu0 %v12046_v45  ;;  %v14867_v23 = vld [vmem:[%s16329_s11 + $0x748] sm:$0xf0]  ;;  %v11985_v39 = vld [vmem:[%s16329_s11 + $0xce4] sm:$0xf] }
 0x53c   : > { %4660 = vmatpush.bf16.msrb.mxu3 %v11902_v61  ;;  %v12065_v26 = vld [vmem:[%s16329_s11 + $0x116c] sm:$0xf]  ;;  %v11898_v27 = vor.u32 %v14867_v23, %v11897_v13  ;;  %v14890_v62 = vld [vmem:[%s16329_s11 + $0xd40] sm:$0xf0] }
 0x53d   : > { %4686 = vmatpush.bf16.msra.mxu1 %v11834_v3  ;;  %v11945_v3 = vld [vmem:[%s16329_s11 + $0x9ec] sm:$0xf]  ;;  %v12066_v33 = vor.u32 %v14909_v30, %v12065_v26  ;;  %v11986_v61 = vor.u32 %v14890_v62, %v11985_v39 }
 0x53e   : > { %v12053_v55 = vld [vmem:[%s16329_s11 + $0x10ac] sm:$0xf] }
 0x53f   : > { %4648 = vmatpush.bf16.msra.mxu2 %v11782_v25  ;;  %v11890_v25 = vor.u32 %v14866_v53, %v11889_v42  ;;  %4671 = vmatpush.bf16.msra.mxu0 %v12034_v51  ;;  %v14906_v45 = vld [vmem:[%s16329_s11 + $0x1108] sm:$0xf0]  ;;  %v14895_v51 = vld [vmem:[%s16329_s11 + $0xe68] sm:$0xf] }
 0x540   : > { %v14864_v53 = vld [vmem:[%s16329_s11 + $0x688] sm:$0xf0] }
 0x541   : > { %4687 = vmatpush.bf16.msra.mxu1 %v11822_v57  ;;  %v11946_v57 = vor.u32 %v14879_v29, %v11945_v3  ;;  %4661 = vmatpush.bf16.msrb.mxu3 %v11890_v25  ;;  %v14898_v29 = vld [vmem:[%s16329_s11 + $0xf28] sm:$0xf]  ;;  %v11973_v25 = vld [vmem:[%s16329_s11 + $0xc24] sm:$0xf]  ;;  %v11825_v23 = vld [vmem:[%s16329_s11 + $0x26c] sm:$0xf] }
 0x542   : > { %v14849_v26 = vld [vmem:[%s16329_s11 + $0x2c8] sm:$0xf0] }
 0x543   : > { %4697 = vmatpush.bf16.msrb.mxu2 %v11966_v54  ;;  %v11894_v54 = vor.u32 %v14865_v8, %v11891_v46  ;;  %4672 = vmatpush.bf16.msra.mxu0 %v12022_v36  ;;  %v12054_v8 = vor.u32 %v14906_v45, %v12053_v55  ;;  %v11974_v46 = vor.u32 %v14887_v40, %v11973_v25  ;;  %v11999_v36 = vld [vmem:[%s16329_s11 + $0xe04] sm:$0xf0]  ;;  %v11993_v30 = vld [vmem:[%s16329_s11 + $0xcec] sm:$0xf] }
 0x544   : > { %v12002_v50 = vor.u32 %v14892_v5, %v11999_v36  ;;  %v11981_v55 = vld [vmem:[%s16329_s11 + $0xc2c] sm:$0xf] }
 0x545   : > { %4688 = vmatpush.bf16.msra.mxu1 %v11810_v60  ;;  %v11934_v60 = vor.u32 %v14876_v10, %v11933_v58  ;;  %v11873_v58 = vld [vmem:[%s16329_s11 + $0x56c] sm:$0xf] }
 0x546   : > { %v12041_v10 = vld [vmem:[%s16329_s11 + $0xfec] sm:$0xf] }
 0x547   : > { %4698 = vmatpush.bf16.msrb.mxu2 %v11954_v1  ;;  %v14862_v1 = vld [vmem:[%s16329_s11 + $0x628] sm:$0xf]  ;;  %v11801_v39 = vld [vmem:[%s16329_s11 + $0xec] sm:$0xf] }
 0x548   : > { %v11882_v9 = vor.u32 %v14862_v1, %v11879_v41  ;;  %v11861_v1 = vld [vmem:[%s16329_s11 + $0x4ac] sm:$0xf] }
 0x549   : > { %4689 = vmatpush.bf16.msra.mxu1 %v11798_v59  ;;  %v11878_v59 = vor.u32 %v14863_v56, %v11877_v63  ;;  %v14903_v63 = vld [vmem:[%s16329_s11 + $0x1048] sm:$0xf0]  ;;  %v11862_v19 = vor.u32 %v14858_v2, %v11861_v1 }
 0x54a   : > { %v14861_v56 = vld [vmem:[%s16329_s11 + $0x5c8] sm:$0xf0]  ;;  %v12042_v41 = vor.u32 %v14903_v63, %v12041_v10 }
 0x54b   : > { %4699 = vmatpush.bf16.msrb.mxu2 %v11942_v32  ;;  %4662 = vmatpush.bf16.msrb.mxu3 %v11878_v59  ;;  %v11874_v0 = vor.u32 %v14861_v56, %v11873_v58  ;;  %v12029_v59 = vld [vmem:[%s16329_s11 + $0xf2c] sm:$0xf] }
 0x54c   : > { %v14843_v62 = vld [vmem:[%s16329_s11 + $0x148] sm:$0xf0] }
 0x54d   : > { %4690 = vmatpush.bf16.msra.mxu1 %v11786_v15  ;;  %v12009_v15 = vld [vmem:[%s16329_s11 + $0xe64] sm:$0xf] }
 0x54e   : > { %v12010_v16 = vor.u32 %v14896_v14, %v12009_v15  ;;  %v12017_v15 = vld [vmem:[%s16329_s11 + $0xe6c] sm:$0xf] }
 0x54f   : > { %4700 = vmatpush.bf16.msrb.mxu2 %v11930_v17  ;;  %4711 = vmatpush.bf16.msra.mxu3 %v12062_v7  ;;  %v11910_v17 = vor.u32 %v14870_v24, %v11909_v31  ;;  %v11849_v7 = vld [vmem:[%s16329_s11 + $0x3ec] sm:$0xf] }
 0x550   : > { %4673 = vmatpush.bf16.msra.mxu0 %v12010_v16  ;;  %v14897_v14 = vld [vmem:[%s16329_s11 + $0xec8] sm:$0xf0] }
 0x551   : > { %4739 = vmatpush.bf16.msrb.mxu1 %v11970_v20  ;;  %v11997_v20 = vld [vmem:[%s16329_s11 + $0xda4] sm:$0xf]  ;;  %v12018_v47 = vor.u32 %v14897_v14, %v12017_v15  ;;  %v12005_v31 = vld [vmem:[%s16329_s11 + $0xdac] sm:$0xf] }
 0x552   : > { %v11998_v11 = vor.u32 %v14893_v21, %v11997_v20  ;;  %v14894_v24 = vld [vmem:[%s16329_s11 + $0xe08] sm:$0xf0] }
 0x553   : > { %4701 = vmatpush.bf16.msrb.mxu2 %v11918_v4  ;;  %4712 = vmatpush.bf16.msra.mxu3 %v12050_v52  ;;  %v12038_v4 = vor.u32 %v14901_v18, %v12035_v22  ;;  %v14886_v52 = vld [vmem:[%s16329_s11 + $0xc28] sm:$0xf]  ;;  %v11837_v20 = vld [vmem:[%s16329_s11 + $0x32c] sm:$0xf]  ;;  %v12006_v13 = vor.u32 %v14894_v24, %v12005_v31 }
 0x554   : > { %4674 = vmatpush.bf16.msra.mxu0 %v11998_v11  ;;  %v14852_v11 = vld [vmem:[%s16329_s11 + $0x388] sm:$0xf0] }
 0x555   : > { %4740 = vmatpush.bf16.msrb.mxu1 %v11958_v37  ;;  %v11838_v22 = vor.u32 %v14852_v11, %v11837_v20  ;;  %v15756_v20 = vld [vmem:[#allocation2 + $0x10] sm:$0xff] }
 0x557   : > { %4702 = vmatpush.bf16.msrb.mxu2 %v11906_v12  ;;  %4713 = vmatpush.bf16.msra.mxu3 %v12038_v4  ;;  %v12023_v12 = vld [vmem:[%s16329_s11 + $0xf84] sm:$0xf0]  ;;  %v14891_v4 = vld [vmem:[%s16329_s11 + $0xd48] sm:$0xf0] }
 0x558   : > { %v12026_v42 = vor.u32 %v14898_v29, %v12023_v12  ;;  %4675 = vmatpush.bf16.msra.mxu0 %v11986_v61  ;;  %v11802_v12 = vor.u32 %v14843_v62, %v11801_v39  ;;  %v15759_v62 = vld [vmem:[#allocation2 + $0x18] sm:$0xff] }
 0x559   : > { %4741 = vmatpush.bf16.msrb.mxu1 %v11946_v57  ;;  %v11885_v57 = vld [vmem:[%s16329_s11 + $0x62c] sm:$0xf] }
 0x55a   : > { %v11886_v43 = vor.u32 %v14864_v53, %v11885_v57  ;;  %v14840_v53 = vld [vmem:[%s16329_s11 + $0x88] sm:$0xf0] }
 0x55b   : > { %4703 = vmatpush.bf16.msrb.mxu2 %v11894_v54  ;;  %v12011_v54 = vld [vmem:[%s16329_s11 + $0xec4] sm:$0xf0]  ;;  %4714 = vmatpush.bf16.msra.mxu3 %v12026_v42  ;;  %v11789_v42 = vld [vmem:[%s16329_s11 + $0x2c] sm:$0xf] }
 0x55c   : > { %4676 = vmatpush.bf16.msra.mxu0 %v11974_v46 }
 0x55d   : > { %4742 = vmatpush.bf16.msrb.mxu1 %v11934_v60  ;;  %v12014_v60 = vor.u32 %v14895_v51, %v12011_v54 }
 0x55f   : > { %4704 = vmatpush.bf16.msrb.mxu2 %v11882_v9  ;;  %4715 = vmatpush.bf16.msra.mxu3 %v12014_v60  ;;  %v11987_v9 = vld [vmem:[%s16329_s11 + $0xd44] sm:$0xf0] }
 0x560   : > { %4725 = vmatpush.bf16.msrb.mxu0 %v11874_v0 }
 0x561   : > { %4743 = vmatpush.bf16.msrb.mxu1 %v11922_v49  ;;  %v14855_v49 = vld [vmem:[%s16329_s11 + $0x448] sm:$0xf0] }
 0x562   : > { %v11850_v16 = vor.u32 %v14855_v49, %v11849_v7 }
 0x563   : > { %4716 = vmatpush.bf16.msra.mxu3 %v12002_v50 }
 0x564   : > { %4726 = vmatpush.bf16.msrb.mxu0 %v11862_v19 }
 0x565   : > { %4744 = vmatpush.bf16.msrb.mxu1 %v11910_v17  ;;  %v11975_v17 = vld [vmem:[%s16329_s11 + $0xc84] sm:$0xf0] }
 0x566   : > { %v11978_v18 = vor.u32 %v14886_v52, %v11975_v17 }
 0x568   : > { %4727 = vmatpush.bf16.msrb.mxu0 %v11850_v16 }
 0x569   : > { %4745 = vmatpush.bf16.msrb.mxu1 %v11898_v27  ;;  %v11826_v27 = vor.u32 %v14849_v26, %v11825_v23  ;;  %v15757_v23 = vld [vmem:[#allocation2 + $0x28] sm:$0xff] }
 0x56c   : > { %4728 = vmatpush.bf16.msrb.mxu0 %v11838_v22 }
 0x56d   : > { %4746 = vmatpush.bf16.msrb.mxu1 %v11886_v43 }
 0x570   : > { %4729 = vmatpush.bf16.msrb.mxu0 %v11826_v27 }
 0x576   : > { %v3892_v48 = vpop.f32.mrf.mxu1 }
 0x57e   : > { %v3894_v35 = vpop.f32.mrf.mxu1 }
 0x586   : > { %v3875_v32 = vpop.f32.mrf.mxu0 }
 0x587   : > { %v3893_v37 = vadd.f32 %v3892_v48, %v3875_v32  ;;  %v14889_v48 = vld [vmem:[%s16329_s11 + $0xce8] sm:$0xf]  ;;  %v12030_v32 = vor.u32 %v14900_v6, %v12029_v59  ;;  %v1919_v59 = vld [vmem:[%s16327_s3 + $0x9] sm:$0x7] }
 0x588   : > { %v11990_v34 = vor.u32 %v14889_v48, %v11987_v9  ;;  %v4252_v6 = vperm.slane %v1919_v59, 1  ;;  %v4251_v9 = vperm.slane %v1919_v59, 0  ;;  %v4253_v14 = vperm.slane %v1919_v59, 2  ;;  %v12741_v59 = vld [vmem:[%s16329_s11 + $0xab0] sm:$0xf] }
 0x58a   : > { %4717 = vmatpush.bf16.msra.mxu3 %v11990_v34 }
 0x58e   : > { %v3877_v28 = vpop.f32.mrf.mxu0  ;;  %4718 = vmatpush.bf16.msra.mxu3 %v11978_v18 }
 0x58f   : > { %v3895_v38 = vadd.f32 %v3894_v35, %v3877_v28  ;;  %v11813_v28 = vld [vmem:[%s16329_s11 + $0x1ac] sm:$0xf] }
 0x591   : > { %v17259_v3 = vpack.c.bf16 %v3895_v38, %v3893_v37  ;;  %v14846_v37 = vld [vmem:[%s16329_s11 + $0x208] sm:$0xf0]  ;;  %v11994_v38 = vor.u32 %v14891_v4, %v11993_v30 }
 0x592   : > { %v11814_v45 = vor.u32 %v14846_v37, %v11813_v28 }
 0x593   : > { %4649 = vmatmul.bf16.vlgmr.msra.gmra.mxu2 %v17259_v3  ;;  %4691 = vmatmul.bf16.vlgmr.msra.gmra.mxu1 %v17259_v3 }
 0x594   : > { %4753 = vmatpush.bf16.msra.mxu2 %v12066_v33  ;;  %v14888_v33 = vld [vmem:[%s16329_s11 + $0xc88] sm:$0xf0]  ;;  %4730 = vmatpush.bf16.msrb.mxu0 %v11814_v45 }
 0x595   : > { %v11982_v29 = vor.u32 %v14888_v33, %v11981_v55 }
 0x596   : > { %v4015_v21 = vpop.f32.mrf.mxu1 }
 0x598   : > { %4754 = vmatpush.bf16.msra.mxu2 %v12054_v8  ;;  %4731 = vmatpush.bf16.msrb.mxu0 %v11802_v12  ;;  %v11790_v8 = vor.u32 %v14840_v53, %v11789_v42 }
 0x59c   : > { %4755 = vmatpush.bf16.msra.mxu2 %v12042_v41  ;;  %4732 = vmatpush.bf16.msrb.mxu0 %v11790_v8 }
 0x59e   : > { %v4017_v61 = vpop.f32.mrf.mxu1 }
 0x5a0   : > { %4756 = vmatpush.bf16.msra.mxu2 %v12030_v32 }
 0x5a4   : > { %4757 = vmatpush.bf16.msra.mxu2 %v12018_v47 }
 0x5a7   : > { %v3998_v35 = vpop.f32.mrf.mxu0 }
 0x5a8   : > { %4758 = vmatpush.bf16.msra.mxu2 %v12006_v13  ;;  %v4016_v43 = vadd.f32 %v4015_v21, %v3998_v35  ;;  %v15758_v35 = vld [vmem:[#allocation2 + $0x8] sm:$0xff] }
 0x5ac   : > { %4759 = vmatpush.bf16.msra.mxu2 %v11994_v38 }
 0x5ad   : > { %v4138_v46 = vpop.f32.mrf.mxu1 }
 0x5af   : > { %v4000_v57 = vpop.f32.mrf.mxu0 }
 0x5b0   : > { %v4018_v25 = vadd.f32 %v4017_v61, %v4000_v57  ;;  %4760 = vmatpush.bf16.msra.mxu2 %v11982_v29  ;;  %v15760_v57 = vld [vmem:[#allocation2] sm:$0xff] }
 0x5b2   : > { %v4248_v40 = vpack.c.bf16 %v4018_v25, %v4016_v43  ;;  %v15761_v43 = vld [vmem:[#allocation2 + $0x20] sm:$0xff] }
 0x5b4   : > { %4663 = vmatmul.bf16.vlgmr.msrb.gmra.mxu3 %v4248_v40  ;;  %4705 = vmatmul.bf16.vlgmr.msrb.gmra.mxu2 %v4248_v40 }
 0x5b5   : > { %4747 = vmatmul.bf16.vlgmr.msrb.gmra.mxu1 %v4248_v40  ;;  %v4140_v54 = vpop.f32.mrf.mxu1 }
 0x5b7   : > { %v4121_v51 = vpop.f32.mrf.mxu0 }
 0x5b8   : > { %v4139_v10 = vadd.f32 %v4138_v46, %v4121_v51  ;;  %v12405_v46 = vld [vmem:[%s16329_s11 + $0x570] sm:$0xf] }
 0x5b9   : > { %v15000_v51 = vld [vmem:[%s16329_s11 + $0x5cc] sm:$0xf0] }
 0x5bf   : > { %v4123_v58 = vpop.f32.mrf.mxu0 }
 0x5c0   : > { %v4141_v63 = vadd.f32 %v4140_v54, %v4123_v58  ;;  %v12789_v54 = vld [vmem:[%s16329_s11 + $0xb70] sm:$0xf]  ;;  %v12406_v58 = vor.u32 %v15000_v51, %v12405_v46  ;;  %v12215_v46 = vld [vmem:[%s16329_s11 + $0x2d0] sm:$0xf0] }
 0x5c2   : > { %v4249_v60 = vpack.c.bf16 %v4141_v63, %v4139_v10  ;;  %v15096_v10 = vld [vmem:[%s16329_s11 + $0xbcc] sm:$0xf0]  ;;  %6616 = vmatpush.bf16.msrb.mxu3 %v12406_v58 }
 0x5c3   : > { %v13173_v63 = vld [vmem:[%s16329_s11 + $0x1170] sm:$0xf] }
 0x5c4   : > { %4677 = vmatmul.bf16.vlgmr.msra.gmra.mxu0 %v4249_v60  ;;  %4719 = vmatmul.bf16.vlgmr.msra.gmra.mxu3 %v4249_v60 }
 0x5c5   : > { %4761 = vmatmul.bf16.vlgmr.msra.gmra.mxu2 %v4249_v60  ;;  %v15192_v60 = vld [vmem:[%s16329_s11 + $0x11cc] sm:$0xf0] }
 0x5d4   : > { %4733 = vmatmul.bf16.vlgmr.msrb.gmra.mxu0 %v17259_v3 }
 0x610   : > { %v4692_v36 = vpop.f32.mrf.mxu1 }
 0x611   : > { %v4693_v49 = vadd.f32 %v4692_v36, %v4252_v6  ;;  %v12407_v36 = vld [vmem:[%s16329_s11 + $0x5d0] sm:$0xf0] }
 0x616   : > { %v4650_v56 = vpop.f32.mrf.mxu2 }
 0x617   : > { %v4651_v32 = vadd.f32 %v4650_v56, %v4251_v9  ;;  %v12790_v56 = vor.u32 %v15096_v10, %v12789_v54 }
 0x618   : > { %v4694_v50 = vpop.f32.mrf.mxu1 }
 0x619   : > { %v4695_v17 = vadd.f32 %v4694_v50, %v4252_v6  ;;  %v15084_v6 = vld [vmem:[%s16329_s11 + $0xb0c] sm:$0xf0]  ;;  %6630 = vmatpush.bf16.msra.mxu0 %v12790_v56 }
 0x61e   : > { %v4652_v0 = vpop.f32.mrf.mxu2 }
 0x61f   : > { %v4653_v22 = vadd.f32 %v4652_v0, %v4251_v9  ;;  %v13174_v0 = vor.u32 %v15192_v60, %v13173_v63  ;;  %v15180_v9 = vld [vmem:[%s16329_s11 + $0x110c] sm:$0xf0] }
 0x621   : > { %6644 = vmatpush.bf16.msra.mxu1 %v13174_v0 }
 0x632   : > { %v4748_v16 = vpop.f32.mrf.mxu1 }
 0x637   : > { %v4664_v5 = vpop.f32.mrf.mxu3  ;;  %v4706_v1 = vpop.f32.mrf.mxu2 }
 0x638   : > { %v4707_v15 = vadd.f32 %v4706_v1, %v4693_v49  ;;  %v4665_v34 = vadd.f32 %v4664_v5, %v4651_v32  ;;  %v14994_v5 = vld [vmem:[%s16329_s11 + $0x574] sm:$0xf]  ;;  %v12357_v1 = vld [vmem:[%s16329_s11 + $0x4b0] sm:$0xf] }
 0x639   : > { %v12359_v32 = vld [vmem:[%s16329_s11 + $0x510] sm:$0xf0] }
 0x63a   : > { %v4750_v39 = vpop.f32.mrf.mxu1 }
 0x63f   : > { %v4666_v41 = vpop.f32.mrf.mxu3  ;;  %v4708_v19 = vpop.f32.mrf.mxu2 }
 0x640   : > { %v4709_v13 = vadd.f32 %v4708_v19, %v4695_v17  ;;  %v4667_v4 = vadd.f32 %v4666_v41, %v4653_v22  ;;  %v12410_v41 = vor.u32 %v14994_v5, %v12407_v36  ;;  %v12742_v19 = vor.u32 %v15084_v6, %v12741_v59  ;;  %v12311_v17 = vld [vmem:[%s16329_s11 + $0x450] sm:$0xf0]  ;;  %v14964_v22 = vld [vmem:[%s16329_s11 + $0x38c] sm:$0xf0] }
 0x641   : > { %v4678_v2 = vpop.f32.mrf.mxu0 }
 0x642   : > { %v4679_v31 = vadd.f32 %v4678_v2, %v4665_v34  ;;  %v14988_v2 = vld [vmem:[%s16329_s11 + $0x50c] sm:$0xf0]  ;;  %6658 = vmatpush.bf16.msrb.mxu2 %v12410_v41  ;;  %6631 = vmatpush.bf16.msra.mxu0 %v12742_v19 }
 0x643   : > { %v12358_v50 = vor.u32 %v14988_v2, %v12357_v1 }
 0x644   : > { %v17309_v26 = vadd.f32 %v15757_v23, %v4679_v31 }
 0x645   : > { %6617 = vmatpush.bf16.msrb.mxu3 %v12358_v50 }
 0x647   : > { %v4720_v7 = vpop.f32.mrf.mxu3 }
 0x648   : > { %v4721_v3 = vadd.f32 %v4720_v7, %v4707_v15  ;;  %v4762_v52 = vpop.f32.mrf.mxu2  ;;  %v14982_v7 = vld [vmem:[%s16329_s11 + $0x4b4] sm:$0xf]  ;;  %v12309_v15 = vld [vmem:[%s16329_s11 + $0x3f0] sm:$0xf] }
 0x649   : > { %v4680_v48 = vpop.f32.mrf.mxu0  ;;  %v12362_v34 = vor.u32 %v14982_v7, %v12359_v32 }
 0x64a   : > { %v17307_v21 = vadd.f32 %v15756_v20, %v4721_v3  ;;  %v4681_v55 = vadd.f32 %v4680_v48, %v4667_v4  ;;  %v13125_v48 = vld [vmem:[%s16329_s11 + $0x10b0] sm:$0xf] }
 0x64b   : > { %v13126_v49 = vor.u32 %v15180_v9, %v13125_v48  ;;  %v12693_v3 = vld [vmem:[%s16329_s11 + $0x9f0] sm:$0xf]  ;;  %6659 = vmatpush.bf16.msrb.mxu2 %v12362_v34 }
 0x64c   : > { %v4773_v37 = vadd.f32 %v17307_v21, %v17309_v26  ;;  %v17318_v42 = vadd.f32 %v15760_v57, %v4681_v55  ;;  %v13029_v4 = vld [vmem:[%s16329_s11 + $0xf30] sm:$0xf] }
 0x64d   : > { %6645 = vmatpush.bf16.msra.mxu1 %v13126_v49  ;;  %v12213_v55 = vld [vmem:[%s16329_s11 + $0x270] sm:$0xf] }
 0x64e   : > { %v15144_v57 = vld [vmem:[%s16329_s11 + $0xecc] sm:$0xf0] }
 0x64f   : > { %v4722_v11 = vpop.f32.mrf.mxu3  ;;  %v12549_v34 = vld [vmem:[%s16329_s11 + $0x7b0] sm:$0xf] }
 0x650   : > { %v4723_v27 = vadd.f32 %v4722_v11, %v4709_v13  ;;  %v4764_v12 = vpop.f32.mrf.mxu2  ;;  %v12261_v11 = vld [vmem:[%s16329_s11 + $0x330] sm:$0xf] }
 0x651   : > { %v4734_v47 = vpop.f32.mrf.mxu0  ;;  %v12645_v13 = vld [vmem:[%s16329_s11 + $0x930] sm:$0xf] }
 0x652   : > { %v4735_v24 = vadd.f32 %v4734_v47, %v4253_v14  ;;  %v17316_v61 = vadd.f32 %v15759_v62, %v4723_v27  ;;  %v13077_v47 = vld [vmem:[%s16329_s11 + $0xff0] sm:$0xf] }
 0x653   : > { %v15156_v27 = vld [vmem:[%s16329_s11 + $0xf8c] sm:$0xf0] }
 0x654   : > { %v4749_v18 = vadd.f32 %v4748_v16, %v4735_v24  ;;  %v4777_v40 = vadd.f32 %v17316_v61, %v17318_v42  ;;  %v15072_v16 = vld [vmem:[%s16329_s11 + $0xa4c] sm:$0xf0]  ;;  %v13030_v62 = vor.u32 %v15156_v27, %v13029_v4 }
 0x655   : > { %v15168_v24 = vld [vmem:[%s16329_s11 + $0x104c] sm:$0xf0]  ;;  %v12694_v20 = vor.u32 %v15072_v16, %v12693_v3 }
 0x656   : > { %v4763_v30 = vadd.f32 %v4762_v52, %v4749_v18  ;;  %v14970_v52 = vld [vmem:[%s16329_s11 + $0x3f4] sm:$0xf]  ;;  %v13078_v18 = vor.u32 %v15168_v24, %v13077_v47  ;;  %v15036_v16 = vld [vmem:[%s16329_s11 + $0x80c] sm:$0xf0] }
 0x657   : > { %v12314_v23 = vor.u32 %v14970_v52, %v12311_v17  ;;  %6632 = vmatpush.bf16.msra.mxu0 %v12694_v20  ;;  %v12933_v47 = vld [vmem:[%s16329_s11 + $0xdb0] sm:$0xf]  ;;  %v12550_v24 = vor.u32 %v15036_v16, %v12549_v34  ;;  %v14934_v17 = vld [vmem:[%s16329_s11 + $0x1b4] sm:$0xf]  ;;  %v12365_v34 = vld [vmem:[%s16329_s11 + $0x4b8] sm:$0xf] }
 0x658   : > { %v17311_v28 = vadd.f32 %v15758_v35, %v4763_v30  ;;  %v15060_v30 = vld [vmem:[%s16329_s11 + $0x98c] sm:$0xf0]  ;;  %v14958_v35 = vld [vmem:[%s16329_s11 + $0x334] sm:$0xf]  ;;  %6646 = vmatpush.bf16.msra.mxu1 %v13078_v18  ;;  %v14989_v16 = vld [vmem:[%s16329_s11 + $0x514] sm:$0xf0] }
 0x659   : > { %v4736_v38 = vpop.f32.mrf.mxu0  ;;  %6660 = vmatpush.bf16.msrb.mxu2 %v12314_v23  ;;  %v12167_v20 = vld [vmem:[%s16329_s11 + $0x210] sm:$0xf0]  ;;  %v12885_v4 = vld [vmem:[%s16329_s11 + $0xcf0] sm:$0xf] }
 0x65a   : > { %v4737_v33 = vadd.f32 %v4736_v38, %v4253_v14  ;;  %v4774_v45 = vadd.f32 %v4773_v37, %v17311_v28  ;;  %v14976_v14 = vld [vmem:[%s16329_s11 + $0x44c] sm:$0xf0]  ;;  %v12263_v37 = vld [vmem:[%s16329_s11 + $0x390] sm:$0xf0]  ;;  %v12262_v38 = vor.u32 %v14964_v22, %v12261_v11  ;;  %v12170_v18 = vor.u32 %v14934_v17, %v12167_v20 }
 0x65b   : > { %v12310_v31 = vor.u32 %v14976_v14, %v12309_v15  ;;  %v12165_v15 = vld [vmem:[%s16329_s11 + $0x1b0] sm:$0xf]  ;;  %v15066_v17 = vld [vmem:[%s16329_s11 + $0x9f4] sm:$0xf] }
 0x65c   : > { %v4751_v29 = vadd.f32 %v4750_v39, %v4737_v33  ;;  %4775 = vadd.xlane.f32.xlu1 %v4774_v45  ;;  %v14952_v33 = vld [vmem:[%s16329_s11 + $0x2cc] sm:$0xf0]  ;;  %v12646_v39 = vor.u32 %v15060_v30, %v12645_v13  ;;  %6647 = vmatpush.bf16.msra.mxu1 %v13030_v62  ;;  %v12695_v20 = vld [vmem:[%s16329_s11 + $0xa50] sm:$0xf0] }
 0x65d   : > { %6618 = vmatpush.bf16.msrb.mxu3 %v12310_v31  ;;  %v12597_v45 = vld [vmem:[%s16329_s11 + $0x870] sm:$0xf]  ;;  %v12214_v51 = vor.u32 %v14952_v33, %v12213_v55  ;;  %v12119_v55 = vld [vmem:[%s16329_s11 + $0x150] sm:$0xf0] }
 0x65e   : > { %v4765_v53 = vadd.f32 %v4764_v12, %v4751_v29  ;;  %v15048_v29 = vld [vmem:[%s16329_s11 + $0x8cc] sm:$0xf0]  ;;  %6633 = vmatpush.bf16.msra.mxu0 %v12646_v39 }
 0x65f   : > { %v12981_v12 = vld [vmem:[%s16329_s11 + $0xe70] sm:$0xf]  ;;  %v12598_v54 = vor.u32 %v15048_v29, %v12597_v45 }
 0x660   : > { %v17320_v25 = vadd.f32 %v15761_v43, %v4765_v53  ;;  %v12266_v43 = vor.u32 %v14958_v35, %v12263_v37  ;;  %v12982_v58 = vor.u32 %v15144_v57, %v12981_v12  ;;  %v14940_v14 = vld [vmem:[%s16329_s11 + $0x20c] sm:$0xf0] }
 0x661   : > { %6619 = vmatpush.bf16.msrb.mxu3 %v12262_v38  ;;  %v12166_v3 = vor.u32 %v14940_v14, %v12165_v15  ;;  %v15132_v31 = vld [vmem:[%s16329_s11 + $0xe0c] sm:$0xf0]  ;;  %v14922_v38 = vld [vmem:[%s16329_s11 + $0xf4] sm:$0xf] }
 0x662   : > { %v4778_v8 = vadd.f32 %v4777_v40, %v17320_v25  ;;  %6661 = vmatpush.bf16.msrb.mxu2 %v12266_v43  ;;  %6634 = vmatpush.bf16.msra.mxu0 %v12598_v54  ;;  %v12934_v52 = vor.u32 %v15132_v31, %v12933_v47  ;;  %v12117_v11 = vld [vmem:[%s16329_s11 + $0xf0] sm:$0xf]  ;;  %v12122_v33 = vor.u32 %v14922_v38, %v12119_v55  ;;  %v15174_v15 = vld [vmem:[%s16329_s11 + $0x10b4] sm:$0xf]  ;;  %v12749_v47 = vld [vmem:[%s16329_s11 + $0xab8] sm:$0xf] }
 0x663   : > { %6648 = vmatpush.bf16.msra.mxu1 %v12982_v58  ;;  %v14928_v22 = vld [vmem:[%s16329_s11 + $0x14c] sm:$0xf0]  ;;  %v12791_v58 = vld [vmem:[%s16329_s11 + $0xbd0] sm:$0xf0]  ;;  %v15085_v31 = vld [vmem:[%s16329_s11 + $0xb14] sm:$0xf0] }
 0x664   : > { %4779 = vadd.xlane.f32.xlu2 %v4778_v8  ;;  %v14946_v8 = vld [vmem:[%s16329_s11 + $0x274] sm:$0xf]  ;;  %v12501_v13 = vld [vmem:[%s16329_s11 + $0x6f0] sm:$0xf]  ;;  %v12118_v23 = vor.u32 %v14928_v22, %v12117_v11  ;;  %v12698_v11 = vor.u32 %v15066_v17, %v12695_v20 }
 0x665   : > { %v12218_v56 = vor.u32 %v14946_v8, %v12215_v46  ;;  %6620 = vmatpush.bf16.msrb.mxu3 %v12214_v51  ;;  %v15024_v30 = vld [vmem:[%s16329_s11 + $0x74c] sm:$0xf0]  ;;  %v14910_v8 = vld [vmem:[%s16329_s11 + $0x34] sm:$0xf] }
 0x666   : > { %6635 = vmatpush.bf16.msra.mxu0 %v12550_v24  ;;  %v15120_v27 = vld [vmem:[%s16329_s11 + $0xd4c] sm:$0xf0]  ;;  %v12502_v35 = vor.u32 %v15024_v30, %v12501_v13  ;;  %v12071_v46 = vld [vmem:[%s16329_s11 + $0x90] sm:$0xf0]  ;;  %v12366_v24 = vor.u32 %v14989_v16, %v12365_v34  ;;  %v12317_v13 = vld [vmem:[%s16329_s11 + $0x3f8] sm:$0xf] }
 0x667   : > { %6662 = vmatpush.bf16.msrb.mxu2 %v12218_v56  ;;  %6649 = vmatpush.bf16.msra.mxu1 %v12934_v52  ;;  %v12886_v37 = vor.u32 %v15120_v27, %v12885_v4  ;;  %v12069_v45 = vld [vmem:[%s16329_s11 + $0x30] sm:$0xf]  ;;  %v15090_v51 = vld [vmem:[%s16329_s11 + $0xb74] sm:$0xf]  ;;  %v12074_v54 = vor.u32 %v14910_v8, %v12071_v46  ;;  %v12750_v52 = vor.u32 %v15085_v31, %v12749_v47  ;;  %v12701_v27 = vld [vmem:[%s16329_s11 + $0x9f8] sm:$0xf] }
 0x668   : > { %v14916_v39 = vld [vmem:[%s16329_s11 + $0x8c] sm:$0xf0]  ;;  %v15186_v56 = vld [vmem:[%s16329_s11 + $0x1174] sm:$0xf]  ;;  %v12557_v47 = vld [vmem:[%s16329_s11 + $0x7b8] sm:$0xf] }
 0x669   : > { %6621 = vmatpush.bf16.msrb.mxu3 %v12166_v3  ;;  %v12453_v62 = vld [vmem:[%s16329_s11 + $0x630] sm:$0xf]  ;;  %v12070_v29 = vor.u32 %v14916_v39, %v12069_v45  ;;  %v13127_v14 = vld [vmem:[%s16329_s11 + $0x1110] sm:$0xf0]  ;;  %v15037_v31 = vld [vmem:[%s16329_s11 + $0x814] sm:$0xf0] }
 0x66a   : > { %6636 = vmatpush.bf16.msra.mxu0 %v12502_v35  ;;  %v15012_v12 = vld [vmem:[%s16329_s11 + $0x68c] sm:$0xf0]  ;;  %v13130_v3 = vor.u32 %v15174_v15, %v13127_v14  ;;  %v13079_v22 = vld [vmem:[%s16329_s11 + $0x1050] sm:$0xf0]  ;;  %v15073_v35 = vld [vmem:[%s16329_s11 + $0xa54] sm:$0xf0] }
 0x66b   : > { %6663 = vmatpush.bf16.msrb.mxu2 %v12170_v18  ;;  %6650 = vmatpush.bf16.msra.mxu1 %v12886_v37  ;;  %v12837_v57 = vld [vmem:[%s16329_s11 + $0xc30] sm:$0xf]  ;;  %v12454_v43 = vor.u32 %v15012_v12, %v12453_v62  ;;  %v15162_v18 = vld [vmem:[%s16329_s11 + $0xff4] sm:$0xf]  ;;  %v12702_v37 = vor.u32 %v15073_v35, %v12701_v27  ;;  %v12269_v62 = vld [vmem:[%s16329_s11 + $0x338] sm:$0xf] }
 0x66c   : > { %v13082_v30 = vor.u32 %v15162_v18, %v13079_v22  ;;  %v15054_v38 = vld [vmem:[%s16329_s11 + $0x934] sm:$0xf]  ;;  %v12173_v15 = vld [vmem:[%s16329_s11 + $0x1b8] sm:$0xf] }
 0x66d   : > { %6622 = vmatpush.bf16.msrb.mxu3 %v12118_v23  ;;  %v14977_v23 = vld [vmem:[%s16329_s11 + $0x454] sm:$0xf0]  ;;  %v12647_v55 = vld [vmem:[%s16329_s11 + $0x990] sm:$0xf0] }
 0x66e   : > { %6637 = vmatpush.bf16.msra.mxu0 %v12454_v43  ;;  %v12318_v4 = vor.u32 %v14977_v23, %v12317_v13  ;;  %v12650_v45 = vor.u32 %v15054_v38, %v12647_v55  ;;  %v13031_v39 = vld [vmem:[%s16329_s11 + $0xf90] sm:$0xf0]  ;;  %v15061_v43 = vld [vmem:[%s16329_s11 + $0x994] sm:$0xf0] }
 0x66f   : > { %6664 = vmatpush.bf16.msrb.mxu2 %v12122_v33  ;;  %v15150_v33 = vld [vmem:[%s16329_s11 + $0xf34] sm:$0xf]  ;;  %v14941_v14 = vld [vmem:[%s16329_s11 + $0x214] sm:$0xf0] }
 0x670   : > { %v13034_v12 = vor.u32 %v15150_v33, %v13031_v39  ;;  %v15042_v8 = vld [vmem:[%s16329_s11 + $0x874] sm:$0xf]  ;;  %v12174_v16 = vor.u32 %v14941_v14, %v12173_v15  ;;  %v12125_v13 = vld [vmem:[%s16329_s11 + $0xf8] sm:$0xf] }
 0x671   : > { %6623 = vmatpush.bf16.msrb.mxu3 %v12070_v29  ;;  %v14965_v29 = vld [vmem:[%s16329_s11 + $0x394] sm:$0xf0]  ;;  %v12599_v46 = vld [vmem:[%s16329_s11 + $0x8d0] sm:$0xf0] }
 0x672   : > { %v15018_v17 = vld [vmem:[%s16329_s11 + $0x6f4] sm:$0xf]  ;;  %v15025_v27 = vld [vmem:[%s16329_s11 + $0x754] sm:$0xf0] }
 0x673   : > { %6665 = vmatpush.bf16.msrb.mxu2 %v12074_v54  ;;  %v12602_v54 = vor.u32 %v15042_v8, %v12599_v46  ;;  %v12503_v20 = vld [vmem:[%s16329_s11 + $0x750] sm:$0xf0]  ;;  %v12077_v39 = vld [vmem:[%s16329_s11 + $0x38] sm:$0xf] }
 0x674   : > { %v12506_v18 = vor.u32 %v15018_v17, %v12503_v20  ;;  %v12887_v22 = vld [vmem:[%s16329_s11 + $0xd50] sm:$0xf0] }
 0x675   : > { %v15006_v38 = vld [vmem:[%s16329_s11 + $0x634] sm:$0xf] }
 0x676   : > { %v12455_v55 = vld [vmem:[%s16329_s11 + $0x690] sm:$0xf0] }
 0x677   : > { %v15102_v33 = vld [vmem:[%s16329_s11 + $0xc34] sm:$0xf] }
 0x6cf   : > { %v4776_v53 = vpop.xlane.xlu1 %4775 }
 0x6d0   : > { %v4781_v40 = vmul.f32 %v4776_v53, %v16480_v44  ;;  %v15108_v53 = vld [vmem:[%s16329_s11 + $0xc8c] sm:$0xf0] }
 0x6d2   : > { %v17367_v10 = vsub.f32 %v17309_v26, %v4781_v40  ;;  %v17370_v63 = vsub.f32 %v17307_v21, %v4781_v40  ;;  %v17373_v60 = vsub.f32 %v17311_v28, %v4781_v40  ;;  %v12838_v40 = vor.u32 %v15108_v53, %v12837_v57  ;;  %v12653_v53 = vld [vmem:[%s16329_s11 + $0x938] sm:$0xf] }
 0x6d3   : > { %v12270_v57 = vor.u32 %v14965_v29, %v12269_v62  ;;  %v14917_v62 = vld [vmem:[%s16329_s11 + $0x94] sm:$0xf0] }
 0x6d4   : > { %v4789_v0 = vmul.f32 %v17367_v10, %v17367_v10  ;;  %v4790_v5 = vmul.f32 %v17370_v63, %v17370_v63  ;;  %v4791_v36 = vmul.f32 %v17373_v60, %v17373_v60  ;;  %6651 = vmatpush.bf16.msra.mxu1 %v12838_v40  ;;  %v12654_v40 = vor.u32 %v15061_v43, %v12653_v53  ;;  %v12461_v53 = vld [vmem:[%s16329_s11 + $0x638] sm:$0xf] }
 0x6d5   : > { %v15013_v43 = vld [vmem:[%s16329_s11 + $0x694] sm:$0xf0]  ;;  %v12078_v8 = vor.u32 %v14917_v62, %v12077_v39  ;;  %v15187_v39 = vld [vmem:[%s16329_s11 + $0x117c] sm:$0xf] }
 0x6d6   : > { %v4795_v1 = vadd.f32 %v4790_v5, %v4789_v0  ;;  %v13175_v0 = vld [vmem:[%s16329_s11 + $0x11d0] sm:$0xf0]  ;;  %v12794_v5 = vor.u32 %v15090_v51, %v12791_v58  ;;  %v12462_v46 = vor.u32 %v15013_v43, %v12461_v53  ;;  %v13183_v62 = vld [vmem:[%s16329_s11 + $0x11d8] sm:$0xf0] }
 0x6d7   : > { %v4780_v41 = vpop.xlane.xlu2 %4779  ;;  %v15138_v51 = vld [vmem:[%s16329_s11 + $0xe74] sm:$0xf] }
 0x6d8   : > { %v4782_v2 = vmul.f32 %v4780_v41, %v16480_v44  ;;  %v4796_v59 = vadd.f32 %v4795_v1, %v4791_v36  ;;  %v13178_v36 = vor.u32 %v15186_v56, %v13175_v0  ;;  %v12413_v1 = vld [vmem:[%s16329_s11 + $0x578] sm:$0xf]  ;;  %6672 = vmatpush.bf16.msra.mxu3 %v12794_v5  ;;  %v12983_v58 = vld [vmem:[%s16329_s11 + $0xed0] sm:$0xf0] }
 0x6d9   : > { %v15001_v41 = vld [vmem:[%s16329_s11 + $0x5d4] sm:$0xf0]  ;;  %v12986_v5 = vor.u32 %v15138_v51, %v12983_v58 }
 0x6da   : > { %v17383_v6 = vsub.f32 %v17318_v42, %v4782_v2  ;;  %v17386_v50 = vsub.f32 %v17316_v61, %v4782_v2  ;;  %v17389_v19 = vsub.f32 %v17320_v25, %v4782_v2  ;;  %4797 = vadd.xlane.f32.xlu0 %v4796_v59  ;;  %v12797_v2 = vld [vmem:[%s16329_s11 + $0xb78] sm:$0xf]  ;;  %v12414_v59 = vor.u32 %v15001_v41, %v12413_v1 }
 0x6db   : > { %6686 = vmatpush.bf16.msrb.mxu0 %v13178_v36  ;;  %v12221_v56 = vld [vmem:[%s16329_s11 + $0x278] sm:$0xf] }
 0x6dc   : > { %v4792_v48 = vmul.f32 %v17383_v6, %v17383_v6  ;;  %v4793_v9 = vmul.f32 %v17386_v50, %v17386_v50  ;;  %v4794_v7 = vmul.f32 %v17389_v19, %v17389_v19  ;;  %6700 = vmatpush.bf16.msrb.mxu1 %v12414_v59  ;;  %v14953_v0 = vld [vmem:[%s16329_s11 + $0x2d4] sm:$0xf0]  ;;  %v15030_v59 = vld [vmem:[%s16329_s11 + $0x7b4] sm:$0xf] }
 0x6dd   : > { %v12222_v36 = vor.u32 %v14953_v0, %v12221_v56  ;;  %v12605_v1 = vld [vmem:[%s16329_s11 + $0x878] sm:$0xf] }
 0x6de   : > { %v4799_v49 = vadd.f32 %v4793_v9, %v4792_v48  ;;  %v15097_v48 = vld [vmem:[%s16329_s11 + $0xbd4] sm:$0xf0]  ;;  %v15078_v9 = vld [vmem:[%s16329_s11 + $0xab4] sm:$0xf] }
 0x6df   : > { %6687 = vmatpush.bf16.msrb.mxu0 %v13130_v3  ;;  %v15049_v41 = vld [vmem:[%s16329_s11 + $0x8d4] sm:$0xf0] }
 0x6e0   : > { %v4800_v32 = vadd.f32 %v4799_v49, %v4794_v7  ;;  %v12743_v7 = vld [vmem:[%s16329_s11 + $0xb10] sm:$0xf0]  ;;  %v12798_v49 = vor.u32 %v15097_v48, %v12797_v2  ;;  %6701 = vmatpush.bf16.msrb.mxu1 %v12366_v24  ;;  %v12606_v2 = vor.u32 %v15049_v41, %v12605_v1  ;;  %v12558_v24 = vor.u32 %v15037_v31, %v12557_v47 }
 0x6e1   : > { %v12551_v48 = vld [vmem:[%s16329_s11 + $0x810] sm:$0xf0] }
 0x6e2   : > { %4801 = vadd.xlane.f32.xlu1 %v4800_v32  ;;  %v12746_v32 = vor.u32 %v15078_v9, %v12743_v7  ;;  %6714 = vmatpush.bf16.msra.mxu2 %v12798_v49  ;;  %v15126_v9 = vld [vmem:[%s16329_s11 + $0xdb4] sm:$0xf]  ;;  %v12554_v49 = vor.u32 %v15030_v59, %v12551_v48 }
 0x6e3   : > { %6688 = vmatpush.bf16.msrb.mxu0 %v13082_v30  ;;  %v14929_v30 = vld [vmem:[%s16329_s11 + $0x154] sm:$0xf0] }
 0x6e4   : > { %6673 = vmatpush.bf16.msra.mxu3 %v12746_v32  ;;  %6702 = vmatpush.bf16.msrb.mxu1 %v12318_v4  ;;  %v12935_v32 = vld [vmem:[%s16329_s11 + $0xe10] sm:$0xf0]  ;;  %v12509_v4 = vld [vmem:[%s16329_s11 + $0x6f8] sm:$0xf]  ;;  %v12126_v35 = vor.u32 %v14929_v30, %v12125_v13 }
 0x6e5   : > { %v12938_v3 = vor.u32 %v15126_v9, %v12935_v32  ;;  %v10907_v32 = vld [vmem:[%s16321_s29 + $0x3] ss:$4 sm:$0x7] }
 0x6e6   : > { %6715 = vmatpush.bf16.msra.mxu2 %v12750_v52  ;;  %v4847_v31 = vperm.slane %v10907_v32, 0  ;;  %v13181_v30 = vld [vmem:[%s16329_s11 + $0x1178] sm:$0xf] }
 0x6e7   : > { %6689 = vmatpush.bf16.msrb.mxu0 %v13034_v12  ;;  %v12458_v12 = vor.u32 %v15006_v38, %v12455_v55  ;;  %v12415_v38 = vld [vmem:[%s16329_s11 + $0x5d8] sm:$0xf0] }
 0x6e8   : > { %6674 = vmatpush.bf16.msra.mxu3 %v12698_v11  ;;  %6703 = vmatpush.bf16.msrb.mxu1 %v12270_v57  ;;  %v15114_v11 = vld [vmem:[%s16329_s11 + $0xcf4] sm:$0xf]  ;;  %v15091_v55 = vld [vmem:[%s16329_s11 + $0xb7c] sm:$0xf] }
 0x6e9   : > { %v12890_v23 = vor.u32 %v15114_v11, %v12887_v22 }
 0x6ea   : > { %6716 = vmatpush.bf16.msra.mxu2 %v12702_v37  ;;  %v12510_v37 = vor.u32 %v15025_v27, %v12509_v4  ;;  %v15193_v4 = vld [vmem:[%s16329_s11 + $0x11d4] sm:$0xf0] }
 0x6eb   : > { %6690 = vmatpush.bf16.msrb.mxu0 %v12986_v5 }
 0x6ec   : > { %6675 = vmatpush.bf16.msra.mxu3 %v12650_v45  ;;  %6704 = vmatpush.bf16.msrb.mxu1 %v12222_v36  ;;  %v12839_v45 = vld [vmem:[%s16329_s11 + $0xc90] sm:$0xf0] }
 0x6ed   : > { %v12842_v57 = vor.u32 %v15102_v33, %v12839_v45  ;;  %v12799_v45 = vld [vmem:[%s16329_s11 + $0xbd8] sm:$0xf0] }
 0x6ee   : > { %6717 = vmatpush.bf16.msra.mxu2 %v12654_v40 }
 0x6ef   : > { %6691 = vmatpush.bf16.msrb.mxu0 %v12938_v3 }
 0x6f0   : > { %6676 = vmatpush.bf16.msra.mxu3 %v12602_v54  ;;  %6705 = vmatpush.bf16.msrb.mxu1 %v12174_v16 }
 0x6f2   : > { %6718 = vmatpush.bf16.msra.mxu2 %v12606_v2  ;;  %v10906_v2 = vld [vmem:[%s16321_s29 + $0x2] ss:$4 sm:$0x7]  ;;  %s19113_s29 = sld [smem:[#allocation27_spill]] }
 0x6f3   : > { %6692 = vmatpush.bf16.msrb.mxu0 %v12890_v23  ;;  %v4836_v3 = vperm.slane %v10906_v2, 2 }
 0x6f4   : > { %6677 = vmatpush.bf16.msra.mxu3 %v12554_v49  ;;  %6706 = vmatpush.bf16.msrb.mxu1 %v12126_v35  ;;  %v4835_v49 = vperm.slane %v10906_v2, 1 }
 0x6f6   : > { %6719 = vmatpush.bf16.msra.mxu2 %v12558_v24  ;;  %v4848_v24 = vperm.slane %v10907_v32, 1 }
 0x6f7   : > { %6693 = vmatpush.bf16.msrb.mxu0 %v12842_v57 }
 0x6f8   : > { %6678 = vmatpush.bf16.msra.mxu3 %v12506_v18  ;;  %6707 = vmatpush.bf16.msrb.mxu1 %v12078_v8  ;;  %v15181_v8 = vld [vmem:[%s16329_s11 + $0x1114] sm:$0xf0]  ;;  %p14371_p1 = scmp.ne.s32.totalorder %s19113_s29, 1 }
 0x6fa   : > { %6720 = vmatpush.bf16.msra.mxu2 %v12510_v37  ;;  %v14995_v37 = vld [vmem:[%s16329_s11 + $0x57c] sm:$0xf] }
 0x6fb   : > { %v12418_v43 = vor.u32 %v14995_v37, %v12415_v38  ;;  %v15043_v37 = vld [vmem:[%s16329_s11 + $0x87c] sm:$0xf] }
 0x6fc   : > { %6679 = vmatpush.bf16.msra.mxu3 %v12458_v12  ;;  %v12607_v38 = vld [vmem:[%s16329_s11 + $0x8d8] sm:$0xf0] }
 0x6fe   : > { %6721 = vmatpush.bf16.msra.mxu2 %v12462_v46  ;;  %v12802_v46 = vor.u32 %v15091_v55, %v12799_v45  ;;  %v15139_v55 = vld [vmem:[%s16329_s11 + $0xe7c] sm:$0xf]  ;;  %v15133_v45 = vld [vmem:[%s16329_s11 + $0xe14] sm:$0xf0] }
 0x74d   : > { %v4798_v7 = vpop.xlane.xlu0 %4797 }
 0x74e   : > { %v4803_v34 = vmul.f32 %v4798_v7, %v16480_v44  ;;  %v4834_v7 = vperm.slane %v10906_v2, 0  ;;  %v13085_v2 = vld [vmem:[%s16329_s11 + $0xff8] sm:$0xf] }
 0x750   : > { %v4805_v52 = vadd.f32 1e-06, %v4803_v34 }
 0x752   : > { %15704 = vrsqrt.f32 %v4805_v52  ;;  %vm4813_vm0 = vweird.f32 %v4805_v52 }
 0x755   : > { %v4802_v29 = vpop.xlane.xlu1 %4801 }
 0x756   : > { %v4804_v40 = vmul.f32 %v4802_v29, %v16480_v44  ;;  %v13182_v29 = vor.u32 %v15193_v4, %v13181_v30 }
 0x758   : > { %v15705_v51 = vpop.eup %15704  ;;  %v4806_v54 = vadd.f32 1e-06, %v4804_v40  ;;  %v13133_v40 = vld [vmem:[%s16329_s11 + $0x10b8] sm:$0xf] }
 0x759   : > { %v4808_v58 = vmul.f32 %v15705_v51, %v4805_v52  ;;  %vm4814_vm15 = vweird.f32 %v15705_v51  ;;  %v4849_v52 = vperm.slane %v10907_v32, 2  ;;  %v15067_v32 = vld [vmem:[%s16329_s11 + $0x9fc] sm:$0xf] }
 0x75a   : > { %15706 = vrsqrt.f32 %v4806_v54  ;;  %vm4815_vm1 = vmor %vm4813_vm0, %vm4814_vm15  ;;  %vm4823_vm3 = vweird.f32 %v4806_v54 }
 0x75b   : > { %v4809_v56 = vmul.f32 %v15705_v51, %v4808_v58  ;;  %v12367_v58 = vld [vmem:[%s16329_s11 + $0x518] sm:$0xf0] }
 0x75d   : > { %v4810_v0 = vmul.f32 0.5, %v4809_v56  ;;  %v15079_v56 = vld [vmem:[%s16329_s11 + $0xabc] sm:$0xf] }
 0x75f   : > { %v4811_v5 = vsub.f32 1.5, %v4810_v0  ;;  %v12751_v0 = vld [vmem:[%s16329_s11 + $0xb18] sm:$0xf0] }
 0x760   : > { %v15707_v36 = vpop.eup %15706 }
 0x761   : > { %v4812_v1 = vmul.f32 %v15705_v51, %v4811_v5  ;;  %v4818_v41 = vmul.f32 %v15707_v36, %v4806_v54  ;;  %vm4824_vm2 = vweird.f32 %v15707_v36  ;;  %v14983_v54 = vld [vmem:[%s16329_s11 + $0x4bc] sm:$0xf] }
 0x762   : > { %vm4825_vm4 = vmor %vm4823_vm3, %vm4824_vm2  ;;  %v15175_v5 = vld [vmem:[%s16329_s11 + $0x10bc] sm:$0xf] }
 0x763   : > { %v4819_v59 = vmul.f32 %v15707_v36, %v4818_v41  ;;  %v4816_v48 = vsel %vm4815_vm1, %v15705_v51, %v4812_v1  ;;  %v13186_v51 = vor.u32 %v15187_v39, %v13183_v62  ;;  %v13134_v1 = vor.u32 %v15181_v8, %v13133_v40  ;;  %v15031_v40 = vld [vmem:[%s16329_s11 + $0x7bc] sm:$0xf] }
 0x764   : > { %v4827_v15 = vmul.f32 %v4816_v48, %v17367_v10  ;;  %v4828_v14 = vmul.f32 %v4816_v48, %v17370_v63  ;;  %v4829_v16 = vmul.f32 %v4816_v48, %v17373_v60  ;;  %v12370_v41 = vor.u32 %v14983_v54, %v12367_v58  ;;  %v12559_v8 = vld [vmem:[%s16329_s11 + $0x818] sm:$0xf0] }
 0x765   : > { %v4820_v9 = vmul.f32 0.5, %v4819_v59  ;;  %v15169_v59 = vld [vmem:[%s16329_s11 + $0x1054] sm:$0xf0]  ;;  %v12754_v48 = vor.u32 %v15079_v56, %v12751_v0  ;;  %v12610_v39 = vor.u32 %v15043_v37, %v12607_v38  ;;  %v12373_v37 = vld [vmem:[%s16329_s11 + $0x4c0] sm:$0xf] }
 0x766   : > { %v4840_v17 = vmul.f32 %v4834_v7, %v4827_v15  ;;  %v4841_v10 = vmul.f32 %v4835_v49, %v4828_v14  ;;  %v4842_v63 = vmul.f32 %v4836_v3, %v4829_v16  ;;  %v12703_v15 = vld [vmem:[%s16329_s11 + $0xa58] sm:$0xf0]  ;;  %v12893_v56 = vld [vmem:[%s16329_s11 + $0xcf8] sm:$0xf]  ;;  %v14990_v38 = vld [vmem:[%s16329_s11 + $0x51c] sm:$0xf0] }
 0x767   : > { %v4821_v34 = vsub.f32 1.5, %v4820_v9  ;;  %v15163_v14 = vld [vmem:[%s16329_s11 + $0xffc] sm:$0xf]  ;;  %v15121_v0 = vld [vmem:[%s16329_s11 + $0xd54] sm:$0xf0] }
 0x768   : > { %v4853_v27 = vadd.f32 %v4847_v31, %v4840_v17  ;;  %v4854_v35 = vadd.f32 %v4848_v24, %v4841_v10  ;;  %v14959_v17 = vld [vmem:[%s16329_s11 + $0x33c] sm:$0xf] }
 0x769   : > { %v4822_v47 = vmul.f32 %v15707_v36, %v4821_v34  ;;  %v13087_v34 = vld [vmem:[%s16329_s11 + $0x1058] sm:$0xf0] }
 0x76a   : > { %v12271_v10 = vld [vmem:[%s16329_s11 + $0x398] sm:$0xf0] }
 0x76b   : > { %v4826_v20 = vsel %vm4825_vm4, %v15707_v36, %v4822_v47  ;;  %v13135_v36 = vld [vmem:[%s16329_s11 + $0x1118] sm:$0xf0]  ;;  %v13037_v47 = vld [vmem:[%s16329_s11 + $0xf38] sm:$0xf] }
 0x76c   : > { %v4830_v18 = vmul.f32 %v4826_v20, %v17383_v6  ;;  %v4831_v11 = vmul.f32 %v4826_v20, %v17386_v50  ;;  %v4832_v60 = vmul.f32 %v4826_v20, %v17389_v19  ;;  %v4855_v6 = vadd.f32 %v4849_v52, %v4842_v63  ;;  %v15055_v20 = vld [vmem:[%s16329_s11 + $0x93c] sm:$0xf] }
 0x76d   : > { %v13138_v9 = vor.u32 %v15175_v5, %v13135_v36  ;;  %v12655_v63 = vld [vmem:[%s16329_s11 + $0x998] sm:$0xf0]  ;;  %v12562_v5 = vor.u32 %v15031_v40, %v12559_v8  ;;  %v12325_v40 = vld [vmem:[%s16329_s11 + $0x400] sm:$0xf] }
 0x76e   : > { %v4843_v22 = vmul.f32 %v4834_v7, %v4830_v18  ;;  %v4844_v13 = vmul.f32 %v4835_v49, %v4831_v11  ;;  %v4845_v23 = vmul.f32 %v4836_v3, %v4832_v60  ;;  %v14971_v7 = vld [vmem:[%s16329_s11 + $0x3fc] sm:$0xf]  ;;  %v13086_v3 = vor.u32 %v15169_v59, %v13085_v2  ;;  %v14978_v8 = vld [vmem:[%s16329_s11 + $0x45c] sm:$0xf0] }
 0x76f   : > { %v12319_v49 = vld [vmem:[%s16329_s11 + $0x458] sm:$0xf0]  ;;  %v12658_v30 = vor.u32 %v15055_v20, %v12655_v63  ;;  %v12805_v20 = vld [vmem:[%s16329_s11 + $0xb80] sm:$0xf] }
 0x770   : > { %v4856_v50 = vadd.f32 %v4847_v31, %v4843_v22  ;;  %v4857_v33 = vadd.f32 %v4848_v24, %v4844_v13  ;;  %v4858_v19 = vadd.f32 %v4849_v52, %v4845_v23  ;;  %v12322_v16 = vor.u32 %v14971_v7, %v12319_v49  ;;  %v15157_v31 = vld [vmem:[%s16329_s11 + $0xf94] sm:$0xf0]  ;;  %v15151_v18 = vld [vmem:[%s16329_s11 + $0xf3c] sm:$0xf]  ;;  %v15098_v63 = vld [vmem:[%s16329_s11 + $0xbdc] sm:$0xf0] }
 0x771   : > { %v12706_v24 = vor.u32 %v15067_v32, %v12703_v15  ;;  %v13090_v52 = vor.u32 %v15163_v14, %v13087_v34  ;;  %v13039_v11 = vld [vmem:[%s16329_s11 + $0xf98] sm:$0xf0]  ;;  %v13038_v60 = vor.u32 %v15157_v31, %v13037_v47  ;;  %v12274_v22 = vor.u32 %v14959_v17, %v12271_v10  ;;  %v12989_v13 = vld [vmem:[%s16329_s11 + $0xe78] sm:$0xf]  ;;  %v12421_v17 = vld [vmem:[%s16329_s11 + $0x580] sm:$0xf] }
 0x772   : > { %v17503_v12 = vpack.c.bf16 %v4856_v50, %v4853_v27  ;;  %v17505_v57 = vpack.c.bf16 %v4857_v33, %v4854_v35  ;;  %v17507_v53 = vpack.c.bf16 %v4858_v19, %v4855_v6  ;;  %v15145_v23 = vld [vmem:[%s16329_s11 + $0xed4] sm:$0xf0]  ;;  %v13042_v4 = vor.u32 %v15151_v18, %v13039_v11  ;;  %v14947_v27 = vld [vmem:[%s16329_s11 + $0x27c] sm:$0xf]  ;;  %v15002_v10 = vld [vmem:[%s16329_s11 + $0x5dc] sm:$0xf0] }
 0x773   : > { %v12223_v35 = vld [vmem:[%s16329_s11 + $0x2d8] sm:$0xf0]  ;;  %v12990_v50 = vor.u32 %v15145_v23, %v12989_v13  ;;  %v12941_v19 = vld [vmem:[%s16329_s11 + $0xdb8] sm:$0xf]  ;;  %v12894_v49 = vor.u32 %v15121_v0, %v12893_v56  ;;  %v13189_v18 = vld [vmem:[%s16329_s11 + $0x1180] sm:$0xf] }
 0x774   : > { %6624 = vmatmul.bf16.vlgmr.msrb.gmra.mxu3 %v17503_v12  ;;  %6638 = vmatmul.bf16.vlgmr.msra.gmra.mxu0 %v17505_v57  ;;  %v12991_v6 = vld [vmem:[%s16329_s11 + $0xed8] sm:$0xf0]  ;;  %v12226_v33 = vor.u32 %v14947_v27, %v12223_v35  ;;  %v12942_v54 = vor.u32 %v15133_v45, %v12941_v19  ;;  %v12845_v7 = vld [vmem:[%s16329_s11 + $0xc38] sm:$0xf]  ;;  %v14996_v13 = vld [vmem:[%s16329_s11 + $0x584] sm:$0xf]  ;;  %v12422_v27 = vor.u32 %v15002_v10, %v12421_v17 }
 0x775   : > { %6652 = vmatmul.bf16.vlgmr.msra.gmra.mxu1 %v17507_v53  ;;  %6666 = vmatmul.bf16.vlgmr.msrb.gmra.mxu2 %v17503_v12  ;;  %v12994_v62 = vor.u32 %v15139_v55, %v12991_v6  ;;  %v15019_v2 = vld [vmem:[%s16329_s11 + $0x6fc] sm:$0xf]  ;;  %v15109_v15 = vld [vmem:[%s16329_s11 + $0xc94] sm:$0xf0]  ;;  %v12423_v23 = vld [vmem:[%s16329_s11 + $0x5e0] sm:$0xf0]  ;;  %v12806_v35 = vor.u32 %v15098_v63, %v12805_v20 }
 0x776   : > { %6728 = vmatpush.bf16.msrb.mxu3 %v13182_v29  ;;  %6742 = vmatpush.bf16.msra.mxu0 %v12418_v43  ;;  %v14935_v29 = vld [vmem:[%s16329_s11 + $0x1bc] sm:$0xf]  ;;  %v12846_v11 = vor.u32 %v15109_v15, %v12845_v7  ;;  %v12426_v6 = vor.u32 %v14996_v13, %v12423_v23  ;;  %v13141_v19 = vld [vmem:[%s16329_s11 + $0x10c0] sm:$0xf] }
 0x777   : > { %6756 = vmatpush.bf16.msra.mxu1 %v12802_v46  ;;  %6770 = vmatpush.bf16.msrb.mxu2 %v13186_v51  ;;  %v12175_v43 = vld [vmem:[%s16329_s11 + $0x218] sm:$0xf0]  ;;  %v15182_v45 = vld [vmem:[%s16329_s11 + $0x111c] sm:$0xf0] }
 0x778   : > { %v15127_v46 = vld [vmem:[%s16329_s11 + $0xdbc] sm:$0xf]  ;;  %v12178_v58 = vor.u32 %v14935_v29, %v12175_v43  ;;  %v12374_v29 = vor.u32 %v14990_v38, %v12373_v37  ;;  %v13093_v56 = vld [vmem:[%s16329_s11 + $0x1000] sm:$0xf] }
 0x779   : > { %v12943_v51 = vld [vmem:[%s16329_s11 + $0xe18] sm:$0xf0]  ;;  %v15170_v0 = vld [vmem:[%s16329_s11 + $0x105c] sm:$0xf0] }
 0x77a   : > { %6729 = vmatpush.bf16.msrb.mxu3 %v13134_v1  ;;  %6743 = vmatpush.bf16.msra.mxu0 %v12370_v41  ;;  %v12946_v36 = vor.u32 %v15127_v46, %v12943_v51  ;;  %v14923_v1 = vld [vmem:[%s16329_s11 + $0xfc] sm:$0xf]  ;;  %v13142_v46 = vor.u32 %v15182_v45, %v13141_v19  ;;  %v12661_v7 = vld [vmem:[%s16329_s11 + $0x940] sm:$0xf] }
 0x77b   : > { %6757 = vmatpush.bf16.msra.mxu1 %v12754_v48  ;;  %6771 = vmatpush.bf16.msrb.mxu2 %v13138_v9  ;;  %v12127_v41 = vld [vmem:[%s16329_s11 + $0x158] sm:$0xf0]  ;;  %v15158_v15 = vld [vmem:[%s16329_s11 + $0xf9c] sm:$0xf0] }
 0x77c   : > { %v12511_v59 = vld [vmem:[%s16329_s11 + $0x758] sm:$0xf0]  ;;  %v12130_v32 = vor.u32 %v14923_v1, %v12127_v41  ;;  %v12326_v1 = vor.u32 %v14978_v8, %v12325_v40  ;;  %v12613_v17 = vld [vmem:[%s16329_s11 + $0x880] sm:$0xf] }
 0x77d   : > { %v15115_v48 = vld [vmem:[%s16329_s11 + $0xcfc] sm:$0xf]  ;;  %v15050_v10 = vld [vmem:[%s16329_s11 + $0x8dc] sm:$0xf0] }
 0x77e   : > { %6730 = vmatpush.bf16.msrb.mxu3 %v13086_v3  ;;  %6744 = vmatpush.bf16.msra.mxu0 %v12322_v16  ;;  %v12895_v9 = vld [vmem:[%s16329_s11 + $0xd58] sm:$0xf0]  ;;  %v12514_v3 = vor.u32 %v15019_v2, %v12511_v59  ;;  %v12277_v2 = vld [vmem:[%s16329_s11 + $0x340] sm:$0xf] }
 0x77f   : > { %6758 = vmatpush.bf16.msra.mxu1 %v12706_v24  ;;  %6772 = vmatpush.bf16.msrb.mxu2 %v13090_v52  ;;  %v14911_v14 = vld [vmem:[%s16329_s11 + $0x3c] sm:$0xf]  ;;  %v12898_v16 = vor.u32 %v15115_v48, %v12895_v9  ;;  %v14966_v59 = vld [vmem:[%s16329_s11 + $0x39c] sm:$0xf0]  ;;  %v13094_v48 = vor.u32 %v15170_v0, %v13093_v56 }
 0x780   : > { %v12079_v34 = vld [vmem:[%s16329_s11 + $0x98] sm:$0xf0]  ;;  %v12997_v20 = vld [vmem:[%s16329_s11 + $0xe80] sm:$0xf] }
 0x781   : > { %v15007_v47 = vld [vmem:[%s16329_s11 + $0x63c] sm:$0xf]  ;;  %v15146_v63 = vld [vmem:[%s16329_s11 + $0xedc] sm:$0xf0] }
 0x782   : > { %6731 = vmatpush.bf16.msrb.mxu3 %v13038_v60  ;;  %6745 = vmatpush.bf16.msra.mxu0 %v12274_v22  ;;  %v12463_v31 = vld [vmem:[%s16329_s11 + $0x698] sm:$0xf0]  ;;  %v12082_v60 = vor.u32 %v14911_v14, %v12079_v34  ;;  %v15194_v22 = vld [vmem:[%s16329_s11 + $0x11dc] sm:$0xf0]  ;;  %v14960_v14 = vld [vmem:[%s16329_s11 + $0x344] sm:$0xf] }
 0x783   : > { %6759 = vmatpush.bf16.msra.mxu1 %v12658_v30  ;;  %6773 = vmatpush.bf16.msrb.mxu2 %v13042_v4  ;;  %v15103_v24 = vld [vmem:[%s16329_s11 + $0xc3c] sm:$0xf]  ;;  %v12466_v30 = vor.u32 %v15007_v47, %v12463_v31  ;;  %v13190_v55 = vor.u32 %v15194_v22, %v13189_v18  ;;  %v12279_v34 = vld [vmem:[%s16329_s11 + $0x3a0] sm:$0xf0]  ;;  %v12229_v47 = vld [vmem:[%s16329_s11 + $0x280] sm:$0xf]  ;;  %v12614_v22 = vor.u32 %v15050_v10, %v12613_v17 }
 0x784   : > { %6680 = vmatmul.bf16.vlgmr.msra.gmra.mxu3 %v17505_v57  ;;  %6694 = vmatmul.bf16.vlgmr.msrb.gmra.mxu0 %v17507_v53  ;;  %v12847_v52 = vld [vmem:[%s16329_s11 + $0xc98] sm:$0xf0]  ;;  %v14954_v31 = vld [vmem:[%s16329_s11 + $0x2dc] sm:$0xf0]  ;;  %v14948_v18 = vld [vmem:[%s16329_s11 + $0x284] sm:$0xf] }
 0x785   : > { %6708 = vmatmul.bf16.vlgmr.msrb.gmra.mxu1 %v17503_v12  ;;  %6722 = vmatmul.bf16.vlgmr.msra.gmra.mxu2 %v17505_v57  ;;  %v12850_v4 = vor.u32 %v15103_v24, %v12847_v52  ;;  %v12282_v52 = vor.u32 %v14960_v14, %v12279_v34  ;;  %v12181_v13 = vld [vmem:[%s16329_s11 + $0x1c0] sm:$0xf]  ;;  %v12429_v14 = vld [vmem:[%s16329_s11 + $0x588] sm:$0xf] }
 0x786   : > { %6732 = vmatpush.bf16.msrb.mxu3 %v12990_v50  ;;  %6746 = vmatpush.bf16.msra.mxu0 %v12226_v33  ;;  %v12757_v50 = vld [vmem:[%s16329_s11 + $0xac0] sm:$0xf] }
 0x787   : > { %6760 = vmatpush.bf16.msra.mxu1 %v12610_v39  ;;  %6774 = vmatpush.bf16.msrb.mxu2 %v12994_v62  ;;  %v15086_v33 = vld [vmem:[%s16329_s11 + $0xb1c] sm:$0xf0]  ;;  %v14984_v39 = vld [vmem:[%s16329_s11 + $0x4c4] sm:$0xf] }
 0x788   : > { %v12375_v62 = vld [vmem:[%s16329_s11 + $0x520] sm:$0xf0]  ;;  %v12758_v43 = vor.u32 %v15086_v33, %v12757_v50  ;;  %v14942_v23 = vld [vmem:[%s16329_s11 + $0x21c] sm:$0xf0] }
 0x789   : > { %v12378_v51 = vor.u32 %v14984_v39, %v12375_v62  ;;  %v12949_v37 = vld [vmem:[%s16329_s11 + $0xdc0] sm:$0xf]  ;;  %v12182_v50 = vor.u32 %v14942_v23, %v12181_v13  ;;  %v12381_v13 = vld [vmem:[%s16329_s11 + $0x4c8] sm:$0xf] }
 0x78a   : > { %6733 = vmatpush.bf16.msrb.mxu3 %v12942_v54  ;;  %6747 = vmatpush.bf16.msra.mxu0 %v12178_v58  ;;  %v12709_v54 = vld [vmem:[%s16329_s11 + $0xa00] sm:$0xf]  ;;  %v14991_v23 = vld [vmem:[%s16329_s11 + $0x524] sm:$0xf0] }
 0x78b   : > { %6761 = vmatpush.bf16.msra.mxu1 %v12562_v5  ;;  %6775 = vmatpush.bf16.msrb.mxu2 %v12946_v36  ;;  %v15074_v58 = vld [vmem:[%s16329_s11 + $0xa5c] sm:$0xf0]  ;;  %v14972_v5 = vld [vmem:[%s16329_s11 + $0x404] sm:$0xf] }
 0x78c   : > { %v12327_v36 = vld [vmem:[%s16329_s11 + $0x460] sm:$0xf0]  ;;  %v12710_v41 = vor.u32 %v15074_v58, %v12709_v54  ;;  %v15134_v38 = vld [vmem:[%s16329_s11 + $0xe1c] sm:$0xf0] }
 0x78d   : > { %v12330_v9 = vor.u32 %v14972_v5, %v12327_v36  ;;  %v12133_v19 = vld [vmem:[%s16329_s11 + $0x100] sm:$0xf]  ;;  %v12950_v39 = vor.u32 %v15134_v38, %v12949_v37  ;;  %v15068_v37 = vld [vmem:[%s16329_s11 + $0xa04] sm:$0xf] }
 0x78e   : > { %6734 = vmatpush.bf16.msrb.mxu3 %v12894_v49  ;;  %6748 = vmatpush.bf16.msra.mxu0 %v12130_v32  ;;  %v15062_v49 = vld [vmem:[%s16329_s11 + $0x99c] sm:$0xf0]  ;;  %v12711_v38 = vld [vmem:[%s16329_s11 + $0xa60] sm:$0xf0] }
 0x78f   : > { %6762 = vmatpush.bf16.msra.mxu1 %v12514_v3  ;;  %6776 = vmatpush.bf16.msrb.mxu2 %v12898_v16  ;;  %v13045_v32 = vld [vmem:[%s16329_s11 + $0xf40] sm:$0xf]  ;;  %v12278_v3 = vor.u32 %v14966_v59, %v12277_v2  ;;  %v12662_v16 = vor.u32 %v15062_v49, %v12661_v7  ;;  %v15092_v7 = vld [vmem:[%s16329_s11 + $0xb84] sm:$0xf] }
 0x790   : > { %v13046_v24 = vor.u32 %v15158_v15, %v13045_v32  ;;  %v14930_v45 = vld [vmem:[%s16329_s11 + $0x15c] sm:$0xf0]  ;;  %v12807_v49 = vld [vmem:[%s16329_s11 + $0xbe0] sm:$0xf0] }
 0x791   : > { %v12901_v40 = vld [vmem:[%s16329_s11 + $0xd00] sm:$0xf]  ;;  %v12134_v58 = vor.u32 %v14930_v45, %v12133_v19  ;;  %v15188_v32 = vld [vmem:[%s16329_s11 + $0x1184] sm:$0xf]  ;;  %v12810_v17 = vor.u32 %v15092_v7, %v12807_v49  ;;  %v12333_v19 = vld [vmem:[%s16329_s11 + $0x408] sm:$0xf] }
 0x792   : > { %6735 = vmatpush.bf16.msrb.mxu3 %v12846_v11  ;;  %6749 = vmatpush.bf16.msra.mxu0 %v12082_v60  ;;  %v12231_v11 = vld [vmem:[%s16329_s11 + $0x2e0] sm:$0xf0]  ;;  %v12230_v60 = vor.u32 %v14954_v31, %v12229_v47  ;;  %v15122_v8 = vld [vmem:[%s16329_s11 + $0xd5c] sm:$0xf0]  ;;  %v12813_v47 = vld [vmem:[%s16329_s11 + $0xb88] sm:$0xf] }
 0x793   : > { %6763 = vmatpush.bf16.msra.mxu1 %v12466_v30  ;;  %6777 = vmatpush.bf16.msrb.mxu2 %v12850_v4  ;;  %v12998_v30 = vor.u32 %v15146_v63, %v12997_v20  ;;  %v12234_v4 = vor.u32 %v14948_v18, %v12231_v11  ;;  %v12085_v54 = vld [vmem:[%s16329_s11 + $0x40] sm:$0xf]  ;;  %v13191_v15 = vld [vmem:[%s16329_s11 + $0x11e0] sm:$0xf0]  ;;  %v15099_v31 = vld [vmem:[%s16329_s11 + $0xbe4] sm:$0xf0] }
 0x794   : > { %v14918_v0 = vld [vmem:[%s16329_s11 + $0x9c] sm:$0xf0]  ;;  %v13194_v10 = vor.u32 %v15188_v32, %v13191_v15  ;;  %v15080_v20 = vld [vmem:[%s16329_s11 + $0xac4] sm:$0xf]  ;;  %v12814_v11 = vor.u32 %v15099_v31, %v12813_v47  ;;  %v14979_v45 = vld [vmem:[%s16329_s11 + $0x464] sm:$0xf0] }
 0x795   : > { %6736 = vmatmul.bf16.vlgmr.msrb.gmra.mxu3 %v17507_v53  ;;  %6750 = vmatmul.bf16.vlgmr.msra.gmra.mxu0 %v17503_v12  ;;  %v12469_v5 = vld [vmem:[%s16329_s11 + $0x640] sm:$0xf]  ;;  %v12086_v34 = vor.u32 %v14918_v0, %v12085_v54  ;;  %v12759_v63 = vld [vmem:[%s16329_s11 + $0xb20] sm:$0xf0]  ;;  %v14967_v0 = vld [vmem:[%s16329_s11 + $0x3a4] sm:$0xf0] }
 0x796   : > { %6784 = vmatpush.bf16.msra.mxu3 %v12422_v27  ;;  %6798 = vmatpush.bf16.msrb.mxu0 %v12806_v35  ;;  %v12565_v27 = vld [vmem:[%s16329_s11 + $0x7c0] sm:$0xf]  ;;  %v15152_v54 = vld [vmem:[%s16329_s11 + $0xf44] sm:$0xf]  ;;  %v12237_v32 = vld [vmem:[%s16329_s11 + $0x288] sm:$0xf] }
 0x797   : > { %6812 = vmatpush.bf16.msrb.mxu1 %v13190_v55  ;;  %6826 = vmatpush.bf16.msra.mxu2 %v12426_v6  ;;  %v15038_v35 = vld [vmem:[%s16329_s11 + $0x81c] sm:$0xf0]  ;;  %v14936_v55 = vld [vmem:[%s16329_s11 + $0x1c4] sm:$0xf]  ;;  %v14955_v15 = vld [vmem:[%s16329_s11 + $0x2e4] sm:$0xf0] }
 0x798   : > { %6764 = vmatmul.bf16.vlgmr.msra.gmra.mxu1 %v17505_v57  ;;  %6778 = vmatmul.bf16.vlgmr.msrb.gmra.mxu2 %v17507_v53  ;;  %v12183_v6 = vld [vmem:[%s16329_s11 + $0x220] sm:$0xf0]  ;;  %v12566_v33 = vor.u32 %v15038_v35, %v12565_v27  ;;  %v15014_v36 = vld [vmem:[%s16329_s11 + $0x69c] sm:$0xf0]  ;;  %v12762_v27 = vor.u32 %v15080_v20, %v12759_v63  ;;  %v12189_v20 = vld [vmem:[%s16329_s11 + $0x1c8] sm:$0xf] }
 0x799   : > { %v12186_v62 = vor.u32 %v14936_v55, %v12183_v6  ;;  %v12853_v2 = vld [vmem:[%s16329_s11 + $0xc40] sm:$0xf]  ;;  %v12382_v55 = vor.u32 %v14991_v23, %v12381_v13  ;;  %v15140_v7 = vld [vmem:[%s16329_s11 + $0xe84] sm:$0xf]  ;;  %v14943_v63 = vld [vmem:[%s16329_s11 + $0x224] sm:$0xf0] }
 0x79a   : > { %6785 = vmatpush.bf16.msra.mxu3 %v12374_v29  ;;  %6799 = vmatpush.bf16.msrb.mxu0 %v12758_v43  ;;  %v12517_v29 = vld [vmem:[%s16329_s11 + $0x700] sm:$0xf]  ;;  %v12999_v49 = vld [vmem:[%s16329_s11 + $0xee0] sm:$0xf0] }
 0x79b   : > { %6813 = vmatpush.bf16.msrb.mxu1 %v13142_v46  ;;  %6827 = vmatpush.bf16.msra.mxu2 %v12378_v51  ;;  %v15026_v43 = vld [vmem:[%s16329_s11 + $0x75c] sm:$0xf0]  ;;  %v14924_v46 = vld [vmem:[%s16329_s11 + $0x104] sm:$0xf] }
 0x79c   : > { %v12135_v51 = vld [vmem:[%s16329_s11 + $0x160] sm:$0xf0]  ;;  %v12518_v56 = vor.u32 %v15026_v43, %v12517_v29  ;;  %v15110_v59 = vld [vmem:[%s16329_s11 + $0xc9c] sm:$0xf0]  ;;  %v12714_v29 = vor.u32 %v15068_v37, %v12711_v38  ;;  %v12141_v37 = vld [vmem:[%s16329_s11 + $0x108] sm:$0xf] }
 0x79d   : > { %v15032_v47 = vld [vmem:[%s16329_s11 + $0x7c4] sm:$0xf]  ;;  %v14931_v38 = vld [vmem:[%s16329_s11 + $0x164] sm:$0xf0] }
 0x79e   : > { %6786 = vmatpush.bf16.msra.mxu3 %v12326_v1  ;;  %6800 = vmatpush.bf16.msrb.mxu0 %v12710_v41  ;;  %v12902_v1 = vor.u32 %v15122_v8, %v12901_v40  ;;  %v12138_v41 = vor.u32 %v14924_v46, %v12135_v51  ;;  %v15056_v40 = vld [vmem:[%s16329_s11 + $0x944] sm:$0xf]  ;;  %v12334_v46 = vor.u32 %v14979_v45, %v12333_v19 }
 0x79f   : > { %6814 = vmatpush.bf16.msrb.mxu1 %v13094_v48  ;;  %6828 = vmatpush.bf16.msra.mxu2 %v12330_v9  ;;  %v14912_v48 = vld [vmem:[%s16329_s11 + $0x44] sm:$0xf] }
 0x7a0   : > { %v12087_v9 = vld [vmem:[%s16329_s11 + $0xa0] sm:$0xf0] }
 0x7a1   : > { %v12663_v8 = vld [vmem:[%s16329_s11 + $0x9a0] sm:$0xf0] }
 0x7a2   : > { %6787 = vmatpush.bf16.msra.mxu3 %v12278_v3  ;;  %6801 = vmatpush.bf16.msrb.mxu0 %v12662_v16  ;;  %v12470_v3 = vor.u32 %v15014_v36, %v12469_v5  ;;  %v15003_v16 = vld [vmem:[%s16329_s11 + $0x5e4] sm:$0xf0]  ;;  %v12567_v31 = vld [vmem:[%s16329_s11 + $0x820] sm:$0xf0] }
 0x7a3   : > { %6815 = vmatpush.bf16.msrb.mxu1 %v13046_v24  ;;  %6829 = vmatpush.bf16.msra.mxu2 %v12282_v52  ;;  %v12854_v24 = vor.u32 %v15110_v59, %v12853_v2  ;;  %v12090_v52 = vor.u32 %v14912_v48, %v12087_v9  ;;  %v12430_v18 = vor.u32 %v15003_v16, %v12429_v14  ;;  %v12669_v5 = vld [vmem:[%s16329_s11 + $0x948] sm:$0xf]  ;;  %v15044_v2 = vld [vmem:[%s16329_s11 + $0x884] sm:$0xf] }
 0x7a4   : > { %v15063_v36 = vld [vmem:[%s16329_s11 + $0x9a4] sm:$0xf0]  ;;  %v12615_v59 = vld [vmem:[%s16329_s11 + $0x8e0] sm:$0xf0]  ;;  %v13002_v16 = vor.u32 %v15140_v7, %v12999_v49 }
 0x7a5   : > { %v12670_v9 = vor.u32 %v15063_v36, %v12669_v5  ;;  %v12621_v14 = vld [vmem:[%s16329_s11 + $0x888] sm:$0xf]  ;;  %v15020_v13 = vld [vmem:[%s16329_s11 + $0x704] sm:$0xf]  ;;  %v15093_v5 = vld [vmem:[%s16329_s11 + $0xb8c] sm:$0xf] }
 0x7a6   : > { %6788 = vmatpush.bf16.msra.mxu3 %v12230_v60  ;;  %6802 = vmatpush.bf16.msrb.mxu0 %v12614_v22  ;;  %v15176_v60 = vld [vmem:[%s16329_s11 + $0x10c4] sm:$0xf] }
 0x7a7   : > { %6816 = vmatpush.bf16.msrb.mxu1 %v12998_v30  ;;  %6830 = vmatpush.bf16.msra.mxu2 %v12234_v4  ;;  %v13143_v22 = vld [vmem:[%s16329_s11 + $0x1120] sm:$0xf0]  ;;  %v12765_v30 = vld [vmem:[%s16329_s11 + $0xac8] sm:$0xf] }
 0x7a8   : > { %v15087_v4 = vld [vmem:[%s16329_s11 + $0xb24] sm:$0xf0]  ;;  %v13146_v35 = vor.u32 %v15176_v60, %v13143_v22  ;;  %v12570_v60 = vor.u32 %v15032_v47, %v12567_v31  ;;  %v12519_v23 = vld [vmem:[%s16329_s11 + $0x760] sm:$0xf0]  ;;  %v15081_v47 = vld [vmem:[%s16329_s11 + $0xacc] sm:$0xf] }
 0x7a9   : > { %v12766_v6 = vor.u32 %v15087_v4, %v12765_v30  ;;  %v12190_v30 = vor.u32 %v14943_v63, %v12189_v20  ;;  %v12471_v45 = vld [vmem:[%s16329_s11 + $0x6a0] sm:$0xf0]  ;;  %v12767_v31 = vld [vmem:[%s16329_s11 + $0xb28] sm:$0xf0]  ;;  %v13101_v20 = vld [vmem:[%s16329_s11 + $0x1008] sm:$0xf] }
 0x7aa   : > { %6789 = vmatpush.bf16.msra.mxu3 %v12182_v50  ;;  %6803 = vmatpush.bf16.msrb.mxu0 %v12566_v33  ;;  %v15164_v50 = vld [vmem:[%s16329_s11 + $0x1004] sm:$0xf]  ;;  %v15171_v63 = vld [vmem:[%s16329_s11 + $0x1064] sm:$0xf0] }
 0x7ab   : > { %6817 = vmatpush.bf16.msrb.mxu1 %v12950_v39  ;;  %6831 = vmatpush.bf16.msra.mxu2 %v12186_v62  ;;  %v13095_v33 = vld [vmem:[%s16329_s11 + $0x1060] sm:$0xf0]  ;;  %v12717_v39 = vld [vmem:[%s16329_s11 + $0xa08] sm:$0xf] }
 0x7ac   : > { %v15075_v62 = vld [vmem:[%s16329_s11 + $0xa64] sm:$0xf0]  ;;  %v13098_v43 = vor.u32 %v15164_v50, %v13095_v33  ;;  %v15008_v50 = vld [vmem:[%s16329_s11 + $0x644] sm:$0xf]  ;;  %v12522_v33 = vor.u32 %v15020_v13, %v12519_v23  ;;  %v15069_v13 = vld [vmem:[%s16329_s11 + $0xa0c] sm:$0xf] }
 0x7ad   : > { %v12718_v51 = vor.u32 %v15075_v62, %v12717_v39  ;;  %v15104_v39 = vld [vmem:[%s16329_s11 + $0xc44] sm:$0xf]  ;;  %v12474_v36 = vor.u32 %v15008_v50, %v12471_v45  ;;  %v12719_v23 = vld [vmem:[%s16329_s11 + $0xa68] sm:$0xf0] }
 0x7ae   : > { %6790 = vmatpush.bf16.msra.mxu3 %v12134_v58  ;;  %6804 = vmatpush.bf16.msrb.mxu0 %v12518_v56  ;;  %v13047_v58 = vld [vmem:[%s16329_s11 + $0xfa0] sm:$0xf0]  ;;  %v12285_v56 = vld [vmem:[%s16329_s11 + $0x348] sm:$0xf]  ;;  %v14961_v50 = vld [vmem:[%s16329_s11 + $0x34c] sm:$0xf] }
 0x7af   : > { %6818 = vmatpush.bf16.msrb.mxu1 %v12902_v1  ;;  %6832 = vmatpush.bf16.msra.mxu2 %v12138_v41  ;;  %v12666_v1 = vor.u32 %v15056_v40, %v12663_v8  ;;  %v13050_v41 = vor.u32 %v15152_v54, %v13047_v58  ;;  %v12286_v48 = vor.u32 %v14967_v0, %v12285_v56  ;;  %v12855_v62 = vld [vmem:[%s16329_s11 + $0xca0] sm:$0xf0]  ;;  %v12093_v40 = vld [vmem:[%s16329_s11 + $0x48] sm:$0xf]  ;;  %v14997_v56 = vld [vmem:[%s16329_s11 + $0x58c] sm:$0xf] }
 0x7b0   : > { %v14919_v8 = vld [vmem:[%s16329_s11 + $0xa4] sm:$0xf0]  ;;  %v12431_v0 = vld [vmem:[%s16329_s11 + $0x5e8] sm:$0xf0] }
 0x7b1   : > { %v13197_v54 = vld [vmem:[%s16329_s11 + $0x1188] sm:$0xf]  ;;  %v12434_v49 = vor.u32 %v14997_v56, %v12431_v0  ;;  %v12671_v45 = vld [vmem:[%s16329_s11 + $0x9a8] sm:$0xf0] }
 0x7b2   : > { %6791 = vmatpush.bf16.msra.mxu3 %v12086_v34  ;;  %6805 = vmatpush.bf16.msrb.mxu0 %v12470_v3  ;;  %v15051_v34 = vld [vmem:[%s16329_s11 + $0x8e4] sm:$0xf0]  ;;  %v12618_v3 = vor.u32 %v15044_v2, %v12615_v59  ;;  %v15189_v2 = vld [vmem:[%s16329_s11 + $0x118c] sm:$0xf] }
 0x7b3   : > { %6819 = vmatpush.bf16.msrb.mxu1 %v12854_v24  ;;  %6833 = vmatpush.bf16.msra.mxu2 %v12090_v52  ;;  %v12238_v24 = vor.u32 %v14955_v15, %v12237_v32  ;;  %v12622_v52 = vor.u32 %v15051_v34, %v12621_v14  ;;  %v15195_v58 = vld [vmem:[%s16329_s11 + $0x11e4] sm:$0xf0]  ;;  %v13199_v59 = vld [vmem:[%s16329_s11 + $0x11e8] sm:$0xf0] }
 0x7b4   : > { %v13198_v7 = vor.u32 %v15195_v58, %v13197_v54  ;;  %v13149_v32 = vld [vmem:[%s16329_s11 + $0x10c8] sm:$0xf]  ;;  %v13202_v34 = vor.u32 %v15189_v2, %v13199_v59  ;;  %v14949_v54 = vld [vmem:[%s16329_s11 + $0x28c] sm:$0xf] }
 0x7b5   : > { %6792 = vmatmul.bf16.vlgmr.msra.gmra.mxu3 %v17503_v12  ;;  %6806 = vmatmul.bf16.vlgmr.msrb.gmra.mxu0 %v17505_v57  ;;  %v15183_v15 = vld [vmem:[%s16329_s11 + $0x1124] sm:$0xf0]  ;;  %v12239_v58 = vld [vmem:[%s16329_s11 + $0x2e8] sm:$0xf0] }
 0x7b6   : > { %6840 = vmatpush.bf16.msrb.mxu3 %v12810_v17  ;;  %6854 = vmatpush.bf16.msra.mxu0 %v13194_v10  ;;  %v15128_v17 = vld [vmem:[%s16329_s11 + $0xdc4] sm:$0xf]  ;;  %v15045_v56 = vld [vmem:[%s16329_s11 + $0x88c] sm:$0xf]  ;;  %v12957_v2 = vld [vmem:[%s16329_s11 + $0xdc8] sm:$0xf] }
 0x7b7   : > { %6868 = vmatpush.bf16.msra.mxu1 %v12430_v18  ;;  %6882 = vmatpush.bf16.msrb.mxu2 %v12814_v11  ;;  %v12951_v10 = vld [vmem:[%s16329_s11 + $0xe20] sm:$0xf0]  ;;  %v12573_v18 = vld [vmem:[%s16329_s11 + $0x7c8] sm:$0xf]  ;;  %v12623_v0 = vld [vmem:[%s16329_s11 + $0x8e8] sm:$0xf0] }
 0x7b8   : > { %6820 = vmatmul.bf16.vlgmr.msrb.gmra.mxu1 %v17507_v53  ;;  %6834 = vmatmul.bf16.vlgmr.msra.gmra.mxu2 %v17503_v12  ;;  %v15039_v11 = vld [vmem:[%s16329_s11 + $0x824] sm:$0xf0]  ;;  %v12954_v22 = vor.u32 %v15128_v17, %v12951_v10  ;;  %v13150_v17 = vor.u32 %v15183_v15, %v13149_v32  ;;  %v15033_v32 = vld [vmem:[%s16329_s11 + $0x7cc] sm:$0xf] }
 0x7b9   : > { %v12574_v4 = vor.u32 %v15039_v11, %v12573_v18  ;;  %v12770_v18 = vor.u32 %v15081_v47, %v12767_v31  ;;  %v15135_v59 = vld [vmem:[%s16329_s11 + $0xe24] sm:$0xf0]  ;;  %v12575_v15 = vld [vmem:[%s16329_s11 + $0x828] sm:$0xf0] }
 0x7ba   : > { %6841 = vmatpush.bf16.msrb.mxu3 %v12762_v27  ;;  %6855 = vmatpush.bf16.msra.mxu0 %v13146_v35  ;;  %v15116_v27 = vld [vmem:[%s16329_s11 + $0xd04] sm:$0xf]  ;;  %v12909_v47 = vld [vmem:[%s16329_s11 + $0xd08] sm:$0xf] }
 0x7bb   : > { %6869 = vmatpush.bf16.msra.mxu1 %v12382_v55  ;;  %6883 = vmatpush.bf16.msrb.mxu2 %v12766_v6  ;;  %v12903_v35 = vld [vmem:[%s16329_s11 + $0xd60] sm:$0xf0]  ;;  %v12525_v55 = vld [vmem:[%s16329_s11 + $0x708] sm:$0xf] }
 0x7bc   : > { %v15027_v6 = vld [vmem:[%s16329_s11 + $0x764] sm:$0xf0]  ;;  %v12906_v19 = vor.u32 %v15116_v27, %v12903_v35  ;;  %v13102_v27 = vor.u32 %v15171_v63, %v13101_v20  ;;  %v15021_v20 = vld [vmem:[%s16329_s11 + $0x70c] sm:$0xf] }
 0x7bd   : > { %v15123_v31 = vld [vmem:[%s16329_s11 + $0xd64] sm:$0xf0]  ;;  %v12527_v63 = vld [vmem:[%s16329_s11 + $0x768] sm:$0xf0] }
 0x7be   : > { %6842 = vmatpush.bf16.msrb.mxu3 %v12714_v29  ;;  %6856 = vmatpush.bf16.msra.mxu0 %v13098_v43  ;;  %v12142_v29 = vor.u32 %v14931_v38, %v12141_v37  ;;  %v12526_v43 = vor.u32 %v15027_v6, %v12525_v55  ;;  %v13053_v37 = vld [vmem:[%s16329_s11 + $0xf48] sm:$0xf]  ;;  %v12722_v55 = vor.u32 %v15069_v13, %v12719_v23 }
 0x7bf   : > { %6870 = vmatpush.bf16.msra.mxu1 %v12334_v46  ;;  %6884 = vmatpush.bf16.msrb.mxu2 %v12718_v51  ;;  %v12477_v46 = vld [vmem:[%s16329_s11 + $0x648] sm:$0xf] }
 0x7c0   : > { %v15015_v51 = vld [vmem:[%s16329_s11 + $0x6a4] sm:$0xf0] }
 0x7c1   : > { %v15159_v38 = vld [vmem:[%s16329_s11 + $0xfa4] sm:$0xf0] }
 0x7c2   : > { %6843 = vmatpush.bf16.msrb.mxu3 %v12666_v1  ;;  %6857 = vmatpush.bf16.msra.mxu0 %v13050_v41  ;;  %v12858_v1 = vor.u32 %v15104_v39, %v12855_v62  ;;  %v12815_v41 = vld [vmem:[%s16329_s11 + $0xbe8] sm:$0xf0]  ;;  %v15111_v23 = vld [vmem:[%s16329_s11 + $0xca4] sm:$0xf0] }
 0x7c3   : > { %6871 = vmatpush.bf16.msra.mxu1 %v12286_v48  ;;  %6885 = vmatpush.bf16.msrb.mxu2 %v12670_v9  ;;  %v12094_v48 = vor.u32 %v14919_v8, %v12093_v40  ;;  %v12478_v9 = vor.u32 %v15015_v51, %v12477_v46  ;;  %v12818_v14 = vor.u32 %v15093_v5, %v12815_v41  ;;  %v15153_v39 = vld [vmem:[%s16329_s11 + $0xf4c] sm:$0xf]  ;;  %v13005_v40 = vld [vmem:[%s16329_s11 + $0xe88] sm:$0xf] }
 0x7c4   : > { %v13055_v62 = vld [vmem:[%s16329_s11 + $0xfa8] sm:$0xf0]  ;;  %v15147_v8 = vld [vmem:[%s16329_s11 + $0xee4] sm:$0xf0]  ;;  %v12242_v41 = vor.u32 %v14949_v54, %v12239_v58 }
 0x7c5   : > { %v13058_v51 = vor.u32 %v15153_v39, %v13055_v62  ;;  %v15141_v5 = vld [vmem:[%s16329_s11 + $0xe8c] sm:$0xf]  ;;  %v13205_v39 = vld [vmem:[%s16329_s11 + $0x1190] sm:$0xf] }
 0x7c6   : > { %6844 = vmatpush.bf16.msrb.mxu3 %v12618_v3  ;;  %6858 = vmatpush.bf16.msra.mxu0 %v13002_v16  ;;  %v14985_v3 = vld [vmem:[%s16329_s11 + $0x4cc] sm:$0xf] }
 0x7c7   : > { %6872 = vmatpush.bf16.msra.mxu1 %v12238_v24  ;;  %6886 = vmatpush.bf16.msrb.mxu2 %v12622_v52  ;;  %v12383_v16 = vld [vmem:[%s16329_s11 + $0x528] sm:$0xf0] }
 0x7c8   : > { %v15177_v24 = vld [vmem:[%s16329_s11 + $0x10cc] sm:$0xf]  ;;  %v12386_v10 = vor.u32 %v14985_v3, %v12383_v16  ;;  %v12958_v3 = vor.u32 %v15135_v59, %v12957_v2  ;;  %v13157_v2 = vld [vmem:[%s16329_s11 + $0x10d0] sm:$0xf] }
 0x7c9   : > { %v13151_v52 = vld [vmem:[%s16329_s11 + $0x1128] sm:$0xf0]  ;;  %v15184_v59 = vld [vmem:[%s16329_s11 + $0x112c] sm:$0xf0] }
 0x7ca   : > { %6845 = vmatpush.bf16.msrb.mxu3 %v12570_v60  ;;  %6859 = vmatpush.bf16.msra.mxu0 %v12954_v22  ;;  %v13154_v11 = vor.u32 %v15177_v24, %v13151_v52  ;;  %v14973_v60 = vld [vmem:[%s16329_s11 + $0x40c] sm:$0xf]  ;;  %v12578_v24 = vor.u32 %v15033_v32, %v12575_v15  ;;  %v12341_v32 = vld [vmem:[%s16329_s11 + $0x410] sm:$0xf] }
 0x7cb   : > { %6873 = vmatpush.bf16.msra.mxu1 %v12190_v30  ;;  %6887 = vmatpush.bf16.msrb.mxu2 %v12574_v4  ;;  %v12335_v22 = vld [vmem:[%s16329_s11 + $0x468] sm:$0xf0]  ;;  %v14980_v15 = vld [vmem:[%s16329_s11 + $0x46c] sm:$0xf0] }
 0x7cc   : > { %v15165_v30 = vld [vmem:[%s16329_s11 + $0x100c] sm:$0xf]  ;;  %v12338_v35 = vor.u32 %v14973_v60, %v12335_v22  ;;  %v12861_v60 = vld [vmem:[%s16329_s11 + $0xc48] sm:$0xf]  ;;  %v12910_v22 = vor.u32 %v15123_v31, %v12909_v47  ;;  %v13109_v47 = vld [vmem:[%s16329_s11 + $0x1010] sm:$0xf] }
 0x7cd   : > { %v13103_v4 = vld [vmem:[%s16329_s11 + $0x1068] sm:$0xf0]  ;;  %v12862_v62 = vor.u32 %v15111_v23, %v12861_v60  ;;  %v15172_v31 = vld [vmem:[%s16329_s11 + $0x106c] sm:$0xf0] }
 0x7ce   : > { %6846 = vmatpush.bf16.msrb.mxu3 %v12522_v33  ;;  %6860 = vmatpush.bf16.msra.mxu0 %v12906_v19  ;;  %v13106_v6 = vor.u32 %v15165_v30, %v13103_v4  ;;  %v12287_v33 = vld [vmem:[%s16329_s11 + $0x3a8] sm:$0xf0]  ;;  %v12677_v60 = vld [vmem:[%s16329_s11 + $0x950] sm:$0xf] }
 0x7cf   : > { %6874 = vmatpush.bf16.msra.mxu1 %v12142_v29  ;;  %6888 = vmatpush.bf16.msrb.mxu2 %v12526_v43  ;;  %v15057_v19 = vld [vmem:[%s16329_s11 + $0x94c] sm:$0xf]  ;;  %v13054_v29 = vor.u32 %v15159_v38, %v13053_v37  ;;  %v12290_v43 = vor.u32 %v14961_v50, %v12287_v33  ;;  %v12437_v50 = vld [vmem:[%s16329_s11 + $0x590] sm:$0xf] }
 0x7d0   : > { %v12674_v46 = vor.u32 %v15057_v19, %v12671_v45  ;;  %v14913_v30 = vld [vmem:[%s16329_s11 + $0x4c] sm:$0xf]  ;;  %v15004_v33 = vld [vmem:[%s16329_s11 + $0x5ec] sm:$0xf0] }
 0x7d1   : > { %v12095_v4 = vld [vmem:[%s16329_s11 + $0xa8] sm:$0xf0]  ;;  %v12821_v19 = vld [vmem:[%s16329_s11 + $0xb90] sm:$0xf]  ;;  %v12438_v54 = vor.u32 %v15004_v33, %v12437_v50 }
 0x7d2   : > { %6847 = vmatpush.bf16.msrb.mxu3 %v12474_v36  ;;  %6861 = vmatpush.bf16.msra.mxu0 %v12858_v1  ;;  %v13007_v36 = vld [vmem:[%s16329_s11 + $0xee8] sm:$0xf0]  ;;  %v13006_v1 = vor.u32 %v15147_v8, %v13005_v40  ;;  %v15100_v45 = vld [vmem:[%s16329_s11 + $0xbec] sm:$0xf0]  ;;  %v14998_v40 = vld [vmem:[%s16329_s11 + $0x594] sm:$0xf] }
 0x7d3   : > { %6875 = vmatpush.bf16.msra.mxu1 %v12094_v48  ;;  %6889 = vmatpush.bf16.msrb.mxu2 %v12478_v9  ;;  %v12626_v48 = vor.u32 %v15045_v56, %v12623_v0  ;;  %v13010_v9 = vor.u32 %v15141_v5, %v13007_v36  ;;  %v15009_v37 = vld [vmem:[%s16329_s11 + $0x64c] sm:$0xf]  ;;  %v12439_v8 = vld [vmem:[%s16329_s11 + $0x5f0] sm:$0xf0]  ;;  %v12822_v58 = vor.u32 %v15100_v45, %v12821_v19  ;;  %v12389_v56 = vld [vmem:[%s16329_s11 + $0x4d0] sm:$0xf] }
 0x7d4   : > { %v12479_v38 = vld [vmem:[%s16329_s11 + $0x6a8] sm:$0xf0]  ;;  %v14992_v0 = vld [vmem:[%s16329_s11 + $0x52c] sm:$0xf0]  ;;  %v12442_v36 = vor.u32 %v14998_v40, %v12439_v8 }
 0x7d5   : > { %6848 = vmatmul.bf16.vlgmr.msrb.gmra.mxu3 %v17505_v57  ;;  %6862 = vmatmul.bf16.vlgmr.msra.gmra.mxu0 %v17507_v53  ;;  %v15160_v23 = vld [vmem:[%s16329_s11 + $0xfac] sm:$0xf0] }
 0x7d6   : > { %6896 = vmatpush.bf16.msra.mxu3 %v13198_v7  ;;  %6910 = vmatpush.bf16.msrb.mxu0 %v12434_v49  ;;  %v14937_v7 = vld [vmem:[%s16329_s11 + $0x1cc] sm:$0xf]  ;;  %v12629_v50 = vld [vmem:[%s16329_s11 + $0x890] sm:$0xf] }
 0x7d7   : > { %6924 = vmatpush.bf16.msrb.mxu1 %v12818_v14  ;;  %6938 = vmatpush.bf16.msra.mxu2 %v13202_v34  ;;  %v12191_v49 = vld [vmem:[%s16329_s11 + $0x228] sm:$0xf0]  ;;  %v15052_v33 = vld [vmem:[%s16329_s11 + $0x8ec] sm:$0xf0] }
 0x7d8   : > { %6876 = vmatmul.bf16.vlgmr.msra.gmra.mxu1 %v17503_v12  ;;  %6890 = vmatmul.bf16.vlgmr.msrb.gmra.mxu2 %v17505_v57  ;;  %v15129_v14 = vld [vmem:[%s16329_s11 + $0xdcc] sm:$0xf]  ;;  %v12194_v16 = vor.u32 %v14937_v7, %v12191_v49  ;;  %v12390_v7 = vor.u32 %v14992_v0, %v12389_v56  ;;  %v13013_v19 = vld [vmem:[%s16329_s11 + $0xe90] sm:$0xf] }
 0x7d9   : > { %v12959_v34 = vld [vmem:[%s16329_s11 + $0xe28] sm:$0xf0]  ;;  %v15148_v45 = vld [vmem:[%s16329_s11 + $0xeec] sm:$0xf0] }
 0x7da   : > { %6897 = vmatpush.bf16.msra.mxu3 %v13150_v17  ;;  %6911 = vmatpush.bf16.msrb.mxu0 %v12386_v10  ;;  %v12962_v52 = vor.u32 %v15129_v14, %v12959_v34  ;;  %v14925_v17 = vld [vmem:[%s16329_s11 + $0x10c] sm:$0xf]  ;;  %v13158_v14 = vor.u32 %v15184_v59, %v13157_v2  ;;  %v12197_v40 = vld [vmem:[%s16329_s11 + $0x1d0] sm:$0xf] }
 0x7db   : > { %6925 = vmatpush.bf16.msrb.mxu1 %v12770_v18  ;;  %6939 = vmatpush.bf16.msra.mxu2 %v13154_v11  ;;  %v12143_v10 = vld [vmem:[%s16329_s11 + $0x168] sm:$0xf0]  ;;  %v14944_v8 = vld [vmem:[%s16329_s11 + $0x22c] sm:$0xf0] }
 0x7dc   : > { %v15117_v18 = vld [vmem:[%s16329_s11 + $0xd0c] sm:$0xf]  ;;  %v12146_v13 = vor.u32 %v14925_v17, %v12143_v10  ;;  %v12342_v17 = vor.u32 %v14980_v15, %v12341_v32  ;;  %v12965_v56 = vld [vmem:[%s16329_s11 + $0xdd0] sm:$0xf] }
 0x7dd   : > { %v12911_v11 = vld [vmem:[%s16329_s11 + $0xd68] sm:$0xf0]  ;;  %v12149_v59 = vld [vmem:[%s16329_s11 + $0x110] sm:$0xf] }
 0x7de   : > { %6898 = vmatpush.bf16.msra.mxu3 %v13102_v27  ;;  %6912 = vmatpush.bf16.msrb.mxu0 %v12338_v35  ;;  %v12530_v27 = vor.u32 %v15021_v20, %v12527_v63  ;;  %v12914_v35 = vor.u32 %v15117_v18, %v12911_v11  ;;  %v12293_v20 = vld [vmem:[%s16329_s11 + $0x350] sm:$0xf]  ;;  %v13110_v18 = vor.u32 %v15172_v31, %v13109_v47 }
 0x7df   : > { %6926 = vmatpush.bf16.msrb.mxu1 %v12722_v55  ;;  %6940 = vmatpush.bf16.msra.mxu2 %v13106_v6  ;;  %v15105_v55 = vld [vmem:[%s16329_s11 + $0xc4c] sm:$0xf]  ;;  %v14968_v63 = vld [vmem:[%s16329_s11 + $0x3ac] sm:$0xf0] }
 0x7e0   : > { %v12863_v6 = vld [vmem:[%s16329_s11 + $0xca8] sm:$0xf0]  ;;  %v15028_v32 = vld [vmem:[%s16329_s11 + $0x76c] sm:$0xf0] }
 0x7e1   : > { %v12917_v15 = vld [vmem:[%s16329_s11 + $0xd10] sm:$0xf] }
 0x7e2   : > { %6899 = vmatpush.bf16.msra.mxu3 %v13054_v29  ;;  %6913 = vmatpush.bf16.msrb.mxu0 %v12290_v43  ;;  %v12098_v29 = vor.u32 %v14913_v30, %v12095_v4  ;;  %v15196_v43 = vld [vmem:[%s16329_s11 + $0x11ec] sm:$0xf0]  ;;  %v14962_v30 = vld [vmem:[%s16329_s11 + $0x354] sm:$0xf] }
 0x7e3   : > { %6927 = vmatpush.bf16.msrb.mxu1 %v12674_v46  ;;  %6941 = vmatpush.bf16.msra.mxu2 %v13058_v51  ;;  %v12482_v46 = vor.u32 %v15009_v37, %v12479_v38  ;;  %v12866_v51 = vor.u32 %v15105_v55, %v12863_v6  ;;  %v13206_v5 = vor.u32 %v15196_v43, %v13205_v39  ;;  %v12295_v4 = vld [vmem:[%s16329_s11 + $0x3b0] sm:$0xf0]  ;;  %v12245_v37 = vld [vmem:[%s16329_s11 + $0x290] sm:$0xf] }
 0x7e4   : > { %v14956_v38 = vld [vmem:[%s16329_s11 + $0x2ec] sm:$0xf0]  ;;  %v12298_v6 = vor.u32 %v14962_v30, %v12295_v4  ;;  %v14950_v39 = vld [vmem:[%s16329_s11 + $0x294] sm:$0xf]  ;;  %v12630_v43 = vor.u32 %v15052_v33, %v12629_v50  ;;  %v15005_v50 = vld [vmem:[%s16329_s11 + $0x5f4] sm:$0xf0] }
 0x7e5   : > { %v12101_v47 = vld [vmem:[%s16329_s11 + $0x50] sm:$0xf]  ;;  %v15094_v30 = vld [vmem:[%s16329_s11 + $0xb94] sm:$0xf]  ;;  %v12829_v33 = vld [vmem:[%s16329_s11 + $0xb98] sm:$0xf] }
 0x7e6   : > { %6900 = vmatpush.bf16.msra.mxu3 %v13006_v1  ;;  %6914 = vmatpush.bf16.msrb.mxu0 %v12242_v41  ;;  %v12773_v1 = vld [vmem:[%s16329_s11 + $0xad0] sm:$0xf]  ;;  %v12823_v4 = vld [vmem:[%s16329_s11 + $0xbf0] sm:$0xf0] }
 0x7e7   : > { %6928 = vmatpush.bf16.msrb.mxu1 %v12626_v48  ;;  %6942 = vmatpush.bf16.msra.mxu2 %v13010_v9  ;;  %v15088_v41 = vld [vmem:[%s16329_s11 + $0xb2c] sm:$0xf0]  ;;  %v14986_v48 = vld [vmem:[%s16329_s11 + $0x4d4] sm:$0xf] }
 0x7e8   : > { %v12391_v9 = vld [vmem:[%s16329_s11 + $0x530] sm:$0xf0]  ;;  %v12774_v49 = vor.u32 %v15088_v41, %v12773_v1  ;;  %v12198_v41 = vor.u32 %v14944_v8, %v12197_v40 }
 0x7e9   : > { %v12394_v34 = vor.u32 %v14986_v48, %v12391_v9  ;;  %v12199_v1 = vld [vmem:[%s16329_s11 + $0x230] sm:$0xf0]  ;;  %v14932_v48 = vld [vmem:[%s16329_s11 + $0x16c] sm:$0xf0] }
 0x7ea   : > { %6901 = vmatpush.bf16.msra.mxu3 %v12958_v3  ;;  %6915 = vmatpush.bf16.msrb.mxu0 %v12194_v16  ;;  %v12725_v3 = vld [vmem:[%s16329_s11 + $0xa10] sm:$0xf]  ;;  %v12775_v40 = vld [vmem:[%s16329_s11 + $0xb30] sm:$0xf0] }
 0x7eb   : > { %6929 = vmatpush.bf16.msrb.mxu1 %v12578_v24  ;;  %6943 = vmatpush.bf16.msra.mxu2 %v12962_v52  ;;  %v15076_v16 = vld [vmem:[%s16329_s11 + $0xa6c] sm:$0xf0]  ;;  %v14974_v24 = vld [vmem:[%s16329_s11 + $0x414] sm:$0xf] }
 0x7ec   : > { %v12343_v52 = vld [vmem:[%s16329_s11 + $0x470] sm:$0xf0]  ;;  %v12726_v10 = vor.u32 %v15076_v16, %v12725_v3 }
 0x7ed   : > { %v12346_v11 = vor.u32 %v14974_v24, %v12343_v52  ;;  %v12151_v3 = vld [vmem:[%s16329_s11 + $0x170] sm:$0xf0]  ;;  %v12150_v52 = vor.u32 %v14932_v48, %v12149_v59 }
 0x7ee   : > { %6902 = vmatpush.bf16.msra.mxu3 %v12910_v22  ;;  %6916 = vmatpush.bf16.msrb.mxu0 %v12146_v13  ;;  %v15064_v22 = vld [vmem:[%s16329_s11 + $0x9ac] sm:$0xf0] }
 0x7ef   : > { %6930 = vmatpush.bf16.msrb.mxu1 %v12530_v27  ;;  %6944 = vmatpush.bf16.msra.mxu2 %v12914_v35  ;;  %v13061_v13 = vld [vmem:[%s16329_s11 + $0xf50] sm:$0xf]  ;;  %v12294_v27 = vor.u32 %v14968_v63, %v12293_v20  ;;  %v12678_v35 = vor.u32 %v15064_v22, %v12677_v60 }
 0x7f0   : > { %v13062_v55 = vor.u32 %v15160_v23, %v13061_v13  ;;  %v12485_v20 = vld [vmem:[%s16329_s11 + $0x650] sm:$0xf]  ;;  %v14914_v13 = vld [vmem:[%s16329_s11 + $0x54] sm:$0xf] }
 0x7f1   : > { %v17826_v0 = vpop.f32.mrf.mxu0  ;;  %v15016_v63 = vld [vmem:[%s16329_s11 + $0x6ac] sm:$0xf0]  ;;  %v12103_v23 = vld [vmem:[%s16329_s11 + $0xb0] sm:$0xf0] }
 0x7f2   : > { %6903 = vmatpush.bf16.msra.mxu3 %v12862_v62  ;;  %6917 = vmatpush.bf16.msrb.mxu0 %v12098_v29  ;;  %v12247_v62 = vld [vmem:[%s16329_s11 + $0x2f0] sm:$0xf0]  ;;  %v12246_v29 = vor.u32 %v14956_v38, %v12245_v37  ;;  %v17842_v31 = vpop.f32.mrf.mxu1  ;;  %v12869_v60 = vld [vmem:[%s16329_s11 + $0xc50] sm:$0xf]  ;;  %v12445_v37 = vld [vmem:[%s16329_s11 + $0x598] sm:$0xf] }
 0x7f3   : > { %6931 = vmatpush.bf16.msrb.mxu1 %v12482_v46  ;;  %6945 = vmatpush.bf16.msra.mxu2 %v12866_v51  ;;  %v13014_v46 = vor.u32 %v15148_v45, %v13013_v19  ;;  %v12250_v51 = vor.u32 %v14950_v39, %v12247_v62  ;;  %v15112_v22 = vld [vmem:[%s16329_s11 + $0xcac] sm:$0xf0]  ;;  %v15101_v19 = vld [vmem:[%s16329_s11 + $0xbf4] sm:$0xf0]  ;;  %v12106_v39 = vor.u32 %v14914_v13, %v12103_v23  ;;  %v15154_v23 = vld [vmem:[%s16329_s11 + $0xf54] sm:$0xf] }
 0x7f4   : > { %v12870_v45 = vor.u32 %v15112_v22, %v12869_v60  ;;  %v12826_v62 = vor.u32 %v15094_v30, %v12823_v4  ;;  %v12446_v8 = vor.u32 %v15005_v50, %v12445_v37  ;;  %v12679_v60 = vld [vmem:[%s16329_s11 + $0x9b0] sm:$0xf0]  ;;  %v12301_v4 = vld [vmem:[%s16329_s11 + $0x358] sm:$0xf] }
 0x7f5   : > { %6904 = vmatmul.bf16.vlgmr.msra.gmra.mxu3 %v17507_v53  ;;  %6918 = vmatmul.bf16.vlgmr.msrb.gmra.mxu0 %v17503_v12  ;;  %v13063_v30 = vld [vmem:[%s16329_s11 + $0xfb0] sm:$0xf0]  ;;  %v15065_v37 = vld [vmem:[%s16329_s11 + $0x9b4] sm:$0xf0] }
 0x7f6   : > { %6952 = vmatpush.bf16.msrb.mxu3 %v12438_v54  ;;  %6966 = vmatpush.bf16.msra.mxu0 %v12822_v58  ;;  %v12581_v54 = vld [vmem:[%s16329_s11 + $0x7d0] sm:$0xf]  ;;  %v13066_v50 = vor.u32 %v15154_v23, %v13063_v30  ;;  %v12157_v23 = vld [vmem:[%s16329_s11 + $0x118] sm:$0xf] }
 0x7f7   : > { %6980 = vmatpush.bf16.msra.mxu1 %v13206_v5  ;;  %6994 = vmatpush.bf16.msrb.mxu2 %v12442_v36  ;;  %v15040_v58 = vld [vmem:[%s16329_s11 + $0x82c] sm:$0xf0]  ;;  %v14938_v36 = vld [vmem:[%s16329_s11 + $0x1d4] sm:$0xf]  ;;  %v17839_v16 = vpop.f32.mrf.mxu3  ;;  %v12541_v30 = vld [vmem:[%s16329_s11 + $0x718] sm:$0xf] }
 0x7f8   : > { %6932 = vmatmul.bf16.vlgmr.msrb.gmra.mxu1 %v17505_v57  ;;  %6946 = vmatmul.bf16.vlgmr.msra.gmra.mxu2 %v17507_v53  ;;  %v15136_v5 = vld [vmem:[%s16329_s11 + $0xe2c] sm:$0xf0]  ;;  %v12582_v2 = vor.u32 %v15040_v58, %v12581_v54  ;;  %v17844_v24 = vpop.f32.mrf.mxu2  ;;  %v13159_v54 = vld [vmem:[%s16329_s11 + $0x1130] sm:$0xf0]  ;;  %v12397_v58 = vld [vmem:[%s16329_s11 + $0x4d8] sm:$0xf] }
 0x7f9   : > { %v12966_v9 = vor.u32 %v15136_v5, %v12965_v56  ;;  %v17858_v38 = vpop.f32.mrf.mxu0  ;;  %v14993_v56 = vld [vmem:[%s16329_s11 + $0x534] sm:$0xf0] }
 0x7fa   : > { %6953 = vmatpush.bf16.msrb.mxu3 %v12390_v7  ;;  %6967 = vmatpush.bf16.msra.mxu0 %v12774_v49  ;;  %v12202_v7 = vor.u32 %v14938_v36, %v12199_v1  ;;  %v12533_v49 = vld [vmem:[%s16329_s11 + $0x710] sm:$0xf]  ;;  %v12781_v5 = vld [vmem:[%s16329_s11 + $0xad8] sm:$0xf] }
 0x7fb   : > { %6981 = vmatpush.bf16.msra.mxu1 %v13158_v14  ;;  %6995 = vmatpush.bf16.msrb.mxu2 %v12394_v34  ;;  %v15124_v14 = vld [vmem:[%s16329_s11 + $0xd6c] sm:$0xf0]  ;;  %v14926_v34 = vld [vmem:[%s16329_s11 + $0x114] sm:$0xf]  ;;  %v15089_v36 = vld [vmem:[%s16329_s11 + $0xb34] sm:$0xf0] }
 0x7fe   : > { %6954 = vmatpush.bf16.msrb.mxu3 %v12342_v17  ;;  %6968 = vmatpush.bf16.msra.mxu0 %v12726_v10  ;;  %v12534_v17 = vor.u32 %v15028_v32, %v12533_v49  ;;  %v14920_v10 = vld [vmem:[%s16329_s11 + $0xac] sm:$0xf0]  ;;  %v12727_v49 = vld [vmem:[%s16329_s11 + $0xa70] sm:$0xf0]  ;;  %v12398_v32 = vor.u32 %v14993_v56, %v12397_v58 }
 0x7ff   : > { %6982 = vmatpush.bf16.msra.mxu1 %v13110_v18  ;;  %6996 = vmatpush.bf16.msrb.mxu2 %v12346_v11  ;;  %v12918_v18 = vor.u32 %v15124_v14, %v12917_v15  ;;  %v12154_v11 = vor.u32 %v14926_v34, %v12151_v3  ;;  %v17871_v1 = vpop.f32.mrf.mxu3  ;;  %v12782_v15 = vor.u32 %v15089_v36, %v12781_v5  ;;  %v15166_v14 = vld [vmem:[%s16329_s11 + $0x1014] sm:$0xf]  ;;  %v12349_v3 = vld [vmem:[%s16329_s11 + $0x418] sm:$0xf] }
 0x800   : > { %v17878_v59 = vpop.f32.mrf.mxu2  ;;  %v13111_v34 = vld [vmem:[%s16329_s11 + $0x1070] sm:$0xf0] }
 0x801   : > { %v15034_v36 = vld [vmem:[%s16329_s11 + $0x7d4] sm:$0xf] }
 0x802   : > { %6955 = vmatpush.bf16.msrb.mxu3 %v12294_v27  ;;  %6969 = vmatpush.bf16.msra.mxu0 %v12678_v35  ;;  %v15190_v27 = vld [vmem:[%s16329_s11 + $0x1194] sm:$0xf] }
 0x803   : > { %6983 = vmatpush.bf16.msra.mxu1 %v13062_v55  ;;  %6997 = vmatpush.bf16.msrb.mxu2 %v12298_v6  ;;  %v13207_v35 = vld [vmem:[%s16329_s11 + $0x11f0] sm:$0xf0]  ;;  %v12102_v55 = vor.u32 %v14920_v10, %v12101_v47  ;;  %v12486_v6 = vor.u32 %v15016_v63, %v12485_v20  ;;  %v14981_v47 = vld [vmem:[%s16329_s11 + $0x474] sm:$0xf0]  ;;  %v17893_v20 = vpop.f32.mrf.mxu0 }
 0x804   : > { %v12350_v22 = vor.u32 %v14981_v47, %v12349_v3  ;;  %v15041_v3 = vld [vmem:[%s16329_s11 + $0x834] sm:$0xf0] }
 0x806   : > { %6956 = vmatpush.bf16.msrb.mxu3 %v12246_v29  ;;  %6970 = vmatpush.bf16.msra.mxu0 %v12630_v43  ;;  %v13210_v29 = vor.u32 %v15190_v27, %v13207_v35  ;;  %v15082_v43 = vld [vmem:[%s16329_s11 + $0xad4] sm:$0xf]  ;;  %v14969_v27 = vld [vmem:[%s16329_s11 + $0x3b4] sm:$0xf0] }
 0x807   : > { %6984 = vmatpush.bf16.msra.mxu1 %v13014_v46  ;;  %6998 = vmatpush.bf16.msrb.mxu2 %v12250_v51  ;;  %v12830_v46 = vor.u32 %v15101_v19, %v12829_v33  ;;  %v15178_v51 = vld [vmem:[%s16329_s11 + $0x10d4] sm:$0xf]  ;;  %v12778_v48 = vor.u32 %v15082_v43, %v12775_v40  ;;  %v12685_v35 = vld [vmem:[%s16329_s11 + $0x958] sm:$0xf] }
 0x808   : > { %v15046_v33 = vld [vmem:[%s16329_s11 + $0x894] sm:$0xf] }
 0x809   : > { %v12631_v19 = vld [vmem:[%s16329_s11 + $0x8f0] sm:$0xf0] }
 0x80a   : > { %6957 = vmatpush.bf16.msrb.mxu3 %v12198_v41  ;;  %6971 = vmatpush.bf16.msra.mxu0 %v12582_v2  ;;  %v17874_v41 = vld [vmem:[%s16327_s3 + $0xc] sm:$0xff]  ;;  %v17876_v2 = vpop.f32.mrf.mxu1  ;;  %v12634_v56 = vor.u32 %v15046_v33, %v12631_v19 }
 0x80b   : > { %6985 = vmatpush.bf16.msra.mxu1 %v12966_v9  ;;  %6999 = vmatpush.bf16.msrb.mxu2 %v12202_v7  ;;  %v13162_v9 = vor.u32 %v15178_v51, %v13159_v54  ;;  %v15070_v7 = vld [vmem:[%s16329_s11 + $0xa14] sm:$0xf]  ;;  %v5152_v10 = vperm.slane %v17874_v41, 0  ;;  %v12637_v51 = vld [vmem:[%s16329_s11 + $0x898] sm:$0xf] }
 0x80c   : > { %v12730_v63 = vor.u32 %v15070_v7, %v12727_v49  ;;  %v13015_v43 = vld [vmem:[%s16329_s11 + $0xef0] sm:$0xf0]  ;;  %v15053_v54 = vld [vmem:[%s16329_s11 + $0x8f4] sm:$0xf0] }
 0x80d   : > { %v12638_v7 = vor.u32 %v15053_v54, %v12637_v51  ;;  %v15130_v49 = vld [vmem:[%s16329_s11 + $0xdd4] sm:$0xf]  ;;  %v14921_v51 = vld [vmem:[%s16329_s11 + $0xb4] sm:$0xf0] }
 0x80e   : > { %6958 = vmatpush.bf16.msrb.mxu3 %v12150_v52  ;;  %6972 = vmatpush.bf16.msra.mxu0 %v12534_v17  ;;  %v12733_v52 = vld [vmem:[%s16329_s11 + $0xa18] sm:$0xf] }
 0x80f   : > { %6986 = vmatpush.bf16.msra.mxu1 %v12918_v18  ;;  %7000 = vmatpush.bf16.msrb.mxu2 %v12154_v11  ;;  %v15077_v17 = vld [vmem:[%s16329_s11 + $0xa74] sm:$0xf0]  ;;  %v13114_v18 = vor.u32 %v15166_v14, %v13111_v34  ;;  %v15058_v11 = vld [vmem:[%s16329_s11 + $0x954] sm:$0xf]  ;;  %v17926_v14 = vpop.f32.mrf.mxu0 }
 0x810   : > { %v12734_v13 = vor.u32 %v15077_v17, %v12733_v52  ;;  %v12589_v34 = vld [vmem:[%s16329_s11 + $0x7d8] sm:$0xf] }
 0x811   : > { %v12493_v54 = vld [vmem:[%s16329_s11 + $0x658] sm:$0xf] }
 0x812   : > { %6959 = vmatpush.bf16.msrb.mxu3 %v12102_v55  ;;  %6973 = vmatpush.bf16.msra.mxu0 %v12486_v6  ;;  %v6626_v55 = vadd.f32 %v17839_v16, %v5152_v10  ;;  %v12682_v6 = vor.u32 %v15058_v11, %v12679_v60  ;;  %v12253_v16 = vld [vmem:[%s16329_s11 + $0x298] sm:$0xf]  ;;  %v17913_v40 = vpop.f32.mrf.mxu1  ;;  %v12590_v60 = vor.u32 %v15041_v3, %v12589_v34  ;;  %v15191_v34 = vld [vmem:[%s16329_s11 + $0x119c] sm:$0xf] }
 0x813   : > { %6987 = vmatpush.bf16.msra.mxu1 %v12870_v45  ;;  %7001 = vmatpush.bf16.msrb.mxu2 %v12106_v39  ;;  %v17908_v45 = vpop.f32.mrf.mxu3  ;;  %v12302_v39 = vor.u32 %v14969_v27, %v12301_v4  ;;  %v15029_v4 = vld [vmem:[%s16329_s11 + $0x774] sm:$0xf0]  ;;  %v13215_v3 = vld [vmem:[%s16329_s11 + $0x11f8] sm:$0xf0] }
 0x814   : > { %v6640_v58 = vadd.f32 %v17826_v0, %v6626_v55  ;;  %v14945_v0 = vld [vmem:[%s16329_s11 + $0x234] sm:$0xf0]  ;;  %v15010_v55 = vld [vmem:[%s16329_s11 + $0x654] sm:$0xf] }
 0x815   : > { %6960 = vmatmul.bf16.vlgmr.msrb.gmra.mxu3 %v17503_v12  ;;  %6974 = vmatmul.bf16.vlgmr.msra.gmra.mxu0 %v17505_v57 }
 0x816   : > { %7008 = vmatpush.bf16.msra.mxu3 %v12826_v62  ;;  %7022 = vmatpush.bf16.msrb.mxu0 %v13210_v29  ;;  %v12686_v62 = vor.u32 %v15065_v37, %v12685_v35  ;;  %v15142_v29 = vld [vmem:[%s16329_s11 + $0xe94] sm:$0xf]  ;;  %v17932_v47 = vadd.f32 %v17842_v31, %v6640_v58  ;;  %v14933_v31 = vld [vmem:[%s16329_s11 + $0x174] sm:$0xf0]  ;;  %v5153_v35 = vperm.slane %v17874_v41, 1  ;;  %v6628_v58 = vadd.f32 %v17871_v1, %v5152_v10 }
 0x817   : > { %7036 = vmatpush.bf16.msrb.mxu1 %v12446_v8  ;;  %7050 = vmatpush.bf16.msra.mxu2 %v12830_v46  ;;  %v17915_v8 = vpop.f32.mrf.mxu2  ;;  %v14957_v46 = vld [vmem:[%s16329_s11 + $0x2f4] sm:$0xf0]  ;;  %v13018_v5 = vor.u32 %v15142_v29, %v13015_v43  ;;  %v12871_v29 = vld [vmem:[%s16329_s11 + $0xcb0] sm:$0xf0]  ;;  %v12158_v43 = vor.u32 %v14933_v31, %v12157_v23  ;;  %v13218_v23 = vor.u32 %v15191_v34, %v13215_v3  ;;  %v14987_v31 = vld [vmem:[%s16329_s11 + $0x4dc] sm:$0xf] }
 0x818   : > { %6988 = vmatmul.bf16.vlgmr.msra.gmra.mxu1 %v17507_v53  ;;  %7002 = vmatmul.bf16.vlgmr.msrb.gmra.mxu2 %v17503_v12  ;;  %v7144_v27 = vmul.f32 0.044715, %v17932_v47  ;;  %v13069_v3 = vld [vmem:[%s16329_s11 + $0xf58] sm:$0xf] }
 0x81a   : > { %7009 = vmatpush.bf16.msra.mxu3 %v12778_v48  ;;  %7023 = vmatpush.bf16.msrb.mxu0 %v13162_v9  ;;  %v12583_v48 = vld [vmem:[%s16329_s11 + $0x830] sm:$0xf0]  ;;  %v12254_v9 = vor.u32 %v14957_v46, %v12253_v16  ;;  %v12542_v16 = vor.u32 %v15029_v4, %v12541_v30  ;;  %v12109_v46 = vld [vmem:[%s16329_s11 + $0x58] sm:$0xf]  ;;  %v12399_v30 = vld [vmem:[%s16329_s11 + $0x538] sm:$0xf0] }
 0x81b   : > { %7037 = vmatpush.bf16.msrb.mxu1 %v12398_v32  ;;  %7051 = vmatpush.bf16.msra.mxu2 %v12782_v15  ;;  %v12967_v32 = vld [vmem:[%s16329_s11 + $0xe30] sm:$0xf0]  ;;  %v12205_v15 = vld [vmem:[%s16329_s11 + $0x1d8] sm:$0xf]  ;;  %v12586_v52 = vor.u32 %v15034_v36, %v12583_v48  ;;  %v17944_v37 = vpop.f32.mrf.mxu3  ;;  %v6668_v48 = vadd.f32 %v17844_v24, %v5153_v35  ;;  %v15083_v4 = vld [vmem:[%s16329_s11 + $0xadc] sm:$0xf] }
 0x81c   : > { %v12970_v17 = vor.u32 %v15130_v49, %v12967_v32  ;;  %v12206_v11 = vor.u32 %v14945_v0, %v12205_v15  ;;  %v15197_v36 = vld [vmem:[%s16329_s11 + $0x11f4] sm:$0xf0]  ;;  %v15095_v49 = vld [vmem:[%s16329_s11 + $0xb9c] sm:$0xf]  ;;  %v7168_v32 = vmul.f32 %v7144_v27, %v17932_v47  ;;  %v17970_v15 = vpop.f32.mrf.mxu0 }
 0x81d   : > { %v12831_v0 = vld [vmem:[%s16329_s11 + $0xbf8] sm:$0xf0]  ;;  %v6682_v24 = vadd.f32 %v17908_v45, %v6668_v48 }
 0x81e   : > { %7010 = vmatpush.bf16.msra.mxu3 %v12730_v63  ;;  %7024 = vmatpush.bf16.msrb.mxu0 %v13114_v18  ;;  %v15022_v63 = vld [vmem:[%s16329_s11 + $0x714] sm:$0xf]  ;;  %v12783_v45 = vld [vmem:[%s16329_s11 + $0xb38] sm:$0xf0] }
 0x81f   : > { %7038 = vmatpush.bf16.msrb.mxu1 %v12350_v22  ;;  %7052 = vmatpush.bf16.msra.mxu2 %v12734_v13  ;;  %v12535_v18 = vld [vmem:[%s16329_s11 + $0x770] sm:$0xf0]  ;;  %v15179_v27 = vld [vmem:[%s16329_s11 + $0x10dc] sm:$0xf] }
 0x820   : > { %v15118_v22 = vld [vmem:[%s16329_s11 + $0xd14] sm:$0xf]  ;;  %v12538_v33 = vor.u32 %v15022_v63, %v12535_v18  ;;  %v6642_v63 = vadd.f32 %v17858_v38, %v6628_v58  ;;  %v5154_v38 = vperm.slane %v17874_v41, 2  ;;  %v12786_v58 = vor.u32 %v15083_v4, %v12783_v45  ;;  %v15071_v48 = vld [vmem:[%s16329_s11 + $0xa1c] sm:$0xf] }
 0x821   : > { %v12919_v13 = vld [vmem:[%s16329_s11 + $0xd70] sm:$0xf0] }
 0x822   : > { %7011 = vmatpush.bf16.msra.mxu3 %v12682_v6  ;;  %7025 = vmatpush.bf16.msrb.mxu0 %v13066_v50  ;;  %v17947_v6 = vpop.f32.mrf.mxu1  ;;  %v17949_v50 = vpop.f32.mrf.mxu2  ;;  %v12922_v19 = vor.u32 %v15118_v22, %v12919_v13  ;;  %v15185_v22 = vld [vmem:[%s16329_s11 + $0x1134] sm:$0xf0]  ;;  %v12834_v13 = vor.u32 %v15095_v49, %v12831_v0  ;;  %v13119_v49 = vld [vmem:[%s16329_s11 + $0x1078] sm:$0xf0] }
 0x823   : > { %7039 = vmatpush.bf16.msrb.mxu1 %v12302_v39  ;;  %7053 = vmatpush.bf16.msra.mxu2 %v12686_v62  ;;  %v12487_v39 = vld [vmem:[%s16329_s11 + $0x6b0] sm:$0xf0] }
 0x824   : > { %v15106_v62 = vld [vmem:[%s16329_s11 + $0xc54] sm:$0xf]  ;;  %v12490_v1 = vor.u32 %v15010_v55, %v12487_v39  ;;  %v13167_v55 = vld [vmem:[%s16329_s11 + $0x1138] sm:$0xf0]  ;;  %v6737_v39 = vpop.f32.mrf.mxu3  ;;  %v6753_v34 = vpop.f32.mrf.mxu0 }
 0x825   : > { %v12874_v10 = vor.u32 %v15106_v62, %v12871_v29  ;;  %v17991_v62 = vadd.f32 %v17876_v2, %v6642_v63  ;;  %v5155_v29 = vperm.slane %v17874_v41, 3  ;;  %v6670_v2 = vadd.f32 %v17878_v59, %v5153_v35 }
 0x826   : > { %7012 = vmatpush.bf16.msra.mxu3 %v12634_v56  ;;  %7026 = vmatpush.bf16.msrb.mxu0 %v13018_v5  ;;  %v15017_v56 = vld [vmem:[%s16329_s11 + $0x6b4] sm:$0xf0] }
 0x827   : > { %7040 = vmatpush.bf16.msrb.mxu1 %v12254_v9  ;;  %7054 = vmatpush.bf16.msra.mxu2 %v12638_v7  ;;  %v13213_v5 = vld [vmem:[%s16329_s11 + $0x1198] sm:$0xf]  ;;  %v14999_v9 = vld [vmem:[%s16329_s11 + $0x59c] sm:$0xf]  ;;  %v6684_v35 = vadd.f32 %v17944_v37, %v6670_v2  ;;  %v7156_v0 = vmul.f32 0.044715, %v17991_v62  ;;  %v6754_v4 = vadd.f32 %v6753_v34, %v5155_v29 }
 0x828   : > { %v12447_v7 = vld [vmem:[%s16329_s11 + $0x5f8] sm:$0xf0]  ;;  %v13214_v18 = vor.u32 %v15197_v36, %v13213_v5 }
 0x829   : > { %v14975_v5 = vld [vmem:[%s16329_s11 + $0x41c] sm:$0xf] }
 0x82a   : > { %7013 = vmatpush.bf16.msra.mxu3 %v12586_v52  ;;  %7027 = vmatpush.bf16.msrb.mxu0 %v12970_v17  ;;  %v12110_v52 = vor.u32 %v14921_v51, %v12109_v46  ;;  %v12494_v17 = vor.u32 %v15017_v56, %v12493_v54  ;;  %v12402_v46 = vor.u32 %v14987_v31, %v12399_v30  ;;  %v13117_v51 = vld [vmem:[%s16329_s11 + $0x1018] sm:$0xf]  ;;  %v12351_v36 = vld [vmem:[%s16329_s11 + $0x478] sm:$0xf0] }
 0x82b   : > { %7041 = vmatpush.bf16.msrb.mxu1 %v12206_v11  ;;  %7055 = vmatpush.bf16.msra.mxu2 %v12590_v60  ;;  %v12450_v11 = vor.u32 %v14999_v9, %v12447_v7  ;;  %v13165_v60 = vld [vmem:[%s16329_s11 + $0x10d8] sm:$0xf]  ;;  %v13170_v56 = vor.u32 %v15179_v27, %v13167_v55  ;;  %v12735_v9 = vld [vmem:[%s16329_s11 + $0xa78] sm:$0xf0]  ;;  %v12354_v37 = vor.u32 %v14975_v5, %v12351_v36 }
 0x82c   : > { %v15173_v54 = vld [vmem:[%s16329_s11 + $0x1074] sm:$0xf0]  ;;  %v15167_v7 = vld [vmem:[%s16329_s11 + $0x101c] sm:$0xf]  ;;  %v6712_v30 = vadd.f32 %v17947_v6, %v5154_v38 }
 0x82d   : > { %v13122_v63 = vor.u32 %v15167_v7, %v13119_v49  ;;  %v12639_v5 = vld [vmem:[%s16329_s11 + $0x8f8] sm:$0xf0] }
 0x82e   : > { %7014 = vmatpush.bf16.msra.mxu3 %v12538_v33  ;;  %7028 = vmatpush.bf16.msrb.mxu0 %v12922_v19  ;;  %v7192_v33 = vmul.f32 %v7168_v32, %v17932_v47  ;;  %v17988_v19 = vadd.f32 %v17893_v20, %v6682_v24  ;;  %v13166_v20 = vor.u32 %v15185_v22, %v13165_v60  ;;  %v15161_v24 = vld [vmem:[%s16329_s11 + $0xfb4] sm:$0xf0]  ;;  %v12687_v22 = vld [vmem:[%s16329_s11 + $0x9b8] sm:$0xf0] }
 0x82f   : > { %7042 = vmatpush.bf16.msrb.mxu1 %v12158_v43  ;;  %7056 = vmatpush.bf16.msra.mxu2 %v12542_v16  ;;  %v6765_v43 = vpop.f32.mrf.mxu1  ;;  %v17994_v16 = vpop.f32.mrf.mxu2  ;;  %v6710_v32 = vadd.f32 %v17913_v40, %v5154_v38  ;;  %v13118_v40 = vor.u32 %v15173_v54, %v13117_v51  ;;  %v12255_v51 = vld [vmem:[%s16329_s11 + $0x2f8] sm:$0xf0]  ;;  %v6726_v2 = vadd.f32 %v17949_v50, %v6712_v30  ;;  %v15125_v30 = vld [vmem:[%s16329_s11 + $0xd74] sm:$0xf0] }
 0x830   : > { %v7145_v59 = vmul.f32 0.044715, %v17988_v19  ;;  %v15047_v54 = vld [vmem:[%s16329_s11 + $0x89c] sm:$0xf] }
 0x831   : > { %v6724_v60 = vadd.f32 %v17915_v8, %v6710_v32  ;;  %v13070_v8 = vor.u32 %v15161_v24, %v13069_v3  ;;  %v15143_v36 = vld [vmem:[%s16329_s11 + $0xe9c] sm:$0xf] }
 0x832   : > { %7015 = vmatpush.bf16.msra.mxu3 %v12490_v1  ;;  %7029 = vmatpush.bf16.msrb.mxu0 %v12874_v10  ;;  %v18015_v1 = vmul.f32 0.5, %v17932_v47  ;;  %v7216_v10 = vadd.f32 %v7192_v33, %v17932_v47  ;;  %v14963_v47 = vld [vmem:[%s16329_s11 + $0x35c] sm:$0xf]  ;;  %v7169_v31 = vmul.f32 %v7145_v59, %v17988_v19  ;;  %v13021_v33 = vld [vmem:[%s16329_s11 + $0xe98] sm:$0xf] }
 0x833   : > { %7043 = vmatpush.bf16.msrb.mxu1 %v12110_v52  ;;  %7057 = vmatpush.bf16.msra.mxu2 %v12494_v17  ;;  %v6752_v52 = vadd.f32 %v17970_v15, %v5155_v29  ;;  %v12738_v17 = vor.u32 %v15071_v48, %v12735_v9  ;;  %v18032_v15 = vadd.f32 %v17926_v14, %v6684_v35  ;;  %v6739_v14 = vpop.f32.mrf.mxu3  ;;  %v13023_v48 = vld [vmem:[%s16329_s11 + $0xef8] sm:$0xf0] }
 0x834   : > { %v18034_v45 = vmul.f32 0.7978846, %v7216_v10  ;;  %v18036_v27 = vadd.f32 %v6737_v39, %v6724_v60  ;;  %v7180_v39 = vmul.f32 %v7156_v0, %v17991_v62  ;;  %v18054_v32 = vadd.f32 %v6739_v14, %v6726_v2  ;;  %v12973_v10 = vld [vmem:[%s16329_s11 + $0xdd8] sm:$0xf]  ;;  %v12207_v3 = vld [vmem:[%s16329_s11 + $0x238] sm:$0xf0] }
 0x835   : > { %7016 = vmatmul.bf16.vlgmr.msra.gmra.mxu3 %v17505_v57  ;;  %7030 = vmatmul.bf16.vlgmr.msrb.gmra.mxu0 %v17507_v53  ;;  %v6766_v6 = vadd.f32 %v6765_v43, %v6752_v52  ;;  %v7193_v43 = vmul.f32 %v7169_v31, %v17988_v19  ;;  %v7157_v9 = vmul.f32 0.044715, %v18032_v15  ;;  %v15137_v0 = vld [vmem:[%s16329_s11 + $0xe34] sm:$0xf0]  ;;  %v15035_v24 = vld [vmem:[%s16329_s11 + $0x7dc] sm:$0xf] }
 0x836   : > { %7064 = vmatpush.bf16.msrb.mxu3 %v13214_v18  ;;  %7078 = vmatpush.bf16.msra.mxu0 %v12450_v11  ;;  %v12303_v18 = vld [vmem:[%s16329_s11 + $0x3b8] sm:$0xf0]  ;;  %v7146_v50 = vmul.f32 0.044715, %v18036_v27  ;;  %15708 = vtanh.f32 %v18034_v45 }
 0x837   : > { %7092 = vmatpush.bf16.msra.mxu1 %v12834_v13  ;;  %7106 = vmatpush.bf16.msrb.mxu2 %v13218_v23  ;;  %v15059_v11 = vld [vmem:[%s16329_s11 + $0x95c] sm:$0xf]  ;;  %v12306_v55 = vor.u32 %v14963_v47, %v12303_v18  ;;  %v18051_v7 = vadd.f32 %v17994_v16, %v6766_v6  ;;  %v12642_v16 = vor.u32 %v15047_v54, %v12639_v5 }
 0x838   : > { %7044 = vmatmul.bf16.vlgmr.msrb.gmra.mxu1 %v17503_v12  ;;  %7058 = vmatmul.bf16.vlgmr.msra.gmra.mxu2 %v17505_v57  ;;  %v15155_v13 = vld [vmem:[%s16329_s11 + $0xf5c] sm:$0xf]  ;;  %v12690_v38 = vor.u32 %v15059_v11, %v12687_v22  ;;  %v7204_v47 = vmul.f32 %v7180_v39, %v17991_v62  ;;  %v7217_v18 = vadd.f32 %v7193_v43, %v17988_v19  ;;  %v12925_v22 = vld [vmem:[%s16329_s11 + $0xd18] sm:$0xf] }
 0x839   : > { %v13071_v23 = vld [vmem:[%s16329_s11 + $0xfb8] sm:$0xf0]  ;;  %v7181_v11 = vmul.f32 %v7157_v9, %v18032_v15  ;;  %v7147_v60 = vmul.f32 0.044715, %v18051_v7  ;;  %v7170_v14 = vmul.f32 %v7146_v50, %v18036_v27  ;;  %v12926_v5 = vor.u32 %v15125_v30, %v12925_v22 }
 0x83a   : > { %7065 = vmatpush.bf16.msrb.mxu3 %v13166_v20  ;;  %7079 = vmatpush.bf16.msra.mxu0 %v12402_v46  ;;  %v15149_v20 = vld [vmem:[%s16329_s11 + $0xef4] sm:$0xf0]  ;;  %v13074_v29 = vor.u32 %v15155_v13, %v13071_v23  ;;  %v14951_v46 = vld [vmem:[%s16329_s11 + $0x29c] sm:$0xf]  ;;  %v7158_v13 = vmul.f32 0.044715, %v18054_v32  ;;  %v12974_v23 = vor.u32 %v15137_v0, %v12973_v10 }
 0x83b   : > { %7093 = vmatpush.bf16.msra.mxu1 %v12786_v58  ;;  %7107 = vmatpush.bf16.msrb.mxu2 %v13170_v56  ;;  %v6767_v58 = vpop.f32.mrf.mxu1  ;;  %v6781_v56 = vpop.f32.mrf.mxu2  ;;  %v13022_v59 = vor.u32 %v15149_v20, %v13021_v33  ;;  %v12258_v35 = vor.u32 %v14951_v46, %v12255_v51  ;;  %v12591_v52 = vld [vmem:[%s16329_s11 + $0x838] sm:$0xf0]  ;;  %v7228_v51 = vadd.f32 %v7204_v47, %v17991_v62  ;;  %v18082_v54 = vmul.f32 0.7978846, %v7217_v18  ;;  %v15244_v47 = vld [vmem:[%s16335_s22 + $0x170] sm:$0xf0] }
 0x83c   : > { %v6768_v49 = vadd.f32 %v6767_v58, %v6754_v4  ;;  %v14927_v4 = vld [vmem:[%s16329_s11 + $0x11c] sm:$0xf]  ;;  %v7205_v39 = vmul.f32 %v7181_v11, %v18032_v15  ;;  %v7171_v2 = vmul.f32 %v7147_v60, %v18051_v7  ;;  %v12877_v58 = vld [vmem:[%s16329_s11 + $0xc58] sm:$0xf]  ;;  %v13497_v18 = vld [vmem:[%s16335_s22 + $0x228] sm:$0xf] }
 0x83d   : > { %v12159_v20 = vld [vmem:[%s16329_s11 + $0x178] sm:$0xf0]  ;;  %15710 = vtanh.f32 %v18082_v54  ;;  %v18137_v54 = vmul.f32 0.5, %v17988_v19 }
 0x83e   : > { %7066 = vmatpush.bf16.msrb.mxu3 %v13118_v40  ;;  %7080 = vmatpush.bf16.msra.mxu0 %v12354_v37  ;;  %v18058_v34 = vadd.f32 %v6781_v56, %v6768_v49  ;;  %v13026_v40 = vor.u32 %v15143_v36, %v13023_v48  ;;  %v14939_v37 = vld [vmem:[%s16329_s11 + $0x1dc] sm:$0xf]  ;;  %v7182_v56 = vmul.f32 %v7158_v13, %v18054_v32  ;;  %v15113_v48 = vld [vmem:[%s16329_s11 + $0xcb4] sm:$0xf0]  ;;  %v15268_v13 = vld [vmem:[%s16335_s22 + $0x230] sm:$0xf0] }
 0x83f   : > { %7094 = vmatpush.bf16.msra.mxu1 %v12738_v17  ;;  %7108 = vmatpush.bf16.msrb.mxu2 %v13122_v63  ;;  %v15131_v17 = vld [vmem:[%s16329_s11 + $0xddc] sm:$0xf]  ;;  %v12210_v31 = vor.u32 %v14939_v37, %v12207_v3  ;;  %v12162_v36 = vor.u32 %v14927_v4, %v12159_v20  ;;  %v13305_v3 = vld [vmem:[%s16335_s22 + $0xa8] sm:$0xf]  ;;  %v12878_v60 = vor.u32 %v15113_v48, %v12877_v58  ;;  %v6807_v4 = vpop.f32.mrf.mxu0  ;;  %v13389_v58 = vld [vmem:[%s16335_s22 + $0x150] sm:$0xf] }
 0x840   : > { %v12975_v63 = vld [vmem:[%s16329_s11 + $0xe38] sm:$0xf0]  ;;  %v7206_v11 = vmul.f32 %v7182_v56, %v18054_v32  ;;  %v13581_v48 = vld [vmem:[%s16335_s22 + $0x2d0] sm:$0xf] }
 0x841   : > { %v12978_v33 = vor.u32 %v15131_v17, %v12975_v63  ;;  %v15023_v6 = vld [vmem:[%s16329_s11 + $0x71c] sm:$0xf]  ;;  %v7195_v17 = vmul.f32 %v7171_v2, %v18051_v7  ;;  %v13401_v63 = vld [vmem:[%s16335_s22 + $0x168] sm:$0xf] }
 0x842   : > { %7067 = vmatpush.bf16.msrb.mxu3 %v13070_v8  ;;  %7081 = vmatpush.bf16.msra.mxu0 %v12306_v55  ;;  %v7159_v8 = vmul.f32 0.044715, %v18058_v34  ;;  %v12594_v55 = vor.u32 %v15035_v24, %v12591_v52  ;;  %v12927_v46 = vld [vmem:[%s16329_s11 + $0xd78] sm:$0xf0]  ;;  %v15220_v24 = vld [vmem:[%s16335_s22 + $0xb0] sm:$0xf0]  ;;  %v7229_v52 = vadd.f32 %v7205_v39, %v18032_v15  ;;  %v13498_v39 = vor.u32 %v15268_v13, %v13497_v18 }
 0x843   : > { %7095 = vmatpush.bf16.msra.mxu1 %v12690_v38  ;;  %7109 = vmatpush.bf16.msrb.mxu2 %v13074_v29  ;;  %v12543_v38 = vld [vmem:[%s16329_s11 + $0x778] sm:$0xf0]  ;;  %v13569_v18 = vld [vmem:[%s16335_s22 + $0x2b8] sm:$0xf]  ;;  %v18142_v13 = vmul.f32 0.5, %v17991_v62 }
 0x844   : > { %v15119_v29 = vld [vmem:[%s16329_s11 + $0xd1c] sm:$0xf]  ;;  %v7183_v49 = vmul.f32 %v7159_v8, %v18058_v34  ;;  %v12546_v50 = vor.u32 %v15023_v6, %v12543_v38  ;;  %v5156_v6 = vperm.slane %v17874_v41, 4  ;;  %v13402_v38 = vor.u32 %v15244_v47, %v13401_v63  ;;  %v6821_v63 = vpop.f32.mrf.mxu1  ;;  %v15262_v47 = vld [vmem:[%s16335_s22 + $0x200] sm:$0xf0] }
 0x845   : > { %v14915_v43 = vld [vmem:[%s16329_s11 + $0x5c] sm:$0xf] }
 0x846   : > { %7068 = vmatpush.bf16.msrb.mxu3 %v13022_v59  ;;  %7082 = vmatpush.bf16.msra.mxu0 %v12258_v35  ;;  %v12111_v9 = vld [vmem:[%s16329_s11 + $0xb8] sm:$0xf0]  ;;  %v12930_v59 = vor.u32 %v15119_v29, %v12927_v46  ;;  %v7207_v30 = vmul.f32 %v7183_v49, %v18058_v34  ;;  %v13293_v29 = vld [vmem:[%s16335_s22 + $0x90] sm:$0xf]  ;;  %v7230_v49 = vadd.f32 %v7206_v11, %v18054_v32  ;;  %v15286_v11 = vld [vmem:[%s16335_s22 + $0x2c0] sm:$0xf0] }
 0x847   : > { %7096 = vmatpush.bf16.msra.mxu1 %v12642_v16  ;;  %7110 = vmatpush.bf16.msrb.mxu2 %v13026_v40  ;;  %v15011_v35 = vld [vmem:[%s16329_s11 + $0x65c] sm:$0xf]  ;;  %v7194_v16 = vmul.f32 %v7170_v14, %v18036_v27  ;;  %v6793_v40 = vpop.f32.mrf.mxu3  ;;  %v12114_v22 = vor.u32 %v14915_v43, %v12111_v9  ;;  %v13306_v14 = vor.u32 %v15220_v24, %v13305_v3  ;;  %v7253_v43 = vmul.f32 0.7978846, %v7229_v52  ;;  %v13377_v24 = vld [vmem:[%s16335_s22 + $0x138] sm:$0xf] }
 0x848   : > { %v12495_v10 = vld [vmem:[%s16329_s11 + $0x6b8] sm:$0xf0]  ;;  %v7219_v9 = vadd.f32 %v7195_v17, %v18051_v7  ;;  %v15238_v52 = vld [vmem:[%s16335_s22 + $0x140] sm:$0xf0]  ;;  %v13473_v17 = vld [vmem:[%s16335_s22 + $0x1f8] sm:$0xf] }
 0x849   : > { %v15107_v0 = vld [vmem:[%s16329_s11 + $0xc5c] sm:$0xf]  ;;  %v12498_v8 = vor.u32 %v15011_v35, %v12495_v10  ;;  %v7218_v20 = vadd.f32 %v7194_v16, %v18036_v27  ;;  %v6794_v35 = vadd.f32 %v6793_v40, %v5156_v6  ;;  %v15214_v16 = vld [vmem:[%s16335_s22 + $0x80] sm:$0xf0] }
 0x84a   : > { %7069 = vmatpush.bf16.msrb.mxu3 %v12974_v23  ;;  %7083 = vmatpush.bf16.msra.mxu0 %v12210_v31  ;;  %v12879_v37 = vld [vmem:[%s16329_s11 + $0xcb8] sm:$0xf0]  ;;  %v13593_v23 = vld [vmem:[%s16335_s22 + $0x2e8] sm:$0xf]  ;;  %v15292_v31 = vld [vmem:[%s16335_s22 + $0x2f0] sm:$0xf0] }
 0x84b   : > { %7097 = vmatpush.bf16.msra.mxu1 %v12594_v55  ;;  %7111 = vmatpush.bf16.msrb.mxu2 %v12978_v33  ;;  %v12882_v55 = vor.u32 %v15107_v0, %v12879_v37  ;;  %v7252_v33 = vmul.f32 0.7978846, %v7228_v51  ;;  %v15217_v46 = vld [vmem:[%s16335_s22 + $0x98] sm:$0xf0]  ;;  %v13594_v2 = vor.u32 %v15292_v31, %v13593_v23  ;;  %v13281_v0 = vld [vmem:[%s16335_s22 + $0x78] sm:$0xf]  ;;  %v15709_v23 = vpop.eup %15708  ;;  %v6808_v31 = vadd.f32 %v6807_v4, %v6794_v35 }
 0x84c   : > { %v15241_v56 = vld [vmem:[%s16335_s22 + $0x158] sm:$0xf0]  ;;  %v13294_v10 = vor.u32 %v15217_v46, %v13293_v29  ;;  %v13282_v19 = vor.u32 %v15214_v16, %v13281_v0  ;;  %v13365_v4 = vld [vmem:[%s16335_s22 + $0x120] sm:$0xf]  ;;  %v15283_v46 = vld [vmem:[%s16335_s22 + $0x2a8] sm:$0xf0] }
 0x84d   : > { %v15289_v51 = vld [vmem:[%s16335_s22 + $0x2d8] sm:$0xf0]  ;;  %v13390_v45 = vor.u32 %v15241_v56, %v13389_v58  ;;  %15712 = vtanh.f32 %v7252_v33  ;;  %v13570_v33 = vor.u32 %v15286_v11, %v13569_v18  ;;  %v13557_v29 = vld [vmem:[%s16335_s22 + $0x2a0] sm:$0xf]  ;;  %v5157_v58 = vperm.slane %v17874_v41, 5 }
 0x84e   : > { %7070 = vmatpush.bf16.msrb.mxu3 %v12926_v5  ;;  %7084 = vmatpush.bf16.msra.mxu0 %v12162_v36  ;;  %v13485_v5 = vld [vmem:[%s16335_s22 + $0x210] sm:$0xf]  ;;  %v15265_v36 = vld [vmem:[%s16335_s22 + $0x218] sm:$0xf0]  ;;  %v13582_v3 = vor.u32 %v15289_v51, %v13581_v48  ;;  %15714 = vtanh.f32 %v7253_v43  ;;  %v18158_v56 = vadd.f32 1.0, %v15709_v23  ;;  %v18163_v48 = vadd.f32 %v6821_v63, %v6808_v31 }
 0x84f   : > { %7098 = vmatpush.bf16.msra.mxu1 %v12546_v50  ;;  %7112 = vmatpush.bf16.msrb.mxu2 %v12930_v59  ;;  %v7231_v50 = vadd.f32 %v7207_v30, %v18058_v34  ;;  %v7242_v59 = vmul.f32 0.7978846, %v7218_v20  ;;  %v13486_v37 = vor.u32 %v15265_v36, %v13485_v5  ;;  %v6795_v40 = vpop.f32.mrf.mxu3  ;;  %v13378_v30 = vor.u32 %v15238_v52, %v13377_v24  ;;  %v15235_v20 = vld [vmem:[%s16335_s22 + $0x128] sm:$0xf0]  ;;  %v13257_v43 = vld [vmem:[%s16335_s22 + $0x48] sm:$0xf] }
 0x850   : > { %v6796_v62 = vadd.f32 %v6795_v40, %v5156_v6  ;;  %v6835_v6 = vpop.f32.mrf.mxu2  ;;  %v18161_v5 = vmul.f32 0.5, %v18032_v15  ;;  %v13366_v51 = vor.u32 %v15235_v20, %v13365_v4  ;;  %v15232_v35 = vld [vmem:[%s16335_s22 + $0x110] sm:$0xf0]  ;;  %v13545_v0 = vld [vmem:[%s16335_s22 + $0x288] sm:$0xf]  ;;  %v18177_v24 = vmul.f32 0.5, %v18054_v32 }
 0x851   : > { %15716 = vtanh.f32 %v7242_v59  ;;  %v13353_v59 = vld [vmem:[%s16335_s22 + $0x108] sm:$0xf]  ;;  %v15280_v16 = vld [vmem:[%s16335_s22 + $0x290] sm:$0xf0]  ;;  %v7148_v40 = vmul.f32 0.044715, %v18163_v48 }
 0x852   : > { %7071 = vmatpush.bf16.msrb.mxu3 %v12878_v60  ;;  %7085 = vmatpush.bf16.msra.mxu0 %v12114_v22  ;;  %v7243_v60 = vmul.f32 0.7978846, %v7219_v9  ;;  %v7254_v22 = vmul.f32 0.7978846, %v7230_v49  ;;  %v15208_v9 = vld [vmem:[%s16335_s22 + $0x50] sm:$0xf0] }
 0x853   : > { %7099 = vmatpush.bf16.msra.mxu1 %v12498_v8  ;;  %7113 = vmatpush.bf16.msrb.mxu2 %v12882_v55  ;;  %v13269_v8 = vld [vmem:[%s16335_s22 + $0x60] sm:$0xf]  ;;  %v13474_v55 = vor.u32 %v15262_v47, %v13473_v17  ;;  %v6823_v47 = vpop.f32.mrf.mxu1  ;;  %v13258_v18 = vor.u32 %v15208_v9, %v13257_v43  ;;  %v13245_v11 = vld [vmem:[%s16335_s22 + $0x30] sm:$0xf]  ;;  %v15205_v32 = vld [vmem:[%s16335_s22 + $0x38] sm:$0xf0] }
 0x854   : > { %15718 = vtanh.f32 %v7243_v60  ;;  %v13329_v43 = vld [vmem:[%s16335_s22 + $0xd8] sm:$0xf]  ;;  %v15226_v9 = vld [vmem:[%s16335_s22 + $0xe0] sm:$0xf0] }
 0x855   : > { %7072 = vmatmul.bf16.vlgmr.msrb.gmra.mxu3 %v17507_v53  ;;  %7086 = vmatmul.bf16.vlgmr.msra.gmra.mxu0 %v17503_v12  ;;  %v7255_v12 = vmul.f32 0.7978846, %v7231_v50  ;;  %15720 = vtanh.f32 %v7254_v22  ;;  %v13558_v50 = vor.u32 %v15283_v46, %v13557_v29  ;;  %v13233_v29 = vld [vmem:[%s16335_s22 + $0x18] sm:$0xf] }
 0x856   : > { %9275 = vmatpush.bf16.msra.mxu3 %v13306_v14  ;;  %9289 = vmatpush.bf16.msrb.mxu0 %v13402_v38  ;;  %v13461_v14 = vld [vmem:[%s16335_s22 + $0x1e0] sm:$0xf]  ;;  %v15259_v38 = vld [vmem:[%s16335_s22 + $0x1e8] sm:$0xf0] }
 0x857   : > { %9303 = vmatpush.bf16.msrb.mxu1 %v13498_v39  ;;  %9317 = vmatpush.bf16.msra.mxu2 %v13594_v2  ;;  %v15711_v39 = vpop.eup %15710  ;;  %v18155_v2 = vmul.f32 0.5, %v18036_v27  ;;  %v13462_v15 = vor.u32 %v15259_v38, %v13461_v14  ;;  %15722 = vtanh.f32 %v7255_v12  ;;  %v13546_v12 = vor.u32 %v15280_v16, %v13545_v0  ;;  %v15274_v0 = vld [vmem:[%s16335_s22 + $0x260] sm:$0xf0] }
 0x858   : > { %7100 = vmatmul.bf16.vlgmr.msra.gmra.mxu1 %v17505_v57  ;;  %7114 = vmatmul.bf16.vlgmr.msrb.gmra.mxu2 %v17507_v53  ;;  %v15211_v57 = vld [vmem:[%s16335_s22 + $0x68] sm:$0xf0]  ;;  %v6809_v53 = vpop.f32.mrf.mxu0  ;;  %v15713_v36 = vpop.eup %15712  ;;  %v18181_v17 = vadd.f32 1.0, %v15711_v39  ;;  %v7135_v14 = vmul.f32 0.5, %v18058_v34  ;;  %v13246_v38 = vor.u32 %v15205_v32, %v13245_v11  ;;  %v7312_v16 = vmul.f32 %v18158_v56, %v18015_v1  ;;  %v13221_v32 = vld [vmem:[%s16335_s22] sm:$0xf] }
 0x859   : > { %v13270_v27 = vor.u32 %v15211_v57, %v13269_v8  ;;  %v6810_v49 = vadd.f32 %v6809_v53, %v6796_v62  ;;  %v18179_v52 = vadd.f32 1.0, %v15713_v36  ;;  %v6849_v31 = vpop.f32.mrf.mxu3  ;;  %v13437_v8 = vld [vmem:[%s16335_s22 + $0x1b0] sm:$0xf]  ;;  %v6836_v53 = vadd.f32 %v6835_v6, %v5157_v58  ;;  %v15253_v62 = vld [vmem:[%s16335_s22 + $0x1b8] sm:$0xf0] }
 0x85a   : > { %9276 = vmatpush.bf16.msra.mxu3 %v13294_v10  ;;  %9290 = vmatpush.bf16.msrb.mxu0 %v13390_v45  ;;  %v13449_v10 = vld [vmem:[%s16335_s22 + $0x1c8] sm:$0xf]  ;;  %v15256_v45 = vld [vmem:[%s16335_s22 + $0x1d0] sm:$0xf0]  ;;  %v7172_v36 = vmul.f32 %v7148_v40, %v18163_v48  ;;  %v15199_v1 = vld [vmem:[%s16335_s22 + $0x8] sm:$0xf0] }
 0x85b   : > { %9304 = vmatpush.bf16.msrb.mxu1 %v13486_v37  ;;  %9318 = vmatpush.bf16.msra.mxu2 %v13582_v3  ;;  %v15715_v37 = vpop.eup %15714  ;;  %v18174_v3 = vmul.f32 0.5, %v18051_v7  ;;  %v13354_v7 = vor.u32 %v15232_v35, %v13353_v59  ;;  %v18186_v60 = vadd.f32 %v6823_v47, %v6810_v49  ;;  %v13450_v23 = vor.u32 %v15256_v45, %v13449_v10  ;;  %v13425_v35 = vld [vmem:[%s16335_s22 + $0x198] sm:$0xf]  ;;  %v15250_v10 = vld [vmem:[%s16335_s22 + $0x1a0] sm:$0xf0] }
 0x85c   : > { %v15717_v63 = vpop.eup %15716  ;;  %v7301_v46 = vadd.f32 1.0, %v15715_v37  ;;  %v6850_v6 = vadd.f32 %v6849_v31, %v6836_v53  ;;  %v13521_v45 = vld [vmem:[%s16335_s22 + $0x258] sm:$0xf]  ;;  %v13317_v56 = vld [vmem:[%s16335_s22 + $0xc0] sm:$0xf] }
 0x85d   : > { %v15719_v57 = vpop.eup %15718  ;;  %v7290_v20 = vadd.f32 1.0, %v15717_v63  ;;  %v7160_v34 = vmul.f32 0.044715, %v18186_v60  ;;  %v13330_v63 = vor.u32 %v15226_v9, %v13329_v43  ;;  %v13522_v31 = vor.u32 %v15274_v0, %v13521_v45  ;;  %v15271_v53 = vld [vmem:[%s16335_s22 + $0x248] sm:$0xf0] }
 0x85e   : > { %9277 = vmatpush.bf16.msra.mxu3 %v13282_v19  ;;  %9291 = vmatpush.bf16.msrb.mxu0 %v13378_v30  ;;  %v13341_v19 = vld [vmem:[%s16335_s22 + $0xf0] sm:$0xf]  ;;  %v15229_v30 = vld [vmem:[%s16335_s22 + $0xf8] sm:$0xf0]  ;;  %v15721_v4 = vpop.eup %15720  ;;  %v18202_v49 = vadd.f32 1.0, %v15719_v57 }
 0x85f   : > { %9305 = vmatpush.bf16.msrb.mxu1 %v13474_v55  ;;  %9319 = vmatpush.bf16.msra.mxu2 %v13570_v33  ;;  %v13533_v55 = vld [vmem:[%s16335_s22 + $0x270] sm:$0xf]  ;;  %v15277_v33 = vld [vmem:[%s16335_s22 + $0x278] sm:$0xf0]  ;;  %v15723_v39 = vpop.eup %15722  ;;  %v7302_v40 = vadd.f32 1.0, %v15721_v4  ;;  %v7325_v4 = vmul.f32 %v7301_v46, %v18161_v5 }
 0x860   : > { %v6863_v22 = vpop.f32.mrf.mxu0  ;;  %v13534_v59 = vor.u32 %v15277_v33, %v13533_v55  ;;  %v7303_v47 = vadd.f32 1.0, %v15723_v39  ;;  %v13509_v57 = vld [vmem:[%s16335_s22 + $0x240] sm:$0xf]  ;;  %v7324_v55 = vmul.f32 %v18179_v52, %v18142_v13  ;;  %v7313_v33 = vmul.f32 %v18181_v17, %v18137_v54  ;;  %v15316_v39 = vld [vmem:[%s16335_s22 + $0x3b0] sm:$0xf0] }
 0x861   : > { %v18214_v11 = vadd.f32 %v6863_v22, %v6850_v6  ;;  %v6851_v41 = vpop.f32.mrf.mxu3  ;;  %v13413_v22 = vld [vmem:[%s16335_s22 + $0x180] sm:$0xf]  ;;  %v15340_v6 = vld [vmem:[%s16335_s22 + $0x470] sm:$0xf0] }
 0x862   : > { %9278 = vmatpush.bf16.msra.mxu3 %v13270_v27  ;;  %9292 = vmatpush.bf16.msrb.mxu0 %v13366_v51  ;;  %v13342_v27 = vor.u32 %v15229_v30, %v13341_v19  ;;  %v15202_v51 = vld [vmem:[%s16335_s22 + $0x20] sm:$0xf0]  ;;  %v15247_v19 = vld [vmem:[%s16335_s22 + $0x188] sm:$0xf0]  ;;  %v18223_v30 = vpop.f32.mrf.mxu1  ;;  %v7327_v43 = vmul.f32 %v7303_v47, %v7135_v14  ;;  %v13881_v14 = vld [vmem:[%s16335_s22 + $0x528] sm:$0xf]  ;;  %v18253_v45 = vpack.c.bf16 %v7324_v55, %v7312_v16 }
 0x863   : > { %9306 = vmatpush.bf16.msrb.mxu1 %v13462_v15  ;;  %9320 = vmatpush.bf16.msra.mxu2 %v13558_v50  ;;  %v6837_v15 = vpop.f32.mrf.mxu2  ;;  %v13438_v50 = vor.u32 %v15253_v62, %v13437_v8  ;;  %v13234_v37 = vor.u32 %v15202_v51, %v13233_v29  ;;  %v13689_v62 = vld [vmem:[%s16335_s22 + $0x3a8] sm:$0xf]  ;;  %v13222_v29 = vor.u32 %v15199_v1, %v13221_v32  ;;  %v7149_v52 = vmul.f32 0.044715, %v18214_v11  ;;  %v15364_v46 = vld [vmem:[%s16335_s22 + $0x530] sm:$0xf0] }
 0x864   : > { %v7326_v51 = vmul.f32 %v7302_v40, %v18177_v24  ;;  %v13510_v24 = vor.u32 %v15271_v53, %v13509_v57  ;;  %v18255_v0 = vpack.c.bf16 %v7325_v4, %v7313_v33  ;;  %v13773_v40 = vld [vmem:[%s16335_s22 + $0x450] sm:$0xf]  ;;  %v15337_v47 = vld [vmem:[%s16335_s22 + $0x458] sm:$0xf0]  ;;  %v13665_v32 = vld [vmem:[%s16335_s22 + $0x378] sm:$0xf]  ;;  %v13882_v1 = vor.u32 %v15364_v46, %v13881_v14 }
 0x865   : > { %v13761_v57 = vld [vmem:[%s16335_s22 + $0x438] sm:$0xf]  ;;  %v15334_v53 = vld [vmem:[%s16335_s22 + $0x440] sm:$0xf0] }
 0x866   : > { %9279 = vmatpush.bf16.msra.mxu3 %v13258_v18  ;;  %9293 = vmatpush.bf16.msrb.mxu0 %v13354_v7  ;;  %v7196_v18 = vmul.f32 %v7172_v36, %v18163_v48  ;;  %v6838_v7 = vadd.f32 %v6837_v15, %v5157_v58  ;;  %v15223_v58 = vld [vmem:[%s16335_s22 + $0xc8] sm:$0xf0]  ;;  %v13785_v36 = vld [vmem:[%s16335_s22 + $0x468] sm:$0xf]  ;;  %v13690_v15 = vor.u32 %v15316_v39, %v13689_v62  ;;  %v18284_v33 = vld [vmem:[%s16327_s3 + $0xc] sm:$0xff] }
 0x867   : > { %9307 = vmatpush.bf16.msrb.mxu1 %v13450_v23  ;;  %9321 = vmatpush.bf16.msra.mxu2 %v13546_v12  ;;  %v7184_v23 = vmul.f32 %v7160_v34, %v18186_v60  ;;  %v13426_v12 = vor.u32 %v15250_v10, %v13425_v35  ;;  %v13318_v5 = vor.u32 %v15223_v58, %v13317_v56  ;;  %v13977_v35 = vld [vmem:[%s16335_s22 + $0x5e8] sm:$0xf]  ;;  %v15388_v10 = vld [vmem:[%s16335_s22 + $0x5f0] sm:$0xf0]  ;;  %v15361_v58 = vld [vmem:[%s16335_s22 + $0x518] sm:$0xf0] }
 0x868   : > { %v6852_v8 = vadd.f32 %v6851_v41, %v6838_v7  ;;  %v7220_v13 = vadd.f32 %v7196_v18, %v18163_v48  ;;  %v7173_v18 = vmul.f32 %v7149_v52, %v18214_v11  ;;  %v13978_v56 = vor.u32 %v15388_v10, %v13977_v35  ;;  %v13953_v52 = vld [vmem:[%s16335_s22 + $0x5b8] sm:$0xf]  ;;  %v13845_v35 = vld [vmem:[%s16335_s22 + $0x4e0] sm:$0xf]  ;;  %v15355_v10 = vld [vmem:[%s16335_s22 + $0x4e8] sm:$0xf0] }
 0x869   : > { %v7208_v17 = vmul.f32 %v7184_v23, %v18186_v60  ;;  %v13869_v23 = vld [vmem:[%s16335_s22 + $0x510] sm:$0xf]  ;;  %v13774_v41 = vor.u32 %v15337_v47, %v13773_v40  ;;  %v5159_v4 = vperm.slane %v18284_v33, 7 }
 0x86a   : > { %9280 = vmatpush.bf16.msra.mxu3 %v13246_v38  ;;  %9294 = vmatpush.bf16.msrb.mxu0 %v13342_v27  ;;  %v6865_v38 = vpop.f32.mrf.mxu0  ;;  %v7314_v27 = vmul.f32 %v7290_v20, %v18155_v2  ;;  %v13414_v2 = vor.u32 %v15247_v19, %v13413_v22  ;;  %v13677_v20 = vld [vmem:[%s16335_s22 + $0x390] sm:$0xf]  ;;  %v15385_v19 = vld [vmem:[%s16335_s22 + $0x5d8] sm:$0xf0]  ;;  %v7197_v62 = vmul.f32 %v7173_v18, %v18214_v11  ;;  %v18279_v55 = vpop.f32.mrf.mxu1  ;;  %v13941_v18 = vld [vmem:[%s16335_s22 + $0x5a0] sm:$0xf] }
 0x86b   : > { %9308 = vmatpush.bf16.msrb.mxu1 %v13438_v50  ;;  %9322 = vmatpush.bf16.msra.mxu2 %v13534_v59  ;;  %v18240_v54 = vadd.f32 %v6865_v38, %v6852_v8  ;;  %v18246_v9 = vpop.f32.mrf.mxu2  ;;  %v13786_v50 = vor.u32 %v15340_v6, %v13785_v36  ;;  %v7315_v59 = vmul.f32 %v18202_v49, %v18174_v3  ;;  %v7244_v49 = vmul.f32 0.7978846, %v7220_v13  ;;  %v13965_v22 = vld [vmem:[%s16335_s22 + $0x5d0] sm:$0xf]  ;;  %v15310_v8 = vld [vmem:[%s16335_s22 + $0x380] sm:$0xf0] }
 0x86c   : > { %v7232_v16 = vadd.f32 %v7208_v17, %v18186_v60  ;;  %v13653_v38 = vld [vmem:[%s16335_s22 + $0x360] sm:$0xf]  ;;  %v13966_v39 = vor.u32 %v15385_v19, %v13965_v22  ;;  %v13857_v36 = vld [vmem:[%s16335_s22 + $0x4f8] sm:$0xf]  ;;  %v15358_v13 = vld [vmem:[%s16335_s22 + $0x500] sm:$0xf0]  ;;  %v7221_v14 = vadd.f32 %v7197_v62, %v18214_v11  ;;  %v13846_v22 = vor.u32 %v15355_v10, %v13845_v35 }
 0x86d   : > { %v7161_v34 = vmul.f32 0.044715, %v18240_v54  ;;  %v18264_v3 = vpack.c.bf16 %v7327_v43, %v7315_v59  ;;  %v13762_v43 = vor.u32 %v15334_v53, %v13761_v57  ;;  %v15307_v17 = vld [vmem:[%s16335_s22 + $0x368] sm:$0xf0]  ;;  %15724 = vtanh.f32 %v7244_v49  ;;  %v15352_v62 = vld [vmem:[%s16335_s22 + $0x4d0] sm:$0xf0] }
 0x86e   : > { %9281 = vmatpush.bf16.msra.mxu3 %v13234_v37  ;;  %9295 = vmatpush.bf16.msrb.mxu0 %v13330_v63  ;;  %v18257_v37 = vpack.c.bf16 %v7326_v51, %v7314_v27  ;;  %v15313_v63 = vld [vmem:[%s16335_s22 + $0x398] sm:$0xf0]  ;;  %v7256_v6 = vmul.f32 0.7978846, %v7232_v16  ;;  %v13666_v51 = vor.u32 %v15310_v8, %v13665_v32  ;;  %v13654_v40 = vor.u32 %v15307_v17, %v13653_v38  ;;  %v15304_v16 = vld [vmem:[%s16335_s22 + $0x350] sm:$0xf0] }
 0x86f   : > { %9309 = vmatpush.bf16.msrb.mxu1 %v13426_v12  ;;  %9323 = vmatpush.bf16.msra.mxu2 %v13522_v31  ;;  %v7185_v7 = vmul.f32 %v7161_v34, %v18240_v54  ;;  %v13678_v31 = vor.u32 %v15313_v63, %v13677_v20  ;;  %v5158_v20 = vperm.slane %v18284_v33, 6  ;;  %v13737_v32 = vld [vmem:[%s16335_s22 + $0x408] sm:$0xf]  ;;  %v18364_v33 = vld [vmem:[%s16335_s22 + $0x308] sm:$0xf0] }
 0x870   : > { %15726 = vtanh.f32 %v7256_v6  ;;  %v13833_v8 = vld [vmem:[%s16335_s22 + $0x4c8] sm:$0xf]  ;;  %v13725_v6 = vld [vmem:[%s16335_s22 + $0x3f0] sm:$0xf] }
 0x871   : > { %v7209_v12 = vmul.f32 %v7185_v7, %v18240_v54  ;;  %v15379_v7 = vld [vmem:[%s16335_s22 + $0x5a8] sm:$0xf0]  ;;  %v13929_v38 = vld [vmem:[%s16335_s22 + $0x588] sm:$0xf] }
 0x872   : > { %9282 = vmatpush.bf16.msra.mxu3 %v13222_v29  ;;  %9296 = vmatpush.bf16.msrb.mxu0 %v13318_v5  ;;  %v13870_v29 = vor.u32 %v15361_v58, %v13869_v23  ;;  %v15382_v5 = vld [vmem:[%s16335_s22 + $0x5c0] sm:$0xf0]  ;;  %v6919_v34 = vpop.f32.mrf.mxu0  ;;  %v7245_v23 = vmul.f32 0.7978846, %v7221_v14  ;;  %v18317_v58 = vmul.f32 0.5, %v18163_v48  ;;  %v13942_v19 = vor.u32 %v15379_v7, %v13941_v18 }
 0x873   : > { %9310 = vmatpush.bf16.msrb.mxu1 %v13414_v2  ;;  %9324 = vmatpush.bf16.msra.mxu2 %v13510_v24  ;;  %v7233_v27 = vadd.f32 %v7209_v12, %v18240_v54  ;;  %v13749_v2 = vld [vmem:[%s16335_s22 + $0x420] sm:$0xf]  ;;  %v15331_v24 = vld [vmem:[%s16335_s22 + $0x428] sm:$0xf0]  ;;  %v18298_v46 = vpop.f32.mrf.mxu2  ;;  %v13954_v59 = vor.u32 %v15382_v5, %v13953_v52  ;;  %v6920_v49 = vadd.f32 %v6919_v34, %v5159_v4  ;;  %v13713_v7 = vld [vmem:[%s16335_s22 + $0x3d8] sm:$0xf] }
 0x874   : > { %v13750_v47 = vor.u32 %v15331_v24, %v13749_v2  ;;  %v18335_v2 = vld [vmem:[%s16335_s22 + $0x318] sm:$0xf]  ;;  %v18338_v24 = vld [vmem:[%s16335_s22 + $0x320] sm:$0xf0]  ;;  %v13834_v14 = vor.u32 %v15352_v62, %v13833_v8 }
 0x875   : > { %9283 = vmatmul.bf16.vlgmr.msra.gmra.mxu3 %v18253_v45  ;;  %9297 = vmatmul.bf16.vlgmr.msrb.gmra.mxu0 %v18255_v0  ;;  %v7257_v63 = vmul.f32 0.7978846, %v7233_v27  ;;  %v6933_v12 = vpop.f32.mrf.mxu1  ;;  %v15325_v27 = vld [vmem:[%s16335_s22 + $0x3f8] sm:$0xf0] }
 0x876   : > { %9331 = vmatpush.bf16.msrb.mxu3 %v13690_v15  ;;  %9345 = vmatpush.bf16.msra.mxu0 %v13786_v50  ;;  %v13641_v15 = vld [vmem:[%s16335_s22 + $0x348] sm:$0xf]  ;;  %v13858_v50 = vor.u32 %v15358_v13, %v13857_v36  ;;  %v15301_v36 = vld [vmem:[%s16335_s22 + $0x338] sm:$0xf0]  ;;  %v13726_v10 = vor.u32 %v15325_v27, %v13725_v6 }
 0x877   : > { %9311 = vmatmul.bf16.vlgmr.msrb.gmra.mxu1 %v18257_v37  ;;  %9325 = vmatmul.bf16.vlgmr.msra.gmra.mxu2 %v18264_v3  ;;  %15728 = vtanh.f32 %v7257_v63  ;;  %v13642_v57 = vor.u32 %v15304_v16, %v13641_v15  ;;  %v13821_v15 = vld [vmem:[%s16335_s22 + $0x4b0] sm:$0xf] }
 0x878   : > { %9359 = vmatpush.bf16.msra.mxu1 %v13882_v1  ;;  %9373 = vmatpush.bf16.msrb.mxu2 %v13978_v56  ;;  %v15328_v1 = vld [vmem:[%s16335_s22 + $0x410] sm:$0xf0]  ;;  %v6878_v56 = vadd.f32 %v18223_v30, %v5158_v20  ;;  %v6905_v48 = vpop.f32.mrf.mxu3  ;;  %15730 = vtanh.f32 %v7245_v23  ;;  %v13917_v63 = vld [vmem:[%s16335_s22 + $0x570] sm:$0xf]  ;;  %v18361_v23 = vld [vmem:[%s16335_s22 + $0x300] sm:$0xf] }
 0x879   : > { %v13738_v53 = vor.u32 %v15328_v1, %v13737_v32 }
 0x87a   : > { %9332 = vmatpush.bf16.msrb.mxu3 %v13678_v31  ;;  %9346 = vmatpush.bf16.msra.mxu0 %v13774_v41  ;;  %v15725_v31 = vpop.eup %15724  ;;  %v18314_v41 = vld [vmem:[%s16335_s22 + $0x330] sm:$0xf]  ;;  %v6892_v30 = vadd.f32 %v18246_v9, %v6878_v56  ;;  %v6921_v17 = vpop.f32.mrf.mxu0 }
 0x87b   : > { %v6947_v9 = vpop.f32.mrf.mxu2  ;;  %v18330_v13 = vadd.f32 1.0, %v15725_v31  ;;  %v15727_v52 = vpop.eup %15726  ;;  %v13630_v35 = vor.u32 %v15301_v36, %v18314_v41  ;;  %v6922_v18 = vadd.f32 %v6921_v17, %v5159_v4  ;;  %v7137_v36 = vmul.f32 0.5, %v18240_v54  ;;  %v15412_v17 = vld [vmem:[%s16335_s22 + $0x6b0] sm:$0xf0]  ;;  %v15409_v54 = vld [vmem:[%s16335_s22 + $0x698] sm:$0xf0] }
 0x87c   : > { %9360 = vmatpush.bf16.msra.mxu1 %v13870_v29  ;;  %9374 = vmatpush.bf16.msrb.mxu2 %v13966_v39  ;;  %v15376_v29 = vld [vmem:[%s16335_s22 + $0x590] sm:$0xf0]  ;;  %v6934_v39 = vadd.f32 %v6933_v12, %v6920_v49  ;;  %v18355_v49 = vmul.f32 0.5, %v18214_v11  ;;  %v7304_v1 = vadd.f32 1.0, %v15727_v52  ;;  %v13809_v11 = vld [vmem:[%s16335_s22 + $0x498] sm:$0xf] }
 0x87d   : > { %v13930_v34 = vor.u32 %v15376_v29, %v13929_v38 }
 0x87e   : > { %9333 = vmatpush.bf16.msrb.mxu3 %v13666_v51  ;;  %9347 = vmatpush.bf16.msra.mxu0 %v13762_v43  ;;  %v18327_v51 = vadd.f32 %v6905_v48, %v6892_v30  ;;  %v7136_v43 = vmul.f32 0.5, %v18186_v60  ;;  %v18332_v5 = vadd.f32 %v6947_v9, %v6934_v39  ;;  %v15349_v60 = vld [vmem:[%s16335_s22 + $0x4b8] sm:$0xf0]  ;;  %v13701_v30 = vld [vmem:[%s16335_s22 + $0x3c0] sm:$0xf] }
 0x87f   : > { %v13822_v4 = vor.u32 %v15349_v60, %v13821_v15  ;;  %v15319_v39 = vld [vmem:[%s16335_s22 + $0x3c8] sm:$0xf0]  ;;  %v14073_v48 = vld [vmem:[%s16335_s22 + $0x6a8] sm:$0xf] }
 0x880   : > { %9361 = vmatpush.bf16.msra.mxu1 %v13858_v50  ;;  %9375 = vmatpush.bf16.msrb.mxu2 %v13954_v59  ;;  %v6880_v50 = vadd.f32 %v18279_v55, %v5158_v20  ;;  %v7150_v59 = vmul.f32 0.044715, %v18327_v51  ;;  %v15322_v55 = vld [vmem:[%s16335_s22 + $0x3e0] sm:$0xf0]  ;;  %v15729_v20 = vpop.eup %15728  ;;  %v6907_v29 = vpop.f32.mrf.mxu3 }
 0x881   : > { %v15731_v31 = vpop.eup %15730  ;;  %v13714_v8 = vor.u32 %v15322_v55, %v13713_v7  ;;  %v7305_v6 = vadd.f32 1.0, %v15729_v20  ;;  %v14074_v55 = vor.u32 %v15412_v17, %v14073_v48  ;;  %v14133_v17 = vld [vmem:[%s16335_s22 + $0x720] sm:$0xf] }
 0x882   : > { %9334 = vmatpush.bf16.msrb.mxu3 %v13654_v40  ;;  %9348 = vmatpush.bf16.msra.mxu0 %v13750_v47  ;;  %v15373_v40 = vld [vmem:[%s16335_s22 + $0x578] sm:$0xf0]  ;;  %v7151_v47 = vmul.f32 0.044715, %v18332_v5  ;;  %v6894_v16 = vadd.f32 %v18298_v46, %v6880_v50  ;;  %v7174_v32 = vmul.f32 %v7150_v59, %v18327_v51  ;;  %v15346_v46 = vld [vmem:[%s16335_s22 + $0x4a0] sm:$0xf0] }
 0x883   : > { %v13918_v12 = vor.u32 %v15373_v40, %v13917_v63  ;;  %v6949_v52 = vpop.f32.mrf.mxu2  ;;  %v7293_v50 = vadd.f32 1.0, %v15731_v31  ;;  %v13702_v63 = vor.u32 %v15319_v39, %v13701_v30  ;;  %v7316_v40 = vmul.f32 %v18330_v13, %v18317_v58  ;;  %v14049_v30 = vld [vmem:[%s16335_s22 + $0x678] sm:$0xf] }
 0x884   : > { %9362 = vmatpush.bf16.msra.mxu1 %v13846_v22  ;;  %9376 = vmatpush.bf16.msrb.mxu2 %v13942_v19  ;;  %v7175_v56 = vmul.f32 %v7151_v47, %v18332_v5  ;;  %v7198_v41 = vmul.f32 %v7174_v32, %v18327_v51  ;;  %v6935_v22 = vpop.f32.mrf.mxu1  ;;  %v13618_v19 = vor.u32 %v18338_v24, %v18335_v2  ;;  %v14061_v24 = vld [vmem:[%s16335_s22 + $0x690] sm:$0xf]  ;;  %v13797_v47 = vld [vmem:[%s16335_s22 + $0x480] sm:$0xf]  ;;  %v15367_v32 = vld [vmem:[%s16335_s22 + $0x548] sm:$0xf0] }
 0x885   : > { %v6936_v38 = vadd.f32 %v6935_v22, %v6922_v18  ;;  %v18379_v9 = vadd.f32 %v6907_v29, %v6894_v16  ;;  %v7328_v2 = vmul.f32 %v7304_v1, %v7136_v43  ;;  %v15343_v18 = vld [vmem:[%s16335_s22 + $0x488] sm:$0xf0]  ;;  %v7329_v20 = vmul.f32 %v7305_v6, %v7137_v36  ;;  %v13893_v16 = vld [vmem:[%s16335_s22 + $0x540] sm:$0xf] }
 0x886   : > { %9335 = vmatpush.bf16.msrb.mxu3 %v13642_v57  ;;  %9349 = vmatpush.bf16.msra.mxu0 %v13738_v53  ;;  %v13905_v57 = vld [vmem:[%s16335_s22 + $0x558] sm:$0xf]  ;;  %v15370_v53 = vld [vmem:[%s16335_s22 + $0x560] sm:$0xf0]  ;;  %v7199_v62 = vmul.f32 %v7175_v56, %v18332_v5  ;;  %v7222_v27 = vadd.f32 %v7198_v41, %v18327_v51  ;;  %v7317_v13 = vmul.f32 %v7293_v50, %v18355_v49  ;;  %v14037_v6 = vld [vmem:[%s16335_s22 + $0x660] sm:$0xf] }
 0x887   : > { %v18385_v60 = vadd.f32 %v6949_v52, %v6936_v38  ;;  %v13906_v59 = vor.u32 %v15370_v53, %v13905_v57  ;;  %v7162_v43 = vmul.f32 0.044715, %v18379_v9  ;;  %v13798_v41 = vor.u32 %v15343_v18, %v13797_v47  ;;  %v15406_v53 = vld [vmem:[%s16335_s22 + $0x680] sm:$0xf0]  ;;  %v15403_v52 = vld [vmem:[%s16335_s22 + $0x668] sm:$0xf0] }
 0x888   : > { %9363 = vmatpush.bf16.msra.mxu1 %v13834_v14  ;;  %9377 = vmatpush.bf16.msrb.mxu2 %v13930_v34  ;;  %v13810_v14 = vor.u32 %v15346_v46, %v13809_v11  ;;  %v14169_v34 = vld [vmem:[%s16335_s22 + $0x768] sm:$0xf]  ;;  %v7223_v15 = vadd.f32 %v7199_v62, %v18332_v5  ;;  %v7246_v56 = vmul.f32 0.7978846, %v7222_v27  ;;  %v14062_v11 = vor.u32 %v15409_v54, %v14061_v24  ;;  %v15433_v46 = vld [vmem:[%s16335_s22 + $0x758] sm:$0xf0] }
 0x889   : > { %v7163_v7 = vmul.f32 0.044715, %v18385_v60  ;;  %v13894_v22 = vor.u32 %v15367_v32, %v13893_v16  ;;  %v14145_v62 = vld [vmem:[%s16335_s22 + $0x738] sm:$0xf]  ;;  %v15430_v38 = vld [vmem:[%s16335_s22 + $0x740] sm:$0xf0]  ;;  %v14050_v36 = vor.u32 %v15406_v53, %v14049_v30 }
 0x88a   : > { %9336 = vmatpush.bf16.msrb.mxu3 %v13630_v35  ;;  %9350 = vmatpush.bf16.msra.mxu0 %v13726_v10  ;;  %v15436_v35 = vld [vmem:[%s16335_s22 + $0x770] sm:$0xf0]  ;;  %v13606_v10 = vor.u32 %v18364_v33, %v18361_v23  ;;  %v14157_v23 = vld [vmem:[%s16335_s22 + $0x750] sm:$0xf]  ;;  %v7247_v33 = vmul.f32 0.7978846, %v7223_v15  ;;  %15732 = vtanh.f32 %v7246_v56  ;;  %v14146_v27 = vor.u32 %v15430_v38, %v14145_v62 }
 0x88b   : > { %v14170_v1 = vor.u32 %v15436_v35, %v14169_v34  ;;  %v7187_v58 = vmul.f32 %v7163_v7, %v18385_v60  ;;  %v14158_v49 = vor.u32 %v15433_v46, %v14157_v23  ;;  %v14038_v34 = vor.u32 %v15403_v52, %v14037_v6  ;;  %v14025_v15 = vld [vmem:[%s16335_s22 + $0x648] sm:$0xf]  ;;  %v18424_v50 = vld [vmem:[%s16327_s3 + $0x14] sm:$0xf]  ;;  %v14013_v32 = vld [vmem:[%s16335_s22 + $0x630] sm:$0xf] }
 0x88c   : > { %9364 = vmatpush.bf16.msra.mxu1 %v13822_v4  ;;  %9378 = vmatpush.bf16.msrb.mxu2 %v13918_v12  ;;  %v7186_v4 = vmul.f32 %v7162_v43, %v18379_v9  ;;  %v18400_v12 = vpack.c.bf16 %v7328_v2, %v7316_v40  ;;  %15734 = vtanh.f32 %v7247_v33  ;;  %v15427_v2 = vld [vmem:[%s16335_s22 + $0x728] sm:$0xf0]  ;;  %v14121_v35 = vld [vmem:[%s16335_s22 + $0x708] sm:$0xf]  ;;  %v15424_v43 = vld [vmem:[%s16335_s22 + $0x710] sm:$0xf0] }
 0x88d   : > { %v14134_v54 = vor.u32 %v15427_v2, %v14133_v17  ;;  %v7126_v40 = vmul.f32 0.5, %v18327_v51  ;;  %v7127_v47 = vmul.f32 0.5, %v18332_v5  ;;  %v5160_v7 = vperm.slane %v18424_v50, 0  ;;  %v14109_v33 = vld [vmem:[%s16335_s22 + $0x6f0] sm:$0xf] }
 0x88e   : > { %9337 = vmatpush.bf16.msrb.mxu3 %v13618_v19  ;;  %9351 = vmatpush.bf16.msra.mxu0 %v13714_v8  ;;  %v7210_v31 = vmul.f32 %v7186_v4, %v18379_v9  ;;  %v7211_v19 = vmul.f32 %v7187_v58, %v18385_v60  ;;  %v18408_v8 = vpack.c.bf16 %v7329_v20, %v7317_v13  ;;  %v7138_v20 = vmul.f32 0.5, %v18379_v9  ;;  %v15421_v58 = vld [vmem:[%s16335_s22 + $0x6f8] sm:$0xf0]  ;;  %v14001_v30 = vld [vmem:[%s16335_s22 + $0x618] sm:$0xf] }
 0x88f   : > { %v14122_v4 = vor.u32 %v15424_v43, %v14121_v35  ;;  %v7139_v23 = vmul.f32 0.5, %v18385_v60  ;;  %v15394_v62 = vld [vmem:[%s16335_s22 + $0x620] sm:$0xf0]  ;;  %v14097_v38 = vld [vmem:[%s16335_s22 + $0x6d8] sm:$0xf] }
 0x890   : > { %9365 = vmatpush.bf16.msra.mxu1 %v13810_v14  ;;  %9379 = vmatpush.bf16.msrb.mxu2 %v13906_v59  ;;  %v7234_v57 = vadd.f32 %v7210_v31, %v18379_v9  ;;  %v7235_v29 = vadd.f32 %v7211_v19, %v18385_v60  ;;  %v15733_v24 = vpop.eup %15732  ;;  %v15400_v59 = vld [vmem:[%s16335_s22 + $0x650] sm:$0xf0]  ;;  %v15219_v6 = vld [vmem:[%s16335_s22 + $0xac] sm:$0xf]  ;;  %v14002_v52 = vor.u32 %v15394_v62, %v14001_v30  ;;  %v14265_v2 = vld [vmem:[%s16335_s22 + $0x828] sm:$0xf] }
 0x891   : > { %v14026_v16 = vor.u32 %v15400_v59, %v14025_v15  ;;  %v14085_v59 = vld [vmem:[%s16335_s22 + $0x6c0] sm:$0xf]  ;;  %v14337_v62 = vld [vmem:[%s16335_s22 + $0x8b8] sm:$0xf] }
 0x892   : > { %9338 = vmatpush.bf16.msrb.mxu3 %v13606_v10  ;;  %9352 = vmatpush.bf16.msra.mxu0 %v13702_v63  ;;  %v7258_v39 = vmul.f32 0.7978846, %v7234_v57  ;;  %v7259_v48 = vmul.f32 0.7978846, %v7235_v29  ;;  %v15735_v14 = vpop.eup %15734  ;;  %v7294_v10 = vadd.f32 1.0, %v15733_v24  ;;  %v6975_v5 = vpop.f32.mrf.mxu0 }
 0x893   : > { %v7295_v18 = vadd.f32 1.0, %v15735_v14  ;;  %v15418_v29 = vld [vmem:[%s16335_s22 + $0x6e0] sm:$0xf0]  ;;  %v15460_v24 = vld [vmem:[%s16335_s22 + $0x830] sm:$0xf0] }
 0x894   : > { %9366 = vmatpush.bf16.msra.mxu1 %v13798_v41  ;;  %9380 = vmatpush.bf16.msrb.mxu2 %v13894_v22  ;;  %15736 = vtanh.f32 %v7258_v39  ;;  %v14098_v17 = vor.u32 %v15418_v29, %v14097_v38  ;;  %v14361_v14 = vld [vmem:[%s16335_s22 + $0x8e8] sm:$0xf]  ;;  %v14266_v15 = vor.u32 %v15460_v24, %v14265_v2 }
 0x895   : > { %9339 = vmatmul.bf16.vlgmr.msrb.gmra.mxu3 %v18400_v12  ;;  %9353 = vmatmul.bf16.vlgmr.msra.gmra.mxu0 %v18408_v8  ;;  %15738 = vtanh.f32 %v7259_v48  ;;  %v7319_v31 = vmul.f32 %v7295_v18, %v7127_v47  ;;  %v6989_v22 = vpop.f32.mrf.mxu1  ;;  %v13989_v48 = vld [vmem:[%s16335_s22 + $0x600] sm:$0xf]  ;;  %v15243_v47 = vld [vmem:[%s16335_s22 + $0x16c] sm:$0xf]  ;;  %v13403_v18 = vld [vmem:[%s16335_s22 + $0x174] sm:$0xf0] }
 0x896   : > { %9387 = vmatpush.bf16.msra.mxu3 %v14074_v55  ;;  %9401 = vmatpush.bf16.msrb.mxu0 %v14170_v1  ;;  %v15397_v1 = vld [vmem:[%s16335_s22 + $0x638] sm:$0xf0] }
 0x897   : > { %v14014_v19 = vor.u32 %v15397_v1, %v14013_v32  ;;  %v15216_v32 = vld [vmem:[%s16335_s22 + $0x94] sm:$0xf] }
 0x898   : > { %v6961_v13 = vpop.f32.mrf.mxu3  ;;  %9415 = vmatpush.bf16.msrb.mxu1 %v14266_v15  ;;  %v15451_v15 = vld [vmem:[%s16335_s22 + $0x7e8] sm:$0xf0] }
 0x899   : > { %v6962_v46 = vadd.f32 %v6961_v13, %v5160_v7  ;;  %v15481_v13 = vld [vmem:[%s16335_s22 + $0x8d8] sm:$0xf0] }
 0x89a   : > { %9388 = vmatpush.bf16.msra.mxu3 %v14062_v11  ;;  %9402 = vmatpush.bf16.msrb.mxu0 %v14158_v49  ;;  %v15737_v63 = vpop.eup %15736  ;;  %v7318_v11 = vmul.f32 %v7294_v10, %v7126_v40  ;;  %v14110_v49 = vor.u32 %v15421_v58, %v14109_v33  ;;  %v15415_v10 = vld [vmem:[%s16335_s22 + $0x6c8] sm:$0xf0]  ;;  %v13406_v33 = vor.u32 %v15243_v47, %v13403_v18  ;;  %v15234_v18 = vld [vmem:[%s16335_s22 + $0x124] sm:$0xf] }
 0x89b   : > { %v15739_v55 = vpop.eup %15738  ;;  %v7306_v56 = vadd.f32 1.0, %v15737_v63  ;;  %v6976_v57 = vadd.f32 %v6975_v5, %v6962_v46  ;;  %v14086_v1 = vor.u32 %v15415_v10, %v14085_v59  ;;  %v14349_v5 = vld [vmem:[%s16335_s22 + $0x8d0] sm:$0xf]  ;;  %v15240_v46 = vld [vmem:[%s16335_s22 + $0x154] sm:$0xf] }
 0x89c   : > { %v7307_v51 = vadd.f32 1.0, %v15739_v55  ;;  %v6977_v55 = vpop.f32.mrf.mxu0 }
 0x89d   : > { %v7330_v9 = vmul.f32 %v7306_v56, %v7138_v20  ;;  %v18447_v39 = vadd.f32 %v6989_v22, %v6976_v57  ;;  %v14253_v56 = vld [vmem:[%s16335_s22 + $0x810] sm:$0xf]  ;;  %v15213_v22 = vld [vmem:[%s16335_s22 + $0x7c] sm:$0xf]  ;;  %v15454_v57 = vld [vmem:[%s16335_s22 + $0x800] sm:$0xf0] }
 0x89e   : > { %9389 = vmatpush.bf16.msra.mxu3 %v14050_v36  ;;  %9403 = vmatpush.bf16.msrb.mxu0 %v14146_v27  ;;  %v7331_v41 = vmul.f32 %v7307_v51, %v7139_v23  ;;  %v15391_v36 = vld [vmem:[%s16335_s22 + $0x608] sm:$0xf0]  ;;  %v13307_v27 = vld [vmem:[%s16335_s22 + $0xb4] sm:$0xf0]  ;;  %v13295_v51 = vld [vmem:[%s16335_s22 + $0x9c] sm:$0xf0] }
 0x89f   : > { %v18438_v60 = vpack.c.bf16 %v7330_v9, %v7318_v11  ;;  %v13990_v20 = vor.u32 %v15391_v36, %v13989_v48  ;;  %v6991_v11 = vpop.f32.mrf.mxu1  ;;  %v14350_v9 = vor.u32 %v15481_v13, %v14349_v5  ;;  %v13298_v30 = vor.u32 %v15216_v32, %v13295_v51  ;;  %v13283_v48 = vld [vmem:[%s16335_s22 + $0x84] sm:$0xf0]  ;;  %v15448_v32 = vld [vmem:[%s16335_s22 + $0x7d0] sm:$0xf0]  ;;  %v13259_v5 = vld [vmem:[%s16335_s22 + $0x54] sm:$0xf0] }
 0x8a0   : > { %v18441_v53 = vpack.c.bf16 %v7331_v41, %v7319_v31  ;;  %v6963_v35 = vpop.f32.mrf.mxu3 }
 0x8a1   : > { %9367 = vmatmul.bf16.vlgmr.msra.gmra.mxu1 %v18438_v60  ;;  %v6964_v40 = vadd.f32 %v6963_v35, %v5160_v7  ;;  %v15210_v35 = vld [vmem:[%s16335_s22 + $0x64] sm:$0xf] }
 0x8a2   : > { %9390 = vmatpush.bf16.msra.mxu3 %v14038_v34  ;;  %9404 = vmatpush.bf16.msrb.mxu0 %v14134_v54  ;;  %v7152_v34 = vmul.f32 0.044715, %v18447_v39  ;;  %v15484_v54 = vld [vmem:[%s16335_s22 + $0x8f0] sm:$0xf0] }
 0x8a3   : > { %9381 = vmatmul.bf16.vlgmr.msrb.gmra.mxu2 %v18441_v53  ;;  %v14362_v43 = vor.u32 %v15484_v54, %v14361_v14  ;;  %v6978_v7 = vadd.f32 %v6977_v55, %v6964_v40  ;;  %v13286_v14 = vor.u32 %v15213_v22, %v13283_v48  ;;  %v14325_v54 = vld [vmem:[%s16335_s22 + $0x8a0] sm:$0xf]  ;;  %v13271_v40 = vld [vmem:[%s16335_s22 + $0x6c] sm:$0xf0] }
 0x8a4   : > { %v7176_v63 = vmul.f32 %v7152_v34, %v18447_v39  ;;  %v14229_v34 = vld [vmem:[%s16335_s22 + $0x7e0] sm:$0xf]  ;;  %v13367_v55 = vld [vmem:[%s16335_s22 + $0x12c] sm:$0xf0] }
 0x8a5   : > { %9429 = vmatpush.bf16.msra.mxu2 %v14362_v43  ;;  %v18473_v41 = vadd.f32 %v6991_v11, %v6978_v7  ;;  %v14230_v10 = vor.u32 %v15451_v15, %v14229_v34  ;;  %v15207_v7 = vld [vmem:[%s16335_s22 + $0x4c] sm:$0xf]  ;;  %v13370_v51 = vor.u32 %v15234_v18, %v13367_v55  ;;  %v15201_v34 = vld [vmem:[%s16335_s22 + $0x1c] sm:$0xf]  ;;  %v14193_v15 = vld [vmem:[%s16335_s22 + $0x798] sm:$0xf] }
 0x8a6   : > { %9391 = vmatpush.bf16.msra.mxu3 %v14026_v16  ;;  %9405 = vmatpush.bf16.msrb.mxu0 %v14122_v4  ;;  %v13310_v16 = vor.u32 %v15219_v6, %v13307_v27  ;;  %v15457_v4 = vld [vmem:[%s16335_s22 + $0x818] sm:$0xf0]  ;;  %v7200_v23 = vmul.f32 %v7176_v63, %v18447_v39  ;;  %v15478_v27 = vld [vmem:[%s16335_s22 + $0x8c0] sm:$0xf0]  ;;  %v15475_v63 = vld [vmem:[%s16335_s22 + $0x8a8] sm:$0xf0] }
 0x8a7   : > { %v14254_v58 = vor.u32 %v15457_v4, %v14253_v56  ;;  %v7164_v29 = vmul.f32 0.044715, %v18473_v41  ;;  %v14338_v24 = vor.u32 %v15478_v27, %v14337_v62  ;;  %v14326_v47 = vor.u32 %v15475_v63, %v14325_v54  ;;  %v15472_v56 = vld [vmem:[%s16335_s22 + $0x890] sm:$0xf0]  ;;  %v15231_v11 = vld [vmem:[%s16335_s22 + $0x10c] sm:$0xf] }
 0x8a8   : > { %v7224_v31 = vadd.f32 %v7200_v23, %v18447_v39  ;;  %v13274_v23 = vor.u32 %v15210_v35, %v13271_v40  ;;  %v15204_v62 = vld [vmem:[%s16335_s22 + $0x34] sm:$0xf]  ;;  %v13343_v27 = vld [vmem:[%s16335_s22 + $0xfc] sm:$0xf0]  ;;  %v15442_v54 = vld [vmem:[%s16335_s22 + $0x7a0] sm:$0xf0] }
 0x8a9   : > { %9416 = vmatpush.bf16.msrb.mxu1 %v14254_v58  ;;  %9430 = vmatpush.bf16.msra.mxu2 %v14350_v9  ;;  %v7188_v2 = vmul.f32 %v7164_v29, %v18473_v41  ;;  %v7003_v58 = vpop.f32.mrf.mxu2  ;;  %v13355_v9 = vld [vmem:[%s16335_s22 + $0x114] sm:$0xf0]  ;;  %v7128_v63 = vmul.f32 0.5, %v18447_v39  ;;  %v15466_v18 = vld [vmem:[%s16335_s22 + $0x860] sm:$0xf0]  ;;  %v7140_v55 = vmul.f32 0.5, %v18473_v41 }
 0x8aa   : > { %9392 = vmatpush.bf16.msra.mxu3 %v14014_v19  ;;  %9406 = vmatpush.bf16.msrb.mxu0 %v14110_v49  ;;  %v13391_v19 = vld [vmem:[%s16335_s22 + $0x15c] sm:$0xf0]  ;;  %v14241_v49 = vld [vmem:[%s16335_s22 + $0x7f8] sm:$0xf]  ;;  %v7248_v38 = vmul.f32 0.7978846, %v7224_v31  ;;  %v13358_v29 = vor.u32 %v15231_v11, %v13355_v9 }
 0x8ab   : > { %v13394_v36 = vor.u32 %v15240_v46, %v13391_v19  ;;  %v14242_v6 = vor.u32 %v15454_v57, %v14241_v49  ;;  %v7212_v59 = vmul.f32 %v7188_v2, %v18473_v41  ;;  %v5161_v46 = vperm.slane %v18424_v50, 1  ;;  %v14205_v31 = vld [vmem:[%s16335_s22 + $0x7b0] sm:$0xf]  ;;  %v15445_v19 = vld [vmem:[%s16335_s22 + $0x7b8] sm:$0xf0] }
 0x8ac   : > { %15740 = vtanh.f32 %v7248_v38  ;;  %v15469_v49 = vld [vmem:[%s16335_s22 + $0x878] sm:$0xf0]  ;;  %v13262_v57 = vor.u32 %v15207_v7, %v13259_v5  ;;  %v13247_v38 = vld [vmem:[%s16335_s22 + $0x3c] sm:$0xf0]  ;;  %v14206_v48 = vor.u32 %v15445_v19, %v14205_v31  ;;  %v13223_v39 = vld [vmem:[%s16335_s22 + $0xc] sm:$0xf0] }
 0x8ad   : > { %9417 = vmatpush.bf16.msrb.mxu1 %v14242_v6  ;;  %9431 = vmatpush.bf16.msra.mxu2 %v14338_v24  ;;  %v15228_v6 = vld [vmem:[%s16335_s22 + $0xf4] sm:$0xf]  ;;  %v15315_v11 = vld [vmem:[%s16335_s22 + $0x3ac] sm:$0xf]  ;;  %v13691_v9 = vld [vmem:[%s16335_s22 + $0x3b4] sm:$0xf0] }
 0x8ae   : > { %9393 = vmatpush.bf16.msra.mxu3 %v14002_v52  ;;  %9407 = vmatpush.bf16.msrb.mxu0 %v14098_v17  ;;  %v15237_v52 = vld [vmem:[%s16335_s22 + $0x13c] sm:$0xf]  ;;  %v13379_v17 = vld [vmem:[%s16335_s22 + $0x144] sm:$0xf0]  ;;  %v13346_v40 = vor.u32 %v15228_v6, %v13343_v27  ;;  %v15463_v19 = vld [vmem:[%s16335_s22 + $0x848] sm:$0xf0] }
 0x8af   : > { %v13382_v43 = vor.u32 %v15237_v52, %v13379_v17  ;;  %v7004_v52 = vadd.f32 %v7003_v58, %v5161_v46  ;;  %v14277_v58 = vld [vmem:[%s16335_s22 + $0x840] sm:$0xf]  ;;  %v13595_v6 = vld [vmem:[%s16335_s22 + $0x2f4] sm:$0xf0]  ;;  %v15222_v27 = vld [vmem:[%s16335_s22 + $0xc4] sm:$0xf] }
 0x8b1   : > { %9418 = vmatpush.bf16.msrb.mxu1 %v14230_v10  ;;  %9432 = vmatpush.bf16.msra.mxu2 %v14326_v47  ;;  %v13235_v10 = vld [vmem:[%s16335_s22 + $0x24] sm:$0xf0]  ;;  %v14194_v47 = vor.u32 %v15442_v54, %v14193_v15  ;;  %v15264_v54 = vld [vmem:[%s16335_s22 + $0x214] sm:$0xf] }
 0x8b2   : > { %9394 = vmatpush.bf16.msra.mxu3 %v13990_v20  ;;  %9408 = vmatpush.bf16.msrb.mxu0 %v14086_v1  ;;  %v7236_v20 = vadd.f32 %v7212_v59, %v18473_v41  ;;  %v14313_v1 = vld [vmem:[%s16335_s22 + $0x888] sm:$0xf]  ;;  %v15741_v22 = vpop.eup %15740  ;;  %v7031_v2 = vpop.f32.mrf.mxu0  ;;  %v14289_v59 = vld [vmem:[%s16335_s22 + $0x858] sm:$0xf]  ;;  %v15439_v41 = vld [vmem:[%s16335_s22 + $0x788] sm:$0xf0] }
 0x8b3   : > { %v14314_v13 = vor.u32 %v15472_v56, %v14313_v1  ;;  %v7296_v17 = vadd.f32 1.0, %v15741_v22  ;;  %v13331_v1 = vld [vmem:[%s16335_s22 + $0xe4] sm:$0xf0] }
 0x8b4   : > { %v7260_v4 = vmul.f32 0.7978846, %v7236_v20 }
 0x8b5   : > { %9433 = vmatpush.bf16.msra.mxu2 %v14314_v13  ;;  %v7320_v7 = vmul.f32 %v7296_v17, %v7128_v63  ;;  %v13238_v13 = vor.u32 %v15201_v34, %v13235_v10  ;;  %v15288_v63 = vld [vmem:[%s16335_s22 + $0x2d4] sm:$0xf] }
 0x8b6   : > { %9443 = vmatpush.bf16.msrb.mxu3 %v13310_v16  ;;  %9457 = vmatpush.bf16.msra.mxu0 %v13406_v33  ;;  %v14217_v16 = vld [vmem:[%s16335_s22 + $0x7c8] sm:$0xf]  ;;  %15742 = vtanh.f32 %v7260_v4  ;;  %v15198_v4 = vld [vmem:[%s16335_s22 + $0x4] sm:$0xf] }
 0x8b7   : > { %v14218_v33 = vor.u32 %v15448_v32, %v14217_v16  ;;  %v14290_v16 = vor.u32 %v15466_v18, %v14289_v59  ;;  %v15225_v32 = vld [vmem:[%s16335_s22 + $0xdc] sm:$0xf]  ;;  %v13487_v59 = vld [vmem:[%s16335_s22 + $0x21c] sm:$0xf0] }
 0x8b8   : > { %v7017_v24 = vpop.f32.mrf.mxu3  ;;  %v13334_v31 = vor.u32 %v15225_v32, %v13331_v1  ;;  %v13490_v10 = vor.u32 %v15264_v54, %v13487_v59  ;;  %v5162_v54 = vperm.slane %v18424_v50, 2 }
 0x8b9   : > { %9419 = vmatpush.bf16.msrb.mxu1 %v14218_v33  ;;  %v14181_v33 = vld [vmem:[%s16335_s22 + $0x780] sm:$0xf] }
 0x8ba   : > { %9444 = vmatpush.bf16.msrb.mxu3 %v13298_v30  ;;  %9458 = vmatpush.bf16.msra.mxu0 %v13394_v36  ;;  %v14301_v30 = vld [vmem:[%s16335_s22 + $0x870] sm:$0xf]  ;;  %v14182_v22 = vor.u32 %v15439_v41, %v14181_v33 }
 0x8bb   : > { %v14302_v36 = vor.u32 %v15469_v49, %v14301_v30  ;;  %v14278_v49 = vor.u32 %v15463_v19, %v14277_v58  ;;  %v13667_v58 = vld [vmem:[%s16335_s22 + $0x384] sm:$0xf0]  ;;  %v15282_v19 = vld [vmem:[%s16335_s22 + $0x2a4] sm:$0xf] }
 0x8bc   : > { %v15743_v35 = vpop.eup %15742 }
 0x8bd   : > { %9420 = vmatpush.bf16.msrb.mxu1 %v14206_v48  ;;  %v7308_v20 = vadd.f32 1.0, %v15743_v35  ;;  %9434 = vmatpush.bf16.msra.mxu2 %v14302_v36  ;;  %v7033_v35 = vpop.f32.mrf.mxu0 }
 0x8be   : > { %9445 = vmatpush.bf16.msrb.mxu3 %v13286_v14  ;;  %9459 = vmatpush.bf16.msra.mxu0 %v13382_v43  ;;  %v13250_v14 = vor.u32 %v15204_v62, %v13247_v38  ;;  %v7018_v43 = vadd.f32 %v7017_v24, %v7004_v52  ;;  %v13499_v62 = vld [vmem:[%s16335_s22 + $0x234] sm:$0xf0]  ;;  %v15291_v38 = vld [vmem:[%s16335_s22 + $0x2ec] sm:$0xf]  ;;  %v13319_v52 = vld [vmem:[%s16335_s22 + $0xcc] sm:$0xf0] }
 0x8bf   : > { %v13598_v24 = vor.u32 %v15291_v38, %v13595_v6  ;;  %v13322_v15 = vor.u32 %v15222_v27, %v13319_v52  ;;  %v15255_v52 = vld [vmem:[%s16335_s22 + $0x1cc] sm:$0xf] }
 0x8c0   : > { %v18525_v56 = vadd.f32 %v7031_v2, %v7018_v43  ;;  %v7019_v17 = vpop.f32.mrf.mxu3  ;;  %v13226_v2 = vor.u32 %v15198_v4, %v13223_v39  ;;  %v13694_v43 = vor.u32 %v15315_v11, %v13691_v9  ;;  %v15309_v4 = vld [vmem:[%s16335_s22 + $0x37c] sm:$0xf] }
 0x8c1   : > { %9421 = vmatpush.bf16.msrb.mxu1 %v14194_v47  ;;  %9435 = vmatpush.bf16.msra.mxu2 %v14290_v16 }
 0x8c2   : > { %9446 = vmatpush.bf16.msrb.mxu3 %v13274_v23  ;;  %9460 = vmatpush.bf16.msra.mxu0 %v13370_v51  ;;  %v7005_v23 = vpop.f32.mrf.mxu2  ;;  %v7332_v51 = vmul.f32 %v7308_v20, %v7140_v55  ;;  %v7153_v5 = vmul.f32 0.044715, %v18525_v56  ;;  %v15312_v55 = vld [vmem:[%s16335_s22 + $0x394] sm:$0xf]  ;;  %v13679_v20 = vld [vmem:[%s16335_s22 + $0x39c] sm:$0xf0] }
 0x8c3   : > { %v13682_v39 = vor.u32 %v15312_v55, %v13679_v20  ;;  %v13439_v55 = vld [vmem:[%s16335_s22 + $0x1bc] sm:$0xf0]  ;;  %v15276_v20 = vld [vmem:[%s16335_s22 + $0x274] sm:$0xf] }
 0x8c4   : > { %v18536_v30 = vpack.c.bf16 %v7332_v51, %v7320_v7  ;;  %v7177_v48 = vmul.f32 %v7153_v5, %v18525_v56  ;;  %v13475_v7 = vld [vmem:[%s16335_s22 + $0x204] sm:$0xf0]  ;;  %v15285_v51 = vld [vmem:[%s16335_s22 + $0x2bc] sm:$0xf] }
 0x8c5   : > { %9422 = vmatpush.bf16.msrb.mxu1 %v14182_v22  ;;  %9436 = vmatpush.bf16.msra.mxu2 %v14278_v49  ;;  %v13463_v22 = vld [vmem:[%s16335_s22 + $0x1ec] sm:$0xf0]  ;;  %v13670_v49 = vor.u32 %v15309_v4, %v13667_v58  ;;  %v15300_v4 = vld [vmem:[%s16335_s22 + $0x334] sm:$0xf]  ;;  %v7129_v58 = vmul.f32 0.5, %v18525_v56 }
 0x8c6   : > { %9447 = vmatpush.bf16.msrb.mxu3 %v13262_v57  ;;  %9461 = vmatpush.bf16.msra.mxu0 %v13358_v29  ;;  %v15267_v57 = vld [vmem:[%s16335_s22 + $0x22c] sm:$0xf]  ;;  %v7006_v29 = vadd.f32 %v7005_v23, %v5161_v46  ;;  %v7201_v46 = vmul.f32 %v7177_v48, %v18525_v56  ;;  %v15261_v23 = vld [vmem:[%s16335_s22 + $0x1fc] sm:$0xf]  ;;  %v15306_v48 = vld [vmem:[%s16335_s22 + $0x364] sm:$0xf] }
 0x8c7   : > { %v13502_v36 = vor.u32 %v15267_v57, %v13499_v62  ;;  %9395 = vmatmul.bf16.vlgmr.msra.gmra.mxu3 %v18536_v30  ;;  %v13478_v5 = vor.u32 %v15261_v23, %v13475_v7  ;;  %v13559_v62 = vld [vmem:[%s16335_s22 + $0x2ac] sm:$0xf0]  ;;  %v13535_v7 = vld [vmem:[%s16335_s22 + $0x27c] sm:$0xf0] }
 0x8c8   : > { %v7020_v34 = vadd.f32 %v7019_v17, %v7006_v29  ;;  %v7225_v47 = vadd.f32 %v7201_v46, %v18525_v56  ;;  %v13562_v6 = vor.u32 %v15282_v19, %v13559_v62  ;;  %v13451_v17 = vld [vmem:[%s16335_s22 + $0x1d4] sm:$0xf0]  ;;  %v15249_v19 = vld [vmem:[%s16335_s22 + $0x19c] sm:$0xf] }
 0x8c9   : > { %9471 = vmatpush.bf16.msra.mxu1 %v13502_v36  ;;  %9485 = vmatpush.bf16.msrb.mxu2 %v13598_v24  ;;  %v13655_v36 = vld [vmem:[%s16335_s22 + $0x36c] sm:$0xf0]  ;;  %v13454_v46 = vor.u32 %v15255_v52, %v13451_v17  ;;  %v13619_v52 = vld [vmem:[%s16335_s22 + $0x324] sm:$0xf0] }
 0x8ca   : > { %9448 = vmatpush.bf16.msrb.mxu3 %v13250_v14  ;;  %9462 = vmatpush.bf16.msra.mxu0 %v13346_v40  ;;  %v18548_v14 = vpop.f32.mrf.mxu1  ;;  %v13583_v40 = vld [vmem:[%s16335_s22 + $0x2dc] sm:$0xf0]  ;;  %v18556_v18 = vadd.f32 %v7033_v35, %v7020_v34  ;;  %v18560_v32 = vpop.f32.mrf.mxu2  ;;  %v7249_v33 = vmul.f32 0.7978846, %v7225_v47  ;;  %v13658_v24 = vor.u32 %v15306_v48, %v13655_v36  ;;  %v15279_v34 = vld [vmem:[%s16335_s22 + $0x28c] sm:$0xf] }
 0x8cb   : > { %v13586_v16 = vor.u32 %v15288_v63, %v13583_v40  ;;  %v15303_v35 = vld [vmem:[%s16335_s22 + $0x34c] sm:$0xf]  ;;  %v15252_v47 = vld [vmem:[%s16335_s22 + $0x1b4] sm:$0xf]  ;;  %v15273_v48 = vld [vmem:[%s16335_s22 + $0x25c] sm:$0xf] }
 0x8cc   : > { %v7165_v1 = vmul.f32 0.044715, %v18556_v18  ;;  %15744 = vtanh.f32 %v7249_v33  ;;  %v13442_v23 = vor.u32 %v15252_v47, %v13439_v55  ;;  %v13523_v36 = vld [vmem:[%s16335_s22 + $0x264] sm:$0xf0] }
 0x8cd   : > { %9472 = vmatpush.bf16.msra.mxu1 %v13490_v10  ;;  %9486 = vmatpush.bf16.msrb.mxu2 %v13586_v16  ;;  %v13526_v17 = vor.u32 %v15273_v48, %v13523_v36  ;;  %v15408_v48 = vld [vmem:[%s16335_s22 + $0x694] sm:$0xf]  ;;  %v14063_v36 = vld [vmem:[%s16335_s22 + $0x69c] sm:$0xf0] }
 0x8ce   : > { %9449 = vmatpush.bf16.msrb.mxu3 %v13238_v13  ;;  %9463 = vmatpush.bf16.msra.mxu0 %v13334_v31  ;;  %v7189_v41 = vmul.f32 %v7165_v1, %v18556_v18  ;;  %v13571_v13 = vld [vmem:[%s16335_s22 + $0x2c4] sm:$0xf0]  ;;  %v15258_v31 = vld [vmem:[%s16335_s22 + $0x1e4] sm:$0xf] }
 0x8cf   : > { %v13574_v11 = vor.u32 %v15285_v51, %v13571_v13  ;;  %v13466_v57 = vor.u32 %v15258_v31, %v13463_v22  ;;  %v7046_v51 = vadd.f32 %v18548_v14, %v5162_v54  ;;  %v15339_v13 = vld [vmem:[%s16335_s22 + $0x46c] sm:$0xf]  ;;  %v13787_v22 = vld [vmem:[%s16335_s22 + $0x474] sm:$0xf0]  ;;  %v7141_v14 = vmul.f32 0.5, %v18556_v18 }
 0x8d0   : > { %v7213_v9 = vmul.f32 %v7189_v41, %v18556_v18  ;;  %v13538_v41 = vor.u32 %v15276_v20, %v13535_v7 }
 0x8d1   : > { %9473 = vmatpush.bf16.msra.mxu1 %v13478_v5  ;;  %9487 = vmatpush.bf16.msrb.mxu2 %v13574_v11 }
 0x8d2   : > { %9450 = vmatpush.bf16.msrb.mxu3 %v13226_v2  ;;  %9464 = vmatpush.bf16.msra.mxu0 %v13322_v15  ;;  %v18575_v38 = vpop.f32.mrf.mxu1  ;;  %v7237_v29 = vadd.f32 %v7213_v9, %v18556_v18  ;;  %v5163_v2 = vperm.slane %v18424_v50, 3  ;;  %v13547_v15 = vld [vmem:[%s16335_s22 + $0x294] sm:$0xf0]  ;;  %v18586_v59 = vpop.f32.mrf.mxu2  ;;  %v7060_v9 = vadd.f32 %v18560_v32, %v7046_v51  ;;  %v15270_v51 = vld [vmem:[%s16335_s22 + $0x244] sm:$0xf] }
 0x8d3   : > { %v13550_v10 = vor.u32 %v15279_v34, %v13547_v15  ;;  %v7087_v63 = vpop.f32.mrf.mxu0  ;;  %v15745_v40 = vpop.eup %15744 }
 0x8d4   : > { %v7261_v27 = vmul.f32 0.7978846, %v7237_v29  ;;  %v7088_v16 = vadd.f32 %v7087_v63, %v5163_v2  ;;  %v7297_v5 = vadd.f32 1.0, %v15745_v40  ;;  %v15246_v63 = vld [vmem:[%s16335_s22 + $0x184] sm:$0xf] }
 0x8d5   : > { %9474 = vmatpush.bf16.msra.mxu1 %v13466_v57  ;;  %9488 = vmatpush.bf16.msrb.mxu2 %v13562_v6 }
 0x8d6   : > { %9499 = vmatpush.bf16.msra.mxu3 %v13694_v43  ;;  %15746 = vtanh.f32 %v7261_v27  ;;  %v13643_v43 = vld [vmem:[%s16335_s22 + $0x354] sm:$0xf0]  ;;  %v15297_v27 = vld [vmem:[%s16335_s22 + $0x31c] sm:$0xf] }
 0x8d7   : > { %9451 = vmatmul.bf16.vlgmr.msrb.gmra.mxu3 %v18253_v45  ;;  %v13646_v1 = vor.u32 %v15303_v35, %v13643_v43  ;;  %v13790_v35 = vor.u32 %v15339_v13, %v13787_v22  ;;  %v15294_v43 = vld [vmem:[%s16335_s22 + $0x304] sm:$0xf]  ;;  %v13622_v20 = vor.u32 %v15297_v27, %v13619_v52 }
 0x8d8   : > { %v7073_v62 = vpop.f32.mrf.mxu3 }
 0x8d9   : > { %9475 = vmatpush.bf16.msra.mxu1 %v13454_v46  ;;  %9489 = vmatpush.bf16.msrb.mxu2 %v13550_v10  ;;  %v18611_v32 = vadd.f32 %v7073_v62, %v7060_v9  ;;  %v7321_v46 = vmul.f32 %v7297_v5, %v7129_v58  ;;  %v15336_v10 = vld [vmem:[%s16335_s22 + $0x454] sm:$0xf]  ;;  %v14075_v58 = vld [vmem:[%s16335_s22 + $0x6b4] sm:$0xf0] }
 0x8da   : > { %9500 = vmatpush.bf16.msra.mxu3 %v13682_v39  ;;  %v13631_v39 = vld [vmem:[%s16335_s22 + $0x33c] sm:$0xf0]  ;;  %v7101_v33 = vpop.f32.mrf.mxu1 }
 0x8db   : > { %v13634_v31 = vor.u32 %v15300_v4, %v13631_v39  ;;  %v7102_v57 = vadd.f32 %v7101_v33, %v7088_v16  ;;  %v7115_v6 = vpop.f32.mrf.mxu2  ;;  %v7154_v15 = vmul.f32 0.044715, %v18611_v32  ;;  %v13775_v16 = vld [vmem:[%s16335_s22 + $0x45c] sm:$0xf0]  ;;  %v7048_v4 = vadd.f32 %v18575_v38, %v5162_v54 }
 0x8dc   : > { %v15747_v11 = vpop.eup %15746  ;;  %v13778_v13 = vor.u32 %v15336_v10, %v13775_v16  ;;  %v15405_v10 = vld [vmem:[%s16335_s22 + $0x67c] sm:$0xf]  ;;  %v15327_v16 = vld [vmem:[%s16335_s22 + $0x40c] sm:$0xf] }
 0x8dd   : > { %v7309_v29 = vadd.f32 1.0, %v15747_v11  ;;  %9476 = vmatpush.bf16.msra.mxu1 %v13442_v23  ;;  %9490 = vmatpush.bf16.msrb.mxu2 %v13538_v41  ;;  %v18615_v18 = vadd.f32 %v7115_v6, %v7102_v57  ;;  %v7178_v39 = vmul.f32 %v7154_v15, %v18611_v32  ;;  %v13607_v23 = vld [vmem:[%s16335_s22 + $0x30c] sm:$0xf0]  ;;  %v15411_v41 = vld [vmem:[%s16335_s22 + $0x6ac] sm:$0xf]  ;;  %v7062_v50 = vadd.f32 %v18586_v59, %v7048_v4 }
 0x8de   : > { %9501 = vmatpush.bf16.msra.mxu3 %v13670_v49  ;;  %v13427_v49 = vld [vmem:[%s16335_s22 + $0x1a4] sm:$0xf0]  ;;  %v13610_v22 = vor.u32 %v15294_v43, %v13607_v23  ;;  %v14078_v62 = vor.u32 %v15411_v41, %v14075_v58  ;;  %v14066_v15 = vor.u32 %v15408_v48, %v14063_v36  ;;  %v15324_v58 = vld [vmem:[%s16335_s22 + $0x3f4] sm:$0xf] }
 0x8df   : > { %v13430_v56 = vor.u32 %v15249_v19, %v13427_v49  ;;  %v7333_v34 = vmul.f32 %v7309_v29, %v7141_v14  ;;  %v7155_v40 = vmul.f32 0.044715, %v18615_v18  ;;  %v7202_v38 = vmul.f32 %v7178_v39, %v18611_v32  ;;  %v15333_v19 = vld [vmem:[%s16335_s22 + $0x43c] sm:$0xf]  ;;  %v13763_v49 = vld [vmem:[%s16335_s22 + $0x444] sm:$0xf0] }
 0x8e0   : > { %v13766_v27 = vor.u32 %v15333_v19, %v13763_v49  ;;  %v15396_v49 = vld [vmem:[%s16335_s22 + $0x634] sm:$0xf]  ;;  %v7131_v36 = vmul.f32 0.5, %v18615_v18 }
 0x8e1   : > { %v18624_v55 = vpack.c.bf16 %v7333_v34, %v7321_v46  ;;  %9477 = vmatpush.bf16.msra.mxu1 %v13430_v56  ;;  %9491 = vmatpush.bf16.msrb.mxu2 %v13526_v17  ;;  %v7179_v33 = vmul.f32 %v7155_v40, %v18615_v18  ;;  %v7226_v59 = vadd.f32 %v7202_v38, %v18611_v32  ;;  %v15330_v17 = vld [vmem:[%s16335_s22 + $0x424] sm:$0xf]  ;;  %v15399_v38 = vld [vmem:[%s16335_s22 + $0x64c] sm:$0xf] }
 0x8e2   : > { %9502 = vmatpush.bf16.msra.mxu3 %v13658_v24  ;;  %v7089_v24 = vpop.f32.mrf.mxu0  ;;  %v7103_v54 = vpop.f32.mrf.mxu1 }
 0x8e3   : > { %v7090_v47 = vadd.f32 %v7089_v24, %v5163_v2  ;;  %v13511_v2 = vld [vmem:[%s16335_s22 + $0x24c] sm:$0xf0]  ;;  %9409 = vmatmul.bf16.vlgmr.msrb.gmra.mxu0 %v18624_v55  ;;  %v7203_v11 = vmul.f32 %v7179_v33, %v18615_v18  ;;  %v7117_v57 = vpop.f32.mrf.mxu2  ;;  %v7250_v46 = vmul.f32 0.7978846, %v7226_v59  ;;  %v7130_v59 = vmul.f32 0.5, %v18611_v32 }
 0x8e4   : > { %v13514_v5 = vor.u32 %v15270_v51, %v13511_v2  ;;  %9513 = vmatpush.bf16.msrb.mxu0 %v13790_v35  ;;  %v13751_v24 = vld [vmem:[%s16335_s22 + $0x42c] sm:$0xf0] }
 0x8e5   : > { %v7104_v9 = vadd.f32 %v7103_v54, %v7090_v47  ;;  %v7227_v29 = vadd.f32 %v7203_v11, %v18615_v18  ;;  %v13754_v47 = vor.u32 %v15330_v17, %v13751_v24  ;;  %15748 = vtanh.f32 %v7250_v46  ;;  %v14039_v51 = vld [vmem:[%s16335_s22 + $0x66c] sm:$0xf0]  ;;  %v14027_v54 = vld [vmem:[%s16335_s22 + $0x654] sm:$0xf0]  ;;  %v15387_v17 = vld [vmem:[%s16335_s22 + $0x5ec] sm:$0xf] }
 0x8e6   : > { %9503 = vmatpush.bf16.msra.mxu3 %v13646_v1  ;;  %v13415_v1 = vld [vmem:[%s16335_s22 + $0x18c] sm:$0xf0]  ;;  %9492 = vmatpush.bf16.msrb.mxu2 %v13514_v5  ;;  %v13727_v5 = vld [vmem:[%s16335_s22 + $0x3fc] sm:$0xf0]  ;;  %v14030_v19 = vor.u32 %v15399_v38, %v14027_v54  ;;  %v15390_v38 = vld [vmem:[%s16335_s22 + $0x604] sm:$0xf] }
 0x8e7   : > { %v13418_v7 = vor.u32 %v15246_v63, %v13415_v1  ;;  %v18648_v56 = vadd.f32 %v7117_v57, %v7104_v9  ;;  %v7251_v35 = vmul.f32 0.7978846, %v7227_v29  ;;  %v14051_v63 = vld [vmem:[%s16335_s22 + $0x684] sm:$0xf0]  ;;  %v13739_v1 = vld [vmem:[%s16335_s22 + $0x414] sm:$0xf0]  ;;  %v13730_v11 = vor.u32 %v15324_v58, %v13727_v5 }
 0x8e8   : > { %9514 = vmatpush.bf16.msrb.mxu0 %v13778_v13  ;;  %v14054_v39 = vor.u32 %v15405_v10, %v14051_v63  ;;  %v13742_v33 = vor.u32 %v15327_v16, %v13739_v1  ;;  %v15363_v29 = vld [vmem:[%s16335_s22 + $0x52c] sm:$0xf]  ;;  %v13703_v10 = vld [vmem:[%s16335_s22 + $0x3cc] sm:$0xf0]  ;;  %v15393_v63 = vld [vmem:[%s16335_s22 + $0x61c] sm:$0xf] }
 0x8e9   : > { %9478 = vmatpush.bf16.msra.mxu1 %v13418_v7  ;;  %v7167_v52 = vmul.f32 0.044715, %v18648_v56  ;;  %15750 = vtanh.f32 %v7251_v35  ;;  %v15402_v7 = vld [vmem:[%s16335_s22 + $0x664] sm:$0xf]  ;;  %v7143_v35 = vmul.f32 0.5, %v18648_v56 }
 0x8ea   : > { %9504 = vmatpush.bf16.msra.mxu3 %v13634_v31  ;;  %v7075_v31 = vpop.f32.mrf.mxu3  ;;  %v15435_v16 = vld [vmem:[%s16335_s22 + $0x76c] sm:$0xf]  ;;  %v14171_v1 = vld [vmem:[%s16335_s22 + $0x774] sm:$0xf0]  ;;  %v15384_v5 = vld [vmem:[%s16335_s22 + $0x5d4] sm:$0xf] }
 0x8eb   : > { %v18645_v14 = vadd.f32 %v7075_v31, %v7062_v50  ;;  %v7191_v43 = vmul.f32 %v7167_v52, %v18648_v56  ;;  %v14042_v50 = vor.u32 %v15402_v7, %v14039_v51  ;;  %v15749_v13 = vpop.eup %15748  ;;  %v15321_v31 = vld [vmem:[%s16335_s22 + $0x3dc] sm:$0xf]  ;;  %v13883_v52 = vld [vmem:[%s16335_s22 + $0x534] sm:$0xf0]  ;;  %v15360_v51 = vld [vmem:[%s16335_s22 + $0x514] sm:$0xf]  ;;  %v14174_v58 = vor.u32 %v15435_v16, %v14171_v1 }
 0x8ec   : > { %9515 = vmatpush.bf16.msrb.mxu0 %v13766_v27  ;;  %v7298_v57 = vadd.f32 1.0, %v15749_v13  ;;  %v13991_v54 = vld [vmem:[%s16335_s22 + $0x60c] sm:$0xf0]  ;;  %v15432_v13 = vld [vmem:[%s16335_s22 + $0x754] sm:$0xf] }
 0x8ed   : > { %v7166_v6 = vmul.f32 0.044715, %v18645_v14  ;;  %v7142_v46 = vmul.f32 0.5, %v18645_v14  ;;  %v15351_v1 = vld [vmem:[%s16335_s22 + $0x4cc] sm:$0xf] }
 0x8ee   : > { %9505 = vmatpush.bf16.msra.mxu3 %v13622_v20  ;;  %v7215_v20 = vmul.f32 %v7191_v43, %v18648_v56 }
 0x8ef   : > { %v7190_v34 = vmul.f32 %v7166_v6, %v18645_v14  ;;  %v15751_v9 = vpop.eup %15750 }
 0x8f0   : > { %v7239_v23 = vadd.f32 %v7215_v20, %v18648_v56  ;;  %9516 = vmatpush.bf16.msrb.mxu0 %v13754_v47  ;;  %v7299_v6 = vadd.f32 1.0, %v15751_v9  ;;  %v14003_v20 = vld [vmem:[%s16335_s22 + $0x624] sm:$0xf0]  ;;  %v13886_v56 = vor.u32 %v15363_v29, %v13883_v52  ;;  %v15381_v29 = vld [vmem:[%s16335_s22 + $0x5bc] sm:$0xf] }
 0x8f1   : > { %v7214_v40 = vmul.f32 %v7190_v34, %v18645_v14  ;;  %v13979_v34 = vld [vmem:[%s16335_s22 + $0x5f4] sm:$0xf0] }
 0x8f2   : > { %9506 = vmatpush.bf16.msra.mxu3 %v13610_v22  ;;  %v7263_v41 = vmul.f32 0.7978846, %v7239_v23  ;;  %v13715_v22 = vld [vmem:[%s16335_s22 + $0x3e4] sm:$0xf0]  ;;  %v13982_v23 = vor.u32 %v15387_v17, %v13979_v34  ;;  %v13301_v17 = vld [vmem:[%s16335_s22 + $0x98] sm:$0xf] }
 0x8f3   : > { %v7238_v4 = vadd.f32 %v7214_v40, %v18645_v14  ;;  %9465 = vmatmul.bf16.vlgmr.msra.gmra.mxu0 %v18255_v0  ;;  %v13718_v27 = vor.u32 %v15321_v31, %v13715_v22  ;;  %v7322_v40 = vmul.f32 %v7298_v57, %v7130_v59  ;;  %v7323_v14 = vmul.f32 %v7299_v6, %v7131_v36  ;;  %v13313_v31 = vld [vmem:[%s16335_s22 + $0xb0] sm:$0xf]  ;;  %v15221_v22 = vld [vmem:[%s16335_s22 + $0xb8] sm:$0xf0]  ;;  %v13859_v59 = vld [vmem:[%s16335_s22 + $0x504] sm:$0xf0] }
 0x8f4   : > { %9517 = vmatpush.bf16.msrb.mxu0 %v13742_v33  ;;  %v13994_v57 = vor.u32 %v15390_v38, %v13991_v54  ;;  %v13314_v36 = vor.u32 %v15221_v22, %v13313_v31  ;;  %v15429_v6 = vld [vmem:[%s16335_s22 + $0x73c] sm:$0xf]  ;;  %v13847_v34 = vld [vmem:[%s16335_s22 + $0x4ec] sm:$0xf0]  ;;  %v15348_v38 = vld [vmem:[%s16335_s22 + $0x4b4] sm:$0xf] }
 0x8f5   : > { %9507 = vmatmul.bf16.vlgmr.msra.gmra.mxu3 %v18400_v12  ;;  %v7262_v2 = vmul.f32 0.7978846, %v7238_v4  ;;  %v13823_v54 = vld [vmem:[%s16335_s22 + $0x4bc] sm:$0xf0]  ;;  %v15420_v22 = vld [vmem:[%s16335_s22 + $0x6f4] sm:$0xf] }
 0x8f6   : > { %9555 = vmatpush.bf16.msrb.mxu3 %v14078_v62  ;;  %v14015_v62 = vld [vmem:[%s16335_s22 + $0x63c] sm:$0xf0] }
 0x8f7   : > { %15752 = vtanh.f32 %v7262_v2  ;;  %v14018_v18 = vor.u32 %v15396_v49, %v14015_v62  ;;  %v13871_v2 = vld [vmem:[%s16335_s22 + $0x51c] sm:$0xf0]  ;;  %v15357_v49 = vld [vmem:[%s16335_s22 + $0x4fc] sm:$0xf] }
 0x8f8   : > { %15754 = vtanh.f32 %v7263_v41  ;;  %9518 = vmatpush.bf16.msrb.mxu0 %v13730_v11  ;;  %v14006_v41 = vor.u32 %v15393_v63, %v14003_v20  ;;  %v14159_v11 = vld [vmem:[%s16335_s22 + $0x75c] sm:$0xf0]  ;;  %v13874_v9 = vor.u32 %v15360_v51, %v13871_v2  ;;  %v13862_v52 = vor.u32 %v15357_v49, %v13859_v59  ;;  %v14135_v63 = vld [vmem:[%s16335_s22 + $0x72c] sm:$0xf0]  ;;  %v15215_v20 = vld [vmem:[%s16335_s22 + $0x88] sm:$0xf0] }
 0x8f9   : > { %v14162_v62 = vor.u32 %v15432_v13, %v14159_v11  ;;  %v15423_v51 = vld [vmem:[%s16335_s22 + $0x70c] sm:$0xf]  ;;  %v14123_v2 = vld [vmem:[%s16335_s22 + $0x714] sm:$0xf0]  ;;  %v15372_v11 = vld [vmem:[%s16335_s22 + $0x574] sm:$0xf]  ;;  %v13826_v49 = vor.u32 %v15348_v38, %v13823_v54 }
 0x8fa   : > { %9556 = vmatpush.bf16.msrb.mxu3 %v14066_v15  ;;  %v15318_v15 = vld [vmem:[%s16335_s22 + $0x3c4] sm:$0xf]  ;;  %v14126_v13 = vor.u32 %v15423_v51, %v14123_v2  ;;  %v13265_v59 = vld [vmem:[%s16335_s22 + $0x50] sm:$0xf]  ;;  %v15245_v2 = vld [vmem:[%s16335_s22 + $0x178] sm:$0xf0] }
 0x8fb   : > { %v13706_v7 = vor.u32 %v15318_v15, %v13703_v10  ;;  %v15426_v10 = vld [vmem:[%s16335_s22 + $0x724] sm:$0xf]  ;;  %v13409_v51 = vld [vmem:[%s16335_s22 + $0x170] sm:$0xf]  ;;  %v15456_v38 = vld [vmem:[%s16335_s22 + $0x814] sm:$0xf] }
 0x8fc   : > { %9519 = vmatpush.bf16.msrb.mxu0 %v13718_v27  ;;  %v14147_v27 = vld [vmem:[%s16335_s22 + $0x744] sm:$0xf0]  ;;  %v14255_v54 = vld [vmem:[%s16335_s22 + $0x81c] sm:$0xf0] }
 0x8fd   : > { %v15753_v48 = vpop.eup %15752  ;;  %v14150_v15 = vor.u32 %v15429_v6, %v14147_v27  ;;  %v15369_v6 = vld [vmem:[%s16335_s22 + $0x55c] sm:$0xf]  ;;  %v13907_v27 = vld [vmem:[%s16335_s22 + $0x564] sm:$0xf0] }
 0x8fe   : > { %9557 = vmatpush.bf16.msrb.mxu3 %v14054_v39  ;;  %v15755_v24 = vpop.eup %15754  ;;  %v7310_v32 = vadd.f32 1.0, %v15753_v48  ;;  %v13955_v48 = vld [vmem:[%s16335_s22 + $0x5c4] sm:$0xf0] }
 0x8ff   : > { %v7311_v43 = vadd.f32 1.0, %v15755_v24  ;;  %v15218_v24 = vld [vmem:[%s16335_s22 + $0xa0] sm:$0xf0] }
 0x900   : > { %v7334_v47 = vmul.f32 %v7310_v32, %v7142_v46  ;;  %9520 = vmatpush.bf16.msrb.mxu0 %v13706_v7  ;;  %v13958_v46 = vor.u32 %v15381_v29, %v13955_v48  ;;  %v15354_v32 = vld [vmem:[%s16335_s22 + $0x4e4] sm:$0xf]  ;;  %v15345_v29 = vld [vmem:[%s16335_s22 + $0x49c] sm:$0xf]  ;;  %v13811_v48 = vld [vmem:[%s16335_s22 + $0x4a4] sm:$0xf0] }
 0x901   : > { %v7335_v4 = vmul.f32 %v7311_v43, %v7143_v35  ;;  %v15378_v35 = vld [vmem:[%s16335_s22 + $0x5a4] sm:$0xf]  ;;  %v13943_v43 = vld [vmem:[%s16335_s22 + $0x5ac] sm:$0xf0] }
 0x902   : > { %9558 = vmatpush.bf16.msrb.mxu3 %v14042_v50  ;;  %v18692_v39 = vpack.c.bf16 %v7334_v47, %v7322_v40  ;;  %v13967_v50 = vld [vmem:[%s16335_s22 + $0x5dc] sm:$0xf0]  ;;  %v13850_v40 = vor.u32 %v15354_v32, %v13847_v34  ;;  %v13946_v16 = vor.u32 %v15378_v35, %v13943_v43  ;;  %v13814_v32 = vor.u32 %v15345_v29, %v13811_v48  ;;  %v15206_v34 = vld [vmem:[%s16335_s22 + $0x40] sm:$0xf0]  ;;  %v13799_v35 = vld [vmem:[%s16335_s22 + $0x48c] sm:$0xf0] }
 0x903   : > { %v18696_v33 = vpack.c.bf16 %v7335_v4, %v7323_v14  ;;  %9521 = vmatmul.bf16.vlgmr.msrb.gmra.mxu0 %v18408_v8  ;;  %v13289_v47 = vld [vmem:[%s16335_s22 + $0x80] sm:$0xf]  ;;  %v13835_v14 = vld [vmem:[%s16335_s22 + $0x4d4] sm:$0xf0]  ;;  %v14138_v4 = vor.u32 %v15426_v10, %v14135_v63  ;;  %v13910_v43 = vor.u32 %v15369_v6, %v13907_v27  ;;  %v13895_v10 = vld [vmem:[%s16335_s22 + $0x54c] sm:$0xf0] }
 0x904   : > { %9423 = vmatmul.bf16.vlgmr.msrb.gmra.mxu1 %v18692_v39  ;;  %9569 = vmatpush.bf16.msra.mxu0 %v14174_v58  ;;  %v13290_v7 = vor.u32 %v15215_v20, %v13289_v47  ;;  %v13277_v58 = vld [vmem:[%s16335_s22 + $0x68] sm:$0xf]  ;;  %v15459_v63 = vld [vmem:[%s16335_s22 + $0x82c] sm:$0xf]  ;;  %v14267_v47 = vld [vmem:[%s16335_s22 + $0x834] sm:$0xf0] }
 0x905   : > { %9437 = vmatmul.bf16.vlgmr.msra.gmra.mxu2 %v18696_v33  ;;  %9527 = vmatpush.bf16.msrb.mxu1 %v13886_v56  ;;  %v15375_v56 = vld [vmem:[%s16335_s22 + $0x58c] sm:$0xf]  ;;  %v15317_v29 = vld [vmem:[%s16335_s22 + $0x3b8] sm:$0xf0]  ;;  %v14243_v6 = vld [vmem:[%s16335_s22 + $0x804] sm:$0xf0] }
 0x906   : > { %9559 = vmatpush.bf16.msrb.mxu3 %v14030_v19  ;;  %9541 = vmatpush.bf16.msra.mxu2 %v13982_v23  ;;  %v13970_v19 = vor.u32 %v15384_v5, %v13967_v50  ;;  %v13931_v23 = vld [vmem:[%s16335_s22 + $0x594] sm:$0xf0]  ;;  %v15212_v5 = vld [vmem:[%s16335_s22 + $0x70] sm:$0xf0]  ;;  %v15483_v20 = vld [vmem:[%s16335_s22 + $0x8ec] sm:$0xf] }
 0x907   : > { %v13934_v50 = vor.u32 %v15375_v56, %v13931_v23  ;;  %v13278_v31 = vor.u32 %v15212_v5, %v13277_v58  ;;  %v13241_v56 = vld [vmem:[%s16335_s22 + $0x20] sm:$0xf]  ;;  %v14270_v58 = vor.u32 %v15459_v63, %v14267_v47  ;;  %v14231_v63 = vld [vmem:[%s16335_s22 + $0x7ec] sm:$0xf0]  ;;  %v15474_v47 = vld [vmem:[%s16335_s22 + $0x8a4] sm:$0xf] }
 0x908   : > { %9570 = vmatpush.bf16.msra.mxu0 %v14162_v62 }
 0x909   : > { %9528 = vmatpush.bf16.msrb.mxu1 %v13874_v9  ;;  %v13919_v9 = vld [vmem:[%s16335_s22 + $0x57c] sm:$0xf0] }
 0x90a   : > { %9560 = vmatpush.bf16.msrb.mxu3 %v14018_v18  ;;  %9542 = vmatpush.bf16.msra.mxu2 %v13970_v19  ;;  %v13302_v18 = vor.u32 %v15218_v24, %v13301_v17  ;;  %v14111_v19 = vld [vmem:[%s16335_s22 + $0x6fc] sm:$0xf0]  ;;  %v13922_v62 = vor.u32 %v15372_v11, %v13919_v9  ;;  %v15417_v17 = vld [vmem:[%s16335_s22 + $0x6dc] sm:$0xf]  ;;  %v14099_v24 = vld [vmem:[%s16335_s22 + $0x6e4] sm:$0xf0]  ;;  %v13410_v11 = vor.u32 %v15245_v2, %v13409_v51 }
 0x90b   : > { %v15480_v9 = vld [vmem:[%s16335_s22 + $0x8d4] sm:$0xf]  ;;  %v15447_v51 = vld [vmem:[%s16335_s22 + $0x7cc] sm:$0xf]  ;;  %v14219_v2 = vld [vmem:[%s16335_s22 + $0x7d4] sm:$0xf0] }
 0x90c   : > { %9571 = vmatpush.bf16.msra.mxu0 %v14150_v15  ;;  %v15342_v15 = vld [vmem:[%s16335_s22 + $0x484] sm:$0xf] }
 0x90d   : > { %9529 = vmatpush.bf16.msrb.mxu1 %v13862_v52  ;;  %v13802_v23 = vor.u32 %v15342_v15, %v13799_v35  ;;  %v13685_v35 = vld [vmem:[%s16335_s22 + $0x398] sm:$0xf] }
 0x90e   : > { %9561 = vmatpush.bf16.msrb.mxu3 %v14006_v41  ;;  %9543 = vmatpush.bf16.msra.mxu2 %v13958_v46  ;;  %v13838_v41 = vor.u32 %v15351_v1, %v13835_v14  ;;  %v13253_v46 = vld [vmem:[%s16335_s22 + $0x38] sm:$0xf]  ;;  %v15414_v14 = vld [vmem:[%s16335_s22 + $0x6c4] sm:$0xf] }
 0x90f   : > { %v13254_v1 = vor.u32 %v15206_v34, %v13253_v46  ;;  %v15239_v34 = vld [vmem:[%s16335_s22 + $0x148] sm:$0xf0] }
 0x910   : > { %9572 = vmatpush.bf16.msra.mxu0 %v14138_v4  ;;  %v14087_v4 = vld [vmem:[%s16335_s22 + $0x6cc] sm:$0xf0] }
 0x911   : > { %9530 = vmatpush.bf16.msrb.mxu1 %v13850_v40  ;;  %v14102_v40 = vor.u32 %v15417_v17, %v14099_v24  ;;  %v15477_v17 = vld [vmem:[%s16335_s22 + $0x8bc] sm:$0xf]  ;;  %v14339_v24 = vld [vmem:[%s16335_s22 + $0x8c4] sm:$0xf0] }
 0x912   : > { %9562 = vmatpush.bf16.msrb.mxu3 %v13994_v57  ;;  %9544 = vmatpush.bf16.msra.mxu2 %v13946_v16  ;;  %v15209_v57 = vld [vmem:[%s16335_s22 + $0x58] sm:$0xf0]  ;;  %v14363_v16 = vld [vmem:[%s16335_s22 + $0x8f4] sm:$0xf0] }
 0x913   : > { %v13266_v52 = vor.u32 %v15209_v57, %v13265_v59  ;;  %v14366_v5 = vor.u32 %v15483_v20, %v14363_v16  ;;  %v15242_v59 = vld [vmem:[%s16335_s22 + $0x160] sm:$0xf0]  ;;  %v14258_v57 = vor.u32 %v15456_v38, %v14255_v54  ;;  %v14327_v20 = vld [vmem:[%s16335_s22 + $0x8ac] sm:$0xf0]  ;;  %v15233_v54 = vld [vmem:[%s16335_s22 + $0x118] sm:$0xf0] }
 0x914   : > { %9479 = vmatmul.bf16.vlgmr.msra.gmra.mxu1 %v18257_v37  ;;  %9573 = vmatpush.bf16.msra.mxu0 %v14126_v13  ;;  %v13361_v38 = vld [vmem:[%s16335_s22 + $0x110] sm:$0xf] }
 0x915   : > { %9563 = vmatmul.bf16.vlgmr.msrb.gmra.mxu3 %v18536_v30  ;;  %9493 = vmatmul.bf16.vlgmr.msrb.gmra.mxu2 %v18264_v3 }
 0x916   : > { %9611 = vmatpush.bf16.msra.mxu3 %v13314_v36  ;;  %9531 = vmatpush.bf16.msrb.mxu1 %v13838_v41  ;;  %v14114_v36 = vor.u32 %v15420_v22, %v14111_v19  ;;  %v13229_v22 = vld [vmem:[%s16335_s22 + $0x8] sm:$0xf]  ;;  %v15200_v19 = vld [vmem:[%s16335_s22 + $0x10] sm:$0xf0] }
 0x917   : > { %9545 = vmatpush.bf16.msra.mxu2 %v13934_v50  ;;  %v14090_v50 = vor.u32 %v15414_v14, %v14087_v4  ;;  %v13230_v27 = vor.u32 %v15200_v19, %v13229_v22  ;;  %v15236_v14 = vld [vmem:[%s16335_s22 + $0x130] sm:$0xf0]  ;;  %v14207_v22 = vld [vmem:[%s16335_s22 + $0x7bc] sm:$0xf0]  ;;  %v13362_v19 = vor.u32 %v15233_v54, %v13361_v38  ;;  %v13793_v54 = vld [vmem:[%s16335_s22 + $0x470] sm:$0xf] }
 0x918   : > { %9574 = vmatpush.bf16.msra.mxu0 %v14114_v36  ;;  %v15453_v36 = vld [vmem:[%s16335_s22 + $0x7fc] sm:$0xf] }
 0x919   : > { %v14246_v15 = vor.u32 %v15453_v36, %v14243_v6  ;;  %v13649_v36 = vld [vmem:[%s16335_s22 + $0x350] sm:$0xf]  ;;  %v15305_v6 = vld [vmem:[%s16335_s22 + $0x358] sm:$0xf0] }
 0x91a   : > { %9612 = vmatpush.bf16.msra.mxu3 %v13302_v18  ;;  %9532 = vmatpush.bf16.msrb.mxu1 %v13826_v49  ;;  %v15366_v18 = vld [vmem:[%s16335_s22 + $0x544] sm:$0xf]  ;;  %v13397_v49 = vld [vmem:[%s16335_s22 + $0x158] sm:$0xf] }
 0x91b   : > { %9546 = vmatpush.bf16.msra.mxu2 %v13922_v62  ;;  %v13898_v41 = vor.u32 %v15366_v18, %v13895_v10  ;;  %v13697_v62 = vld [vmem:[%s16335_s22 + $0x3b0] sm:$0xf]  ;;  %v14342_v18 = vor.u32 %v15477_v17, %v14339_v24  ;;  %v15450_v10 = vld [vmem:[%s16335_s22 + $0x7e4] sm:$0xf]  ;;  %v14195_v17 = vld [vmem:[%s16335_s22 + $0x7a4] sm:$0xf0] }
 0x91c   : > { %9575 = vmatpush.bf16.msra.mxu0 %v14102_v40  ;;  %v13698_v46 = vor.u32 %v15317_v29, %v13697_v62  ;;  %v14234_v4 = vor.u32 %v15450_v10, %v14231_v63  ;;  %v13349_v62 = vld [vmem:[%s16335_s22 + $0xf8] sm:$0xf]  ;;  %v15230_v29 = vld [vmem:[%s16335_s22 + $0x100] sm:$0xf0] }
 0x91d   : > { %v13350_v24 = vor.u32 %v15230_v29, %v13349_v62  ;;  %v15302_v10 = vld [vmem:[%s16335_s22 + $0x340] sm:$0xf0]  ;;  %v15296_v62 = vld [vmem:[%s16335_s22 + $0x310] sm:$0xf0]  ;;  %v13781_v29 = vld [vmem:[%s16335_s22 + $0x458] sm:$0xf] }
 0x91e   : > { %9613 = vmatpush.bf16.msra.mxu3 %v13290_v7  ;;  %9533 = vmatpush.bf16.msrb.mxu1 %v13814_v32  ;;  %v15203_v7 = vld [vmem:[%s16335_s22 + $0x28] sm:$0xf0]  ;;  %v13385_v32 = vld [vmem:[%s16335_s22 + $0x140] sm:$0xf]  ;;  %v15438_v63 = vld [vmem:[%s16335_s22 + $0x784] sm:$0xf] }
 0x91f   : > { %9547 = vmatpush.bf16.msra.mxu2 %v13910_v43  ;;  %v13242_v13 = vor.u32 %v15203_v7, %v13241_v56  ;;  %v15314_v43 = vld [vmem:[%s16335_s22 + $0x3a0] sm:$0xf0]  ;;  %v13386_v40 = vor.u32 %v15239_v34, %v13385_v32  ;;  %v13673_v56 = vld [vmem:[%s16335_s22 + $0x380] sm:$0xf]  ;;  %v14330_v7 = vor.u32 %v15474_v47, %v14327_v20  ;;  %v14291_v32 = vld [vmem:[%s16335_s22 + $0x864] sm:$0xf0]  ;;  %v13650_v34 = vor.u32 %v15305_v6, %v13649_v36 }
 0x920   : > { %9576 = vmatpush.bf16.msra.mxu0 %v14090_v50  ;;  %v13686_v16 = vor.u32 %v15314_v43, %v13685_v35  ;;  %v15227_v35 = vld [vmem:[%s16335_s22 + $0xe8] sm:$0xf0]  ;;  %v14183_v47 = vld [vmem:[%s16335_s22 + $0x78c] sm:$0xf0]  ;;  %v15462_v20 = vld [vmem:[%s16335_s22 + $0x844] sm:$0xf] }
 0x921   : > { %v15338_v36 = vld [vmem:[%s16335_s22 + $0x460] sm:$0xf0]  ;;  %v14081_v6 = vld [vmem:[%s16335_s22 + $0x6b0] sm:$0xf] }
 0x922   : > { %9614 = vmatpush.bf16.msra.mxu3 %v13278_v31  ;;  %v14351_v31 = vld [vmem:[%s16335_s22 + $0x8dc] sm:$0xf0]  ;;  %9534 = vmatpush.bf16.msrb.mxu1 %v13802_v23  ;;  %v15311_v23 = vld [vmem:[%s16335_s22 + $0x388] sm:$0xf0] }
 0x923   : > { %9548 = vmatpush.bf16.msra.mxu2 %v13898_v41  ;;  %v14354_v48 = vor.u32 %v15480_v9, %v14351_v31  ;;  %9577 = vmatmul.bf16.vlgmr.msra.gmra.mxu0 %v18624_v55  ;;  %v13674_v50 = vor.u32 %v15311_v23, %v13673_v56  ;;  %v15444_v31 = vld [vmem:[%s16335_s22 + $0x7b4] sm:$0xf]  ;;  %v13601_v56 = vld [vmem:[%s16335_s22 + $0x2f0] sm:$0xf] }
 0x924   : > { %9625 = vmatpush.bf16.msrb.mxu0 %v13410_v11  ;;  %v15308_v11 = vld [vmem:[%s16335_s22 + $0x370] sm:$0xf0] }
 0x925   : > { %9535 = vmatmul.bf16.vlgmr.msrb.gmra.mxu1 %v18438_v60 }
 0x926   : > { %9615 = vmatpush.bf16.msra.mxu3 %v13266_v52  ;;  %9583 = vmatpush.bf16.msra.mxu1 %v14270_v58  ;;  %v13398_v52 = vor.u32 %v15242_v59, %v13397_v49  ;;  %v15471_v58 = vld [vmem:[%s16335_s22 + $0x88c] sm:$0xf]  ;;  %v15468_v49 = vld [vmem:[%s16335_s22 + $0x874] sm:$0xf]  ;;  %v14303_v59 = vld [vmem:[%s16335_s22 + $0x87c] sm:$0xf0] }
 0x927   : > { %9597 = vmatpush.bf16.msrb.mxu2 %v14366_v5  ;;  %v14315_v5 = vld [vmem:[%s16335_s22 + $0x894] sm:$0xf0] }
 0x928   : > { %9549 = vmatmul.bf16.vlgmr.msra.gmra.mxu2 %v18441_v53  ;;  %9626 = vmatpush.bf16.msrb.mxu0 %v13398_v52  ;;  %v14318_v9 = vor.u32 %v15471_v58, %v14315_v5  ;;  %v15441_v52 = vld [vmem:[%s16335_s22 + $0x79c] sm:$0xf]  ;;  %v13625_v58 = vld [vmem:[%s16335_s22 + $0x320] sm:$0xf]  ;;  %v15299_v5 = vld [vmem:[%s16335_s22 + $0x328] sm:$0xf0] }
 0x929   : > { %v14198_v43 = vor.u32 %v15441_v52, %v14195_v17  ;;  %v13481_v17 = vld [vmem:[%s16335_s22 + $0x200] sm:$0xf] }
 0x92a   : > { %9616 = vmatpush.bf16.msra.mxu3 %v13254_v1  ;;  %9584 = vmatpush.bf16.msra.mxu1 %v14258_v57  ;;  %v13373_v1 = vld [vmem:[%s16335_s22 + $0x128] sm:$0xf] }
 0x92b   : > { %9598 = vmatpush.bf16.msrb.mxu2 %v14354_v48  ;;  %v13374_v41 = vor.u32 %v15236_v14, %v13373_v1  ;;  %v14210_v48 = vor.u32 %v15444_v31, %v14207_v22  ;;  %v13505_v14 = vld [vmem:[%s16335_s22 + $0x230] sm:$0xf]  ;;  %v15266_v31 = vld [vmem:[%s16335_s22 + $0x220] sm:$0xf0]  ;;  %v13626_v22 = vor.u32 %v15299_v5, %v13625_v58  ;;  %v15257_v5 = vld [vmem:[%s16335_s22 + $0x1d8] sm:$0xf0] }
 0x92c   : > { %9627 = vmatpush.bf16.msrb.mxu0 %v13386_v40  ;;  %v13457_v58 = vld [vmem:[%s16335_s22 + $0x1d0] sm:$0xf] }
 0x92e   : > { %9617 = vmatpush.bf16.msra.mxu3 %v13242_v13  ;;  %9585 = vmatpush.bf16.msra.mxu1 %v14246_v15  ;;  %v14222_v13 = vor.u32 %v15447_v51, %v14219_v2  ;;  %v13337_v15 = vld [vmem:[%s16335_s22 + $0xe0] sm:$0xf]  ;;  %v13325_v51 = vld [vmem:[%s16335_s22 + $0xc8] sm:$0xf]  ;;  %v15224_v2 = vld [vmem:[%s16335_s22 + $0xd0] sm:$0xf0] }
 0x92f   : > { %9599 = vmatpush.bf16.msrb.mxu2 %v14342_v18  ;;  %v13637_v18 = vld [vmem:[%s16335_s22 + $0x338] sm:$0xf]  ;;  %v13338_v1 = vor.u32 %v15227_v35, %v13337_v15  ;;  %v13782_v15 = vor.u32 %v15338_v36, %v13781_v29 }
 0x930   : > { %9628 = vmatpush.bf16.msrb.mxu0 %v13374_v41  ;;  %v13638_v23 = vor.u32 %v15302_v10, %v13637_v18  ;;  %v14186_v41 = vor.u32 %v15438_v63, %v14183_v47  ;;  %v15335_v10 = vld [vmem:[%s16335_s22 + $0x448] sm:$0xf0]  ;;  %v14069_v63 = vld [vmem:[%s16335_s22 + $0x698] sm:$0xf] }
 0x932   : > { %9618 = vmatpush.bf16.msra.mxu3 %v13230_v27  ;;  %9586 = vmatpush.bf16.msra.mxu1 %v14234_v4  ;;  %v14306_v27 = vor.u32 %v15468_v49, %v14303_v59  ;;  %v15269_v4 = vld [vmem:[%s16335_s22 + $0x238] sm:$0xf0]  ;;  %v15290_v49 = vld [vmem:[%s16335_s22 + $0x2e0] sm:$0xf0] }
 0x933   : > { %9600 = vmatpush.bf16.msrb.mxu2 %v14330_v7  ;;  %v15293_v7 = vld [vmem:[%s16335_s22 + $0x2f8] sm:$0xf0]  ;;  %v13506_v38 = vor.u32 %v15269_v4, %v13505_v14  ;;  %v15284_v14 = vld [vmem:[%s16335_s22 + $0x2b0] sm:$0xf0] }
 0x934   : > { %9629 = vmatpush.bf16.msrb.mxu0 %v13362_v19  ;;  %v13589_v19 = vld [vmem:[%s16335_s22 + $0x2d8] sm:$0xf] }
 0x935   : > { %9619 = vmatmul.bf16.vlgmr.msra.gmra.mxu3 %v18253_v45  ;;  %v13661_v45 = vld [vmem:[%s16335_s22 + $0x368] sm:$0xf]  ;;  %v13590_v52 = vor.u32 %v15290_v49, %v13589_v19  ;;  %v13445_v19 = vld [vmem:[%s16335_s22 + $0x1b8] sm:$0xf]  ;;  %v15254_v49 = vld [vmem:[%s16335_s22 + $0x1c0] sm:$0xf0] }
 0x936   : > { %9667 = vmatpush.bf16.msrb.mxu3 %v13698_v46  ;;  %v13662_v57 = vor.u32 %v15308_v11, %v13661_v45  ;;  %9587 = vmatpush.bf16.msra.mxu1 %v14222_v13  ;;  %v15465_v46 = vld [vmem:[%s16335_s22 + $0x85c] sm:$0xf]  ;;  %v13602_v45 = vor.u32 %v15293_v7, %v13601_v56  ;;  %v13326_v11 = vor.u32 %v15224_v2, %v13325_v51  ;;  %v13757_v56 = vld [vmem:[%s16335_s22 + $0x428] sm:$0xf]  ;;  %v15332_v7 = vld [vmem:[%s16335_s22 + $0x430] sm:$0xf0] }
 0x937   : > { %9601 = vmatpush.bf16.msrb.mxu2 %v14318_v9  ;;  %v14294_v40 = vor.u32 %v15465_v46, %v14291_v32  ;;  %v15341_v13 = vld [vmem:[%s16335_s22 + $0x478] sm:$0xf0]  ;;  %v13493_v9 = vld [vmem:[%s16335_s22 + $0x218] sm:$0xf]  ;;  %v13577_v32 = vld [vmem:[%s16335_s22 + $0x2c0] sm:$0xf]  ;;  %v13446_v36 = vor.u32 %v15254_v49, %v13445_v19 }
 0x938   : > { %9630 = vmatpush.bf16.msrb.mxu0 %v13350_v24  ;;  %v13794_v59 = vor.u32 %v15341_v13, %v13793_v54  ;;  %v15263_v24 = vld [vmem:[%s16335_s22 + $0x208] sm:$0xf0]  ;;  %v14057_v51 = vld [vmem:[%s16335_s22 + $0x680] sm:$0xf]  ;;  %v13758_v54 = vor.u32 %v15332_v7, %v13757_v56  ;;  %v13985_v7 = vld [vmem:[%s16335_s22 + $0x5f0] sm:$0xf] }
 0x939   : > { %v13482_v18 = vor.u32 %v15263_v24, %v13481_v17  ;;  %v15407_v2 = vld [vmem:[%s16335_s22 + $0x688] sm:$0xf0]  ;;  %v13433_v24 = vld [vmem:[%s16335_s22 + $0x1a0] sm:$0xf]  ;;  %v13973_v19 = vld [vmem:[%s16335_s22 + $0x5d8] sm:$0xf] }
 0x93a   : > { %9668 = vmatpush.bf16.msrb.mxu3 %v13686_v16  ;;  %9588 = vmatpush.bf16.msra.mxu1 %v14210_v48  ;;  %v14279_v16 = vld [vmem:[%s16335_s22 + $0x84c] sm:$0xf0]  ;;  %v13494_v48 = vor.u32 %v15266_v31, %v13493_v9  ;;  %v14058_v13 = vor.u32 %v15407_v2, %v14057_v51  ;;  %v15329_v9 = vld [vmem:[%s16335_s22 + $0x418] sm:$0xf0]  ;;  %v15404_v31 = vld [vmem:[%s16335_s22 + $0x670] sm:$0xf0] }
 0x93b   : > { %9602 = vmatpush.bf16.msrb.mxu2 %v14306_v27  ;;  %v15413_v27 = vld [vmem:[%s16335_s22 + $0x6b8] sm:$0xf0]  ;;  %v15386_v49 = vld [vmem:[%s16335_s22 + $0x5e0] sm:$0xf0] }
 0x93c   : > { %9631 = vmatpush.bf16.msrb.mxu0 %v13338_v1  ;;  %v14082_v35 = vor.u32 %v15413_v27, %v14081_v6  ;;  %v13565_v1 = vld [vmem:[%s16335_s22 + $0x2a8] sm:$0xf]  ;;  %v15326_v6 = vld [vmem:[%s16335_s22 + $0x400] sm:$0xf0]  ;;  %v14033_v27 = vld [vmem:[%s16335_s22 + $0x650] sm:$0xf] }
 0x93d   : > { %v15389_v51 = vld [vmem:[%s16335_s22 + $0x5f8] sm:$0xf0] }
 0x93e   : > { %9669 = vmatpush.bf16.msrb.mxu3 %v13674_v50  ;;  %9589 = vmatpush.bf16.msra.mxu1 %v14198_v43  ;;  %v14282_v50 = vor.u32 %v15462_v20, %v14279_v16  ;;  %v13769_v43 = vld [vmem:[%s16335_s22 + $0x440] sm:$0xf]  ;;  %v13469_v20 = vld [vmem:[%s16335_s22 + $0x1e8] sm:$0xf]  ;;  %v15260_v16 = vld [vmem:[%s16335_s22 + $0x1f0] sm:$0xf0] }
 0x93f   : > { %9603 = vmatpush.bf16.msrb.mxu2 %v14294_v40  ;;  %v15410_v40 = vld [vmem:[%s16335_s22 + $0x6a0] sm:$0xf0] }
 0x940   : > { %9632 = vmatpush.bf16.msrb.mxu0 %v13326_v11  ;;  %v14070_v4 = vor.u32 %v15410_v40, %v14069_v63  ;;  %v13458_v11 = vor.u32 %v15257_v5, %v13457_v58  ;;  %v14021_v63 = vld [vmem:[%s16335_s22 + $0x638] sm:$0xf]  ;;  %v15398_v40 = vld [vmem:[%s16335_s22 + $0x640] sm:$0xf0]  ;;  %v15320_v58 = vld [vmem:[%s16335_s22 + $0x3d0] sm:$0xf0] }
 0x942   : > { %9670 = vmatpush.bf16.msrb.mxu3 %v13662_v57  ;;  %9590 = vmatpush.bf16.msra.mxu1 %v14186_v41  ;;  %v13613_v57 = vld [vmem:[%s16335_s22 + $0x308] sm:$0xf]  ;;  %v13566_v41 = vor.u32 %v15284_v14, %v13565_v1  ;;  %v15272_v14 = vld [vmem:[%s16335_s22 + $0x250] sm:$0xf0] }
 0x943   : > { %9604 = vmatpush.bf16.msrb.mxu2 %v14282_v50  ;;  %v13614_v46 = vor.u32 %v15296_v62, %v13613_v57  ;;  %9633 = vmatmul.bf16.vlgmr.msrb.gmra.mxu0 %v18255_v0  ;;  %v13770_v0 = vor.u32 %v15335_v10, %v13769_v43  ;;  %v13553_v50 = vld [vmem:[%s16335_s22 + $0x290] sm:$0xf]  ;;  %v15278_v57 = vld [vmem:[%s16335_s22 + $0x280] sm:$0xf0]  ;;  %v13721_v43 = vld [vmem:[%s16335_s22 + $0x3e0] sm:$0xf] }
 0x944   : > { %9681 = vmatpush.bf16.msra.mxu0 %v13794_v59  ;;  %v13541_v59 = vld [vmem:[%s16335_s22 + $0x278] sm:$0xf]  ;;  %v15323_v10 = vld [vmem:[%s16335_s22 + $0x3e8] sm:$0xf0]  ;;  %v13517_v1 = vld [vmem:[%s16335_s22 + $0x248] sm:$0xf] }
 0x945   : > { %9591 = vmatmul.bf16.vlgmr.msra.gmra.mxu1 %v18692_v39  ;;  %v13542_v17 = vor.u32 %v15278_v57, %v13541_v59  ;;  %v13722_v56 = vor.u32 %v15323_v10, %v13721_v43  ;;  %v13518_v5 = vor.u32 %v15272_v14, %v13517_v1  ;;  %v18908_v57 = vpop.f32.mrf.mxu0  ;;  %v15431_v10 = vld [vmem:[%s16335_s22 + $0x748] sm:$0xf0] }
 0x946   : > { %9671 = vmatpush.bf16.msrb.mxu3 %v13650_v34  ;;  %9639 = vmatpush.bf16.msrb.mxu1 %v13506_v38  ;;  %v15287_v34 = vld [vmem:[%s16335_s22 + $0x2c8] sm:$0xf0]  ;;  %v15281_v38 = vld [vmem:[%s16335_s22 + $0x298] sm:$0xf0] }
 0x947   : > { %9653 = vmatpush.bf16.msra.mxu2 %v13602_v45  ;;  %v13578_v47 = vor.u32 %v15287_v34, %v13577_v32  ;;  %v13745_v45 = vld [vmem:[%s16335_s22 + $0x410] sm:$0xf]  ;;  %v13529_v32 = vld [vmem:[%s16335_s22 + $0x260] sm:$0xf]  ;;  %v15275_v34 = vld [vmem:[%s16335_s22 + $0x268] sm:$0xf0] }
 0x948   : > { %9605 = vmatmul.bf16.vlgmr.msrb.gmra.mxu2 %v18696_v33  ;;  %9682 = vmatpush.bf16.msra.mxu0 %v13782_v15  ;;  %v13746_v62 = vor.u32 %v15329_v9, %v13745_v45  ;;  %v13986_v45 = vor.u32 %v15389_v51, %v13985_v7  ;;  %v13877_v9 = vld [vmem:[%s16335_s22 + $0x518] sm:$0xf]  ;;  %v15353_v7 = vld [vmem:[%s16335_s22 + $0x4d8] sm:$0xf0] }
 0x94a   : > { %9672 = vmatpush.bf16.msrb.mxu3 %v13638_v23  ;;  %9640 = vmatpush.bf16.msrb.mxu1 %v13494_v48  ;;  %v13470_v23 = vor.u32 %v15260_v16, %v13469_v20  ;;  %v13733_v48 = vld [vmem:[%s16335_s22 + $0x3f8] sm:$0xf]  ;;  %v13421_v20 = vld [vmem:[%s16335_s22 + $0x188] sm:$0xf]  ;;  %v15248_v16 = vld [vmem:[%s16335_s22 + $0x190] sm:$0xf0] }
 0x94b   : > { %9654 = vmatpush.bf16.msra.mxu2 %v13590_v52  ;;  %v15401_v52 = vld [vmem:[%s16335_s22 + $0x658] sm:$0xf0]  ;;  %v13734_v15 = vor.u32 %v15326_v6, %v13733_v48  ;;  %v13422_v2 = vor.u32 %v15248_v16, %v13421_v20  ;;  %v13997_v48 = vld [vmem:[%s16335_s22 + $0x608] sm:$0xf]  ;;  %v14165_v6 = vld [vmem:[%s16335_s22 + $0x758] sm:$0xf]  ;;  %v18932_v16 = vpop.f32.mrf.mxu2 }
 0x94c   : > { %9683 = vmatpush.bf16.msra.mxu0 %v13770_v0  ;;  %v13889_v0 = vld [vmem:[%s16335_s22 + $0x530] sm:$0xf]  ;;  %v18930_v20 = vld [vmem:[%s16327_s3 + $0x18] sm:$0x7] }
 0x94d   : > { %v18938_v51 = vpop.f32.mrf.mxu0 }
 0x94e   : > { %9673 = vmatpush.bf16.msrb.mxu3 %v13626_v22  ;;  %9641 = vmatpush.bf16.msrb.mxu1 %v13482_v18  ;;  %v13554_v22 = vor.u32 %v15281_v38, %v13553_v50  ;;  %v14009_v38 = vld [vmem:[%s16335_s22 + $0x620] sm:$0xf] }
 0x94f   : > { %9655 = vmatpush.bf16.msra.mxu2 %v13578_v47  ;;  %v13530_v47 = vor.u32 %v15275_v34, %v13529_v32  ;;  %v13961_v32 = vld [vmem:[%s16335_s22 + $0x5c0] sm:$0xf]  ;;  %v15383_v34 = vld [vmem:[%s16335_s22 + $0x5c8] sm:$0xf0] }
 0x950   : > { %9684 = vmatpush.bf16.msra.mxu0 %v13758_v54  ;;  %v15395_v54 = vld [vmem:[%s16335_s22 + $0x628] sm:$0xf0] }
 0x951   : > { %v14010_v59 = vor.u32 %v15395_v54, %v14009_v38  ;;  %v14129_v54 = vld [vmem:[%s16335_s22 + $0x710] sm:$0xf] }
 0x952   : > { %9674 = vmatpush.bf16.msrb.mxu3 %v13614_v46  ;;  %9642 = vmatpush.bf16.msrb.mxu1 %v13470_v23  ;;  %v15251_v46 = vld [vmem:[%s16335_s22 + $0x1a8] sm:$0xf0]  ;;  %v14022_v23 = vor.u32 %v15398_v40, %v14021_v63  ;;  %v13853_v63 = vld [vmem:[%s16335_s22 + $0x4e8] sm:$0xf]  ;;  %v15356_v40 = vld [vmem:[%s16335_s22 + $0x4f0] sm:$0xf0] }
 0x953   : > { %9656 = vmatpush.bf16.msra.mxu2 %v13566_v41  ;;  %v13434_v18 = vor.u32 %v15251_v46, %v13433_v24  ;;  %v13709_v41 = vld [vmem:[%s16335_s22 + $0x3c8] sm:$0xf]  ;;  %v15359_v24 = vld [vmem:[%s16335_s22 + $0x508] sm:$0xf0]  ;;  %v18916_v46 = vpop.f32.mrf.mxu1  ;;  %v13854_v14 = vor.u32 %v15356_v40, %v13853_v63  ;;  %v15368_v40 = vld [vmem:[%s16335_s22 + $0x550] sm:$0xf0] }
 0x954   : > { %9685 = vmatpush.bf16.msra.mxu0 %v13746_v62  ;;  %v13901_v63 = vld [vmem:[%s16335_s22 + $0x548] sm:$0xf] }
 0x955   : > { %9675 = vmatmul.bf16.vlgmr.msrb.gmra.mxu3 %v18400_v12  ;;  %v14045_v12 = vld [vmem:[%s16335_s22 + $0x668] sm:$0xf] }
 0x956   : > { %9723 = vmatpush.bf16.msra.mxu3 %v14082_v35  ;;  %v14046_v29 = vor.u32 %v15404_v31, %v14045_v12  ;;  %9643 = vmatpush.bf16.msrb.mxu1 %v13458_v11  ;;  %v14034_v35 = vor.u32 %v15401_v52, %v14033_v27  ;;  %v15437_v11 = vld [vmem:[%s16335_s22 + $0x778] sm:$0xf0]  ;;  %v15362_v12 = vld [vmem:[%s16335_s22 + $0x520] sm:$0xf0]  ;;  %v18904_v31 = vpop.f32.mrf.mxu3  ;;  %v13974_v27 = vor.u32 %v15386_v49, %v13973_v19 }
 0x957   : > { %9657 = vmatpush.bf16.msra.mxu2 %v13554_v22  ;;  %v13710_v22 = vor.u32 %v15320_v58, %v13709_v41  ;;  %v15434_v52 = vld [vmem:[%s16335_s22 + $0x760] sm:$0xf0]  ;;  %v15377_v41 = vld [vmem:[%s16335_s22 + $0x598] sm:$0xf0]  ;;  %v7733_v58 = vperm.slane %v18930_v20, 0 }
 0x958   : > { %9686 = vmatpush.bf16.msra.mxu0 %v13734_v15 }
 0x95a   : > { %9724 = vmatpush.bf16.msra.mxu3 %v14070_v4  ;;  %9644 = vmatpush.bf16.msrb.mxu1 %v13446_v36  ;;  %v15365_v4 = vld [vmem:[%s16335_s22 + $0x538] sm:$0xf0]  ;;  %v15392_v36 = vld [vmem:[%s16335_s22 + $0x610] sm:$0xf0] }
 0x95b   : > { %9658 = vmatpush.bf16.msra.mxu2 %v13542_v17  ;;  %v13890_v50 = vor.u32 %v15365_v4, %v13889_v0  ;;  %v13865_v17 = vld [vmem:[%s16335_s22 + $0x500] sm:$0xf]  ;;  %v13998_v15 = vor.u32 %v15392_v36, %v13997_v48  ;;  %v14141_v0 = vld [vmem:[%s16335_s22 + $0x728] sm:$0xf]  ;;  %v15422_v48 = vld [vmem:[%s16335_s22 + $0x700] sm:$0xf0] }
 0x95c   : > { %9687 = vmatpush.bf16.msra.mxu0 %v13722_v56  ;;  %v13866_v43 = vor.u32 %v15359_v24, %v13865_v17  ;;  %v15428_v56 = vld [vmem:[%s16335_s22 + $0x730] sm:$0xf0]  ;;  %v13817_v36 = vld [vmem:[%s16335_s22 + $0x4a0] sm:$0xf]  ;;  %v15371_v17 = vld [vmem:[%s16335_s22 + $0x568] sm:$0xf0] }
 0x95e   : > { %9725 = vmatpush.bf16.msra.mxu3 %v14058_v13  ;;  %9645 = vmatpush.bf16.msrb.mxu1 %v13434_v18  ;;  %v14177_v13 = vld [vmem:[%s16335_s22 + $0x770] sm:$0xf]  ;;  %v14153_v18 = vld [vmem:[%s16335_s22 + $0x740] sm:$0xf]  ;;  %v9286_v1 = vpop.f32.mrf.mxu3 }
 0x95f   : > { %9659 = vmatpush.bf16.msra.mxu2 %v13530_v47  ;;  %v14178_v62 = vor.u32 %v15437_v11, %v14177_v13  ;;  %v15380_v47 = vld [vmem:[%s16335_s22 + $0x5b0] sm:$0xf0]  ;;  %v15350_v11 = vld [vmem:[%s16335_s22 + $0x4c0] sm:$0xf0] }
 0x960   : > { %9688 = vmatpush.bf16.msra.mxu0 %v13710_v22  ;;  %v9285_v22 = vadd.f32 %v18904_v31, %v7733_v58  ;;  %v13913_v31 = vld [vmem:[%s16335_s22 + $0x560] sm:$0xf] }
 0x962   : > { %9726 = vmatpush.bf16.msra.mxu3 %v14046_v29  ;;  %9646 = vmatpush.bf16.msrb.mxu1 %v13422_v2  ;;  %v13878_v29 = vor.u32 %v15362_v12, %v13877_v9  ;;  %v13937_v2 = vld [vmem:[%s16335_s22 + $0x590] sm:$0xf]  ;;  %v13925_v9 = vld [vmem:[%s16335_s22 + $0x578] sm:$0xf]  ;;  %v15374_v12 = vld [vmem:[%s16335_s22 + $0x580] sm:$0xf0]  ;;  %v9299_v24 = vadd.f32 %v18908_v57, %v9285_v22 }
 0x963   : > { %9660 = vmatpush.bf16.msra.mxu2 %v13518_v5  ;;  %9689 = vmatmul.bf16.vlgmr.msra.gmra.mxu0 %v18408_v8  ;;  %v14154_v8 = vor.u32 %v15431_v10, %v14153_v18  ;;  %v18944_v5 = vpop.f32.mrf.mxu1  ;;  %v13938_v13 = vor.u32 %v15377_v41, %v13937_v2  ;;  %v13914_v18 = vor.u32 %v15371_v17, %v13913_v31  ;;  %v15344_v10 = vld [vmem:[%s16335_s22 + $0x490] sm:$0xf0]  ;;  %v15461_v57 = vld [vmem:[%s16335_s22 + $0x838] sm:$0xf0]  ;;  %v14093_v2 = vld [vmem:[%s16335_s22 + $0x6c8] sm:$0xf] }
 0x964   : > { %9737 = vmatpush.bf16.msrb.mxu0 %v14178_v62  ;;  %v14117_v62 = vld [vmem:[%s16335_s22 + $0x6f8] sm:$0xf]  ;;  %v15416_v41 = vld [vmem:[%s16335_s22 + $0x6d0] sm:$0xf0]  ;;  %v14237_v17 = vld [vmem:[%s16335_s22 + $0x7e8] sm:$0xf] }
 0x965   : > { %9647 = vmatmul.bf16.vlgmr.msrb.gmra.mxu1 %v18257_v37  ;;  %v13962_v37 = vor.u32 %v15383_v34, %v13961_v32  ;;  %v14118_v34 = vor.u32 %v15422_v48, %v14117_v62  ;;  %v15455_v62 = vld [vmem:[%s16335_s22 + $0x808] sm:$0xf0] }
 0x966   : > { %9727 = vmatpush.bf16.msra.mxu3 %v14034_v35  ;;  %9695 = vmatpush.bf16.msra.mxu1 %v13890_v50  ;;  %v14166_v35 = vor.u32 %v15434_v52, %v14165_v6  ;;  %v14142_v50 = vor.u32 %v15428_v56, %v14141_v0  ;;  %v9340_v19 = vpop.f32.mrf.mxu3  ;;  %v15347_v6 = vld [vmem:[%s16335_s22 + $0x4a8] sm:$0xf0]  ;;  %v9354_v52 = vpop.f32.mrf.mxu0  ;;  %v15485_v0 = vld [vmem:[%s16335_s22 + $0x8f8] sm:$0xf0] }
 0x967   : > { %9709 = vmatpush.bf16.msrb.mxu2 %v13986_v45  ;;  %v15425_v45 = vld [vmem:[%s16335_s22 + $0x718] sm:$0xf0]  ;;  %v15479_v48 = vld [vmem:[%s16335_s22 + $0x8c8] sm:$0xf0] }
 0x968   : > { %9661 = vmatmul.bf16.vlgmr.msra.gmra.mxu2 %v18264_v3  ;;  %v13949_v3 = vld [vmem:[%s16335_s22 + $0x5a8] sm:$0xf]  ;;  %9738 = vmatpush.bf16.msrb.mxu0 %v14166_v35  ;;  %v14130_v49 = vor.u32 %v15425_v45, %v14129_v54  ;;  %v14105_v35 = vld [vmem:[%s16335_s22 + $0x6e0] sm:$0xf]  ;;  %v14357_v45 = vld [vmem:[%s16335_s22 + $0x8d8] sm:$0xf] }
 0x969   : > { %v13950_v4 = vor.u32 %v15380_v47, %v13949_v3  ;;  %v14273_v3 = vld [vmem:[%s16335_s22 + $0x830] sm:$0xf]  ;;  %v9313_v47 = vadd.f32 %v18916_v46, %v9299_v24  ;;  %v14261_v46 = vld [vmem:[%s16335_s22 + $0x818] sm:$0xf]  ;;  %v15452_v24 = vld [vmem:[%s16335_s22 + $0x7f0] sm:$0xf0] }
 0x96a   : > { %9728 = vmatpush.bf16.msra.mxu3 %v14022_v23  ;;  %9696 = vmatpush.bf16.msra.mxu1 %v13878_v29  ;;  %v13841_v23 = vld [vmem:[%s16335_s22 + $0x4d0] sm:$0xf]  ;;  %v13926_v29 = vor.u32 %v15374_v12, %v13925_v9  ;;  %v14094_v9 = vor.u32 %v15416_v41, %v14093_v2 }
 0x96b   : > { %9710 = vmatpush.bf16.msrb.mxu2 %v13974_v27  ;;  %v13842_v38 = vor.u32 %v15353_v7, %v13841_v23  ;;  %v18957_v27 = vpop.f32.mrf.mxu2  ;;  %v18962_v32 = vpop.f32.mrf.mxu1  ;;  %v13902_v23 = vor.u32 %v15368_v40, %v13901_v63  ;;  %v14274_v7 = vor.u32 %v15461_v57, %v14273_v3  ;;  %v15473_v40 = vld [vmem:[%s16335_s22 + $0x898] sm:$0xf0] }
 0x96c   : > { %9739 = vmatpush.bf16.msrb.mxu0 %v14154_v8  ;;  %v9287_v8 = vadd.f32 %v9286_v1, %v7733_v58  ;;  %v9327_v1 = vadd.f32 %v18932_v16, %v9313_v47  ;;  %v14249_v16 = vld [vmem:[%s16335_s22 + $0x800] sm:$0xf] }
 0x96e   : > { %9729 = vmatpush.bf16.msra.mxu3 %v14010_v59  ;;  %9697 = vmatpush.bf16.msra.mxu1 %v13866_v43  ;;  %v15419_v43 = vld [vmem:[%s16335_s22 + $0x6e8] sm:$0xf0]  ;;  %v9301_v58 = vadd.f32 %v18938_v51, %v9287_v8  ;;  %v9341_v12 = vadd.f32 %v9340_v19, %v9327_v1  ;;  %v14201_v1 = vld [vmem:[%s16335_s22 + $0x7a0] sm:$0xf] }
 0x96f   : > { %9711 = vmatpush.bf16.msrb.mxu2 %v13962_v37  ;;  %v13805_v37 = vld [vmem:[%s16335_s22 + $0x488] sm:$0xf] }
 0x970   : > { %9740 = vmatpush.bf16.msrb.mxu0 %v14142_v50  ;;  %v13806_v56 = vor.u32 %v15344_v10, %v13805_v37  ;;  %v9342_v50 = vpop.f32.mrf.mxu3  ;;  %v9315_v51 = vadd.f32 %v18944_v5, %v9301_v58  ;;  %v9355_v19 = vadd.f32 %v9354_v52, %v9341_v12  ;;  %v15443_v58 = vld [vmem:[%s16335_s22 + $0x7a8] sm:$0xf0] }
 0x972   : > { %9730 = vmatpush.bf16.msra.mxu3 %v13998_v15  ;;  %9698 = vmatpush.bf16.msra.mxu1 %v13854_v14  ;;  %v13818_v15 = vor.u32 %v15347_v6, %v13817_v36  ;;  %v14369_v14 = vld [vmem:[%s16335_s22 + $0x8f0] sm:$0xf]  ;;  %v14250_v36 = vor.u32 %v15455_v62, %v14249_v16  ;;  %v9329_v5 = vadd.f32 %v18957_v27, %v9315_v51  ;;  %v14189_v16 = vld [vmem:[%s16335_s22 + $0x788] sm:$0xf]  ;;  %v15440_v62 = vld [vmem:[%s16335_s22 + $0x790] sm:$0xf0] }
 0x973   : > { %9712 = vmatpush.bf16.msrb.mxu2 %v13950_v4  ;;  %v14106_v4 = vor.u32 %v15419_v43, %v14105_v35  ;;  %v14370_v54 = vor.u32 %v15485_v0, %v14369_v14  ;;  %v14225_v27 = vld [vmem:[%s16335_s22 + $0x7d0] sm:$0xf]  ;;  %v14213_v14 = vld [vmem:[%s16335_s22 + $0x7b8] sm:$0xf]  ;;  %v15446_v0 = vld [vmem:[%s16335_s22 + $0x7c0] sm:$0xf0] }
 0x974   : > { %9741 = vmatpush.bf16.msrb.mxu0 %v14130_v49  ;;  %v9370_v49 = vpop.f32.mrf.mxu1  ;;  %v9343_v35 = vadd.f32 %v9342_v50, %v9329_v5 }
 0x975   : > { %9731 = vmatmul.bf16.vlgmr.msra.gmra.mxu3 %v18536_v30  ;;  %v13829_v30 = vld [vmem:[%s16335_s22 + $0x4b8] sm:$0xf] }
 0x976   : > { %9699 = vmatpush.bf16.msra.mxu1 %v13842_v38  ;;  %v13830_v59 = vor.u32 %v15350_v11, %v13829_v30  ;;  %v9382_v38 = vpop.f32.mrf.mxu2  ;;  %v15482_v30 = vld [vmem:[%s16335_s22 + $0x8e0] sm:$0xf0]  ;;  %v9356_v11 = vpop.f32.mrf.mxu0 }
 0x977   : > { %9713 = vmatpush.bf16.msrb.mxu2 %v13938_v13  ;;  %v15458_v13 = vld [vmem:[%s16335_s22 + $0x820] sm:$0xf0]  ;;  %v9357_v3 = vadd.f32 %v9356_v11, %v9343_v35  ;;  %v14297_v11 = vld [vmem:[%s16335_s22 + $0x860] sm:$0xf] }
 0x978   : > { %9742 = vmatpush.bf16.msrb.mxu0 %v14118_v34  ;;  %v14262_v22 = vor.u32 %v15458_v13, %v14261_v46  ;;  %v9396_v6 = vpop.f32.mrf.mxu3  ;;  %v14333_v34 = vld [vmem:[%s16335_s22 + $0x8a8] sm:$0xf] }
 0x97a   : > { %9700 = vmatpush.bf16.msra.mxu1 %v13830_v59  ;;  %v14358_v59 = vor.u32 %v15482_v30, %v14357_v45 }
 0x97b   : > { %9714 = vmatpush.bf16.msrb.mxu2 %v13926_v29  ;;  %v14345_v29 = vld [vmem:[%s16335_s22 + $0x8c0] sm:$0xf] }
 0x97c   : > { %9743 = vmatpush.bf16.msrb.mxu0 %v14106_v4  ;;  %v14346_v31 = vor.u32 %v15479_v48, %v14345_v29  ;;  %v9371_v4 = vadd.f32 %v9370_v49, %v9357_v3  ;;  %v14202_v49 = vor.u32 %v15443_v58, %v14201_v1  ;;  %v14285_v29 = vld [vmem:[%s16335_s22 + $0x848] sm:$0xf]  ;;  %v15464_v48 = vld [vmem:[%s16335_s22 + $0x850] sm:$0xf0] }
 0x97e   : > { %9701 = vmatpush.bf16.msra.mxu1 %v13818_v15  ;;  %v9384_v52 = vpop.f32.mrf.mxu2  ;;  %v9410_v15 = vpop.f32.mrf.mxu0 }
 0x97f   : > { %9715 = vmatpush.bf16.msrb.mxu2 %v13914_v18  ;;  %v14238_v18 = vor.u32 %v15452_v24, %v14237_v17  ;;  %v9385_v50 = vadd.f32 %v9384_v52, %v9371_v4 }
 0x980   : > { %9744 = vmatpush.bf16.msrb.mxu0 %v14094_v9  ;;  %v9398_v2 = vpop.f32.mrf.mxu3  ;;  %v15467_v9 = vld [vmem:[%s16335_s22 + $0x868] sm:$0xf0] }
 0x981   : > { %v9424_v37 = vpop.f32.mrf.mxu1  ;;  %v9399_v45 = vadd.f32 %v9398_v2, %v9385_v50 }
 0x982   : > { %9702 = vmatpush.bf16.msra.mxu1 %v13806_v56 }
 0x983   : > { %9716 = vmatpush.bf16.msrb.mxu2 %v13902_v23  ;;  %9745 = vmatmul.bf16.vlgmr.msrb.gmra.mxu0 %v18624_v55  ;;  %v14321_v55 = vld [vmem:[%s16335_s22 + $0x890] sm:$0xf]  ;;  %v14309_v23 = vld [vmem:[%s16335_s22 + $0x878] sm:$0xf] }
 0x984   : > { %v14322_v8 = vor.u32 %v15473_v40, %v14321_v55 }
 0x985   : > { %9703 = vmatmul.bf16.vlgmr.msra.gmra.mxu1 %v18438_v60  ;;  %v9369_v60 = vadd.f32 %v18962_v32, %v9355_v19  ;;  %v15449_v32 = vld [vmem:[%s16335_s22 + $0x7d8] sm:$0xf0] }
 0x986   : > { %9751 = vmatpush.bf16.msrb.mxu1 %v14274_v7  ;;  %9717 = vmatmul.bf16.vlgmr.msrb.gmra.mxu2 %v18441_v53  ;;  %v15476_v53 = vld [vmem:[%s16335_s22 + $0x8b0] sm:$0xf0]  ;;  %v14226_v47 = vor.u32 %v15449_v32, %v14225_v27  ;;  %v15470_v7 = vld [vmem:[%s16335_s22 + $0x880] sm:$0xf0]  ;;  %v9412_v46 = vpop.f32.mrf.mxu0 }
 0x987   : > { %9765 = vmatpush.bf16.msra.mxu2 %v14370_v54  ;;  %v9383_v43 = vadd.f32 %v9382_v38, %v9369_v60  ;;  %v14334_v10 = vor.u32 %v15476_v53, %v14333_v34  ;;  %v14214_v54 = vor.u32 %v15446_v0, %v14213_v14  ;;  %v14310_v13 = vor.u32 %v15470_v7, %v14309_v23 }
 0x988   : > { %v9438_v41 = vpop.f32.mrf.mxu2  ;;  %v9452_v17 = vpop.f32.mrf.mxu3 }
 0x989   : > { %v9397_v63 = vadd.f32 %v9396_v6, %v9383_v43  ;;  %v9426_v12 = vpop.f32.mrf.mxu1  ;;  %v14190_v6 = vor.u32 %v15440_v62, %v14189_v16 }
 0x98a   : > { %9752 = vmatpush.bf16.msrb.mxu1 %v14262_v22  ;;  %v9413_v22 = vadd.f32 %v9412_v46, %v9399_v45 }
 0x98b   : > { %9766 = vmatpush.bf16.msra.mxu2 %v14358_v59  ;;  %v9411_v57 = vadd.f32 %v9410_v15, %v9397_v63  ;;  %v14298_v59 = vor.u32 %v15467_v9, %v14297_v11  ;;  %v7734_v15 = vperm.slane %v18930_v20, 1 }
 0x98c   : > { %v9427_v51 = vadd.f32 %v9426_v12, %v9413_v22 }
 0x98d   : > { %v9425_v56 = vadd.f32 %v9424_v37, %v9411_v57  ;;  %v9453_v35 = vadd.f32 %v9452_v17, %v7734_v15 }
 0x98e   : > { %9753 = vmatpush.bf16.msrb.mxu1 %v14250_v36  ;;  %v9466_v24 = vpop.f32.mrf.mxu0 }
 0x98f   : > { %9767 = vmatpush.bf16.msra.mxu2 %v14346_v31  ;;  %v9439_v38 = vadd.f32 %v9438_v41, %v9425_v56 }
 0x990   : > { %v9440_v19 = vpop.f32.mrf.mxu2  ;;  %v9454_v34 = vpop.f32.mrf.mxu3 }
 0x991   : > { %v9779_v30 = vadd.f32 %v9439_v38, %v17309_v26  ;;  %v9441_v36 = vadd.f32 %v9440_v19, %v9427_v51  ;;  %v14286_v26 = vor.u32 %v15464_v48, %v14285_v29  ;;  %v9480_v5 = vpop.f32.mrf.mxu1  ;;  %v9455_v63 = vadd.f32 %v9454_v34, %v7734_v15 }
 0x992   : > { %9754 = vmatpush.bf16.msrb.mxu1 %v14238_v18 }
 0x993   : > { %9768 = vmatpush.bf16.msra.mxu2 %v14334_v10  ;;  %9785 = vst [vmem:[#allocation2 + $0x28] sm:$0xff] %v9779_v30  ;;  %v9782_v31 = vadd.f32 %v9441_v36, %v17318_v42  ;;  %v9467_v42 = vadd.f32 %v9466_v24, %v9453_v35 }
 0x995   : > { %9788 = vst [vmem:[#allocation2] sm:$0xff] %v9782_v31  ;;  %v9481_v37 = vadd.f32 %v9480_v5, %v9467_v42 }
 0x996   : > { %9755 = vmatpush.bf16.msrb.mxu1 %v14226_v47  ;;  %v9468_v53 = vpop.f32.mrf.mxu0 }
 0x997   : > { %9769 = vmatpush.bf16.msra.mxu2 %v14322_v8 }
 0x998   : > { %v9494_v60 = vpop.f32.mrf.mxu2  ;;  %v9508_v43 = vpop.f32.mrf.mxu3 }
 0x999   : > { %v9482_v52 = vpop.f32.mrf.mxu1  ;;  %v9495_v32 = vadd.f32 %v9494_v60, %v9481_v37 }
 0x99a   : > { %9756 = vmatpush.bf16.msrb.mxu1 %v14214_v54 }
 0x99b   : > { %9770 = vmatpush.bf16.msra.mxu2 %v14310_v13  ;;  %v9509_v55 = vadd.f32 %v9508_v43, %v9495_v32 }
 0x99e   : > { %9757 = vmatpush.bf16.msrb.mxu1 %v14202_v49  ;;  %v9522_v10 = vpop.f32.mrf.mxu0 }
 0x99f   : > { %9771 = vmatpush.bf16.msra.mxu2 %v14298_v59  ;;  %v9523_v47 = vadd.f32 %v9522_v10, %v9509_v55 }
 0x9a0   : > { %v9496_v18 = vpop.f32.mrf.mxu2  ;;  %v9510_v40 = vpop.f32.mrf.mxu3 }
 0x9a2   : > { %9758 = vmatpush.bf16.msrb.mxu1 %v14190_v6  ;;  %v9536_v27 = vpop.f32.mrf.mxu1 }
 0x9a3   : > { %9772 = vmatpush.bf16.msra.mxu2 %v14286_v26  ;;  %v9537_v0 = vadd.f32 %v9536_v27, %v9523_v47  ;;  %v7735_v26 = vperm.slane %v18930_v20, 2 }
 0x9a5   : > { %9759 = vmatmul.bf16.vlgmr.msrb.gmra.mxu1 %v18692_v39  ;;  %v9469_v39 = vadd.f32 %v9468_v53, %v9455_v63 }
 0x9a6   : > { %9773 = vmatmul.bf16.vlgmr.msra.gmra.mxu2 %v18696_v33  ;;  %v9524_v8 = vpop.f32.mrf.mxu0 }
 0x9a7   : > { %v9483_v33 = vadd.f32 %v9482_v52, %v9469_v39 }
 0x9a8   : > { %v9564_v23 = vpop.f32.mrf.mxu3 }
 0x9a9   : > { %v9497_v57 = vadd.f32 %v9496_v18, %v9483_v33 }
 0x9aa   : > { %v9538_v14 = vpop.f32.mrf.mxu1 }
 0x9ab   : > { %v9550_v3 = vpop.f32.mrf.mxu2  ;;  %v9511_v4 = vadd.f32 %v9510_v40, %v9497_v57 }
 0x9ac   : > { %v9551_v56 = vadd.f32 %v9550_v3, %v9537_v0 }
 0x9ad   : > { %v9525_v41 = vadd.f32 %v9524_v8, %v9511_v4 }
 0x9ae   : > { %v9565_v2 = vadd.f32 %v9564_v23, %v9551_v56  ;;  %v9578_v50 = vpop.f32.mrf.mxu0 }
 0x9af   : > { %v9539_v54 = vadd.f32 %v9538_v14, %v9525_v41 }
 0x9b0   : > { %v9579_v13 = vadd.f32 %v9578_v50, %v9565_v2  ;;  %v9566_v58 = vpop.f32.mrf.mxu3 }
 0x9b3   : > { %v9552_v7 = vpop.f32.mrf.mxu2 }
 0x9b4   : > { %v9553_v46 = vadd.f32 %v9552_v7, %v9539_v54 }
 0x9b6   : > { %v9567_v30 = vadd.f32 %v9566_v58, %v9553_v46  ;;  %v9580_v12 = vpop.f32.mrf.mxu0 }
 0x9b8   : > { %v9581_v49 = vadd.f32 %v9580_v12, %v9567_v30  ;;  %v9620_v29 = vpop.f32.mrf.mxu3 }
 0x9c0   : > { %v9634_v48 = vpop.f32.mrf.mxu0  ;;  %v9622_v36 = vpop.f32.mrf.mxu3 }
 0x9c1   : > { %v9623_v35 = vadd.f32 %v9622_v36, %v7735_v26 }
 0x9c2   : > { %v9592_v38 = vpop.f32.mrf.mxu1 }
 0x9c3   : > { %v9593_v1 = vadd.f32 %v9592_v38, %v9579_v13 }
 0x9c8   : > { %v9636_v31 = vpop.f32.mrf.mxu0 }
 0x9ca   : > { %v9594_v22 = vpop.f32.mrf.mxu1 }
 0x9cb   : > { %v9606_v45 = vpop.f32.mrf.mxu2  ;;  %v9595_v59 = vadd.f32 %v9594_v22, %v9581_v49 }
 0x9cc   : > { %v9607_v11 = vadd.f32 %v9606_v45, %v9593_v1 }
 0x9ce   : > { %v9780_v9 = vadd.f32 %v9607_v11, %v17307_v21  ;;  %v9621_v21 = vadd.f32 %v9620_v29, %v7735_v26 }
 0x9d0   : > { %9786 = vst [vmem:[#allocation2 + $0x10] sm:$0xff] %v9780_v9  ;;  %v9635_v5 = vadd.f32 %v9634_v48, %v9621_v21 }
 0x9d3   : > { %v9608_v16 = vpop.f32.mrf.mxu2 }
 0x9d4   : > { %v9609_v62 = vadd.f32 %v9608_v16, %v9595_v59 }
 0x9d6   : > { %v9783_v51 = vadd.f32 %v9609_v62, %v17316_v61  ;;  %v9637_v61 = vadd.f32 %v9636_v31, %v9623_v35 }
 0x9d8   : > { %9789 = vst [vmem:[#allocation2 + $0x18] sm:$0xff] %v9783_v51  ;;  %v9676_v24 = vpop.f32.mrf.mxu3 }
 0x9e0   : > { %v9690_v53 = vpop.f32.mrf.mxu0  ;;  %v9678_v18 = vpop.f32.mrf.mxu3 }
 0x9e2   : > { %v9648_v19 = vpop.f32.mrf.mxu1 }
 0x9e3   : > { %v9649_v34 = vadd.f32 %v9648_v19, %v9635_v5 }
 0x9e8   : > { %v9692_v32 = vpop.f32.mrf.mxu0 }
 0x9ea   : > { %v9650_v17 = vpop.f32.mrf.mxu1 }
 0x9eb   : > { %v9662_v6 = vpop.f32.mrf.mxu2  ;;  %v9651_v37 = vadd.f32 %v9650_v17, %v9637_v61 }
 0x9ec   : > { %v9663_v15 = vadd.f32 %v9662_v6, %v9649_v34 }
 0x9ee   : > { %v9677_v43 = vadd.f32 %v9676_v24, %v9663_v15 }
 0x9f0   : > { %v9691_v27 = vadd.f32 %v9690_v53, %v9677_v43 }
 0x9f3   : > { %v9664_v60 = vpop.f32.mrf.mxu2 }
 0x9f4   : > { %v9665_v10 = vadd.f32 %v9664_v60, %v9651_v37 }
 0x9f6   : > { %v9679_v39 = vadd.f32 %v9678_v18, %v9665_v10 }
 0x9f8   : > { %v9732_v40 = vpop.f32.mrf.mxu3  ;;  %v9693_v57 = vadd.f32 %v9692_v32, %v9679_v39 }
 0xa00   : > { %v9746_v47 = vpop.f32.mrf.mxu0  ;;  %v9734_v23 = vpop.f32.mrf.mxu3 }
 0xa02   : > { %v9704_v52 = vpop.f32.mrf.mxu1 }
 0xa03   : > { %v9705_v63 = vadd.f32 %v9704_v52, %v9691_v27 }
 0xa08   : > { %v9748_v38 = vpop.f32.mrf.mxu0 }
 0xa09   : > { %v9718_v42 = vpop.f32.mrf.mxu2 }
 0xa0a   : > { %v9706_v20 = vpop.f32.mrf.mxu1  ;;  %v9719_v55 = vadd.f32 %v9718_v42, %v9705_v63 }
 0xa0b   : > { %v9707_v14 = vadd.f32 %v9706_v20, %v9693_v57 }
 0xa0c   : > { %v9733_v33 = vadd.f32 %v9732_v40, %v9719_v55 }
 0xa0e   : > { %v9747_v4 = vadd.f32 %v9746_v47, %v9733_v33 }
 0xa11   : > { %v9720_v3 = vpop.f32.mrf.mxu2 }
 0xa12   : > { %v9721_v0 = vadd.f32 %v9720_v3, %v9707_v14 }
 0xa14   : > { %v9735_v2 = vadd.f32 %v9734_v23, %v9721_v0 }
 0xa16   : > { %v9749_v46 = vadd.f32 %v9748_v38, %v9735_v2 }
 0xa22   : > { %v9760_v8 = vpop.f32.mrf.mxu1 }
 0xa23   : > { %v9761_v56 = vadd.f32 %v9760_v8, %v9747_v4 }
 0xa29   : > { %v9774_v7 = vpop.f32.mrf.mxu2 }
 0xa2a   : > { %v9775_v41 = vadd.f32 %v9774_v7, %v9761_v56  ;;  %v9762_v54 = vpop.f32.mrf.mxu1 }
 0xa2b   : > { %v9763_v13 = vadd.f32 %v9762_v54, %v9749_v46 }
 0xa2c   : > { %v9781_v50 = vadd.f32 %v9775_v41, %v17311_v28 }
 0xa2e   : > { %9787 = vst [vmem:[#allocation2 + $0x8] sm:$0xff] %v9781_v50 }
 0xa31   : > { %v9776_v1 = vpop.f32.mrf.mxu2 }
 0xa32   : > { %v9777_v58 = vadd.f32 %v9776_v1, %v9763_v13  ;;  %9794 = sbr.rel (%p14371_p1) target bundleno = 3035 (0xbdb), region = 100 }
 0xa34   : > { %v9784_v45 = vadd.f32 %v9777_v58, %v17320_v25 }
 0xa36   : > { %9790 = vst [vmem:[#allocation2 + $0x20] sm:$0xff] %v9784_v45 }
 0xa37   : > { %v9795_v30 = vld [vmem:[#allocation2 + $0x28] sm:$0x3]  ;;  %v9796_v11 = vld [vmem:[#allocation2 + $0x10] sm:$0x3]  ;;  %vm9801_vm5 = vcmask 1041408   ;;  %v15491_v15 = vld [vmem:[#allocation16 + $0x28] sm:$0xff] }
 0xa38   : > { %v9797_v9 = vld [vmem:[#allocation2 + $0x8] sm:$0x3]  ;;  %v9802_v12 = vsel %vm9801_vm5, %v9795_v30, 0.0  ;;  %v9803_v28 = vsel %vm9801_vm5, %v9796_v11, 0.0  ;;  %v15493_v16 = vld [vmem:[#allocation16 + $0x38] sm:$0xff]  ;;  %v15499_v35 = vld [vmem:[#allocation16 + $0x68] sm:$0xff] }
 0xa39   : > { %v9805_v22 = vsel %vm9801_vm5, %v9797_v9, 0.0  ;;  %v9804_v49 = vadd.f32 %v9803_v28, %v9802_v12  ;;  %v15501_v62 = vld [vmem:[#allocation16 + $0x78] sm:$0xff]  ;;  %10057 = vmatpush.bf16.msra.mxu0 %v15493_v16  ;;  %v15492_v34 = vld [vmem:[#allocation16 + $0x30] sm:$0xff]  ;;  %v15507_v61 = vld [vmem:[#allocation16 + $0xa8] sm:$0xff] }
 0xa3a   : > { %v15509_v25 = vld [vmem:[#allocation16 + $0xb8] sm:$0xff]  ;;  %10070 = vmatpush.bf16.msra.mxu1 %v15501_v62  ;;  %v15500_v53 = vld [vmem:[#allocation16 + $0x70] sm:$0xff]  ;;  %v15490_v43 = vld [vmem:[#allocation16 + $0x20] sm:$0xff] }
 0xa3b   : > { %v9806_v59 = vadd.f32 %v9805_v22, %v9804_v49  ;;  %10083 = vmatpush.bf16.msra.mxu2 %v15509_v25  ;;  %v15508_v52 = vld [vmem:[#allocation16 + $0xb0] sm:$0xff]  ;;  %v15498_v18 = vld [vmem:[#allocation16 + $0x60] sm:$0xff]  ;;  %v15489_v37 = vld [vmem:[#allocation16 + $0x18] sm:$0xff] }
 0xa3c   : > { %v15506_v42 = vld [vmem:[#allocation16 + $0xa0] sm:$0xff]  ;;  %v15497_v10 = vld [vmem:[#allocation16 + $0x58] sm:$0xff]  ;;  %v15488_v32 = vld [vmem:[#allocation16 + $0x10] sm:$0xff] }
 0xa3d   : > { %9807 = vadd.xlane.f32.xlu0 %v9806_v59  ;;  %10058 = vmatpush.bf16.msra.mxu0 %v15492_v34  ;;  %v15505_v27 = vld [vmem:[#allocation16 + $0x98] sm:$0xff]  ;;  %v15496_v20 = vld [vmem:[#allocation16 + $0x50] sm:$0xff]  ;;  %v15487_v39 = vld [vmem:[#allocation16 + $0x8] sm:$0xff] }
 0xa3e   : > { %10071 = vmatpush.bf16.msra.mxu1 %v15500_v53  ;;  %v15504_v63 = vld [vmem:[#allocation16 + $0x90] sm:$0xff]  ;;  %v15495_v55 = vld [vmem:[#allocation16 + $0x48] sm:$0xff]  ;;  %v15486_v3 = vld [vmem:[#allocation16] sm:$0xff] }
 0xa3f   : > { %10084 = vmatpush.bf16.msra.mxu2 %v15508_v52  ;;  %v15503_v40 = vld [vmem:[#allocation16 + $0x88] sm:$0xff]  ;;  %v15494_v33 = vld [vmem:[#allocation16 + $0x40] sm:$0xff]  ;;  %v9798_v2 = vld [vmem:[#allocation14] ss:$2 sm:$0x7] }
 0xa40   : > { %v15502_v57 = vld [vmem:[#allocation16 + $0x80] sm:$0xff]  ;;  %v9800_v41 = vld [vmem:[#allocation14 + $0x1] ss:$2 sm:$0x7]  ;;  %v9839_v38 = vperm.slane %v9798_v2, 0  ;;  %v9840_v54 = vperm.slane %v9798_v2, 1 }
 0xa41   : > { %10059 = vmatpush.bf16.msra.mxu0 %v15491_v15  ;;  %v9841_v46 = vperm.slane %v9798_v2, 2  ;;  %v9849_v1 = vperm.slane %v9800_v41, 0  ;;  %v9850_v58 = vperm.slane %v9800_v41, 1 }
 0xa42   : > { %10072 = vmatpush.bf16.msra.mxu1 %v15499_v35 }
 0xa43   : > { %10085 = vmatpush.bf16.msra.mxu2 %v15507_v61 }
 0xa45   : > { %10060 = vmatpush.bf16.msra.mxu0 %v15490_v43 }
 0xa46   : > { %10073 = vmatpush.bf16.msra.mxu1 %v15498_v18 }
 0xa47   : > { %10086 = vmatpush.bf16.msra.mxu2 %v15506_v42 }
 0xa49   : > { %10061 = vmatpush.bf16.msra.mxu0 %v15489_v37 }
 0xa4a   : > { %10074 = vmatpush.bf16.msra.mxu1 %v15497_v10 }
 0xa4b   : > { %10087 = vmatpush.bf16.msra.mxu2 %v15505_v27 }
 0xa4d   : > { %10062 = vmatpush.bf16.msra.mxu0 %v15488_v32 }
 0xa4e   : > { %10075 = vmatpush.bf16.msra.mxu1 %v15496_v20 }
 0xa4f   : > { %10088 = vmatpush.bf16.msra.mxu2 %v15504_v63 }
 0xa51   : > { %10063 = vmatpush.bf16.msra.mxu0 %v15487_v39 }
 0xa52   : > { %10076 = vmatpush.bf16.msra.mxu1 %v15495_v55 }
 0xa53   : > { %10089 = vmatpush.bf16.msra.mxu2 %v15503_v40 }
 0xa55   : > { %10064 = vmatpush.bf16.msra.mxu0 %v15486_v3 }
 0xa56   : > { %10077 = vmatpush.bf16.msra.mxu1 %v15494_v33 }
 0xa57   : > { %10090 = vmatpush.bf16.msra.mxu2 %v15502_v57 }
 0xab0   : > { %v9808_v51 = vpop.xlane.xlu0 %9807 }
 0xab1   : > { %v9809_v29 = vmul.f32 %v9808_v51, %v16480_v44  ;;  %v15763_v51 = vld [vmem:[#allocation17] ss:$0 sm:$0xff] }
 0xab3   : > { %v19028_v48 = vsub.f32 %v9795_v30, %v9809_v29  ;;  %v19030_v19 = vsub.f32 %v9796_v11, %v9809_v29  ;;  %v19032_v36 = vsub.f32 %v9797_v9, %v9809_v29  ;;  %v9851_v11 = vperm.slane %v9800_v41, 2 }
 0xab5   : > { %v9813_v6 = vmul.f32 %v19028_v48, %v19028_v48  ;;  %v9814_v26 = vmul.f32 %v19030_v19, %v19030_v19  ;;  %v9815_v31 = vmul.f32 %v19032_v36, %v19032_v36 }
 0xab7   : > { %v9816_v17 = vsel %vm9801_vm5, %v9813_v6, 0.0  ;;  %v9817_v21 = vsel %vm9801_vm5, %v9814_v26, 0.0  ;;  %v9819_v5 = vsel %vm9801_vm5, %v9815_v31, 0.0 }
 0xab8   : > { %v9818_v24 = vadd.f32 %v9817_v21, %v9816_v17 }
 0xaba   : > { %v9820_v60 = vadd.f32 %v9819_v5, %v9818_v24 }
 0xabc   : > { %9821 = vadd.xlane.f32.xlu0 %v9820_v60 }
 0xb2f   : > { %v9822_v47 = vpop.xlane.xlu0 %9821 }
 0xb30   : > { %v9823_v8 = vmul.f32 %v9822_v47, %v16480_v44 }
 0xb32   : > { %v9824_v14 = vadd.f32 1e-06, %v9823_v8 }
 0xb34   : > { %15764 = vrsqrt.f32 %v9824_v14  ;;  %vm9831_vm7 = vweird.f32 %v9824_v14 }
 0xb3a   : > { %v15765_v0 = vpop.eup %15764 }
 0xb3b   : > { %v9826_v4 = vmul.f32 %v15765_v0, %v9824_v14  ;;  %vm9832_vm6 = vweird.f32 %v15765_v0 }
 0xb3c   : > { %vm9833_vm8 = vmor %vm9831_vm7, %vm9832_vm6 }
 0xb3d   : > { %v9827_v56 = vmul.f32 %v15765_v0, %v9826_v4 }
 0xb3f   : > { %v9828_v23 = vmul.f32 0.5, %v9827_v56 }
 0xb41   : > { %v9829_v7 = vsub.f32 1.5, %v9828_v23 }
 0xb43   : > { %v9830_v50 = vmul.f32 %v15765_v0, %v9829_v7 }
 0xb45   : > { %v9834_v13 = vsel %vm9833_vm8, %v15765_v0, %v9830_v50 }
 0xb46   : > { %v9835_v44 = vmul.f32 %v9834_v13, %v19028_v48  ;;  %v9836_v45 = vmul.f32 %v9834_v13, %v19030_v19  ;;  %v9837_v30 = vmul.f32 %v9834_v13, %v19032_v36 }
 0xb48   : > { %v9845_v9 = vmul.f32 %v9839_v38, %v9835_v44  ;;  %v9846_v12 = vmul.f32 %v9840_v54, %v9836_v45  ;;  %v9847_v28 = vmul.f32 %v9841_v46, %v9837_v30 }
 0xb4a   : > { %v9855_v22 = vadd.f32 %v9849_v1, %v9845_v9  ;;  %v9856_v49 = vadd.f32 %v9850_v58, %v9846_v12  ;;  %v9857_v59 = vadd.f32 %v9851_v11, %v9847_v28 }
 0xb4c   : > { %v9907_v16 = vpack.c.bf16 %v9855_v22, %v9855_v22  ;;  %v9908_v62 = vpack.c.bf16 %v9856_v49, %v9856_v49  ;;  %v9909_v25 = vpack.c.bf16 %v9857_v59, %v9857_v59 }
 0xb4e   : > { %10065 = vmatmul.bf16.vlgmr.msra.gmra.mxu0 %v9907_v16  ;;  %10078 = vmatmul.bf16.vlgmr.msra.gmra.mxu1 %v9908_v62 }
 0xb4f   : > { %10091 = vmatmul.bf16.vlgmr.msra.gmra.mxu2 %v9909_v25 }
 0xbcb   : > { %v10066_v29 = vpop.f32.mrf.mxu0  ;;  %v10079_v48 = vpop.f32.mrf.mxu1 }
 0xbcc   : > { %v10067_v6 = vadd.f32 %v15763_v51, %v10066_v29 }
 0xbce   : > { %v10080_v19 = vadd.f32 %v10079_v48, %v10067_v6 }
 0xbd2   : > { %v10092_v26 = vpop.f32.mrf.mxu2 }
 0xbd3   : > { %v10093_v36 = vadd.f32 %v10092_v26, %v10080_v19  ;;  %v10068_v31 = vpop.f32.mrf.mxu0  ;;  %v10081_v17 = vpop.f32.mrf.mxu1 }
 0xbd5   : > { %10096 = vst [vmem:[#allocation19] sm:$0x3] %v10093_v36 }
 0xbda   : > { %v10094_v21 = vpop.f32.mrf.mxu2 }
 0xbdb PF: > { %p15585_p3 = scmp.eq.s32.totalorder %s16204_s19, 1  ;;  %s19114_s22 = sld [smem:[#allocation36_spill]] }
 0xbdc   : > { %s16119_s0 = smov [#allocation19]  }
 0xbdd   : > { %s10105_s27 = sshll.u32 %s16119_s0, 4  ;;  %s10106_s27 = int_to_ptr.vmem [resolvable:$true] %s10105_s27 }
 0xbe1   : > { %s10107_s23 = sshll.u32 %s19114_s22, 4  ;;  %s10108_s23 = int_to_ptr.hbm [resolvable:$true] %s10107_s23 }
 0xbe2   : > { %15547 = dma.vmem_to_hbm [thread:$0]  (%p15585_p3), %s10106_s27, 32, %s10108_s23, [#allocation7]  }
 0xbe3   : > { %16079 = dma.done.wait (%p15585_p3), [#allocation7], 32  }
 0xbe4   : > { %16081 = vsyncadd (%p15585_p3), [#allocation7], 4294967264 }
 0xbe5 PF: > { %s19115_s7 = sld [smem:[#allocation28_spill]]  ;;  %s19119_s13 = smov %s16088_s14 }
 0xbe6   : > { %s19116_s21 = sld [smem:[#allocation26_spill]]  ;;  %s19121_s16 = smov %s16100_s17 }
 0xbe7   : > { %s19117_s15 = sld [smem:[#allocation30_spill]] }
 0xbe8   : > { %s19118_s19 = sld [smem:[#allocation29_spill]] }
 0xbeb   : > { %s30_s18 = sadd.s32 1, %s19115_s7  }
 0xbec   : > { %p27_p4 = scmp.ge.s32.totalorder %s30_s18, 4   ;;  %s19120_s14 = smov %s19116_s21 }
 0xbee   : > { %s19122_s17 = smov %s19118_s19  ;;  %29 = sbr.rel (!%p27_p4) target bundleno = 17 (0x11), region = 165 }
 0xbf3   :  { %10121 = vsyncpa [#allocation6], 1 }
 0xbf4   :  { %10123 = vsyncpa [#allocation6 + $0x1], 1 }
 0xbf5   :  { %10124 = vsyncpa [#allocation9], 1 }
 0xbf6   :  { %10126 = vsyncpa [#allocation9 + $0x1], 1 }
 0xbf7   :  { %10127 = vsyncpa [#allocation12], 1 }
 0xbf8   :  { %10129 = vsyncpa [#allocation12 + $0x1], 1 }
 0xbf9   :  { %10130 = vsyncpa [#allocation15], 1 }
 0xbfa   :  { %10131 = vsyncpa [#allocation18], 1 }
 0xbfb   :  { %10132 = vsyncpa [#allocation7], 1 }
 0xbfc   :  { %10134 = vsyncpa [#allocation7 + $0x1], 1 }

</bundles_post_ra>
